<compile_context>
chip_gen: v7x
topology: tpu7x:2x2x1
jax: 0.10.0
libtpu: 0.0.40
codegen_flags: <defaults>
</compile_context>

<pallas_src>
import numpy as np

import jax
import jax.numpy as jnp
from jax.experimental import pallas as pl
from jax.experimental.pallas import tpu as pltpu

EPS = 1e-5


# ---------------------------------------------------------------------------
# static layer table: (H, W, Cin, Cout, dilation) for conv0..conv9
# ---------------------------------------------------------------------------
def layer_specs(in_ch, mid_ch, out_ch, h, w):
    return [
        (h,      w,      in_ch,      out_ch, 1),   # conv0
        (h,      w,      out_ch,     mid_ch, 1),   # conv1
        (h // 2, w // 2, mid_ch,     mid_ch, 1),   # conv2
        (h // 4, w // 4, mid_ch,     mid_ch, 1),   # conv3
        (h // 8, w // 8, mid_ch,     mid_ch, 1),   # conv4
        (h // 8, w // 8, mid_ch,     mid_ch, 2),   # conv5 (dilation 2)
        (h // 8, w // 8, 2 * mid_ch, mid_ch, 1),   # conv6
        (h // 4, w // 4, 2 * mid_ch, mid_ch, 1),   # conv7
        (h // 2, w // 2, 2 * mid_ch, mid_ch, 1),   # conv8
        (h,      w,      2 * mid_ch, out_ch, 1),   # conv9
    ]


# ---------------------------------------------------------------------------
# in-kernel building blocks (operate on VMEM-resident values / refs)
# ---------------------------------------------------------------------------
def _shift_lanes(x, s):
    """out[:, i] = x[:, i + s] with zero fill at the array ends.

    Implemented as a static lane slice + concat (direction- and wrap-proof);
    the conv border masks / pool selection matrix take care of any position
    whose shifted source would be out of range anyway.
    """
    if s == 0:
        return x
    c, m = x.shape
    z = jnp.zeros((c, abs(s)), x.dtype)
    if s > 0:
        return jnp.concatenate([x[:, s:], z], axis=1)
    return jnp.concatenate([z, x[:, :s]], axis=1)


def _conv_bn_relu(parts, w_ref, g_ref, b_ref, pos_ref, n, h, w, dil):
    """3x3 'same' conv (given dilation) + BatchNorm (batch stats) + ReLU.

    `parts` is a list of (cin_p, n*h*w) f32 values treated as channel-
    concatenated (the decoder torch.cat is fused here).  No im2col slab: each
    of the 9 taps is a lane shift + border mask + one small bf16 MXU matmul
    accumulated in f32.  The Conv2d bias is omitted on purpose: in training-
    mode BN it is cancelled exactly by the batch-mean subtraction.
    """
    m = n * h * w
    cout = int(w_ref.shape[1])
    wv = w_ref[...]                                  # (9, cout, cin_total) bf16

    # host-precomputed lane-position planes (no vector int div/mod in-kernel)
    hpos = pos_ref[0:1, :]                           # (1, m) int32
    wpos = pos_ref[1:2, :]                           # (1, m) int32

    parts_bf = [p.astype(jnp.bfloat16) for p in parts]
    y = jnp.zeros((cout, m), jnp.float32)

    for ky in range(3):
        for kx in range(3):
            dy, dx = (ky - 1) * dil, (kx - 1) * dil
            # taps falling entirely inside the zero padding contribute nothing
            if max(0, -dy) >= min(h, h - dy) or max(0, -dx) >= min(w, w - dx):
                continue
            conds = []
            if dy > 0:
                conds.append(hpos < h - dy)
            elif dy < 0:
                conds.append(hpos >= -dy)
            if dx > 0:
                conds.append(wpos < w - dx)
            elif dx < 0:
                conds.append(wpos >= -dx)
            valid = None
            for c in conds:
                valid = c if valid is None else (valid & c)

            c0 = 0
            for p in parts_bf:
                cin_p = int(p.shape[0])
                xt = _shift_lanes(p, dy * w + dx)
                if valid is not None:
                    xt = jnp.where(valid, xt, jnp.zeros_like(xt))
                wt = wv[ky * 3 + kx, :, c0:c0 + cin_p]      # (cout, cin_p) bf16
                y = y + jnp.dot(wt, xt, preferred_element_type=jnp.float32)
                c0 += cin_p

    # BatchNorm2d training-mode batch stats, single pass, f32 + affine + ReLU.
    # TODO(synk): two-pass / Welford reduction once the spatial grid is added
    # (single-pass s2 - mean^2 cancels catastrophically at large n*h*w).
    fm = float(m)
    s1 = jnp.sum(y, axis=1, keepdims=True)
    s2 = jnp.sum(y * y, axis=1, keepdims=True)
    mean = s1 / fm
    var = jnp.maximum(s2 / fm - mean * mean, 0.0)          # biased variance
    scale = g_ref[...] * jax.lax.rsqrt(var + EPS)
    shift = b_ref[...] - mean * scale
    return jnp.maximum(y * scale + shift, 0.0)


def _maxpool2(x, s_ref, w):
    """MaxPool2d(2, 2) in the spatial-in-lanes layout.

    3 lane shifts + elementwise max build the window maxima at the even-(h, w)
    lane positions; one 0/1 selection matmul compacts them into the pooled
    lane order (all-zero rows discard the other positions).
    """
    mx = jnp.maximum(jnp.maximum(x, _shift_lanes(x, 1)),
                     jnp.maximum(_shift_lanes(x, w), _shift_lanes(x, w + 1)))
    return jnp.dot(mx.astype(jnp.bfloat16), s_ref[...],
                   preferred_element_type=jnp.float32)


def _upsample(x, u_ref):
    """Bilinear 2x upsample (F.interpolate defaults) as one bf16 matmul with a
    precomputed interpolation matrix (weights 0.25/0.75 are exact in bf16)."""
    return jnp.dot(x.astype(jnp.bfloat16), u_ref[...],
                   preferred_element_type=jnp.float32)


# ---------------------------------------------------------------------------
# the single fused kernel
# ---------------------------------------------------------------------------
def _make_unet3_kernel(n, h, w):
    res = [(h, w), (h // 2, w // 2), (h // 4, w // 4), (h // 8, w // 8)]

    def kernel(*refs):
        # refs = [x] + [(w, gamma, beta)]*10 + [pos0..pos3] + [S1..S3]
        #        + [U1..U3] + [out]
        x_ref = refs[0]
        cp = refs[1:31]
        pos_refs = refs[31:35]
        s_refs = refs[35:38]
        u_refs = refs[38:41]
        o_ref = refs[41]

        def conv(i, parts, r, dil=1):
            hh, ww = res[r]
            return _conv_bn_relu(parts, cp[3 * i], cp[3 * i + 1], cp[3 * i + 2],
                                 pos_refs[r], n, hh, ww, dil)

        x = x_ref[...]

        x0 = conv(0, [x], 0)
        x1 = conv(1, [x0], 0)
        d1 = _maxpool2(x1, s_refs[0], res[0][1])
        x2 = conv(2, [d1], 1)
        d2 = _maxpool2(x2, s_refs[1], res[1][1])
        x3 = conv(3, [d2], 2)
        d3 = _maxpool2(x3, s_refs[2], res[2][1])
        x4 = conv(4, [d3], 3)
        x5 = conv(5, [x4], 3, dil=2)
        x6 = conv(6, [x5, x4], 3)                     # cat(x5, x4) fused
        up1 = _upsample(x6, u_refs[0])
        x7 = conv(7, [up1, x3], 2)                    # cat(up1, x3) fused
        up2 = _upsample(x7, u_refs[1])
        x8 = conv(8, [up2, x2], 1)                    # cat(up2, x2) fused
        up3 = _upsample(x8, u_refs[2])
        x9 = conv(9, [up3, x1], 0)                    # cat(up3, x1) fused

        o_ref[...] = x9 + x0                          # residual: x9 + x0

    return kernel


# ---------------------------------------------------------------------------
# host-side helpers / wrapper
# ---------------------------------------------------------------------------
def init_unet3_params(key, in_ch, mid_ch, out_ch, h, w):
    """PyTorch-layout params: conv weight (cout, cin, 3, 3), BN gamma/beta."""
    specs = layer_specs(in_ch, mid_ch, out_ch, h, w)
    keys = jax.random.split(key, len(specs))
    params = []
    for k, (_, _, cin, cout, _) in zip(keys, specs):
        wgt = jax.random.normal(k, (cout, cin, 3, 3), jnp.float32) / np.sqrt(9 * cin)
        gamma = jnp.ones((cout,), jnp.float32)   # BatchNorm2d default weight
        beta = jnp.zeros((cout,), jnp.float32)   # BatchNorm2d default bias
        # NOTE: no Conv2d bias — exactly cancelled by training-mode BN.
        params.append((wgt, gamma, beta))
    return params


def _interp_matrix_1d(out_size, in_size):
    # torch F.interpolate(mode='bilinear', align_corners=False) source weights.
    scale = in_size / out_size
    s = np.maximum((np.arange(out_size) + 0.5) * scale - 0.5, 0.0)
    i0 = np.minimum(np.floor(s).astype(np.int64), in_size - 1)
    i1 = np.minimum(i0 + 1, in_size - 1)
    w1 = (s - i0).astype(np.float32)
    m = np.zeros((out_size, in_size), np.float32)
    m[np.arange(out_size), i0] += 1.0 - w1
    m[np.arange(out_size), i1] += w1
    return m


def _upsample_matrix(n, ih, iw, oh, ow):
    # out(c, n*oh*ow) = x(c, n*ih*iw) @ U
    u = np.kron(_interp_matrix_1d(oh, ih).T, _interp_matrix_1d(ow, iw).T)
    u = np.kron(np.eye(n, dtype=np.float32), u)      # block-diagonal over batch
    return jnp.asarray(u, jnp.bfloat16)


def _pool_select_matrix(n, h, w):
    # 0/1 matrix: lane (b, 2*ho, 2*wo) -> output lane (b, ho, wo)
    ho, wo = h // 2, w // 2
    sel = np.zeros((n * h * w, n * ho * wo), np.float32)
    for b in range(n):
        for i in range(ho):
            for j in range(wo):
                sel[b * h * w + 2 * i * w + 2 * j, b * ho * wo + i * wo + j] = 1.0
    return jnp.asarray(sel, jnp.bfloat16)


def _pos_planes(n, h, w):
    # (2, n*h*w) int32: row 0 = h position, row 1 = w position of each lane.
    idx = np.arange(n * h * w, dtype=np.int64)
    hpos = (idx // w) % h
    wpos = idx % w
    return jnp.asarray(np.stack([hpos, wpos]).astype(np.int32))


def unet3_forward(x_nchw, params, mid_ch, out_ch):
    n, in_ch, h, w = x_nchw.shape

    # spatial-in-lanes layout: one channel's full (n, h, w) plane per row.
    x_cm = jnp.transpose(x_nchw, (1, 0, 2, 3)).reshape(in_ch, n * h * w)

    inputs = [x_cm]
    for wgt, gamma, beta in params:
        cout, cin = int(wgt.shape[0]), int(wgt.shape[1])
        # (cout, cin, ky, kx) -> (tap = ky*3+kx, cout, cin), bf16 MXU operands.
        wk = jnp.transpose(wgt, (2, 3, 0, 1)).reshape(9, cout, cin)
        inputs += [wk.astype(jnp.bfloat16),
                   gamma.reshape(cout, 1), beta.reshape(cout, 1)]

    inputs += [_pos_planes(n, h, w),
               _pos_planes(n, h // 2, w // 2),
               _pos_planes(n, h // 4, w // 4),
               _pos_planes(n, h // 8, w // 8)]
    inputs += [_pool_select_matrix(n, h, w),
               _pool_select_matrix(n, h // 2, w // 2),
               _pool_select_matrix(n, h // 4, w // 4)]
    inputs += [_upsample_matrix(n, h // 8, w // 8, h // 4, w // 4),   # up1
               _upsample_matrix(n, h // 4, w // 4, h // 2, w // 2),   # up2
               _upsample_matrix(n, h // 2, w // 2, h, w)]             # up3

    vmem = pl.BlockSpec(memory_space=pltpu.MemorySpace.VMEM)
    out = pl.pallas_call(
        _make_unet3_kernel(n, h, w),
        out_shape=jax.ShapeDtypeStruct((out_ch, n * h * w), jnp.float32),
        in_specs=[vmem] * len(inputs),
        out_specs=vmem,
    )(*inputs)

    # back to NCHW at the boundary (layout plumbing stays outside the kernel).
    return jnp.transpose(out.reshape(out_ch, n, h, w), (1, 0, 2, 3))


# ---------------------------------------------------------------------------
# main
# ---------------------------------------------------------------------------
if __name__ == "__main__":
    # NCHW input (2, 4, 16, 16), mid_channels=8, out_channels=4.
    N, C_IN, H, W = 2, 4, 16, 16
    MID, C_OUT = 8, 4

    key = jax.random.PRNGKey(0)
    k_params, k_x = jax.random.split(key)

    params = init_unet3_params(k_params, C_IN, MID, C_OUT, H, W)
    x_nchw = jax.random.normal(k_x, (N, C_IN, H, W), jnp.float32)

    out_nchw = unet3_forward(x_nchw, params, MID, C_OUT)
    jax.block_until_ready(out_nchw)

    assert out_nchw.shape == (N, C_OUT, H, W)
    assert bool(jnp.all(jnp.isfinite(out_nchw)))
    print("KERNEL_OK")
</pallas_src>

<mosaic_0001>
module attributes {stable_mosaic.version = 11 : i64} {
  func.func @kernel(%arg0: memref<4x512xf32, #tpu.memory_space<vmem>>, %arg1: memref<9x4x4xbf16, #tpu.memory_space<vmem>>, %arg2: memref<4x1xf32, #tpu.memory_space<vmem>>, %arg3: memref<4x1xf32, #tpu.memory_space<vmem>>, %arg4: memref<9x8x4xbf16, #tpu.memory_space<vmem>>, %arg5: memref<8x1xf32, #tpu.memory_space<vmem>>, %arg6: memref<8x1xf32, #tpu.memory_space<vmem>>, %arg7: memref<9x8x8xbf16, #tpu.memory_space<vmem>>, %arg8: memref<8x1xf32, #tpu.memory_space<vmem>>, %arg9: memref<8x1xf32, #tpu.memory_space<vmem>>, %arg10: memref<9x8x8xbf16, #tpu.memory_space<vmem>>, %arg11: memref<8x1xf32, #tpu.memory_space<vmem>>, %arg12: memref<8x1xf32, #tpu.memory_space<vmem>>, %arg13: memref<9x8x8xbf16, #tpu.memory_space<vmem>>, %arg14: memref<8x1xf32, #tpu.memory_space<vmem>>, %arg15: memref<8x1xf32, #tpu.memory_space<vmem>>, %arg16: memref<9x8x8xbf16, #tpu.memory_space<vmem>>, %arg17: memref<8x1xf32, #tpu.memory_space<vmem>>, %arg18: memref<8x1xf32, #tpu.memory_space<vmem>>, %arg19: memref<9x8x16xbf16, #tpu.memory_space<vmem>>, %arg20: memref<8x1xf32, #tpu.memory_space<vmem>>, %arg21: memref<8x1xf32, #tpu.memory_space<vmem>>, %arg22: memref<9x8x16xbf16, #tpu.memory_space<vmem>>, %arg23: memref<8x1xf32, #tpu.memory_space<vmem>>, %arg24: memref<8x1xf32, #tpu.memory_space<vmem>>, %arg25: memref<9x8x16xbf16, #tpu.memory_space<vmem>>, %arg26: memref<8x1xf32, #tpu.memory_space<vmem>>, %arg27: memref<8x1xf32, #tpu.memory_space<vmem>>, %arg28: memref<9x4x16xbf16, #tpu.memory_space<vmem>>, %arg29: memref<4x1xf32, #tpu.memory_space<vmem>>, %arg30: memref<4x1xf32, #tpu.memory_space<vmem>>, %arg31: memref<2x512xi32, #tpu.memory_space<vmem>>, %arg32: memref<2x128xi32, #tpu.memory_space<vmem>>, %arg33: memref<2x32xi32, #tpu.memory_space<vmem>>, %arg34: memref<2x8xi32, #tpu.memory_space<vmem>>, %arg35: memref<512x128xbf16, #tpu.memory_space<vmem>>, %arg36: memref<128x32xbf16, #tpu.memory_space<vmem>>, %arg37: memref<32x8xbf16, #tpu.memory_space<vmem>>, %arg38: memref<8x32xbf16, #tpu.memory_space<vmem>>, %arg39: memref<32x128xbf16, #tpu.memory_space<vmem>>, %arg40: memref<128x512xbf16, #tpu.memory_space<vmem>>, %arg41: memref<4x512xf32, #tpu.memory_space<vmem>>) attributes {dimension_semantics = [], scalar_prefetch = 0 : i64, scratch_operands = 0 : i64, tpu.core_type = #tpu.core_type<tc>} {
    %c0 = arith.constant 0 : index
    %c0_0 = arith.constant 0 : index
    %0 = vector.load %arg0[%c0, %c0_0] : memref<4x512xf32, #tpu.memory_space<vmem>>, vector<4x512xf32>
    %c0_1 = arith.constant 0 : index
    %c0_2 = arith.constant 0 : index
    %c0_3 = arith.constant 0 : index
    %1 = vector.load %arg1[%c0_1, %c0_2, %c0_3] : memref<9x4x4xbf16, #tpu.memory_space<vmem>>, vector<9x4x4xbf16>
    %c0_4 = arith.constant 0 : index
    %c0_5 = arith.constant 0 : index
    %2 = vector.load %arg31[%c0_4, %c0_5] : memref<2x512xi32, #tpu.memory_space<vmem>>, vector<1x512xi32>
    %c1 = arith.constant 1 : index
    %c0_6 = arith.constant 0 : index
    %3 = vector.load %arg31[%c1, %c0_6] : memref<2x512xi32, #tpu.memory_space<vmem>>, vector<1x512xi32>
    %4 = arith.truncf %0 : vector<4x512xf32> to vector<4x512xbf16>
    %cst = arith.constant 0.000000e+00 : f32
    %5 = vector.broadcast %cst : f32 to vector<4x512xf32>
    %c1_i32 = arith.constant 1 : i32
    %6 = vector.broadcast %c1_i32 : i32 to vector<1x512xi32>
    %7 = arith.cmpi sge, %2, %6 : vector<1x512xi32>
    %c1_i32_7 = arith.constant 1 : i32
    %8 = vector.broadcast %c1_i32_7 : i32 to vector<1x512xi32>
    %9 = arith.cmpi sge, %3, %8 : vector<1x512xi32>
    %10 = arith.andi %7, %9 : vector<1x512xi1>
    %cst_8 = arith.constant 0.000000e+00 : bf16
    %11 = vector.broadcast %cst_8 : bf16 to vector<4x17xbf16>
    %12 = vector.extract_strided_slice %4 {offsets = [0, 0], sizes = [4, 495], strides = [1, 1]} : vector<4x512xbf16> to vector<4x495xbf16>
    %13 = tpu.concatenate %11, %12 in 1 : vector<4x17xbf16>, vector<4x495xbf16> -> vector<4x512xbf16>
    %cst_9 = arith.constant 0.000000e+00 : bf16
    %14 = vector.broadcast %cst_9 : bf16 to vector<4x512xbf16>
    %15 = vector.shape_cast %10 : vector<1x512xi1> to vector<1x512xi1>
    %16 = vector.broadcast %15 : vector<1x512xi1> to vector<4x512xi1>
    %17 = arith.select %16, %13, %14 : vector<4x512xi1>, vector<4x512xbf16>
    %18 = vector.extract_strided_slice %1 {offsets = [0, 0, 0], sizes = [1, 4, 4], strides = [1, 1, 1]} : vector<9x4x4xbf16> to vector<1x4x4xbf16>
    %19 = vector.shape_cast %18 : vector<1x4x4xbf16> to vector<4x4xbf16>
    %cst_10 = arith.constant dense<0.000000e+00> : vector<4x512xf32>
    %20 = tpu.matmul %19, %17, %cst_10 {dimension_numbers = #tpu.dot_dimension_numbers<[1], [0], [0], [1], [0, 0, 1, 1], [], []>} : vector<4x4xbf16>, vector<4x512xbf16>, vector<4x512xf32> -> vector<4x512xf32>
    %21 = arith.addf %5, %20 : vector<4x512xf32>
    %c1_i32_11 = arith.constant 1 : i32
    %22 = vector.broadcast %c1_i32_11 : i32 to vector<1x512xi32>
    %23 = arith.cmpi sge, %2, %22 : vector<1x512xi32>
    %cst_12 = arith.constant 0.000000e+00 : bf16
    %24 = vector.broadcast %cst_12 : bf16 to vector<4x16xbf16>
    %25 = vector.extract_strided_slice %4 {offsets = [0, 0], sizes = [4, 496], strides = [1, 1]} : vector<4x512xbf16> to vector<4x496xbf16>
    %26 = tpu.concatenate %24, %25 in 1 : vector<4x16xbf16>, vector<4x496xbf16> -> vector<4x512xbf16>
    %cst_13 = arith.constant 0.000000e+00 : bf16
    %27 = vector.broadcast %cst_13 : bf16 to vector<4x512xbf16>
    %28 = vector.shape_cast %23 : vector<1x512xi1> to vector<1x512xi1>
    %29 = vector.broadcast %28 : vector<1x512xi1> to vector<4x512xi1>
    %30 = arith.select %29, %26, %27 : vector<4x512xi1>, vector<4x512xbf16>
    %31 = vector.extract_strided_slice %1 {offsets = [1, 0, 0], sizes = [1, 4, 4], strides = [1, 1, 1]} : vector<9x4x4xbf16> to vector<1x4x4xbf16>
    %32 = vector.shape_cast %31 : vector<1x4x4xbf16> to vector<4x4xbf16>
    %cst_14 = arith.constant dense<0.000000e+00> : vector<4x512xf32>
    %33 = tpu.matmul %32, %30, %cst_14 {dimension_numbers = #tpu.dot_dimension_numbers<[1], [0], [0], [1], [0, 0, 1, 1], [], []>} : vector<4x4xbf16>, vector<4x512xbf16>, vector<4x512xf32> -> vector<4x512xf32>
    %34 = arith.addf %21, %33 : vector<4x512xf32>
    %c1_i32_15 = arith.constant 1 : i32
    %35 = vector.broadcast %c1_i32_15 : i32 to vector<1x512xi32>
    %36 = arith.cmpi sge, %2, %35 : vector<1x512xi32>
    %c15_i32 = arith.constant 15 : i32
    %37 = vector.broadcast %c15_i32 : i32 to vector<1x512xi32>
    %38 = arith.cmpi slt, %3, %37 : vector<1x512xi32>
    %39 = arith.andi %36, %38 : vector<1x512xi1>
    %cst_16 = arith.constant 0.000000e+00 : bf16
    %40 = vector.broadcast %cst_16 : bf16 to vector<4x15xbf16>
    %41 = vector.extract_strided_slice %4 {offsets = [0, 0], sizes = [4, 497], strides = [1, 1]} : vector<4x512xbf16> to vector<4x497xbf16>
    %42 = tpu.concatenate %40, %41 in 1 : vector<4x15xbf16>, vector<4x497xbf16> -> vector<4x512xbf16>
    %cst_17 = arith.constant 0.000000e+00 : bf16
    %43 = vector.broadcast %cst_17 : bf16 to vector<4x512xbf16>
    %44 = vector.shape_cast %39 : vector<1x512xi1> to vector<1x512xi1>
    %45 = vector.broadcast %44 : vector<1x512xi1> to vector<4x512xi1>
    %46 = arith.select %45, %42, %43 : vector<4x512xi1>, vector<4x512xbf16>
    %47 = vector.extract_strided_slice %1 {offsets = [2, 0, 0], sizes = [1, 4, 4], strides = [1, 1, 1]} : vector<9x4x4xbf16> to vector<1x4x4xbf16>
    %48 = vector.shape_cast %47 : vector<1x4x4xbf16> to vector<4x4xbf16>
    %cst_18 = arith.constant dense<0.000000e+00> : vector<4x512xf32>
    %49 = tpu.matmul %48, %46, %cst_18 {dimension_numbers = #tpu.dot_dimension_numbers<[1], [0], [0], [1], [0, 0, 1, 1], [], []>} : vector<4x4xbf16>, vector<4x512xbf16>, vector<4x512xf32> -> vector<4x512xf32>
    %50 = arith.addf %34, %49 : vector<4x512xf32>
    %c1_i32_19 = arith.constant 1 : i32
    %51 = vector.broadcast %c1_i32_19 : i32 to vector<1x512xi32>
    %52 = arith.cmpi sge, %3, %51 : vector<1x512xi32>
    %cst_20 = arith.constant 0.000000e+00 : bf16
    %53 = vector.broadcast %cst_20 : bf16 to vector<4x1xbf16>
    %54 = vector.extract_strided_slice %4 {offsets = [0, 0], sizes = [4, 511], strides = [1, 1]} : vector<4x512xbf16> to vector<4x511xbf16>
    %55 = tpu.concatenate %53, %54 in 1 : vector<4x1xbf16>, vector<4x511xbf16> -> vector<4x512xbf16>
    %cst_21 = arith.constant 0.000000e+00 : bf16
    %56 = vector.broadcast %cst_21 : bf16 to vector<4x512xbf16>
    %57 = vector.shape_cast %52 : vector<1x512xi1> to vector<1x512xi1>
    %58 = vector.broadcast %57 : vector<1x512xi1> to vector<4x512xi1>
    %59 = arith.select %58, %55, %56 : vector<4x512xi1>, vector<4x512xbf16>
    %60 = vector.extract_strided_slice %1 {offsets = [3, 0, 0], sizes = [1, 4, 4], strides = [1, 1, 1]} : vector<9x4x4xbf16> to vector<1x4x4xbf16>
    %61 = vector.shape_cast %60 : vector<1x4x4xbf16> to vector<4x4xbf16>
    %cst_22 = arith.constant dense<0.000000e+00> : vector<4x512xf32>
    %62 = tpu.matmul %61, %59, %cst_22 {dimension_numbers = #tpu.dot_dimension_numbers<[1], [0], [0], [1], [0, 0, 1, 1], [], []>} : vector<4x4xbf16>, vector<4x512xbf16>, vector<4x512xf32> -> vector<4x512xf32>
    %63 = arith.addf %50, %62 : vector<4x512xf32>
    %64 = vector.extract_strided_slice %1 {offsets = [4, 0, 0], sizes = [1, 4, 4], strides = [1, 1, 1]} : vector<9x4x4xbf16> to vector<1x4x4xbf16>
    %65 = vector.shape_cast %64 : vector<1x4x4xbf16> to vector<4x4xbf16>
    %cst_23 = arith.constant dense<0.000000e+00> : vector<4x512xf32>
    %66 = tpu.matmul %65, %4, %cst_23 {dimension_numbers = #tpu.dot_dimension_numbers<[1], [0], [0], [1], [0, 0, 1, 1], [], []>} : vector<4x4xbf16>, vector<4x512xbf16>, vector<4x512xf32> -> vector<4x512xf32>
    %67 = arith.addf %63, %66 : vector<4x512xf32>
    %c15_i32_24 = arith.constant 15 : i32
    %68 = vector.broadcast %c15_i32_24 : i32 to vector<1x512xi32>
    %69 = arith.cmpi slt, %3, %68 : vector<1x512xi32>
    %cst_25 = arith.constant 0.000000e+00 : bf16
    %70 = vector.broadcast %cst_25 : bf16 to vector<4x1xbf16>
    %71 = vector.extract_strided_slice %4 {offsets = [0, 1], sizes = [4, 511], strides = [1, 1]} : vector<4x512xbf16> to vector<4x511xbf16>
    %72 = tpu.concatenate %71, %70 in 1 : vector<4x511xbf16>, vector<4x1xbf16> -> vector<4x512xbf16>
    %cst_26 = arith.constant 0.000000e+00 : bf16
    %73 = vector.broadcast %cst_26 : bf16 to vector<4x512xbf16>
    %74 = vector.shape_cast %69 : vector<1x512xi1> to vector<1x512xi1>
    %75 = vector.broadcast %74 : vector<1x512xi1> to vector<4x512xi1>
    %76 = arith.select %75, %72, %73 : vector<4x512xi1>, vector<4x512xbf16>
    %77 = vector.extract_strided_slice %1 {offsets = [5, 0, 0], sizes = [1, 4, 4], strides = [1, 1, 1]} : vector<9x4x4xbf16> to vector<1x4x4xbf16>
    %78 = vector.shape_cast %77 : vector<1x4x4xbf16> to vector<4x4xbf16>
    %cst_27 = arith.constant dense<0.000000e+00> : vector<4x512xf32>
    %79 = tpu.matmul %78, %76, %cst_27 {dimension_numbers = #tpu.dot_dimension_numbers<[1], [0], [0], [1], [0, 0, 1, 1], [], []>} : vector<4x4xbf16>, vector<4x512xbf16>, vector<4x512xf32> -> vector<4x512xf32>
    %80 = arith.addf %67, %79 : vector<4x512xf32>
    %c15_i32_28 = arith.constant 15 : i32
    %81 = vector.broadcast %c15_i32_28 : i32 to vector<1x512xi32>
    %82 = arith.cmpi slt, %2, %81 : vector<1x512xi32>
    %c1_i32_29 = arith.constant 1 : i32
    %83 = vector.broadcast %c1_i32_29 : i32 to vector<1x512xi32>
    %84 = arith.cmpi sge, %3, %83 : vector<1x512xi32>
    %85 = arith.andi %82, %84 : vector<1x512xi1>
    %cst_30 = arith.constant 0.000000e+00 : bf16
    %86 = vector.broadcast %cst_30 : bf16 to vector<4x15xbf16>
    %87 = vector.extract_strided_slice %4 {offsets = [0, 15], sizes = [4, 497], strides = [1, 1]} : vector<4x512xbf16> to vector<4x497xbf16>
    %88 = tpu.concatenate %87, %86 in 1 : vector<4x497xbf16>, vector<4x15xbf16> -> vector<4x512xbf16>
    %cst_31 = arith.constant 0.000000e+00 : bf16
    %89 = vector.broadcast %cst_31 : bf16 to vector<4x512xbf16>
    %90 = vector.shape_cast %85 : vector<1x512xi1> to vector<1x512xi1>
    %91 = vector.broadcast %90 : vector<1x512xi1> to vector<4x512xi1>
    %92 = arith.select %91, %88, %89 : vector<4x512xi1>, vector<4x512xbf16>
    %93 = vector.extract_strided_slice %1 {offsets = [6, 0, 0], sizes = [1, 4, 4], strides = [1, 1, 1]} : vector<9x4x4xbf16> to vector<1x4x4xbf16>
    %94 = vector.shape_cast %93 : vector<1x4x4xbf16> to vector<4x4xbf16>
    %cst_32 = arith.constant dense<0.000000e+00> : vector<4x512xf32>
    %95 = tpu.matmul %94, %92, %cst_32 {dimension_numbers = #tpu.dot_dimension_numbers<[1], [0], [0], [1], [0, 0, 1, 1], [], []>} : vector<4x4xbf16>, vector<4x512xbf16>, vector<4x512xf32> -> vector<4x512xf32>
    %96 = arith.addf %80, %95 : vector<4x512xf32>
    %c15_i32_33 = arith.constant 15 : i32
    %97 = vector.broadcast %c15_i32_33 : i32 to vector<1x512xi32>
    %98 = arith.cmpi slt, %2, %97 : vector<1x512xi32>
    %cst_34 = arith.constant 0.000000e+00 : bf16
    %99 = vector.broadcast %cst_34 : bf16 to vector<4x16xbf16>
    %100 = vector.extract_strided_slice %4 {offsets = [0, 16], sizes = [4, 496], strides = [1, 1]} : vector<4x512xbf16> to vector<4x496xbf16>
    %101 = tpu.concatenate %100, %99 in 1 : vector<4x496xbf16>, vector<4x16xbf16> -> vector<4x512xbf16>
    %cst_35 = arith.constant 0.000000e+00 : bf16
    %102 = vector.broadcast %cst_35 : bf16 to vector<4x512xbf16>
    %103 = vector.shape_cast %98 : vector<1x512xi1> to vector<1x512xi1>
    %104 = vector.broadcast %103 : vector<1x512xi1> to vector<4x512xi1>
    %105 = arith.select %104, %101, %102 : vector<4x512xi1>, vector<4x512xbf16>
    %106 = vector.extract_strided_slice %1 {offsets = [7, 0, 0], sizes = [1, 4, 4], strides = [1, 1, 1]} : vector<9x4x4xbf16> to vector<1x4x4xbf16>
    %107 = vector.shape_cast %106 : vector<1x4x4xbf16> to vector<4x4xbf16>
    %cst_36 = arith.constant dense<0.000000e+00> : vector<4x512xf32>
    %108 = tpu.matmul %107, %105, %cst_36 {dimension_numbers = #tpu.dot_dimension_numbers<[1], [0], [0], [1], [0, 0, 1, 1], [], []>} : vector<4x4xbf16>, vector<4x512xbf16>, vector<4x512xf32> -> vector<4x512xf32>
    %109 = arith.addf %96, %108 : vector<4x512xf32>
    %c15_i32_37 = arith.constant 15 : i32
    %110 = vector.broadcast %c15_i32_37 : i32 to vector<1x512xi32>
    %111 = arith.cmpi slt, %2, %110 : vector<1x512xi32>
    %c15_i32_38 = arith.constant 15 : i32
    %112 = vector.broadcast %c15_i32_38 : i32 to vector<1x512xi32>
    %113 = arith.cmpi slt, %3, %112 : vector<1x512xi32>
    %114 = arith.andi %111, %113 : vector<1x512xi1>
    %cst_39 = arith.constant 0.000000e+00 : bf16
    %115 = vector.broadcast %cst_39 : bf16 to vector<4x17xbf16>
    %116 = vector.extract_strided_slice %4 {offsets = [0, 17], sizes = [4, 495], strides = [1, 1]} : vector<4x512xbf16> to vector<4x495xbf16>
    %117 = tpu.concatenate %116, %115 in 1 : vector<4x495xbf16>, vector<4x17xbf16> -> vector<4x512xbf16>
    %cst_40 = arith.constant 0.000000e+00 : bf16
    %118 = vector.broadcast %cst_40 : bf16 to vector<4x512xbf16>
    %119 = vector.shape_cast %114 : vector<1x512xi1> to vector<1x512xi1>
    %120 = vector.broadcast %119 : vector<1x512xi1> to vector<4x512xi1>
    %121 = arith.select %120, %117, %118 : vector<4x512xi1>, vector<4x512xbf16>
    %122 = vector.extract_strided_slice %1 {offsets = [8, 0, 0], sizes = [1, 4, 4], strides = [1, 1, 1]} : vector<9x4x4xbf16> to vector<1x4x4xbf16>
    %123 = vector.shape_cast %122 : vector<1x4x4xbf16> to vector<4x4xbf16>
    %cst_41 = arith.constant dense<0.000000e+00> : vector<4x512xf32>
    %124 = tpu.matmul %123, %121, %cst_41 {dimension_numbers = #tpu.dot_dimension_numbers<[1], [0], [0], [1], [0, 0, 1, 1], [], []>} : vector<4x4xbf16>, vector<4x512xbf16>, vector<4x512xf32> -> vector<4x512xf32>
    %125 = arith.addf %109, %124 : vector<4x512xf32>
    %cst_42 = arith.constant dense<0.000000e+00> : vector<4xf32>
    %126 = vector.multi_reduction <add>, %125, %cst_42 [1] : vector<4x512xf32> to vector<4xf32>
    %127 = vector.shape_cast %126 : vector<4xf32> to vector<4x1xf32>
    %128 = arith.mulf %125, %125 : vector<4x512xf32>
    %cst_43 = arith.constant dense<0.000000e+00> : vector<4xf32>
    %129 = vector.multi_reduction <add>, %128, %cst_43 [1] : vector<4x512xf32> to vector<4xf32>
    %130 = vector.shape_cast %129 : vector<4xf32> to vector<4x1xf32>
    %cst_44 = arith.constant 5.120000e+02 : f32
    %131 = vector.broadcast %cst_44 : f32 to vector<4x1xf32>
    %132 = arith.divf %127, %131 : vector<4x1xf32>
    %cst_45 = arith.constant 5.120000e+02 : f32
    %133 = vector.broadcast %cst_45 : f32 to vector<4x1xf32>
    %134 = arith.divf %130, %133 : vector<4x1xf32>
    %135 = arith.mulf %132, %132 : vector<4x1xf32>
    %136 = arith.subf %134, %135 : vector<4x1xf32>
    %cst_46 = arith.constant 0.000000e+00 : f32
    %137 = vector.broadcast %cst_46 : f32 to vector<4x1xf32>
    %138 = arith.maximumf %136, %137 : vector<4x1xf32>
    %c0_47 = arith.constant 0 : index
    %c0_48 = arith.constant 0 : index
    %139 = vector.load %arg2[%c0_47, %c0_48] : memref<4x1xf32, #tpu.memory_space<vmem>>, vector<4x1xf32>
    %cst_49 = arith.constant 9.99999974E-6 : f32
    %140 = vector.broadcast %cst_49 : f32 to vector<4x1xf32>
    %141 = arith.addf %138, %140 : vector<4x1xf32>
    %142 = math.rsqrt %141 : vector<4x1xf32>
    %143 = arith.mulf %139, %142 : vector<4x1xf32>
    %c0_50 = arith.constant 0 : index
    %c0_51 = arith.constant 0 : index
    %144 = vector.load %arg3[%c0_50, %c0_51] : memref<4x1xf32, #tpu.memory_space<vmem>>, vector<4x1xf32>
    %145 = arith.mulf %132, %143 : vector<4x1xf32>
    %146 = arith.subf %144, %145 : vector<4x1xf32>
    %147 = vector.broadcast %143 : vector<4x1xf32> to vector<4x512xf32>
    %148 = arith.mulf %125, %147 : vector<4x512xf32>
    %149 = vector.broadcast %146 : vector<4x1xf32> to vector<4x512xf32>
    %150 = arith.addf %148, %149 : vector<4x512xf32>
    %cst_52 = arith.constant 0.000000e+00 : f32
    %151 = vector.broadcast %cst_52 : f32 to vector<4x512xf32>
    %152 = arith.maximumf %150, %151 : vector<4x512xf32>
    %c0_53 = arith.constant 0 : index
    %c0_54 = arith.constant 0 : index
    %c0_55 = arith.constant 0 : index
    %153 = vector.load %arg4[%c0_53, %c0_54, %c0_55] : memref<9x8x4xbf16, #tpu.memory_space<vmem>>, vector<9x8x4xbf16>
    %c0_56 = arith.constant 0 : index
    %c0_57 = arith.constant 0 : index
    %154 = vector.load %arg31[%c0_56, %c0_57] : memref<2x512xi32, #tpu.memory_space<vmem>>, vector<1x512xi32>
    %c1_58 = arith.constant 1 : index
    %c0_59 = arith.constant 0 : index
    %155 = vector.load %arg31[%c1_58, %c0_59] : memref<2x512xi32, #tpu.memory_space<vmem>>, vector<1x512xi32>
    %156 = arith.truncf %152 : vector<4x512xf32> to vector<4x512xbf16>
    %cst_60 = arith.constant 0.000000e+00 : f32
    %157 = vector.broadcast %cst_60 : f32 to vector<8x512xf32>
    %c1_i32_61 = arith.constant 1 : i32
    %158 = vector.broadcast %c1_i32_61 : i32 to vector<1x512xi32>
    %159 = arith.cmpi sge, %154, %158 : vector<1x512xi32>
    %c1_i32_62 = arith.constant 1 : i32
    %160 = vector.broadcast %c1_i32_62 : i32 to vector<1x512xi32>
    %161 = arith.cmpi sge, %155, %160 : vector<1x512xi32>
    %162 = arith.andi %159, %161 : vector<1x512xi1>
    %cst_63 = arith.constant 0.000000e+00 : bf16
    %163 = vector.broadcast %cst_63 : bf16 to vector<4x17xbf16>
    %164 = vector.extract_strided_slice %156 {offsets = [0, 0], sizes = [4, 495], strides = [1, 1]} : vector<4x512xbf16> to vector<4x495xbf16>
    %165 = tpu.concatenate %163, %164 in 1 : vector<4x17xbf16>, vector<4x495xbf16> -> vector<4x512xbf16>
    %cst_64 = arith.constant 0.000000e+00 : bf16
    %166 = vector.broadcast %cst_64 : bf16 to vector<4x512xbf16>
    %167 = vector.shape_cast %162 : vector<1x512xi1> to vector<1x512xi1>
    %168 = vector.broadcast %167 : vector<1x512xi1> to vector<4x512xi1>
    %169 = arith.select %168, %165, %166 : vector<4x512xi1>, vector<4x512xbf16>
    %170 = vector.extract_strided_slice %153 {offsets = [0, 0, 0], sizes = [1, 8, 4], strides = [1, 1, 1]} : vector<9x8x4xbf16> to vector<1x8x4xbf16>
    %171 = vector.shape_cast %170 : vector<1x8x4xbf16> to vector<8x4xbf16>
    %cst_65 = arith.constant dense<0.000000e+00> : vector<8x512xf32>
    %172 = tpu.matmul %171, %169, %cst_65 {dimension_numbers = #tpu.dot_dimension_numbers<[1], [0], [0], [1], [0, 0, 1, 1], [], []>} : vector<8x4xbf16>, vector<4x512xbf16>, vector<8x512xf32> -> vector<8x512xf32>
    %173 = arith.addf %157, %172 : vector<8x512xf32>
    %c1_i32_66 = arith.constant 1 : i32
    %174 = vector.broadcast %c1_i32_66 : i32 to vector<1x512xi32>
    %175 = arith.cmpi sge, %154, %174 : vector<1x512xi32>
    %cst_67 = arith.constant 0.000000e+00 : bf16
    %176 = vector.broadcast %cst_67 : bf16 to vector<4x16xbf16>
    %177 = vector.extract_strided_slice %156 {offsets = [0, 0], sizes = [4, 496], strides = [1, 1]} : vector<4x512xbf16> to vector<4x496xbf16>
    %178 = tpu.concatenate %176, %177 in 1 : vector<4x16xbf16>, vector<4x496xbf16> -> vector<4x512xbf16>
    %cst_68 = arith.constant 0.000000e+00 : bf16
    %179 = vector.broadcast %cst_68 : bf16 to vector<4x512xbf16>
    %180 = vector.shape_cast %175 : vector<1x512xi1> to vector<1x512xi1>
    %181 = vector.broadcast %180 : vector<1x512xi1> to vector<4x512xi1>
    %182 = arith.select %181, %178, %179 : vector<4x512xi1>, vector<4x512xbf16>
    %183 = vector.extract_strided_slice %153 {offsets = [1, 0, 0], sizes = [1, 8, 4], strides = [1, 1, 1]} : vector<9x8x4xbf16> to vector<1x8x4xbf16>
    %184 = vector.shape_cast %183 : vector<1x8x4xbf16> to vector<8x4xbf16>
    %cst_69 = arith.constant dense<0.000000e+00> : vector<8x512xf32>
    %185 = tpu.matmul %184, %182, %cst_69 {dimension_numbers = #tpu.dot_dimension_numbers<[1], [0], [0], [1], [0, 0, 1, 1], [], []>} : vector<8x4xbf16>, vector<4x512xbf16>, vector<8x512xf32> -> vector<8x512xf32>
    %186 = arith.addf %173, %185 : vector<8x512xf32>
    %c1_i32_70 = arith.constant 1 : i32
    %187 = vector.broadcast %c1_i32_70 : i32 to vector<1x512xi32>
    %188 = arith.cmpi sge, %154, %187 : vector<1x512xi32>
    %c15_i32_71 = arith.constant 15 : i32
    %189 = vector.broadcast %c15_i32_71 : i32 to vector<1x512xi32>
    %190 = arith.cmpi slt, %155, %189 : vector<1x512xi32>
    %191 = arith.andi %188, %190 : vector<1x512xi1>
    %cst_72 = arith.constant 0.000000e+00 : bf16
    %192 = vector.broadcast %cst_72 : bf16 to vector<4x15xbf16>
    %193 = vector.extract_strided_slice %156 {offsets = [0, 0], sizes = [4, 497], strides = [1, 1]} : vector<4x512xbf16> to vector<4x497xbf16>
    %194 = tpu.concatenate %192, %193 in 1 : vector<4x15xbf16>, vector<4x497xbf16> -> vector<4x512xbf16>
    %cst_73 = arith.constant 0.000000e+00 : bf16
    %195 = vector.broadcast %cst_73 : bf16 to vector<4x512xbf16>
    %196 = vector.shape_cast %191 : vector<1x512xi1> to vector<1x512xi1>
    %197 = vector.broadcast %196 : vector<1x512xi1> to vector<4x512xi1>
    %198 = arith.select %197, %194, %195 : vector<4x512xi1>, vector<4x512xbf16>
    %199 = vector.extract_strided_slice %153 {offsets = [2, 0, 0], sizes = [1, 8, 4], strides = [1, 1, 1]} : vector<9x8x4xbf16> to vector<1x8x4xbf16>
    %200 = vector.shape_cast %199 : vector<1x8x4xbf16> to vector<8x4xbf16>
    %cst_74 = arith.constant dense<0.000000e+00> : vector<8x512xf32>
    %201 = tpu.matmul %200, %198, %cst_74 {dimension_numbers = #tpu.dot_dimension_numbers<[1], [0], [0], [1], [0, 0, 1, 1], [], []>} : vector<8x4xbf16>, vector<4x512xbf16>, vector<8x512xf32> -> vector<8x512xf32>
    %202 = arith.addf %186, %201 : vector<8x512xf32>
    %c1_i32_75 = arith.constant 1 : i32
    %203 = vector.broadcast %c1_i32_75 : i32 to vector<1x512xi32>
    %204 = arith.cmpi sge, %155, %203 : vector<1x512xi32>
    %cst_76 = arith.constant 0.000000e+00 : bf16
    %205 = vector.broadcast %cst_76 : bf16 to vector<4x1xbf16>
    %206 = vector.extract_strided_slice %156 {offsets = [0, 0], sizes = [4, 511], strides = [1, 1]} : vector<4x512xbf16> to vector<4x511xbf16>
    %207 = tpu.concatenate %205, %206 in 1 : vector<4x1xbf16>, vector<4x511xbf16> -> vector<4x512xbf16>
    %cst_77 = arith.constant 0.000000e+00 : bf16
    %208 = vector.broadcast %cst_77 : bf16 to vector<4x512xbf16>
    %209 = vector.shape_cast %204 : vector<1x512xi1> to vector<1x512xi1>
    %210 = vector.broadcast %209 : vector<1x512xi1> to vector<4x512xi1>
    %211 = arith.select %210, %207, %208 : vector<4x512xi1>, vector<4x512xbf16>
    %212 = vector.extract_strided_slice %153 {offsets = [3, 0, 0], sizes = [1, 8, 4], strides = [1, 1, 1]} : vector<9x8x4xbf16> to vector<1x8x4xbf16>
    %213 = vector.shape_cast %212 : vector<1x8x4xbf16> to vector<8x4xbf16>
    %cst_78 = arith.constant dense<0.000000e+00> : vector<8x512xf32>
    %214 = tpu.matmul %213, %211, %cst_78 {dimension_numbers = #tpu.dot_dimension_numbers<[1], [0], [0], [1], [0, 0, 1, 1], [], []>} : vector<8x4xbf16>, vector<4x512xbf16>, vector<8x512xf32> -> vector<8x512xf32>
    %215 = arith.addf %202, %214 : vector<8x512xf32>
    %216 = vector.extract_strided_slice %153 {offsets = [4, 0, 0], sizes = [1, 8, 4], strides = [1, 1, 1]} : vector<9x8x4xbf16> to vector<1x8x4xbf16>
    %217 = vector.shape_cast %216 : vector<1x8x4xbf16> to vector<8x4xbf16>
    %cst_79 = arith.constant dense<0.000000e+00> : vector<8x512xf32>
    %218 = tpu.matmul %217, %156, %cst_79 {dimension_numbers = #tpu.dot_dimension_numbers<[1], [0], [0], [1], [0, 0, 1, 1], [], []>} : vector<8x4xbf16>, vector<4x512xbf16>, vector<8x512xf32> -> vector<8x512xf32>
    %219 = arith.addf %215, %218 : vector<8x512xf32>
    %c15_i32_80 = arith.constant 15 : i32
    %220 = vector.broadcast %c15_i32_80 : i32 to vector<1x512xi32>
    %221 = arith.cmpi slt, %155, %220 : vector<1x512xi32>
    %cst_81 = arith.constant 0.000000e+00 : bf16
    %222 = vector.broadcast %cst_81 : bf16 to vector<4x1xbf16>
    %223 = vector.extract_strided_slice %156 {offsets = [0, 1], sizes = [4, 511], strides = [1, 1]} : vector<4x512xbf16> to vector<4x511xbf16>
    %224 = tpu.concatenate %223, %222 in 1 : vector<4x511xbf16>, vector<4x1xbf16> -> vector<4x512xbf16>
    %cst_82 = arith.constant 0.000000e+00 : bf16
    %225 = vector.broadcast %cst_82 : bf16 to vector<4x512xbf16>
    %226 = vector.shape_cast %221 : vector<1x512xi1> to vector<1x512xi1>
    %227 = vector.broadcast %226 : vector<1x512xi1> to vector<4x512xi1>
    %228 = arith.select %227, %224, %225 : vector<4x512xi1>, vector<4x512xbf16>
    %229 = vector.extract_strided_slice %153 {offsets = [5, 0, 0], sizes = [1, 8, 4], strides = [1, 1, 1]} : vector<9x8x4xbf16> to vector<1x8x4xbf16>
    %230 = vector.shape_cast %229 : vector<1x8x4xbf16> to vector<8x4xbf16>
    %cst_83 = arith.constant dense<0.000000e+00> : vector<8x512xf32>
    %231 = tpu.matmul %230, %228, %cst_83 {dimension_numbers = #tpu.dot_dimension_numbers<[1], [0], [0], [1], [0, 0, 1, 1], [], []>} : vector<8x4xbf16>, vector<4x512xbf16>, vector<8x512xf32> -> vector<8x512xf32>
    %232 = arith.addf %219, %231 : vector<8x512xf32>
    %c15_i32_84 = arith.constant 15 : i32
    %233 = vector.broadcast %c15_i32_84 : i32 to vector<1x512xi32>
    %234 = arith.cmpi slt, %154, %233 : vector<1x512xi32>
    %c1_i32_85 = arith.constant 1 : i32
    %235 = vector.broadcast %c1_i32_85 : i32 to vector<1x512xi32>
    %236 = arith.cmpi sge, %155, %235 : vector<1x512xi32>
    %237 = arith.andi %234, %236 : vector<1x512xi1>
    %cst_86 = arith.constant 0.000000e+00 : bf16
    %238 = vector.broadcast %cst_86 : bf16 to vector<4x15xbf16>
    %239 = vector.extract_strided_slice %156 {offsets = [0, 15], sizes = [4, 497], strides = [1, 1]} : vector<4x512xbf16> to vector<4x497xbf16>
    %240 = tpu.concatenate %239, %238 in 1 : vector<4x497xbf16>, vector<4x15xbf16> -> vector<4x512xbf16>
    %cst_87 = arith.constant 0.000000e+00 : bf16
    %241 = vector.broadcast %cst_87 : bf16 to vector<4x512xbf16>
    %242 = vector.shape_cast %237 : vector<1x512xi1> to vector<1x512xi1>
    %243 = vector.broadcast %242 : vector<1x512xi1> to vector<4x512xi1>
    %244 = arith.select %243, %240, %241 : vector<4x512xi1>, vector<4x512xbf16>
    %245 = vector.extract_strided_slice %153 {offsets = [6, 0, 0], sizes = [1, 8, 4], strides = [1, 1, 1]} : vector<9x8x4xbf16> to vector<1x8x4xbf16>
    %246 = vector.shape_cast %245 : vector<1x8x4xbf16> to vector<8x4xbf16>
    %cst_88 = arith.constant dense<0.000000e+00> : vector<8x512xf32>
    %247 = tpu.matmul %246, %244, %cst_88 {dimension_numbers = #tpu.dot_dimension_numbers<[1], [0], [0], [1], [0, 0, 1, 1], [], []>} : vector<8x4xbf16>, vector<4x512xbf16>, vector<8x512xf32> -> vector<8x512xf32>
    %248 = arith.addf %232, %247 : vector<8x512xf32>
    %c15_i32_89 = arith.constant 15 : i32
    %249 = vector.broadcast %c15_i32_89 : i32 to vector<1x512xi32>
    %250 = arith.cmpi slt, %154, %249 : vector<1x512xi32>
    %cst_90 = arith.constant 0.000000e+00 : bf16
    %251 = vector.broadcast %cst_90 : bf16 to vector<4x16xbf16>
    %252 = vector.extract_strided_slice %156 {offsets = [0, 16], sizes = [4, 496], strides = [1, 1]} : vector<4x512xbf16> to vector<4x496xbf16>
    %253 = tpu.concatenate %252, %251 in 1 : vector<4x496xbf16>, vector<4x16xbf16> -> vector<4x512xbf16>
    %cst_91 = arith.constant 0.000000e+00 : bf16
    %254 = vector.broadcast %cst_91 : bf16 to vector<4x512xbf16>
    %255 = vector.shape_cast %250 : vector<1x512xi1> to vector<1x512xi1>
    %256 = vector.broadcast %255 : vector<1x512xi1> to vector<4x512xi1>
    %257 = arith.select %256, %253, %254 : vector<4x512xi1>, vector<4x512xbf16>
    %258 = vector.extract_strided_slice %153 {offsets = [7, 0, 0], sizes = [1, 8, 4], strides = [1, 1, 1]} : vector<9x8x4xbf16> to vector<1x8x4xbf16>
    %259 = vector.shape_cast %258 : vector<1x8x4xbf16> to vector<8x4xbf16>
    %cst_92 = arith.constant dense<0.000000e+00> : vector<8x512xf32>
    %260 = tpu.matmul %259, %257, %cst_92 {dimension_numbers = #tpu.dot_dimension_numbers<[1], [0], [0], [1], [0, 0, 1, 1], [], []>} : vector<8x4xbf16>, vector<4x512xbf16>, vector<8x512xf32> -> vector<8x512xf32>
    %261 = arith.addf %248, %260 : vector<8x512xf32>
    %c15_i32_93 = arith.constant 15 : i32
    %262 = vector.broadcast %c15_i32_93 : i32 to vector<1x512xi32>
    %263 = arith.cmpi slt, %154, %262 : vector<1x512xi32>
    %c15_i32_94 = arith.constant 15 : i32
    %264 = vector.broadcast %c15_i32_94 : i32 to vector<1x512xi32>
    %265 = arith.cmpi slt, %155, %264 : vector<1x512xi32>
    %266 = arith.andi %263, %265 : vector<1x512xi1>
    %cst_95 = arith.constant 0.000000e+00 : bf16
    %267 = vector.broadcast %cst_95 : bf16 to vector<4x17xbf16>
    %268 = vector.extract_strided_slice %156 {offsets = [0, 17], sizes = [4, 495], strides = [1, 1]} : vector<4x512xbf16> to vector<4x495xbf16>
    %269 = tpu.concatenate %268, %267 in 1 : vector<4x495xbf16>, vector<4x17xbf16> -> vector<4x512xbf16>
    %cst_96 = arith.constant 0.000000e+00 : bf16
    %270 = vector.broadcast %cst_96 : bf16 to vector<4x512xbf16>
    %271 = vector.shape_cast %266 : vector<1x512xi1> to vector<1x512xi1>
    %272 = vector.broadcast %271 : vector<1x512xi1> to vector<4x512xi1>
    %273 = arith.select %272, %269, %270 : vector<4x512xi1>, vector<4x512xbf16>
    %274 = vector.extract_strided_slice %153 {offsets = [8, 0, 0], sizes = [1, 8, 4], strides = [1, 1, 1]} : vector<9x8x4xbf16> to vector<1x8x4xbf16>
    %275 = vector.shape_cast %274 : vector<1x8x4xbf16> to vector<8x4xbf16>
    %cst_97 = arith.constant dense<0.000000e+00> : vector<8x512xf32>
    %276 = tpu.matmul %275, %273, %cst_97 {dimension_numbers = #tpu.dot_dimension_numbers<[1], [0], [0], [1], [0, 0, 1, 1], [], []>} : vector<8x4xbf16>, vector<4x512xbf16>, vector<8x512xf32> -> vector<8x512xf32>
    %277 = arith.addf %261, %276 : vector<8x512xf32>
    %cst_98 = arith.constant dense<0.000000e+00> : vector<8xf32>
    %278 = vector.multi_reduction <add>, %277, %cst_98 [1] : vector<8x512xf32> to vector<8xf32>
    %279 = vector.shape_cast %278 : vector<8xf32> to vector<8x1xf32>
    %280 = arith.mulf %277, %277 : vector<8x512xf32>
    %cst_99 = arith.constant dense<0.000000e+00> : vector<8xf32>
    %281 = vector.multi_reduction <add>, %280, %cst_99 [1] : vector<8x512xf32> to vector<8xf32>
    %282 = vector.shape_cast %281 : vector<8xf32> to vector<8x1xf32>
    %cst_100 = arith.constant 5.120000e+02 : f32
    %283 = vector.broadcast %cst_100 : f32 to vector<8x1xf32>
    %284 = arith.divf %279, %283 : vector<8x1xf32>
    %cst_101 = arith.constant 5.120000e+02 : f32
    %285 = vector.broadcast %cst_101 : f32 to vector<8x1xf32>
    %286 = arith.divf %282, %285 : vector<8x1xf32>
    %287 = arith.mulf %284, %284 : vector<8x1xf32>
    %288 = arith.subf %286, %287 : vector<8x1xf32>
    %cst_102 = arith.constant 0.000000e+00 : f32
    %289 = vector.broadcast %cst_102 : f32 to vector<8x1xf32>
    %290 = arith.maximumf %288, %289 : vector<8x1xf32>
    %c0_103 = arith.constant 0 : index
    %c0_104 = arith.constant 0 : index
    %291 = vector.load %arg5[%c0_103, %c0_104] : memref<8x1xf32, #tpu.memory_space<vmem>>, vector<8x1xf32>
    %cst_105 = arith.constant 9.99999974E-6 : f32
    %292 = vector.broadcast %cst_105 : f32 to vector<8x1xf32>
    %293 = arith.addf %290, %292 : vector<8x1xf32>
    %294 = math.rsqrt %293 : vector<8x1xf32>
    %295 = arith.mulf %291, %294 : vector<8x1xf32>
    %c0_106 = arith.constant 0 : index
    %c0_107 = arith.constant 0 : index
    %296 = vector.load %arg6[%c0_106, %c0_107] : memref<8x1xf32, #tpu.memory_space<vmem>>, vector<8x1xf32>
    %297 = arith.mulf %284, %295 : vector<8x1xf32>
    %298 = arith.subf %296, %297 : vector<8x1xf32>
    %299 = vector.broadcast %295 : vector<8x1xf32> to vector<8x512xf32>
    %300 = arith.mulf %277, %299 : vector<8x512xf32>
    %301 = vector.broadcast %298 : vector<8x1xf32> to vector<8x512xf32>
    %302 = arith.addf %300, %301 : vector<8x512xf32>
    %cst_108 = arith.constant 0.000000e+00 : f32
    %303 = vector.broadcast %cst_108 : f32 to vector<8x512xf32>
    %304 = arith.maximumf %302, %303 : vector<8x512xf32>
    %cst_109 = arith.constant 0.000000e+00 : f32
    %305 = vector.broadcast %cst_109 : f32 to vector<8x1xf32>
    %306 = vector.extract_strided_slice %304 {offsets = [0, 1], sizes = [8, 511], strides = [1, 1]} : vector<8x512xf32> to vector<8x511xf32>
    %307 = tpu.concatenate %306, %305 in 1 : vector<8x511xf32>, vector<8x1xf32> -> vector<8x512xf32>
    %308 = arith.maximumf %304, %307 : vector<8x512xf32>
    %cst_110 = arith.constant 0.000000e+00 : f32
    %309 = vector.broadcast %cst_110 : f32 to vector<8x16xf32>
    %310 = vector.extract_strided_slice %304 {offsets = [0, 16], sizes = [8, 496], strides = [1, 1]} : vector<8x512xf32> to vector<8x496xf32>
    %311 = tpu.concatenate %310, %309 in 1 : vector<8x496xf32>, vector<8x16xf32> -> vector<8x512xf32>
    %cst_111 = arith.constant 0.000000e+00 : f32
    %312 = vector.broadcast %cst_111 : f32 to vector<8x17xf32>
    %313 = vector.extract_strided_slice %304 {offsets = [0, 17], sizes = [8, 495], strides = [1, 1]} : vector<8x512xf32> to vector<8x495xf32>
    %314 = tpu.concatenate %313, %312 in 1 : vector<8x495xf32>, vector<8x17xf32> -> vector<8x512xf32>
    %315 = arith.maximumf %311, %314 : vector<8x512xf32>
    %316 = arith.maximumf %308, %315 : vector<8x512xf32>
    %317 = arith.truncf %316 : vector<8x512xf32> to vector<8x512xbf16>
    %c0_112 = arith.constant 0 : index
    %c0_113 = arith.constant 0 : index
    %318 = vector.load %arg35[%c0_112, %c0_113] : memref<512x128xbf16, #tpu.memory_space<vmem>>, vector<512x128xbf16>
    %cst_114 = arith.constant dense<0.000000e+00> : vector<8x128xf32>
    %319 = tpu.matmul %317, %318, %cst_114 {dimension_numbers = #tpu.dot_dimension_numbers<[1], [0], [0], [1], [0, 0, 1, 1], [], []>} : vector<8x512xbf16>, vector<512x128xbf16>, vector<8x128xf32> -> vector<8x128xf32>
    %c0_115 = arith.constant 0 : index
    %c0_116 = arith.constant 0 : index
    %c0_117 = arith.constant 0 : index
    %320 = vector.load %arg7[%c0_115, %c0_116, %c0_117] : memref<9x8x8xbf16, #tpu.memory_space<vmem>>, vector<9x8x8xbf16>
    %c0_118 = arith.constant 0 : index
    %c0_119 = arith.constant 0 : index
    %321 = vector.load %arg32[%c0_118, %c0_119] : memref<2x128xi32, #tpu.memory_space<vmem>>, vector<1x128xi32>
    %c1_120 = arith.constant 1 : index
    %c0_121 = arith.constant 0 : index
    %322 = vector.load %arg32[%c1_120, %c0_121] : memref<2x128xi32, #tpu.memory_space<vmem>>, vector<1x128xi32>
    %323 = arith.truncf %319 : vector<8x128xf32> to vector<8x128xbf16>
    %cst_122 = arith.constant 0.000000e+00 : f32
    %324 = vector.broadcast %cst_122 : f32 to vector<8x128xf32>
    %c1_i32_123 = arith.constant 1 : i32
    %325 = vector.broadcast %c1_i32_123 : i32 to vector<1x128xi32>
    %326 = arith.cmpi sge, %321, %325 : vector<1x128xi32>
    %c1_i32_124 = arith.constant 1 : i32
    %327 = vector.broadcast %c1_i32_124 : i32 to vector<1x128xi32>
    %328 = arith.cmpi sge, %322, %327 : vector<1x128xi32>
    %329 = arith.andi %326, %328 : vector<1x128xi1>
    %cst_125 = arith.constant 0.000000e+00 : bf16
    %330 = vector.broadcast %cst_125 : bf16 to vector<8x9xbf16>
    %331 = vector.extract_strided_slice %323 {offsets = [0, 0], sizes = [8, 119], strides = [1, 1]} : vector<8x128xbf16> to vector<8x119xbf16>
    %332 = tpu.concatenate %330, %331 in 1 : vector<8x9xbf16>, vector<8x119xbf16> -> vector<8x128xbf16>
    %cst_126 = arith.constant 0.000000e+00 : bf16
    %333 = vector.broadcast %cst_126 : bf16 to vector<8x128xbf16>
    %334 = vector.shape_cast %329 : vector<1x128xi1> to vector<1x128xi1>
    %335 = vector.broadcast %334 : vector<1x128xi1> to vector<8x128xi1>
    %336 = arith.select %335, %332, %333 : vector<8x128xi1>, vector<8x128xbf16>
    %337 = vector.extract_strided_slice %320 {offsets = [0, 0, 0], sizes = [1, 8, 8], strides = [1, 1, 1]} : vector<9x8x8xbf16> to vector<1x8x8xbf16>
    %338 = vector.shape_cast %337 : vector<1x8x8xbf16> to vector<8x8xbf16>
    %cst_127 = arith.constant dense<0.000000e+00> : vector<8x128xf32>
    %339 = tpu.matmul %338, %336, %cst_127 {dimension_numbers = #tpu.dot_dimension_numbers<[1], [0], [0], [1], [0, 0, 1, 1], [], []>} : vector<8x8xbf16>, vector<8x128xbf16>, vector<8x128xf32> -> vector<8x128xf32>
    %340 = arith.addf %324, %339 : vector<8x128xf32>
    %c1_i32_128 = arith.constant 1 : i32
    %341 = vector.broadcast %c1_i32_128 : i32 to vector<1x128xi32>
    %342 = arith.cmpi sge, %321, %341 : vector<1x128xi32>
    %cst_129 = arith.constant 0.000000e+00 : bf16
    %343 = vector.broadcast %cst_129 : bf16 to vector<8x8xbf16>
    %344 = vector.extract_strided_slice %323 {offsets = [0, 0], sizes = [8, 120], strides = [1, 1]} : vector<8x128xbf16> to vector<8x120xbf16>
    %345 = tpu.concatenate %343, %344 in 1 : vector<8x8xbf16>, vector<8x120xbf16> -> vector<8x128xbf16>
    %cst_130 = arith.constant 0.000000e+00 : bf16
    %346 = vector.broadcast %cst_130 : bf16 to vector<8x128xbf16>
    %347 = vector.shape_cast %342 : vector<1x128xi1> to vector<1x128xi1>
    %348 = vector.broadcast %347 : vector<1x128xi1> to vector<8x128xi1>
    %349 = arith.select %348, %345, %346 : vector<8x128xi1>, vector<8x128xbf16>
    %350 = vector.extract_strided_slice %320 {offsets = [1, 0, 0], sizes = [1, 8, 8], strides = [1, 1, 1]} : vector<9x8x8xbf16> to vector<1x8x8xbf16>
    %351 = vector.shape_cast %350 : vector<1x8x8xbf16> to vector<8x8xbf16>
    %cst_131 = arith.constant dense<0.000000e+00> : vector<8x128xf32>
    %352 = tpu.matmul %351, %349, %cst_131 {dimension_numbers = #tpu.dot_dimension_numbers<[1], [0], [0], [1], [0, 0, 1, 1], [], []>} : vector<8x8xbf16>, vector<8x128xbf16>, vector<8x128xf32> -> vector<8x128xf32>
    %353 = arith.addf %340, %352 : vector<8x128xf32>
    %c1_i32_132 = arith.constant 1 : i32
    %354 = vector.broadcast %c1_i32_132 : i32 to vector<1x128xi32>
    %355 = arith.cmpi sge, %321, %354 : vector<1x128xi32>
    %c7_i32 = arith.constant 7 : i32
    %356 = vector.broadcast %c7_i32 : i32 to vector<1x128xi32>
    %357 = arith.cmpi slt, %322, %356 : vector<1x128xi32>
    %358 = arith.andi %355, %357 : vector<1x128xi1>
    %cst_133 = arith.constant 0.000000e+00 : bf16
    %359 = vector.broadcast %cst_133 : bf16 to vector<8x7xbf16>
    %360 = vector.extract_strided_slice %323 {offsets = [0, 0], sizes = [8, 121], strides = [1, 1]} : vector<8x128xbf16> to vector<8x121xbf16>
    %361 = tpu.concatenate %359, %360 in 1 : vector<8x7xbf16>, vector<8x121xbf16> -> vector<8x128xbf16>
    %cst_134 = arith.constant 0.000000e+00 : bf16
    %362 = vector.broadcast %cst_134 : bf16 to vector<8x128xbf16>
    %363 = vector.shape_cast %358 : vector<1x128xi1> to vector<1x128xi1>
    %364 = vector.broadcast %363 : vector<1x128xi1> to vector<8x128xi1>
    %365 = arith.select %364, %361, %362 : vector<8x128xi1>, vector<8x128xbf16>
    %366 = vector.extract_strided_slice %320 {offsets = [2, 0, 0], sizes = [1, 8, 8], strides = [1, 1, 1]} : vector<9x8x8xbf16> to vector<1x8x8xbf16>
    %367 = vector.shape_cast %366 : vector<1x8x8xbf16> to vector<8x8xbf16>
    %cst_135 = arith.constant dense<0.000000e+00> : vector<8x128xf32>
    %368 = tpu.matmul %367, %365, %cst_135 {dimension_numbers = #tpu.dot_dimension_numbers<[1], [0], [0], [1], [0, 0, 1, 1], [], []>} : vector<8x8xbf16>, vector<8x128xbf16>, vector<8x128xf32> -> vector<8x128xf32>
    %369 = arith.addf %353, %368 : vector<8x128xf32>
    %c1_i32_136 = arith.constant 1 : i32
    %370 = vector.broadcast %c1_i32_136 : i32 to vector<1x128xi32>
    %371 = arith.cmpi sge, %322, %370 : vector<1x128xi32>
    %cst_137 = arith.constant 0.000000e+00 : bf16
    %372 = vector.broadcast %cst_137 : bf16 to vector<8x1xbf16>
    %373 = vector.extract_strided_slice %323 {offsets = [0, 0], sizes = [8, 127], strides = [1, 1]} : vector<8x128xbf16> to vector<8x127xbf16>
    %374 = tpu.concatenate %372, %373 in 1 : vector<8x1xbf16>, vector<8x127xbf16> -> vector<8x128xbf16>
    %cst_138 = arith.constant 0.000000e+00 : bf16
    %375 = vector.broadcast %cst_138 : bf16 to vector<8x128xbf16>
    %376 = vector.shape_cast %371 : vector<1x128xi1> to vector<1x128xi1>
    %377 = vector.broadcast %376 : vector<1x128xi1> to vector<8x128xi1>
    %378 = arith.select %377, %374, %375 : vector<8x128xi1>, vector<8x128xbf16>
    %379 = vector.extract_strided_slice %320 {offsets = [3, 0, 0], sizes = [1, 8, 8], strides = [1, 1, 1]} : vector<9x8x8xbf16> to vector<1x8x8xbf16>
    %380 = vector.shape_cast %379 : vector<1x8x8xbf16> to vector<8x8xbf16>
    %cst_139 = arith.constant dense<0.000000e+00> : vector<8x128xf32>
    %381 = tpu.matmul %380, %378, %cst_139 {dimension_numbers = #tpu.dot_dimension_numbers<[1], [0], [0], [1], [0, 0, 1, 1], [], []>} : vector<8x8xbf16>, vector<8x128xbf16>, vector<8x128xf32> -> vector<8x128xf32>
    %382 = arith.addf %369, %381 : vector<8x128xf32>
    %383 = vector.extract_strided_slice %320 {offsets = [4, 0, 0], sizes = [1, 8, 8], strides = [1, 1, 1]} : vector<9x8x8xbf16> to vector<1x8x8xbf16>
    %384 = vector.shape_cast %383 : vector<1x8x8xbf16> to vector<8x8xbf16>
    %cst_140 = arith.constant dense<0.000000e+00> : vector<8x128xf32>
    %385 = tpu.matmul %384, %323, %cst_140 {dimension_numbers = #tpu.dot_dimension_numbers<[1], [0], [0], [1], [0, 0, 1, 1], [], []>} : vector<8x8xbf16>, vector<8x128xbf16>, vector<8x128xf32> -> vector<8x128xf32>
    %386 = arith.addf %382, %385 : vector<8x128xf32>
    %c7_i32_141 = arith.constant 7 : i32
    %387 = vector.broadcast %c7_i32_141 : i32 to vector<1x128xi32>
    %388 = arith.cmpi slt, %322, %387 : vector<1x128xi32>
    %cst_142 = arith.constant 0.000000e+00 : bf16
    %389 = vector.broadcast %cst_142 : bf16 to vector<8x1xbf16>
    %390 = vector.extract_strided_slice %323 {offsets = [0, 1], sizes = [8, 127], strides = [1, 1]} : vector<8x128xbf16> to vector<8x127xbf16>
    %391 = tpu.concatenate %390, %389 in 1 : vector<8x127xbf16>, vector<8x1xbf16> -> vector<8x128xbf16>
    %cst_143 = arith.constant 0.000000e+00 : bf16
    %392 = vector.broadcast %cst_143 : bf16 to vector<8x128xbf16>
    %393 = vector.shape_cast %388 : vector<1x128xi1> to vector<1x128xi1>
    %394 = vector.broadcast %393 : vector<1x128xi1> to vector<8x128xi1>
    %395 = arith.select %394, %391, %392 : vector<8x128xi1>, vector<8x128xbf16>
    %396 = vector.extract_strided_slice %320 {offsets = [5, 0, 0], sizes = [1, 8, 8], strides = [1, 1, 1]} : vector<9x8x8xbf16> to vector<1x8x8xbf16>
    %397 = vector.shape_cast %396 : vector<1x8x8xbf16> to vector<8x8xbf16>
    %cst_144 = arith.constant dense<0.000000e+00> : vector<8x128xf32>
    %398 = tpu.matmul %397, %395, %cst_144 {dimension_numbers = #tpu.dot_dimension_numbers<[1], [0], [0], [1], [0, 0, 1, 1], [], []>} : vector<8x8xbf16>, vector<8x128xbf16>, vector<8x128xf32> -> vector<8x128xf32>
    %399 = arith.addf %386, %398 : vector<8x128xf32>
    %c7_i32_145 = arith.constant 7 : i32
    %400 = vector.broadcast %c7_i32_145 : i32 to vector<1x128xi32>
    %401 = arith.cmpi slt, %321, %400 : vector<1x128xi32>
    %c1_i32_146 = arith.constant 1 : i32
    %402 = vector.broadcast %c1_i32_146 : i32 to vector<1x128xi32>
    %403 = arith.cmpi sge, %322, %402 : vector<1x128xi32>
    %404 = arith.andi %401, %403 : vector<1x128xi1>
    %cst_147 = arith.constant 0.000000e+00 : bf16
    %405 = vector.broadcast %cst_147 : bf16 to vector<8x7xbf16>
    %406 = vector.extract_strided_slice %323 {offsets = [0, 7], sizes = [8, 121], strides = [1, 1]} : vector<8x128xbf16> to vector<8x121xbf16>
    %407 = tpu.concatenate %406, %405 in 1 : vector<8x121xbf16>, vector<8x7xbf16> -> vector<8x128xbf16>
    %cst_148 = arith.constant 0.000000e+00 : bf16
    %408 = vector.broadcast %cst_148 : bf16 to vector<8x128xbf16>
    %409 = vector.shape_cast %404 : vector<1x128xi1> to vector<1x128xi1>
    %410 = vector.broadcast %409 : vector<1x128xi1> to vector<8x128xi1>
    %411 = arith.select %410, %407, %408 : vector<8x128xi1>, vector<8x128xbf16>
    %412 = vector.extract_strided_slice %320 {offsets = [6, 0, 0], sizes = [1, 8, 8], strides = [1, 1, 1]} : vector<9x8x8xbf16> to vector<1x8x8xbf16>
    %413 = vector.shape_cast %412 : vector<1x8x8xbf16> to vector<8x8xbf16>
    %cst_149 = arith.constant dense<0.000000e+00> : vector<8x128xf32>
    %414 = tpu.matmul %413, %411, %cst_149 {dimension_numbers = #tpu.dot_dimension_numbers<[1], [0], [0], [1], [0, 0, 1, 1], [], []>} : vector<8x8xbf16>, vector<8x128xbf16>, vector<8x128xf32> -> vector<8x128xf32>
    %415 = arith.addf %399, %414 : vector<8x128xf32>
    %c7_i32_150 = arith.constant 7 : i32
    %416 = vector.broadcast %c7_i32_150 : i32 to vector<1x128xi32>
    %417 = arith.cmpi slt, %321, %416 : vector<1x128xi32>
    %cst_151 = arith.constant 0.000000e+00 : bf16
    %418 = vector.broadcast %cst_151 : bf16 to vector<8x8xbf16>
    %419 = vector.extract_strided_slice %323 {offsets = [0, 8], sizes = [8, 120], strides = [1, 1]} : vector<8x128xbf16> to vector<8x120xbf16>
    %420 = tpu.concatenate %419, %418 in 1 : vector<8x120xbf16>, vector<8x8xbf16> -> vector<8x128xbf16>
    %cst_152 = arith.constant 0.000000e+00 : bf16
    %421 = vector.broadcast %cst_152 : bf16 to vector<8x128xbf16>
    %422 = vector.shape_cast %417 : vector<1x128xi1> to vector<1x128xi1>
    %423 = vector.broadcast %422 : vector<1x128xi1> to vector<8x128xi1>
    %424 = arith.select %423, %420, %421 : vector<8x128xi1>, vector<8x128xbf16>
    %425 = vector.extract_strided_slice %320 {offsets = [7, 0, 0], sizes = [1, 8, 8], strides = [1, 1, 1]} : vector<9x8x8xbf16> to vector<1x8x8xbf16>
    %426 = vector.shape_cast %425 : vector<1x8x8xbf16> to vector<8x8xbf16>
    %cst_153 = arith.constant dense<0.000000e+00> : vector<8x128xf32>
    %427 = tpu.matmul %426, %424, %cst_153 {dimension_numbers = #tpu.dot_dimension_numbers<[1], [0], [0], [1], [0, 0, 1, 1], [], []>} : vector<8x8xbf16>, vector<8x128xbf16>, vector<8x128xf32> -> vector<8x128xf32>
    %428 = arith.addf %415, %427 : vector<8x128xf32>
    %c7_i32_154 = arith.constant 7 : i32
    %429 = vector.broadcast %c7_i32_154 : i32 to vector<1x128xi32>
    %430 = arith.cmpi slt, %321, %429 : vector<1x128xi32>
    %c7_i32_155 = arith.constant 7 : i32
    %431 = vector.broadcast %c7_i32_155 : i32 to vector<1x128xi32>
    %432 = arith.cmpi slt, %322, %431 : vector<1x128xi32>
    %433 = arith.andi %430, %432 : vector<1x128xi1>
    %cst_156 = arith.constant 0.000000e+00 : bf16
    %434 = vector.broadcast %cst_156 : bf16 to vector<8x9xbf16>
    %435 = vector.extract_strided_slice %323 {offsets = [0, 9], sizes = [8, 119], strides = [1, 1]} : vector<8x128xbf16> to vector<8x119xbf16>
    %436 = tpu.concatenate %435, %434 in 1 : vector<8x119xbf16>, vector<8x9xbf16> -> vector<8x128xbf16>
    %cst_157 = arith.constant 0.000000e+00 : bf16
    %437 = vector.broadcast %cst_157 : bf16 to vector<8x128xbf16>
    %438 = vector.shape_cast %433 : vector<1x128xi1> to vector<1x128xi1>
    %439 = vector.broadcast %438 : vector<1x128xi1> to vector<8x128xi1>
    %440 = arith.select %439, %436, %437 : vector<8x128xi1>, vector<8x128xbf16>
    %441 = vector.extract_strided_slice %320 {offsets = [8, 0, 0], sizes = [1, 8, 8], strides = [1, 1, 1]} : vector<9x8x8xbf16> to vector<1x8x8xbf16>
    %442 = vector.shape_cast %441 : vector<1x8x8xbf16> to vector<8x8xbf16>
    %cst_158 = arith.constant dense<0.000000e+00> : vector<8x128xf32>
    %443 = tpu.matmul %442, %440, %cst_158 {dimension_numbers = #tpu.dot_dimension_numbers<[1], [0], [0], [1], [0, 0, 1, 1], [], []>} : vector<8x8xbf16>, vector<8x128xbf16>, vector<8x128xf32> -> vector<8x128xf32>
    %444 = arith.addf %428, %443 : vector<8x128xf32>
    %cst_159 = arith.constant dense<0.000000e+00> : vector<8xf32>
    %445 = vector.multi_reduction <add>, %444, %cst_159 [1] : vector<8x128xf32> to vector<8xf32>
    %446 = vector.shape_cast %445 : vector<8xf32> to vector<8x1xf32>
    %447 = arith.mulf %444, %444 : vector<8x128xf32>
    %cst_160 = arith.constant dense<0.000000e+00> : vector<8xf32>
    %448 = vector.multi_reduction <add>, %447, %cst_160 [1] : vector<8x128xf32> to vector<8xf32>
    %449 = vector.shape_cast %448 : vector<8xf32> to vector<8x1xf32>
    %cst_161 = arith.constant 1.280000e+02 : f32
    %450 = vector.broadcast %cst_161 : f32 to vector<8x1xf32>
    %451 = arith.divf %446, %450 : vector<8x1xf32>
    %cst_162 = arith.constant 1.280000e+02 : f32
    %452 = vector.broadcast %cst_162 : f32 to vector<8x1xf32>
    %453 = arith.divf %449, %452 : vector<8x1xf32>
    %454 = arith.mulf %451, %451 : vector<8x1xf32>
    %455 = arith.subf %453, %454 : vector<8x1xf32>
    %cst_163 = arith.constant 0.000000e+00 : f32
    %456 = vector.broadcast %cst_163 : f32 to vector<8x1xf32>
    %457 = arith.maximumf %455, %456 : vector<8x1xf32>
    %c0_164 = arith.constant 0 : index
    %c0_165 = arith.constant 0 : index
    %458 = vector.load %arg8[%c0_164, %c0_165] : memref<8x1xf32, #tpu.memory_space<vmem>>, vector<8x1xf32>
    %cst_166 = arith.constant 9.99999974E-6 : f32
    %459 = vector.broadcast %cst_166 : f32 to vector<8x1xf32>
    %460 = arith.addf %457, %459 : vector<8x1xf32>
    %461 = math.rsqrt %460 : vector<8x1xf32>
    %462 = arith.mulf %458, %461 : vector<8x1xf32>
    %c0_167 = arith.constant 0 : index
    %c0_168 = arith.constant 0 : index
    %463 = vector.load %arg9[%c0_167, %c0_168] : memref<8x1xf32, #tpu.memory_space<vmem>>, vector<8x1xf32>
    %464 = arith.mulf %451, %462 : vector<8x1xf32>
    %465 = arith.subf %463, %464 : vector<8x1xf32>
    %466 = vector.broadcast %462 : vector<8x1xf32> to vector<8x128xf32>
    %467 = arith.mulf %444, %466 : vector<8x128xf32>
    %468 = vector.broadcast %465 : vector<8x1xf32> to vector<8x128xf32>
    %469 = arith.addf %467, %468 : vector<8x128xf32>
    %cst_169 = arith.constant 0.000000e+00 : f32
    %470 = vector.broadcast %cst_169 : f32 to vector<8x128xf32>
    %471 = arith.maximumf %469, %470 : vector<8x128xf32>
    %cst_170 = arith.constant 0.000000e+00 : f32
    %472 = vector.broadcast %cst_170 : f32 to vector<8x1xf32>
    %473 = vector.extract_strided_slice %471 {offsets = [0, 1], sizes = [8, 127], strides = [1, 1]} : vector<8x128xf32> to vector<8x127xf32>
    %474 = tpu.concatenate %473, %472 in 1 : vector<8x127xf32>, vector<8x1xf32> -> vector<8x128xf32>
    %475 = arith.maximumf %471, %474 : vector<8x128xf32>
    %cst_171 = arith.constant 0.000000e+00 : f32
    %476 = vector.broadcast %cst_171 : f32 to vector<8x8xf32>
    %477 = vector.extract_strided_slice %471 {offsets = [0, 8], sizes = [8, 120], strides = [1, 1]} : vector<8x128xf32> to vector<8x120xf32>
    %478 = tpu.concatenate %477, %476 in 1 : vector<8x120xf32>, vector<8x8xf32> -> vector<8x128xf32>
    %cst_172 = arith.constant 0.000000e+00 : f32
    %479 = vector.broadcast %cst_172 : f32 to vector<8x9xf32>
    %480 = vector.extract_strided_slice %471 {offsets = [0, 9], sizes = [8, 119], strides = [1, 1]} : vector<8x128xf32> to vector<8x119xf32>
    %481 = tpu.concatenate %480, %479 in 1 : vector<8x119xf32>, vector<8x9xf32> -> vector<8x128xf32>
    %482 = arith.maximumf %478, %481 : vector<8x128xf32>
    %483 = arith.maximumf %475, %482 : vector<8x128xf32>
    %484 = arith.truncf %483 : vector<8x128xf32> to vector<8x128xbf16>
    %c0_173 = arith.constant 0 : index
    %c0_174 = arith.constant 0 : index
    %485 = vector.load %arg36[%c0_173, %c0_174] : memref<128x32xbf16, #tpu.memory_space<vmem>>, vector<128x32xbf16>
    %cst_175 = arith.constant dense<0.000000e+00> : vector<8x32xf32>
    %486 = tpu.matmul %484, %485, %cst_175 {dimension_numbers = #tpu.dot_dimension_numbers<[1], [0], [0], [1], [0, 0, 1, 1], [], []>} : vector<8x128xbf16>, vector<128x32xbf16>, vector<8x32xf32> -> vector<8x32xf32>
    %c0_176 = arith.constant 0 : index
    %c0_177 = arith.constant 0 : index
    %c0_178 = arith.constant 0 : index
    %487 = vector.load %arg10[%c0_176, %c0_177, %c0_178] : memref<9x8x8xbf16, #tpu.memory_space<vmem>>, vector<9x8x8xbf16>
    %c0_179 = arith.constant 0 : index
    %c0_180 = arith.constant 0 : index
    %488 = vector.load %arg33[%c0_179, %c0_180] : memref<2x32xi32, #tpu.memory_space<vmem>>, vector<1x32xi32>
    %c1_181 = arith.constant 1 : index
    %c0_182 = arith.constant 0 : index
    %489 = vector.load %arg33[%c1_181, %c0_182] : memref<2x32xi32, #tpu.memory_space<vmem>>, vector<1x32xi32>
    %490 = arith.truncf %486 : vector<8x32xf32> to vector<8x32xbf16>
    %cst_183 = arith.constant 0.000000e+00 : f32
    %491 = vector.broadcast %cst_183 : f32 to vector<8x32xf32>
    %c1_i32_184 = arith.constant 1 : i32
    %492 = vector.broadcast %c1_i32_184 : i32 to vector<1x32xi32>
    %493 = arith.cmpi sge, %488, %492 : vector<1x32xi32>
    %c1_i32_185 = arith.constant 1 : i32
    %494 = vector.broadcast %c1_i32_185 : i32 to vector<1x32xi32>
    %495 = arith.cmpi sge, %489, %494 : vector<1x32xi32>
    %496 = arith.andi %493, %495 : vector<1x32xi1>
    %cst_186 = arith.constant 0.000000e+00 : bf16
    %497 = vector.broadcast %cst_186 : bf16 to vector<8x5xbf16>
    %498 = vector.extract_strided_slice %490 {offsets = [0, 0], sizes = [8, 27], strides = [1, 1]} : vector<8x32xbf16> to vector<8x27xbf16>
    %499 = tpu.concatenate %497, %498 in 1 : vector<8x5xbf16>, vector<8x27xbf16> -> vector<8x32xbf16>
    %cst_187 = arith.constant 0.000000e+00 : bf16
    %500 = vector.broadcast %cst_187 : bf16 to vector<8x32xbf16>
    %501 = vector.shape_cast %496 : vector<1x32xi1> to vector<1x32xi1>
    %502 = vector.broadcast %501 : vector<1x32xi1> to vector<8x32xi1>
    %503 = arith.select %502, %499, %500 : vector<8x32xi1>, vector<8x32xbf16>
    %504 = vector.extract_strided_slice %487 {offsets = [0, 0, 0], sizes = [1, 8, 8], strides = [1, 1, 1]} : vector<9x8x8xbf16> to vector<1x8x8xbf16>
    %505 = vector.shape_cast %504 : vector<1x8x8xbf16> to vector<8x8xbf16>
    %cst_188 = arith.constant dense<0.000000e+00> : vector<8x32xf32>
    %506 = tpu.matmul %505, %503, %cst_188 {dimension_numbers = #tpu.dot_dimension_numbers<[1], [0], [0], [1], [0, 0, 1, 1], [], []>} : vector<8x8xbf16>, vector<8x32xbf16>, vector<8x32xf32> -> vector<8x32xf32>
    %507 = arith.addf %491, %506 : vector<8x32xf32>
    %c1_i32_189 = arith.constant 1 : i32
    %508 = vector.broadcast %c1_i32_189 : i32 to vector<1x32xi32>
    %509 = arith.cmpi sge, %488, %508 : vector<1x32xi32>
    %cst_190 = arith.constant 0.000000e+00 : bf16
    %510 = vector.broadcast %cst_190 : bf16 to vector<8x4xbf16>
    %511 = vector.extract_strided_slice %490 {offsets = [0, 0], sizes = [8, 28], strides = [1, 1]} : vector<8x32xbf16> to vector<8x28xbf16>
    %512 = tpu.concatenate %510, %511 in 1 : vector<8x4xbf16>, vector<8x28xbf16> -> vector<8x32xbf16>
    %cst_191 = arith.constant 0.000000e+00 : bf16
    %513 = vector.broadcast %cst_191 : bf16 to vector<8x32xbf16>
    %514 = vector.shape_cast %509 : vector<1x32xi1> to vector<1x32xi1>
    %515 = vector.broadcast %514 : vector<1x32xi1> to vector<8x32xi1>
    %516 = arith.select %515, %512, %513 : vector<8x32xi1>, vector<8x32xbf16>
    %517 = vector.extract_strided_slice %487 {offsets = [1, 0, 0], sizes = [1, 8, 8], strides = [1, 1, 1]} : vector<9x8x8xbf16> to vector<1x8x8xbf16>
    %518 = vector.shape_cast %517 : vector<1x8x8xbf16> to vector<8x8xbf16>
    %cst_192 = arith.constant dense<0.000000e+00> : vector<8x32xf32>
    %519 = tpu.matmul %518, %516, %cst_192 {dimension_numbers = #tpu.dot_dimension_numbers<[1], [0], [0], [1], [0, 0, 1, 1], [], []>} : vector<8x8xbf16>, vector<8x32xbf16>, vector<8x32xf32> -> vector<8x32xf32>
    %520 = arith.addf %507, %519 : vector<8x32xf32>
    %c1_i32_193 = arith.constant 1 : i32
    %521 = vector.broadcast %c1_i32_193 : i32 to vector<1x32xi32>
    %522 = arith.cmpi sge, %488, %521 : vector<1x32xi32>
    %c3_i32 = arith.constant 3 : i32
    %523 = vector.broadcast %c3_i32 : i32 to vector<1x32xi32>
    %524 = arith.cmpi slt, %489, %523 : vector<1x32xi32>
    %525 = arith.andi %522, %524 : vector<1x32xi1>
    %cst_194 = arith.constant 0.000000e+00 : bf16
    %526 = vector.broadcast %cst_194 : bf16 to vector<8x3xbf16>
    %527 = vector.extract_strided_slice %490 {offsets = [0, 0], sizes = [8, 29], strides = [1, 1]} : vector<8x32xbf16> to vector<8x29xbf16>
    %528 = tpu.concatenate %526, %527 in 1 : vector<8x3xbf16>, vector<8x29xbf16> -> vector<8x32xbf16>
    %cst_195 = arith.constant 0.000000e+00 : bf16
    %529 = vector.broadcast %cst_195 : bf16 to vector<8x32xbf16>
    %530 = vector.shape_cast %525 : vector<1x32xi1> to vector<1x32xi1>
    %531 = vector.broadcast %530 : vector<1x32xi1> to vector<8x32xi1>
    %532 = arith.select %531, %528, %529 : vector<8x32xi1>, vector<8x32xbf16>
    %533 = vector.extract_strided_slice %487 {offsets = [2, 0, 0], sizes = [1, 8, 8], strides = [1, 1, 1]} : vector<9x8x8xbf16> to vector<1x8x8xbf16>
    %534 = vector.shape_cast %533 : vector<1x8x8xbf16> to vector<8x8xbf16>
    %cst_196 = arith.constant dense<0.000000e+00> : vector<8x32xf32>
    %535 = tpu.matmul %534, %532, %cst_196 {dimension_numbers = #tpu.dot_dimension_numbers<[1], [0], [0], [1], [0, 0, 1, 1], [], []>} : vector<8x8xbf16>, vector<8x32xbf16>, vector<8x32xf32> -> vector<8x32xf32>
    %536 = arith.addf %520, %535 : vector<8x32xf32>
    %c1_i32_197 = arith.constant 1 : i32
    %537 = vector.broadcast %c1_i32_197 : i32 to vector<1x32xi32>
    %538 = arith.cmpi sge, %489, %537 : vector<1x32xi32>
    %cst_198 = arith.constant 0.000000e+00 : bf16
    %539 = vector.broadcast %cst_198 : bf16 to vector<8x1xbf16>
    %540 = vector.extract_strided_slice %490 {offsets = [0, 0], sizes = [8, 31], strides = [1, 1]} : vector<8x32xbf16> to vector<8x31xbf16>
    %541 = tpu.concatenate %539, %540 in 1 : vector<8x1xbf16>, vector<8x31xbf16> -> vector<8x32xbf16>
    %cst_199 = arith.constant 0.000000e+00 : bf16
    %542 = vector.broadcast %cst_199 : bf16 to vector<8x32xbf16>
    %543 = vector.shape_cast %538 : vector<1x32xi1> to vector<1x32xi1>
    %544 = vector.broadcast %543 : vector<1x32xi1> to vector<8x32xi1>
    %545 = arith.select %544, %541, %542 : vector<8x32xi1>, vector<8x32xbf16>
    %546 = vector.extract_strided_slice %487 {offsets = [3, 0, 0], sizes = [1, 8, 8], strides = [1, 1, 1]} : vector<9x8x8xbf16> to vector<1x8x8xbf16>
    %547 = vector.shape_cast %546 : vector<1x8x8xbf16> to vector<8x8xbf16>
    %cst_200 = arith.constant dense<0.000000e+00> : vector<8x32xf32>
    %548 = tpu.matmul %547, %545, %cst_200 {dimension_numbers = #tpu.dot_dimension_numbers<[1], [0], [0], [1], [0, 0, 1, 1], [], []>} : vector<8x8xbf16>, vector<8x32xbf16>, vector<8x32xf32> -> vector<8x32xf32>
    %549 = arith.addf %536, %548 : vector<8x32xf32>
    %550 = vector.extract_strided_slice %487 {offsets = [4, 0, 0], sizes = [1, 8, 8], strides = [1, 1, 1]} : vector<9x8x8xbf16> to vector<1x8x8xbf16>
    %551 = vector.shape_cast %550 : vector<1x8x8xbf16> to vector<8x8xbf16>
    %cst_201 = arith.constant dense<0.000000e+00> : vector<8x32xf32>
    %552 = tpu.matmul %551, %490, %cst_201 {dimension_numbers = #tpu.dot_dimension_numbers<[1], [0], [0], [1], [0, 0, 1, 1], [], []>} : vector<8x8xbf16>, vector<8x32xbf16>, vector<8x32xf32> -> vector<8x32xf32>
    %553 = arith.addf %549, %552 : vector<8x32xf32>
    %c3_i32_202 = arith.constant 3 : i32
    %554 = vector.broadcast %c3_i32_202 : i32 to vector<1x32xi32>
    %555 = arith.cmpi slt, %489, %554 : vector<1x32xi32>
    %cst_203 = arith.constant 0.000000e+00 : bf16
    %556 = vector.broadcast %cst_203 : bf16 to vector<8x1xbf16>
    %557 = vector.extract_strided_slice %490 {offsets = [0, 1], sizes = [8, 31], strides = [1, 1]} : vector<8x32xbf16> to vector<8x31xbf16>
    %558 = tpu.concatenate %557, %556 in 1 : vector<8x31xbf16>, vector<8x1xbf16> -> vector<8x32xbf16>
    %cst_204 = arith.constant 0.000000e+00 : bf16
    %559 = vector.broadcast %cst_204 : bf16 to vector<8x32xbf16>
    %560 = vector.shape_cast %555 : vector<1x32xi1> to vector<1x32xi1>
    %561 = vector.broadcast %560 : vector<1x32xi1> to vector<8x32xi1>
    %562 = arith.select %561, %558, %559 : vector<8x32xi1>, vector<8x32xbf16>
    %563 = vector.extract_strided_slice %487 {offsets = [5, 0, 0], sizes = [1, 8, 8], strides = [1, 1, 1]} : vector<9x8x8xbf16> to vector<1x8x8xbf16>
    %564 = vector.shape_cast %563 : vector<1x8x8xbf16> to vector<8x8xbf16>
    %cst_205 = arith.constant dense<0.000000e+00> : vector<8x32xf32>
    %565 = tpu.matmul %564, %562, %cst_205 {dimension_numbers = #tpu.dot_dimension_numbers<[1], [0], [0], [1], [0, 0, 1, 1], [], []>} : vector<8x8xbf16>, vector<8x32xbf16>, vector<8x32xf32> -> vector<8x32xf32>
    %566 = arith.addf %553, %565 : vector<8x32xf32>
    %c3_i32_206 = arith.constant 3 : i32
    %567 = vector.broadcast %c3_i32_206 : i32 to vector<1x32xi32>
    %568 = arith.cmpi slt, %488, %567 : vector<1x32xi32>
    %c1_i32_207 = arith.constant 1 : i32
    %569 = vector.broadcast %c1_i32_207 : i32 to vector<1x32xi32>
    %570 = arith.cmpi sge, %489, %569 : vector<1x32xi32>
    %571 = arith.andi %568, %570 : vector<1x32xi1>
    %cst_208 = arith.constant 0.000000e+00 : bf16
    %572 = vector.broadcast %cst_208 : bf16 to vector<8x3xbf16>
    %573 = vector.extract_strided_slice %490 {offsets = [0, 3], sizes = [8, 29], strides = [1, 1]} : vector<8x32xbf16> to vector<8x29xbf16>
    %574 = tpu.concatenate %573, %572 in 1 : vector<8x29xbf16>, vector<8x3xbf16> -> vector<8x32xbf16>
    %cst_209 = arith.constant 0.000000e+00 : bf16
    %575 = vector.broadcast %cst_209 : bf16 to vector<8x32xbf16>
    %576 = vector.shape_cast %571 : vector<1x32xi1> to vector<1x32xi1>
    %577 = vector.broadcast %576 : vector<1x32xi1> to vector<8x32xi1>
    %578 = arith.select %577, %574, %575 : vector<8x32xi1>, vector<8x32xbf16>
    %579 = vector.extract_strided_slice %487 {offsets = [6, 0, 0], sizes = [1, 8, 8], strides = [1, 1, 1]} : vector<9x8x8xbf16> to vector<1x8x8xbf16>
    %580 = vector.shape_cast %579 : vector<1x8x8xbf16> to vector<8x8xbf16>
    %cst_210 = arith.constant dense<0.000000e+00> : vector<8x32xf32>
    %581 = tpu.matmul %580, %578, %cst_210 {dimension_numbers = #tpu.dot_dimension_numbers<[1], [0], [0], [1], [0, 0, 1, 1], [], []>} : vector<8x8xbf16>, vector<8x32xbf16>, vector<8x32xf32> -> vector<8x32xf32>
    %582 = arith.addf %566, %581 : vector<8x32xf32>
    %c3_i32_211 = arith.constant 3 : i32
    %583 = vector.broadcast %c3_i32_211 : i32 to vector<1x32xi32>
    %584 = arith.cmpi slt, %488, %583 : vector<1x32xi32>
    %cst_212 = arith.constant 0.000000e+00 : bf16
    %585 = vector.broadcast %cst_212 : bf16 to vector<8x4xbf16>
    %586 = vector.extract_strided_slice %490 {offsets = [0, 4], sizes = [8, 28], strides = [1, 1]} : vector<8x32xbf16> to vector<8x28xbf16>
    %587 = tpu.concatenate %586, %585 in 1 : vector<8x28xbf16>, vector<8x4xbf16> -> vector<8x32xbf16>
    %cst_213 = arith.constant 0.000000e+00 : bf16
    %588 = vector.broadcast %cst_213 : bf16 to vector<8x32xbf16>
    %589 = vector.shape_cast %584 : vector<1x32xi1> to vector<1x32xi1>
    %590 = vector.broadcast %589 : vector<1x32xi1> to vector<8x32xi1>
    %591 = arith.select %590, %587, %588 : vector<8x32xi1>, vector<8x32xbf16>
    %592 = vector.extract_strided_slice %487 {offsets = [7, 0, 0], sizes = [1, 8, 8], strides = [1, 1, 1]} : vector<9x8x8xbf16> to vector<1x8x8xbf16>
    %593 = vector.shape_cast %592 : vector<1x8x8xbf16> to vector<8x8xbf16>
    %cst_214 = arith.constant dense<0.000000e+00> : vector<8x32xf32>
    %594 = tpu.matmul %593, %591, %cst_214 {dimension_numbers = #tpu.dot_dimension_numbers<[1], [0], [0], [1], [0, 0, 1, 1], [], []>} : vector<8x8xbf16>, vector<8x32xbf16>, vector<8x32xf32> -> vector<8x32xf32>
    %595 = arith.addf %582, %594 : vector<8x32xf32>
    %c3_i32_215 = arith.constant 3 : i32
    %596 = vector.broadcast %c3_i32_215 : i32 to vector<1x32xi32>
    %597 = arith.cmpi slt, %488, %596 : vector<1x32xi32>
    %c3_i32_216 = arith.constant 3 : i32
    %598 = vector.broadcast %c3_i32_216 : i32 to vector<1x32xi32>
    %599 = arith.cmpi slt, %489, %598 : vector<1x32xi32>
    %600 = arith.andi %597, %599 : vector<1x32xi1>
    %cst_217 = arith.constant 0.000000e+00 : bf16
    %601 = vector.broadcast %cst_217 : bf16 to vector<8x5xbf16>
    %602 = vector.extract_strided_slice %490 {offsets = [0, 5], sizes = [8, 27], strides = [1, 1]} : vector<8x32xbf16> to vector<8x27xbf16>
    %603 = tpu.concatenate %602, %601 in 1 : vector<8x27xbf16>, vector<8x5xbf16> -> vector<8x32xbf16>
    %cst_218 = arith.constant 0.000000e+00 : bf16
    %604 = vector.broadcast %cst_218 : bf16 to vector<8x32xbf16>
    %605 = vector.shape_cast %600 : vector<1x32xi1> to vector<1x32xi1>
    %606 = vector.broadcast %605 : vector<1x32xi1> to vector<8x32xi1>
    %607 = arith.select %606, %603, %604 : vector<8x32xi1>, vector<8x32xbf16>
    %608 = vector.extract_strided_slice %487 {offsets = [8, 0, 0], sizes = [1, 8, 8], strides = [1, 1, 1]} : vector<9x8x8xbf16> to vector<1x8x8xbf16>
    %609 = vector.shape_cast %608 : vector<1x8x8xbf16> to vector<8x8xbf16>
    %cst_219 = arith.constant dense<0.000000e+00> : vector<8x32xf32>
    %610 = tpu.matmul %609, %607, %cst_219 {dimension_numbers = #tpu.dot_dimension_numbers<[1], [0], [0], [1], [0, 0, 1, 1], [], []>} : vector<8x8xbf16>, vector<8x32xbf16>, vector<8x32xf32> -> vector<8x32xf32>
    %611 = arith.addf %595, %610 : vector<8x32xf32>
    %cst_220 = arith.constant dense<0.000000e+00> : vector<8xf32>
    %612 = vector.multi_reduction <add>, %611, %cst_220 [1] : vector<8x32xf32> to vector<8xf32>
    %613 = vector.shape_cast %612 : vector<8xf32> to vector<8x1xf32>
    %614 = arith.mulf %611, %611 : vector<8x32xf32>
    %cst_221 = arith.constant dense<0.000000e+00> : vector<8xf32>
    %615 = vector.multi_reduction <add>, %614, %cst_221 [1] : vector<8x32xf32> to vector<8xf32>
    %616 = vector.shape_cast %615 : vector<8xf32> to vector<8x1xf32>
    %cst_222 = arith.constant 3.200000e+01 : f32
    %617 = vector.broadcast %cst_222 : f32 to vector<8x1xf32>
    %618 = arith.divf %613, %617 : vector<8x1xf32>
    %cst_223 = arith.constant 3.200000e+01 : f32
    %619 = vector.broadcast %cst_223 : f32 to vector<8x1xf32>
    %620 = arith.divf %616, %619 : vector<8x1xf32>
    %621 = arith.mulf %618, %618 : vector<8x1xf32>
    %622 = arith.subf %620, %621 : vector<8x1xf32>
    %cst_224 = arith.constant 0.000000e+00 : f32
    %623 = vector.broadcast %cst_224 : f32 to vector<8x1xf32>
    %624 = arith.maximumf %622, %623 : vector<8x1xf32>
    %c0_225 = arith.constant 0 : index
    %c0_226 = arith.constant 0 : index
    %625 = vector.load %arg11[%c0_225, %c0_226] : memref<8x1xf32, #tpu.memory_space<vmem>>, vector<8x1xf32>
    %cst_227 = arith.constant 9.99999974E-6 : f32
    %626 = vector.broadcast %cst_227 : f32 to vector<8x1xf32>
    %627 = arith.addf %624, %626 : vector<8x1xf32>
    %628 = math.rsqrt %627 : vector<8x1xf32>
    %629 = arith.mulf %625, %628 : vector<8x1xf32>
    %c0_228 = arith.constant 0 : index
    %c0_229 = arith.constant 0 : index
    %630 = vector.load %arg12[%c0_228, %c0_229] : memref<8x1xf32, #tpu.memory_space<vmem>>, vector<8x1xf32>
    %631 = arith.mulf %618, %629 : vector<8x1xf32>
    %632 = arith.subf %630, %631 : vector<8x1xf32>
    %633 = vector.broadcast %629 : vector<8x1xf32> to vector<8x32xf32>
    %634 = arith.mulf %611, %633 : vector<8x32xf32>
    %635 = vector.broadcast %632 : vector<8x1xf32> to vector<8x32xf32>
    %636 = arith.addf %634, %635 : vector<8x32xf32>
    %cst_230 = arith.constant 0.000000e+00 : f32
    %637 = vector.broadcast %cst_230 : f32 to vector<8x32xf32>
    %638 = arith.maximumf %636, %637 : vector<8x32xf32>
    %cst_231 = arith.constant 0.000000e+00 : f32
    %639 = vector.broadcast %cst_231 : f32 to vector<8x1xf32>
    %640 = vector.extract_strided_slice %638 {offsets = [0, 1], sizes = [8, 31], strides = [1, 1]} : vector<8x32xf32> to vector<8x31xf32>
    %641 = tpu.concatenate %640, %639 in 1 : vector<8x31xf32>, vector<8x1xf32> -> vector<8x32xf32>
    %642 = arith.maximumf %638, %641 : vector<8x32xf32>
    %cst_232 = arith.constant 0.000000e+00 : f32
    %643 = vector.broadcast %cst_232 : f32 to vector<8x4xf32>
    %644 = vector.extract_strided_slice %638 {offsets = [0, 4], sizes = [8, 28], strides = [1, 1]} : vector<8x32xf32> to vector<8x28xf32>
    %645 = tpu.concatenate %644, %643 in 1 : vector<8x28xf32>, vector<8x4xf32> -> vector<8x32xf32>
    %cst_233 = arith.constant 0.000000e+00 : f32
    %646 = vector.broadcast %cst_233 : f32 to vector<8x5xf32>
    %647 = vector.extract_strided_slice %638 {offsets = [0, 5], sizes = [8, 27], strides = [1, 1]} : vector<8x32xf32> to vector<8x27xf32>
    %648 = tpu.concatenate %647, %646 in 1 : vector<8x27xf32>, vector<8x5xf32> -> vector<8x32xf32>
    %649 = arith.maximumf %645, %648 : vector<8x32xf32>
    %650 = arith.maximumf %642, %649 : vector<8x32xf32>
    %651 = arith.truncf %650 : vector<8x32xf32> to vector<8x32xbf16>
    %c0_234 = arith.constant 0 : index
    %c0_235 = arith.constant 0 : index
    %652 = vector.load %arg37[%c0_234, %c0_235] : memref<32x8xbf16, #tpu.memory_space<vmem>>, vector<32x8xbf16>
    %cst_236 = arith.constant dense<0.000000e+00> : vector<8x8xf32>
    %653 = tpu.matmul %651, %652, %cst_236 {dimension_numbers = #tpu.dot_dimension_numbers<[1], [0], [0], [1], [0, 0, 1, 1], [], []>} : vector<8x32xbf16>, vector<32x8xbf16>, vector<8x8xf32> -> vector<8x8xf32>
    %c0_237 = arith.constant 0 : index
    %c0_238 = arith.constant 0 : index
    %c0_239 = arith.constant 0 : index
    %654 = vector.load %arg13[%c0_237, %c0_238, %c0_239] : memref<9x8x8xbf16, #tpu.memory_space<vmem>>, vector<9x8x8xbf16>
    %c0_240 = arith.constant 0 : index
    %c0_241 = arith.constant 0 : index
    %655 = vector.load %arg34[%c0_240, %c0_241] : memref<2x8xi32, #tpu.memory_space<vmem>>, vector<1x8xi32>
    %c1_242 = arith.constant 1 : index
    %c0_243 = arith.constant 0 : index
    %656 = vector.load %arg34[%c1_242, %c0_243] : memref<2x8xi32, #tpu.memory_space<vmem>>, vector<1x8xi32>
    %657 = arith.truncf %653 : vector<8x8xf32> to vector<8x8xbf16>
    %cst_244 = arith.constant 0.000000e+00 : f32
    %658 = vector.broadcast %cst_244 : f32 to vector<8x8xf32>
    %c1_i32_245 = arith.constant 1 : i32
    %659 = vector.broadcast %c1_i32_245 : i32 to vector<1x8xi32>
    %660 = arith.cmpi sge, %655, %659 : vector<1x8xi32>
    %c1_i32_246 = arith.constant 1 : i32
    %661 = vector.broadcast %c1_i32_246 : i32 to vector<1x8xi32>
    %662 = arith.cmpi sge, %656, %661 : vector<1x8xi32>
    %663 = arith.andi %660, %662 : vector<1x8xi1>
    %cst_247 = arith.constant 0.000000e+00 : bf16
    %664 = vector.broadcast %cst_247 : bf16 to vector<8x3xbf16>
    %665 = vector.extract_strided_slice %657 {offsets = [0, 0], sizes = [8, 5], strides = [1, 1]} : vector<8x8xbf16> to vector<8x5xbf16>
    %666 = tpu.concatenate %664, %665 in 1 : vector<8x3xbf16>, vector<8x5xbf16> -> vector<8x8xbf16>
    %cst_248 = arith.constant 0.000000e+00 : bf16
    %667 = vector.broadcast %cst_248 : bf16 to vector<8x8xbf16>
    %668 = vector.shape_cast %663 : vector<1x8xi1> to vector<1x8xi1>
    %669 = vector.broadcast %668 : vector<1x8xi1> to vector<8x8xi1>
    %670 = arith.select %669, %666, %667 : vector<8x8xi1>, vector<8x8xbf16>
    %671 = vector.extract_strided_slice %654 {offsets = [0, 0, 0], sizes = [1, 8, 8], strides = [1, 1, 1]} : vector<9x8x8xbf16> to vector<1x8x8xbf16>
    %672 = vector.shape_cast %671 : vector<1x8x8xbf16> to vector<8x8xbf16>
    %cst_249 = arith.constant dense<0.000000e+00> : vector<8x8xf32>
    %673 = tpu.matmul %672, %670, %cst_249 {dimension_numbers = #tpu.dot_dimension_numbers<[1], [0], [0], [1], [0, 0, 1, 1], [], []>} : vector<8x8xbf16>, vector<8x8xbf16>, vector<8x8xf32> -> vector<8x8xf32>
    %674 = arith.addf %658, %673 : vector<8x8xf32>
    %c1_i32_250 = arith.constant 1 : i32
    %675 = vector.broadcast %c1_i32_250 : i32 to vector<1x8xi32>
    %676 = arith.cmpi sge, %655, %675 : vector<1x8xi32>
    %cst_251 = arith.constant 0.000000e+00 : bf16
    %677 = vector.broadcast %cst_251 : bf16 to vector<8x2xbf16>
    %678 = vector.extract_strided_slice %657 {offsets = [0, 0], sizes = [8, 6], strides = [1, 1]} : vector<8x8xbf16> to vector<8x6xbf16>
    %679 = tpu.concatenate %677, %678 in 1 : vector<8x2xbf16>, vector<8x6xbf16> -> vector<8x8xbf16>
    %cst_252 = arith.constant 0.000000e+00 : bf16
    %680 = vector.broadcast %cst_252 : bf16 to vector<8x8xbf16>
    %681 = vector.shape_cast %676 : vector<1x8xi1> to vector<1x8xi1>
    %682 = vector.broadcast %681 : vector<1x8xi1> to vector<8x8xi1>
    %683 = arith.select %682, %679, %680 : vector<8x8xi1>, vector<8x8xbf16>
    %684 = vector.extract_strided_slice %654 {offsets = [1, 0, 0], sizes = [1, 8, 8], strides = [1, 1, 1]} : vector<9x8x8xbf16> to vector<1x8x8xbf16>
    %685 = vector.shape_cast %684 : vector<1x8x8xbf16> to vector<8x8xbf16>
    %cst_253 = arith.constant dense<0.000000e+00> : vector<8x8xf32>
    %686 = tpu.matmul %685, %683, %cst_253 {dimension_numbers = #tpu.dot_dimension_numbers<[1], [0], [0], [1], [0, 0, 1, 1], [], []>} : vector<8x8xbf16>, vector<8x8xbf16>, vector<8x8xf32> -> vector<8x8xf32>
    %687 = arith.addf %674, %686 : vector<8x8xf32>
    %c1_i32_254 = arith.constant 1 : i32
    %688 = vector.broadcast %c1_i32_254 : i32 to vector<1x8xi32>
    %689 = arith.cmpi sge, %655, %688 : vector<1x8xi32>
    %c1_i32_255 = arith.constant 1 : i32
    %690 = vector.broadcast %c1_i32_255 : i32 to vector<1x8xi32>
    %691 = arith.cmpi slt, %656, %690 : vector<1x8xi32>
    %692 = arith.andi %689, %691 : vector<1x8xi1>
    %cst_256 = arith.constant 0.000000e+00 : bf16
    %693 = vector.broadcast %cst_256 : bf16 to vector<8x1xbf16>
    %694 = vector.extract_strided_slice %657 {offsets = [0, 0], sizes = [8, 7], strides = [1, 1]} : vector<8x8xbf16> to vector<8x7xbf16>
    %695 = tpu.concatenate %693, %694 in 1 : vector<8x1xbf16>, vector<8x7xbf16> -> vector<8x8xbf16>
    %cst_257 = arith.constant 0.000000e+00 : bf16
    %696 = vector.broadcast %cst_257 : bf16 to vector<8x8xbf16>
    %697 = vector.shape_cast %692 : vector<1x8xi1> to vector<1x8xi1>
    %698 = vector.broadcast %697 : vector<1x8xi1> to vector<8x8xi1>
    %699 = arith.select %698, %695, %696 : vector<8x8xi1>, vector<8x8xbf16>
    %700 = vector.extract_strided_slice %654 {offsets = [2, 0, 0], sizes = [1, 8, 8], strides = [1, 1, 1]} : vector<9x8x8xbf16> to vector<1x8x8xbf16>
    %701 = vector.shape_cast %700 : vector<1x8x8xbf16> to vector<8x8xbf16>
    %cst_258 = arith.constant dense<0.000000e+00> : vector<8x8xf32>
    %702 = tpu.matmul %701, %699, %cst_258 {dimension_numbers = #tpu.dot_dimension_numbers<[1], [0], [0], [1], [0, 0, 1, 1], [], []>} : vector<8x8xbf16>, vector<8x8xbf16>, vector<8x8xf32> -> vector<8x8xf32>
    %703 = arith.addf %687, %702 : vector<8x8xf32>
    %c1_i32_259 = arith.constant 1 : i32
    %704 = vector.broadcast %c1_i32_259 : i32 to vector<1x8xi32>
    %705 = arith.cmpi sge, %656, %704 : vector<1x8xi32>
    %cst_260 = arith.constant 0.000000e+00 : bf16
    %706 = vector.broadcast %cst_260 : bf16 to vector<8x1xbf16>
    %707 = vector.extract_strided_slice %657 {offsets = [0, 0], sizes = [8, 7], strides = [1, 1]} : vector<8x8xbf16> to vector<8x7xbf16>
    %708 = tpu.concatenate %706, %707 in 1 : vector<8x1xbf16>, vector<8x7xbf16> -> vector<8x8xbf16>
    %cst_261 = arith.constant 0.000000e+00 : bf16
    %709 = vector.broadcast %cst_261 : bf16 to vector<8x8xbf16>
    %710 = vector.shape_cast %705 : vector<1x8xi1> to vector<1x8xi1>
    %711 = vector.broadcast %710 : vector<1x8xi1> to vector<8x8xi1>
    %712 = arith.select %711, %708, %709 : vector<8x8xi1>, vector<8x8xbf16>
    %713 = vector.extract_strided_slice %654 {offsets = [3, 0, 0], sizes = [1, 8, 8], strides = [1, 1, 1]} : vector<9x8x8xbf16> to vector<1x8x8xbf16>
    %714 = vector.shape_cast %713 : vector<1x8x8xbf16> to vector<8x8xbf16>
    %cst_262 = arith.constant dense<0.000000e+00> : vector<8x8xf32>
    %715 = tpu.matmul %714, %712, %cst_262 {dimension_numbers = #tpu.dot_dimension_numbers<[1], [0], [0], [1], [0, 0, 1, 1], [], []>} : vector<8x8xbf16>, vector<8x8xbf16>, vector<8x8xf32> -> vector<8x8xf32>
    %716 = arith.addf %703, %715 : vector<8x8xf32>
    %717 = vector.extract_strided_slice %654 {offsets = [4, 0, 0], sizes = [1, 8, 8], strides = [1, 1, 1]} : vector<9x8x8xbf16> to vector<1x8x8xbf16>
    %718 = vector.shape_cast %717 : vector<1x8x8xbf16> to vector<8x8xbf16>
    %cst_263 = arith.constant dense<0.000000e+00> : vector<8x8xf32>
    %719 = tpu.matmul %718, %657, %cst_263 {dimension_numbers = #tpu.dot_dimension_numbers<[1], [0], [0], [1], [0, 0, 1, 1], [], []>} : vector<8x8xbf16>, vector<8x8xbf16>, vector<8x8xf32> -> vector<8x8xf32>
    %720 = arith.addf %716, %719 : vector<8x8xf32>
    %c1_i32_264 = arith.constant 1 : i32
    %721 = vector.broadcast %c1_i32_264 : i32 to vector<1x8xi32>
    %722 = arith.cmpi slt, %656, %721 : vector<1x8xi32>
    %cst_265 = arith.constant 0.000000e+00 : bf16
    %723 = vector.broadcast %cst_265 : bf16 to vector<8x1xbf16>
    %724 = vector.extract_strided_slice %657 {offsets = [0, 1], sizes = [8, 7], strides = [1, 1]} : vector<8x8xbf16> to vector<8x7xbf16>
    %725 = tpu.concatenate %724, %723 in 1 : vector<8x7xbf16>, vector<8x1xbf16> -> vector<8x8xbf16>
    %cst_266 = arith.constant 0.000000e+00 : bf16
    %726 = vector.broadcast %cst_266 : bf16 to vector<8x8xbf16>
    %727 = vector.shape_cast %722 : vector<1x8xi1> to vector<1x8xi1>
    %728 = vector.broadcast %727 : vector<1x8xi1> to vector<8x8xi1>
    %729 = arith.select %728, %725, %726 : vector<8x8xi1>, vector<8x8xbf16>
    %730 = vector.extract_strided_slice %654 {offsets = [5, 0, 0], sizes = [1, 8, 8], strides = [1, 1, 1]} : vector<9x8x8xbf16> to vector<1x8x8xbf16>
    %731 = vector.shape_cast %730 : vector<1x8x8xbf16> to vector<8x8xbf16>
    %cst_267 = arith.constant dense<0.000000e+00> : vector<8x8xf32>
    %732 = tpu.matmul %731, %729, %cst_267 {dimension_numbers = #tpu.dot_dimension_numbers<[1], [0], [0], [1], [0, 0, 1, 1], [], []>} : vector<8x8xbf16>, vector<8x8xbf16>, vector<8x8xf32> -> vector<8x8xf32>
    %733 = arith.addf %720, %732 : vector<8x8xf32>
    %c1_i32_268 = arith.constant 1 : i32
    %734 = vector.broadcast %c1_i32_268 : i32 to vector<1x8xi32>
    %735 = arith.cmpi slt, %655, %734 : vector<1x8xi32>
    %c1_i32_269 = arith.constant 1 : i32
    %736 = vector.broadcast %c1_i32_269 : i32 to vector<1x8xi32>
    %737 = arith.cmpi sge, %656, %736 : vector<1x8xi32>
    %738 = arith.andi %735, %737 : vector<1x8xi1>
    %cst_270 = arith.constant 0.000000e+00 : bf16
    %739 = vector.broadcast %cst_270 : bf16 to vector<8x1xbf16>
    %740 = vector.extract_strided_slice %657 {offsets = [0, 1], sizes = [8, 7], strides = [1, 1]} : vector<8x8xbf16> to vector<8x7xbf16>
    %741 = tpu.concatenate %740, %739 in 1 : vector<8x7xbf16>, vector<8x1xbf16> -> vector<8x8xbf16>
    %cst_271 = arith.constant 0.000000e+00 : bf16
    %742 = vector.broadcast %cst_271 : bf16 to vector<8x8xbf16>
    %743 = vector.shape_cast %738 : vector<1x8xi1> to vector<1x8xi1>
    %744 = vector.broadcast %743 : vector<1x8xi1> to vector<8x8xi1>
    %745 = arith.select %744, %741, %742 : vector<8x8xi1>, vector<8x8xbf16>
    %746 = vector.extract_strided_slice %654 {offsets = [6, 0, 0], sizes = [1, 8, 8], strides = [1, 1, 1]} : vector<9x8x8xbf16> to vector<1x8x8xbf16>
    %747 = vector.shape_cast %746 : vector<1x8x8xbf16> to vector<8x8xbf16>
    %cst_272 = arith.constant dense<0.000000e+00> : vector<8x8xf32>
    %748 = tpu.matmul %747, %745, %cst_272 {dimension_numbers = #tpu.dot_dimension_numbers<[1], [0], [0], [1], [0, 0, 1, 1], [], []>} : vector<8x8xbf16>, vector<8x8xbf16>, vector<8x8xf32> -> vector<8x8xf32>
    %749 = arith.addf %733, %748 : vector<8x8xf32>
    %c1_i32_273 = arith.constant 1 : i32
    %750 = vector.broadcast %c1_i32_273 : i32 to vector<1x8xi32>
    %751 = arith.cmpi slt, %655, %750 : vector<1x8xi32>
    %cst_274 = arith.constant 0.000000e+00 : bf16
    %752 = vector.broadcast %cst_274 : bf16 to vector<8x2xbf16>
    %753 = vector.extract_strided_slice %657 {offsets = [0, 2], sizes = [8, 6], strides = [1, 1]} : vector<8x8xbf16> to vector<8x6xbf16>
    %754 = tpu.concatenate %753, %752 in 1 : vector<8x6xbf16>, vector<8x2xbf16> -> vector<8x8xbf16>
    %cst_275 = arith.constant 0.000000e+00 : bf16
    %755 = vector.broadcast %cst_275 : bf16 to vector<8x8xbf16>
    %756 = vector.shape_cast %751 : vector<1x8xi1> to vector<1x8xi1>
    %757 = vector.broadcast %756 : vector<1x8xi1> to vector<8x8xi1>
    %758 = arith.select %757, %754, %755 : vector<8x8xi1>, vector<8x8xbf16>
    %759 = vector.extract_strided_slice %654 {offsets = [7, 0, 0], sizes = [1, 8, 8], strides = [1, 1, 1]} : vector<9x8x8xbf16> to vector<1x8x8xbf16>
    %760 = vector.shape_cast %759 : vector<1x8x8xbf16> to vector<8x8xbf16>
    %cst_276 = arith.constant dense<0.000000e+00> : vector<8x8xf32>
    %761 = tpu.matmul %760, %758, %cst_276 {dimension_numbers = #tpu.dot_dimension_numbers<[1], [0], [0], [1], [0, 0, 1, 1], [], []>} : vector<8x8xbf16>, vector<8x8xbf16>, vector<8x8xf32> -> vector<8x8xf32>
    %762 = arith.addf %749, %761 : vector<8x8xf32>
    %c1_i32_277 = arith.constant 1 : i32
    %763 = vector.broadcast %c1_i32_277 : i32 to vector<1x8xi32>
    %764 = arith.cmpi slt, %655, %763 : vector<1x8xi32>
    %c1_i32_278 = arith.constant 1 : i32
    %765 = vector.broadcast %c1_i32_278 : i32 to vector<1x8xi32>
    %766 = arith.cmpi slt, %656, %765 : vector<1x8xi32>
    %767 = arith.andi %764, %766 : vector<1x8xi1>
    %cst_279 = arith.constant 0.000000e+00 : bf16
    %768 = vector.broadcast %cst_279 : bf16 to vector<8x3xbf16>
    %769 = vector.extract_strided_slice %657 {offsets = [0, 3], sizes = [8, 5], strides = [1, 1]} : vector<8x8xbf16> to vector<8x5xbf16>
    %770 = tpu.concatenate %769, %768 in 1 : vector<8x5xbf16>, vector<8x3xbf16> -> vector<8x8xbf16>
    %cst_280 = arith.constant 0.000000e+00 : bf16
    %771 = vector.broadcast %cst_280 : bf16 to vector<8x8xbf16>
    %772 = vector.shape_cast %767 : vector<1x8xi1> to vector<1x8xi1>
    %773 = vector.broadcast %772 : vector<1x8xi1> to vector<8x8xi1>
    %774 = arith.select %773, %770, %771 : vector<8x8xi1>, vector<8x8xbf16>
    %775 = vector.extract_strided_slice %654 {offsets = [8, 0, 0], sizes = [1, 8, 8], strides = [1, 1, 1]} : vector<9x8x8xbf16> to vector<1x8x8xbf16>
    %776 = vector.shape_cast %775 : vector<1x8x8xbf16> to vector<8x8xbf16>
    %cst_281 = arith.constant dense<0.000000e+00> : vector<8x8xf32>
    %777 = tpu.matmul %776, %774, %cst_281 {dimension_numbers = #tpu.dot_dimension_numbers<[1], [0], [0], [1], [0, 0, 1, 1], [], []>} : vector<8x8xbf16>, vector<8x8xbf16>, vector<8x8xf32> -> vector<8x8xf32>
    %778 = arith.addf %762, %777 : vector<8x8xf32>
    %cst_282 = arith.constant dense<0.000000e+00> : vector<8xf32>
    %779 = vector.multi_reduction <add>, %778, %cst_282 [1] : vector<8x8xf32> to vector<8xf32>
    %780 = vector.shape_cast %779 : vector<8xf32> to vector<8x1xf32>
    %781 = arith.mulf %778, %778 : vector<8x8xf32>
    %cst_283 = arith.constant dense<0.000000e+00> : vector<8xf32>
    %782 = vector.multi_reduction <add>, %781, %cst_283 [1] : vector<8x8xf32> to vector<8xf32>
    %783 = vector.shape_cast %782 : vector<8xf32> to vector<8x1xf32>
    %cst_284 = arith.constant 8.000000e+00 : f32
    %784 = vector.broadcast %cst_284 : f32 to vector<8x1xf32>
    %785 = arith.divf %780, %784 : vector<8x1xf32>
    %cst_285 = arith.constant 8.000000e+00 : f32
    %786 = vector.broadcast %cst_285 : f32 to vector<8x1xf32>
    %787 = arith.divf %783, %786 : vector<8x1xf32>
    %788 = arith.mulf %785, %785 : vector<8x1xf32>
    %789 = arith.subf %787, %788 : vector<8x1xf32>
    %cst_286 = arith.constant 0.000000e+00 : f32
    %790 = vector.broadcast %cst_286 : f32 to vector<8x1xf32>
    %791 = arith.maximumf %789, %790 : vector<8x1xf32>
    %c0_287 = arith.constant 0 : index
    %c0_288 = arith.constant 0 : index
    %792 = vector.load %arg14[%c0_287, %c0_288] : memref<8x1xf32, #tpu.memory_space<vmem>>, vector<8x1xf32>
    %cst_289 = arith.constant 9.99999974E-6 : f32
    %793 = vector.broadcast %cst_289 : f32 to vector<8x1xf32>
    %794 = arith.addf %791, %793 : vector<8x1xf32>
    %795 = math.rsqrt %794 : vector<8x1xf32>
    %796 = arith.mulf %792, %795 : vector<8x1xf32>
    %c0_290 = arith.constant 0 : index
    %c0_291 = arith.constant 0 : index
    %797 = vector.load %arg15[%c0_290, %c0_291] : memref<8x1xf32, #tpu.memory_space<vmem>>, vector<8x1xf32>
    %798 = arith.mulf %785, %796 : vector<8x1xf32>
    %799 = arith.subf %797, %798 : vector<8x1xf32>
    %800 = vector.broadcast %796 : vector<8x1xf32> to vector<8x8xf32>
    %801 = arith.mulf %778, %800 : vector<8x8xf32>
    %802 = vector.broadcast %799 : vector<8x1xf32> to vector<8x8xf32>
    %803 = arith.addf %801, %802 : vector<8x8xf32>
    %cst_292 = arith.constant 0.000000e+00 : f32
    %804 = vector.broadcast %cst_292 : f32 to vector<8x8xf32>
    %805 = arith.maximumf %803, %804 : vector<8x8xf32>
    %c0_293 = arith.constant 0 : index
    %c0_294 = arith.constant 0 : index
    %c0_295 = arith.constant 0 : index
    %806 = vector.load %arg16[%c0_293, %c0_294, %c0_295] : memref<9x8x8xbf16, #tpu.memory_space<vmem>>, vector<9x8x8xbf16>
    %807 = arith.truncf %805 : vector<8x8xf32> to vector<8x8xbf16>
    %cst_296 = arith.constant 0.000000e+00 : f32
    %808 = vector.broadcast %cst_296 : f32 to vector<8x8xf32>
    %809 = vector.extract_strided_slice %806 {offsets = [4, 0, 0], sizes = [1, 8, 8], strides = [1, 1, 1]} : vector<9x8x8xbf16> to vector<1x8x8xbf16>
    %810 = vector.shape_cast %809 : vector<1x8x8xbf16> to vector<8x8xbf16>
    %cst_297 = arith.constant dense<0.000000e+00> : vector<8x8xf32>
    %811 = tpu.matmul %810, %807, %cst_297 {dimension_numbers = #tpu.dot_dimension_numbers<[1], [0], [0], [1], [0, 0, 1, 1], [], []>} : vector<8x8xbf16>, vector<8x8xbf16>, vector<8x8xf32> -> vector<8x8xf32>
    %812 = arith.addf %808, %811 : vector<8x8xf32>
    %cst_298 = arith.constant dense<0.000000e+00> : vector<8xf32>
    %813 = vector.multi_reduction <add>, %812, %cst_298 [1] : vector<8x8xf32> to vector<8xf32>
    %814 = vector.shape_cast %813 : vector<8xf32> to vector<8x1xf32>
    %815 = arith.mulf %812, %812 : vector<8x8xf32>
    %cst_299 = arith.constant dense<0.000000e+00> : vector<8xf32>
    %816 = vector.multi_reduction <add>, %815, %cst_299 [1] : vector<8x8xf32> to vector<8xf32>
    %817 = vector.shape_cast %816 : vector<8xf32> to vector<8x1xf32>
    %cst_300 = arith.constant 8.000000e+00 : f32
    %818 = vector.broadcast %cst_300 : f32 to vector<8x1xf32>
    %819 = arith.divf %814, %818 : vector<8x1xf32>
    %cst_301 = arith.constant 8.000000e+00 : f32
    %820 = vector.broadcast %cst_301 : f32 to vector<8x1xf32>
    %821 = arith.divf %817, %820 : vector<8x1xf32>
    %822 = arith.mulf %819, %819 : vector<8x1xf32>
    %823 = arith.subf %821, %822 : vector<8x1xf32>
    %cst_302 = arith.constant 0.000000e+00 : f32
    %824 = vector.broadcast %cst_302 : f32 to vector<8x1xf32>
    %825 = arith.maximumf %823, %824 : vector<8x1xf32>
    %c0_303 = arith.constant 0 : index
    %c0_304 = arith.constant 0 : index
    %826 = vector.load %arg17[%c0_303, %c0_304] : memref<8x1xf32, #tpu.memory_space<vmem>>, vector<8x1xf32>
    %cst_305 = arith.constant 9.99999974E-6 : f32
    %827 = vector.broadcast %cst_305 : f32 to vector<8x1xf32>
    %828 = arith.addf %825, %827 : vector<8x1xf32>
    %829 = math.rsqrt %828 : vector<8x1xf32>
    %830 = arith.mulf %826, %829 : vector<8x1xf32>
    %c0_306 = arith.constant 0 : index
    %c0_307 = arith.constant 0 : index
    %831 = vector.load %arg18[%c0_306, %c0_307] : memref<8x1xf32, #tpu.memory_space<vmem>>, vector<8x1xf32>
    %832 = arith.mulf %819, %830 : vector<8x1xf32>
    %833 = arith.subf %831, %832 : vector<8x1xf32>
    %834 = vector.broadcast %830 : vector<8x1xf32> to vector<8x8xf32>
    %835 = arith.mulf %812, %834 : vector<8x8xf32>
    %836 = vector.broadcast %833 : vector<8x1xf32> to vector<8x8xf32>
    %837 = arith.addf %835, %836 : vector<8x8xf32>
    %cst_308 = arith.constant 0.000000e+00 : f32
    %838 = vector.broadcast %cst_308 : f32 to vector<8x8xf32>
    %839 = arith.maximumf %837, %838 : vector<8x8xf32>
    %c0_309 = arith.constant 0 : index
    %c0_310 = arith.constant 0 : index
    %c0_311 = arith.constant 0 : index
    %840 = vector.load %arg19[%c0_309, %c0_310, %c0_311] : memref<9x8x16xbf16, #tpu.memory_space<vmem>>, vector<9x8x16xbf16>
    %c0_312 = arith.constant 0 : index
    %c0_313 = arith.constant 0 : index
    %841 = vector.load %arg34[%c0_312, %c0_313] : memref<2x8xi32, #tpu.memory_space<vmem>>, vector<1x8xi32>
    %c1_314 = arith.constant 1 : index
    %c0_315 = arith.constant 0 : index
    %842 = vector.load %arg34[%c1_314, %c0_315] : memref<2x8xi32, #tpu.memory_space<vmem>>, vector<1x8xi32>
    %843 = arith.truncf %839 : vector<8x8xf32> to vector<8x8xbf16>
    %844 = arith.truncf %805 : vector<8x8xf32> to vector<8x8xbf16>
    %cst_316 = arith.constant 0.000000e+00 : f32
    %845 = vector.broadcast %cst_316 : f32 to vector<8x8xf32>
    %c1_i32_317 = arith.constant 1 : i32
    %846 = vector.broadcast %c1_i32_317 : i32 to vector<1x8xi32>
    %847 = arith.cmpi sge, %841, %846 : vector<1x8xi32>
    %c1_i32_318 = arith.constant 1 : i32
    %848 = vector.broadcast %c1_i32_318 : i32 to vector<1x8xi32>
    %849 = arith.cmpi sge, %842, %848 : vector<1x8xi32>
    %850 = arith.andi %847, %849 : vector<1x8xi1>
    %cst_319 = arith.constant 0.000000e+00 : bf16
    %851 = vector.broadcast %cst_319 : bf16 to vector<8x3xbf16>
    %852 = vector.extract_strided_slice %843 {offsets = [0, 0], sizes = [8, 5], strides = [1, 1]} : vector<8x8xbf16> to vector<8x5xbf16>
    %853 = tpu.concatenate %851, %852 in 1 : vector<8x3xbf16>, vector<8x5xbf16> -> vector<8x8xbf16>
    %cst_320 = arith.constant 0.000000e+00 : bf16
    %854 = vector.broadcast %cst_320 : bf16 to vector<8x8xbf16>
    %855 = vector.shape_cast %850 : vector<1x8xi1> to vector<1x8xi1>
    %856 = vector.broadcast %855 : vector<1x8xi1> to vector<8x8xi1>
    %857 = arith.select %856, %853, %854 : vector<8x8xi1>, vector<8x8xbf16>
    %858 = vector.extract_strided_slice %840 {offsets = [0, 0, 0], sizes = [1, 8, 8], strides = [1, 1, 1]} : vector<9x8x16xbf16> to vector<1x8x8xbf16>
    %859 = vector.shape_cast %858 : vector<1x8x8xbf16> to vector<8x8xbf16>
    %cst_321 = arith.constant dense<0.000000e+00> : vector<8x8xf32>
    %860 = tpu.matmul %859, %857, %cst_321 {dimension_numbers = #tpu.dot_dimension_numbers<[1], [0], [0], [1], [0, 0, 1, 1], [], []>} : vector<8x8xbf16>, vector<8x8xbf16>, vector<8x8xf32> -> vector<8x8xf32>
    %861 = arith.addf %845, %860 : vector<8x8xf32>
    %cst_322 = arith.constant 0.000000e+00 : bf16
    %862 = vector.broadcast %cst_322 : bf16 to vector<8x3xbf16>
    %863 = vector.extract_strided_slice %844 {offsets = [0, 0], sizes = [8, 5], strides = [1, 1]} : vector<8x8xbf16> to vector<8x5xbf16>
    %864 = tpu.concatenate %862, %863 in 1 : vector<8x3xbf16>, vector<8x5xbf16> -> vector<8x8xbf16>
    %cst_323 = arith.constant 0.000000e+00 : bf16
    %865 = vector.broadcast %cst_323 : bf16 to vector<8x8xbf16>
    %866 = vector.shape_cast %850 : vector<1x8xi1> to vector<1x8xi1>
    %867 = vector.broadcast %866 : vector<1x8xi1> to vector<8x8xi1>
    %868 = arith.select %867, %864, %865 : vector<8x8xi1>, vector<8x8xbf16>
    %869 = vector.extract_strided_slice %840 {offsets = [0, 0, 8], sizes = [1, 8, 8], strides = [1, 1, 1]} : vector<9x8x16xbf16> to vector<1x8x8xbf16>
    %870 = vector.shape_cast %869 : vector<1x8x8xbf16> to vector<8x8xbf16>
    %cst_324 = arith.constant dense<0.000000e+00> : vector<8x8xf32>
    %871 = tpu.matmul %870, %868, %cst_324 {dimension_numbers = #tpu.dot_dimension_numbers<[1], [0], [0], [1], [0, 0, 1, 1], [], []>} : vector<8x8xbf16>, vector<8x8xbf16>, vector<8x8xf32> -> vector<8x8xf32>
    %872 = arith.addf %861, %871 : vector<8x8xf32>
    %c1_i32_325 = arith.constant 1 : i32
    %873 = vector.broadcast %c1_i32_325 : i32 to vector<1x8xi32>
    %874 = arith.cmpi sge, %841, %873 : vector<1x8xi32>
    %cst_326 = arith.constant 0.000000e+00 : bf16
    %875 = vector.broadcast %cst_326 : bf16 to vector<8x2xbf16>
    %876 = vector.extract_strided_slice %843 {offsets = [0, 0], sizes = [8, 6], strides = [1, 1]} : vector<8x8xbf16> to vector<8x6xbf16>
    %877 = tpu.concatenate %875, %876 in 1 : vector<8x2xbf16>, vector<8x6xbf16> -> vector<8x8xbf16>
    %cst_327 = arith.constant 0.000000e+00 : bf16
    %878 = vector.broadcast %cst_327 : bf16 to vector<8x8xbf16>
    %879 = vector.shape_cast %874 : vector<1x8xi1> to vector<1x8xi1>
    %880 = vector.broadcast %879 : vector<1x8xi1> to vector<8x8xi1>
    %881 = arith.select %880, %877, %878 : vector<8x8xi1>, vector<8x8xbf16>
    %882 = vector.extract_strided_slice %840 {offsets = [1, 0, 0], sizes = [1, 8, 8], strides = [1, 1, 1]} : vector<9x8x16xbf16> to vector<1x8x8xbf16>
    %883 = vector.shape_cast %882 : vector<1x8x8xbf16> to vector<8x8xbf16>
    %cst_328 = arith.constant dense<0.000000e+00> : vector<8x8xf32>
    %884 = tpu.matmul %883, %881, %cst_328 {dimension_numbers = #tpu.dot_dimension_numbers<[1], [0], [0], [1], [0, 0, 1, 1], [], []>} : vector<8x8xbf16>, vector<8x8xbf16>, vector<8x8xf32> -> vector<8x8xf32>
    %885 = arith.addf %872, %884 : vector<8x8xf32>
    %cst_329 = arith.constant 0.000000e+00 : bf16
    %886 = vector.broadcast %cst_329 : bf16 to vector<8x2xbf16>
    %887 = vector.extract_strided_slice %844 {offsets = [0, 0], sizes = [8, 6], strides = [1, 1]} : vector<8x8xbf16> to vector<8x6xbf16>
    %888 = tpu.concatenate %886, %887 in 1 : vector<8x2xbf16>, vector<8x6xbf16> -> vector<8x8xbf16>
    %cst_330 = arith.constant 0.000000e+00 : bf16
    %889 = vector.broadcast %cst_330 : bf16 to vector<8x8xbf16>
    %890 = vector.shape_cast %874 : vector<1x8xi1> to vector<1x8xi1>
    %891 = vector.broadcast %890 : vector<1x8xi1> to vector<8x8xi1>
    %892 = arith.select %891, %888, %889 : vector<8x8xi1>, vector<8x8xbf16>
    %893 = vector.extract_strided_slice %840 {offsets = [1, 0, 8], sizes = [1, 8, 8], strides = [1, 1, 1]} : vector<9x8x16xbf16> to vector<1x8x8xbf16>
    %894 = vector.shape_cast %893 : vector<1x8x8xbf16> to vector<8x8xbf16>
    %cst_331 = arith.constant dense<0.000000e+00> : vector<8x8xf32>
    %895 = tpu.matmul %894, %892, %cst_331 {dimension_numbers = #tpu.dot_dimension_numbers<[1], [0], [0], [1], [0, 0, 1, 1], [], []>} : vector<8x8xbf16>, vector<8x8xbf16>, vector<8x8xf32> -> vector<8x8xf32>
    %896 = arith.addf %885, %895 : vector<8x8xf32>
    %c1_i32_332 = arith.constant 1 : i32
    %897 = vector.broadcast %c1_i32_332 : i32 to vector<1x8xi32>
    %898 = arith.cmpi sge, %841, %897 : vector<1x8xi32>
    %c1_i32_333 = arith.constant 1 : i32
    %899 = vector.broadcast %c1_i32_333 : i32 to vector<1x8xi32>
    %900 = arith.cmpi slt, %842, %899 : vector<1x8xi32>
    %901 = arith.andi %898, %900 : vector<1x8xi1>
    %cst_334 = arith.constant 0.000000e+00 : bf16
    %902 = vector.broadcast %cst_334 : bf16 to vector<8x1xbf16>
    %903 = vector.extract_strided_slice %843 {offsets = [0, 0], sizes = [8, 7], strides = [1, 1]} : vector<8x8xbf16> to vector<8x7xbf16>
    %904 = tpu.concatenate %902, %903 in 1 : vector<8x1xbf16>, vector<8x7xbf16> -> vector<8x8xbf16>
    %cst_335 = arith.constant 0.000000e+00 : bf16
    %905 = vector.broadcast %cst_335 : bf16 to vector<8x8xbf16>
    %906 = vector.shape_cast %901 : vector<1x8xi1> to vector<1x8xi1>
    %907 = vector.broadcast %906 : vector<1x8xi1> to vector<8x8xi1>
    %908 = arith.select %907, %904, %905 : vector<8x8xi1>, vector<8x8xbf16>
    %909 = vector.extract_strided_slice %840 {offsets = [2, 0, 0], sizes = [1, 8, 8], strides = [1, 1, 1]} : vector<9x8x16xbf16> to vector<1x8x8xbf16>
    %910 = vector.shape_cast %909 : vector<1x8x8xbf16> to vector<8x8xbf16>
    %cst_336 = arith.constant dense<0.000000e+00> : vector<8x8xf32>
    %911 = tpu.matmul %910, %908, %cst_336 {dimension_numbers = #tpu.dot_dimension_numbers<[1], [0], [0], [1], [0, 0, 1, 1], [], []>} : vector<8x8xbf16>, vector<8x8xbf16>, vector<8x8xf32> -> vector<8x8xf32>
    %912 = arith.addf %896, %911 : vector<8x8xf32>
    %cst_337 = arith.constant 0.000000e+00 : bf16
    %913 = vector.broadcast %cst_337 : bf16 to vector<8x1xbf16>
    %914 = vector.extract_strided_slice %844 {offsets = [0, 0], sizes = [8, 7], strides = [1, 1]} : vector<8x8xbf16> to vector<8x7xbf16>
    %915 = tpu.concatenate %913, %914 in 1 : vector<8x1xbf16>, vector<8x7xbf16> -> vector<8x8xbf16>
    %cst_338 = arith.constant 0.000000e+00 : bf16
    %916 = vector.broadcast %cst_338 : bf16 to vector<8x8xbf16>
    %917 = vector.shape_cast %901 : vector<1x8xi1> to vector<1x8xi1>
    %918 = vector.broadcast %917 : vector<1x8xi1> to vector<8x8xi1>
    %919 = arith.select %918, %915, %916 : vector<8x8xi1>, vector<8x8xbf16>
    %920 = vector.extract_strided_slice %840 {offsets = [2, 0, 8], sizes = [1, 8, 8], strides = [1, 1, 1]} : vector<9x8x16xbf16> to vector<1x8x8xbf16>
    %921 = vector.shape_cast %920 : vector<1x8x8xbf16> to vector<8x8xbf16>
    %cst_339 = arith.constant dense<0.000000e+00> : vector<8x8xf32>
    %922 = tpu.matmul %921, %919, %cst_339 {dimension_numbers = #tpu.dot_dimension_numbers<[1], [0], [0], [1], [0, 0, 1, 1], [], []>} : vector<8x8xbf16>, vector<8x8xbf16>, vector<8x8xf32> -> vector<8x8xf32>
    %923 = arith.addf %912, %922 : vector<8x8xf32>
    %c1_i32_340 = arith.constant 1 : i32
    %924 = vector.broadcast %c1_i32_340 : i32 to vector<1x8xi32>
    %925 = arith.cmpi sge, %842, %924 : vector<1x8xi32>
    %cst_341 = arith.constant 0.000000e+00 : bf16
    %926 = vector.broadcast %cst_341 : bf16 to vector<8x1xbf16>
    %927 = vector.extract_strided_slice %843 {offsets = [0, 0], sizes = [8, 7], strides = [1, 1]} : vector<8x8xbf16> to vector<8x7xbf16>
    %928 = tpu.concatenate %926, %927 in 1 : vector<8x1xbf16>, vector<8x7xbf16> -> vector<8x8xbf16>
    %cst_342 = arith.constant 0.000000e+00 : bf16
    %929 = vector.broadcast %cst_342 : bf16 to vector<8x8xbf16>
    %930 = vector.shape_cast %925 : vector<1x8xi1> to vector<1x8xi1>
    %931 = vector.broadcast %930 : vector<1x8xi1> to vector<8x8xi1>
    %932 = arith.select %931, %928, %929 : vector<8x8xi1>, vector<8x8xbf16>
    %933 = vector.extract_strided_slice %840 {offsets = [3, 0, 0], sizes = [1, 8, 8], strides = [1, 1, 1]} : vector<9x8x16xbf16> to vector<1x8x8xbf16>
    %934 = vector.shape_cast %933 : vector<1x8x8xbf16> to vector<8x8xbf16>
    %cst_343 = arith.constant dense<0.000000e+00> : vector<8x8xf32>
    %935 = tpu.matmul %934, %932, %cst_343 {dimension_numbers = #tpu.dot_dimension_numbers<[1], [0], [0], [1], [0, 0, 1, 1], [], []>} : vector<8x8xbf16>, vector<8x8xbf16>, vector<8x8xf32> -> vector<8x8xf32>
    %936 = arith.addf %923, %935 : vector<8x8xf32>
    %cst_344 = arith.constant 0.000000e+00 : bf16
    %937 = vector.broadcast %cst_344 : bf16 to vector<8x1xbf16>
    %938 = vector.extract_strided_slice %844 {offsets = [0, 0], sizes = [8, 7], strides = [1, 1]} : vector<8x8xbf16> to vector<8x7xbf16>
    %939 = tpu.concatenate %937, %938 in 1 : vector<8x1xbf16>, vector<8x7xbf16> -> vector<8x8xbf16>
    %cst_345 = arith.constant 0.000000e+00 : bf16
    %940 = vector.broadcast %cst_345 : bf16 to vector<8x8xbf16>
    %941 = vector.shape_cast %925 : vector<1x8xi1> to vector<1x8xi1>
    %942 = vector.broadcast %941 : vector<1x8xi1> to vector<8x8xi1>
    %943 = arith.select %942, %939, %940 : vector<8x8xi1>, vector<8x8xbf16>
    %944 = vector.extract_strided_slice %840 {offsets = [3, 0, 8], sizes = [1, 8, 8], strides = [1, 1, 1]} : vector<9x8x16xbf16> to vector<1x8x8xbf16>
    %945 = vector.shape_cast %944 : vector<1x8x8xbf16> to vector<8x8xbf16>
    %cst_346 = arith.constant dense<0.000000e+00> : vector<8x8xf32>
    %946 = tpu.matmul %945, %943, %cst_346 {dimension_numbers = #tpu.dot_dimension_numbers<[1], [0], [0], [1], [0, 0, 1, 1], [], []>} : vector<8x8xbf16>, vector<8x8xbf16>, vector<8x8xf32> -> vector<8x8xf32>
    %947 = arith.addf %936, %946 : vector<8x8xf32>
    %948 = vector.extract_strided_slice %840 {offsets = [4, 0, 0], sizes = [1, 8, 8], strides = [1, 1, 1]} : vector<9x8x16xbf16> to vector<1x8x8xbf16>
    %949 = vector.shape_cast %948 : vector<1x8x8xbf16> to vector<8x8xbf16>
    %cst_347 = arith.constant dense<0.000000e+00> : vector<8x8xf32>
    %950 = tpu.matmul %949, %843, %cst_347 {dimension_numbers = #tpu.dot_dimension_numbers<[1], [0], [0], [1], [0, 0, 1, 1], [], []>} : vector<8x8xbf16>, vector<8x8xbf16>, vector<8x8xf32> -> vector<8x8xf32>
    %951 = arith.addf %947, %950 : vector<8x8xf32>
    %952 = vector.extract_strided_slice %840 {offsets = [4, 0, 8], sizes = [1, 8, 8], strides = [1, 1, 1]} : vector<9x8x16xbf16> to vector<1x8x8xbf16>
    %953 = vector.shape_cast %952 : vector<1x8x8xbf16> to vector<8x8xbf16>
    %cst_348 = arith.constant dense<0.000000e+00> : vector<8x8xf32>
    %954 = tpu.matmul %953, %844, %cst_348 {dimension_numbers = #tpu.dot_dimension_numbers<[1], [0], [0], [1], [0, 0, 1, 1], [], []>} : vector<8x8xbf16>, vector<8x8xbf16>, vector<8x8xf32> -> vector<8x8xf32>
    %955 = arith.addf %951, %954 : vector<8x8xf32>
    %c1_i32_349 = arith.constant 1 : i32
    %956 = vector.broadcast %c1_i32_349 : i32 to vector<1x8xi32>
    %957 = arith.cmpi slt, %842, %956 : vector<1x8xi32>
    %cst_350 = arith.constant 0.000000e+00 : bf16
    %958 = vector.broadcast %cst_350 : bf16 to vector<8x1xbf16>
    %959 = vector.extract_strided_slice %843 {offsets = [0, 1], sizes = [8, 7], strides = [1, 1]} : vector<8x8xbf16> to vector<8x7xbf16>
    %960 = tpu.concatenate %959, %958 in 1 : vector<8x7xbf16>, vector<8x1xbf16> -> vector<8x8xbf16>
    %cst_351 = arith.constant 0.000000e+00 : bf16
    %961 = vector.broadcast %cst_351 : bf16 to vector<8x8xbf16>
    %962 = vector.shape_cast %957 : vector<1x8xi1> to vector<1x8xi1>
    %963 = vector.broadcast %962 : vector<1x8xi1> to vector<8x8xi1>
    %964 = arith.select %963, %960, %961 : vector<8x8xi1>, vector<8x8xbf16>
    %965 = vector.extract_strided_slice %840 {offsets = [5, 0, 0], sizes = [1, 8, 8], strides = [1, 1, 1]} : vector<9x8x16xbf16> to vector<1x8x8xbf16>
    %966 = vector.shape_cast %965 : vector<1x8x8xbf16> to vector<8x8xbf16>
    %cst_352 = arith.constant dense<0.000000e+00> : vector<8x8xf32>
    %967 = tpu.matmul %966, %964, %cst_352 {dimension_numbers = #tpu.dot_dimension_numbers<[1], [0], [0], [1], [0, 0, 1, 1], [], []>} : vector<8x8xbf16>, vector<8x8xbf16>, vector<8x8xf32> -> vector<8x8xf32>
    %968 = arith.addf %955, %967 : vector<8x8xf32>
    %cst_353 = arith.constant 0.000000e+00 : bf16
    %969 = vector.broadcast %cst_353 : bf16 to vector<8x1xbf16>
    %970 = vector.extract_strided_slice %844 {offsets = [0, 1], sizes = [8, 7], strides = [1, 1]} : vector<8x8xbf16> to vector<8x7xbf16>
    %971 = tpu.concatenate %970, %969 in 1 : vector<8x7xbf16>, vector<8x1xbf16> -> vector<8x8xbf16>
    %cst_354 = arith.constant 0.000000e+00 : bf16
    %972 = vector.broadcast %cst_354 : bf16 to vector<8x8xbf16>
    %973 = vector.shape_cast %957 : vector<1x8xi1> to vector<1x8xi1>
    %974 = vector.broadcast %973 : vector<1x8xi1> to vector<8x8xi1>
    %975 = arith.select %974, %971, %972 : vector<8x8xi1>, vector<8x8xbf16>
    %976 = vector.extract_strided_slice %840 {offsets = [5, 0, 8], sizes = [1, 8, 8], strides = [1, 1, 1]} : vector<9x8x16xbf16> to vector<1x8x8xbf16>
    %977 = vector.shape_cast %976 : vector<1x8x8xbf16> to vector<8x8xbf16>
    %cst_355 = arith.constant dense<0.000000e+00> : vector<8x8xf32>
    %978 = tpu.matmul %977, %975, %cst_355 {dimension_numbers = #tpu.dot_dimension_numbers<[1], [0], [0], [1], [0, 0, 1, 1], [], []>} : vector<8x8xbf16>, vector<8x8xbf16>, vector<8x8xf32> -> vector<8x8xf32>
    %979 = arith.addf %968, %978 : vector<8x8xf32>
    %c1_i32_356 = arith.constant 1 : i32
    %980 = vector.broadcast %c1_i32_356 : i32 to vector<1x8xi32>
    %981 = arith.cmpi slt, %841, %980 : vector<1x8xi32>
    %c1_i32_357 = arith.constant 1 : i32
    %982 = vector.broadcast %c1_i32_357 : i32 to vector<1x8xi32>
    %983 = arith.cmpi sge, %842, %982 : vector<1x8xi32>
    %984 = arith.andi %981, %983 : vector<1x8xi1>
    %cst_358 = arith.constant 0.000000e+00 : bf16
    %985 = vector.broadcast %cst_358 : bf16 to vector<8x1xbf16>
    %986 = vector.extract_strided_slice %843 {offsets = [0, 1], sizes = [8, 7], strides = [1, 1]} : vector<8x8xbf16> to vector<8x7xbf16>
    %987 = tpu.concatenate %986, %985 in 1 : vector<8x7xbf16>, vector<8x1xbf16> -> vector<8x8xbf16>
    %cst_359 = arith.constant 0.000000e+00 : bf16
    %988 = vector.broadcast %cst_359 : bf16 to vector<8x8xbf16>
    %989 = vector.shape_cast %984 : vector<1x8xi1> to vector<1x8xi1>
    %990 = vector.broadcast %989 : vector<1x8xi1> to vector<8x8xi1>
    %991 = arith.select %990, %987, %988 : vector<8x8xi1>, vector<8x8xbf16>
    %992 = vector.extract_strided_slice %840 {offsets = [6, 0, 0], sizes = [1, 8, 8], strides = [1, 1, 1]} : vector<9x8x16xbf16> to vector<1x8x8xbf16>
    %993 = vector.shape_cast %992 : vector<1x8x8xbf16> to vector<8x8xbf16>
    %cst_360 = arith.constant dense<0.000000e+00> : vector<8x8xf32>
    %994 = tpu.matmul %993, %991, %cst_360 {dimension_numbers = #tpu.dot_dimension_numbers<[1], [0], [0], [1], [0, 0, 1, 1], [], []>} : vector<8x8xbf16>, vector<8x8xbf16>, vector<8x8xf32> -> vector<8x8xf32>
    %995 = arith.addf %979, %994 : vector<8x8xf32>
    %cst_361 = arith.constant 0.000000e+00 : bf16
    %996 = vector.broadcast %cst_361 : bf16 to vector<8x1xbf16>
    %997 = vector.extract_strided_slice %844 {offsets = [0, 1], sizes = [8, 7], strides = [1, 1]} : vector<8x8xbf16> to vector<8x7xbf16>
    %998 = tpu.concatenate %997, %996 in 1 : vector<8x7xbf16>, vector<8x1xbf16> -> vector<8x8xbf16>
    %cst_362 = arith.constant 0.000000e+00 : bf16
    %999 = vector.broadcast %cst_362 : bf16 to vector<8x8xbf16>
    %1000 = vector.shape_cast %984 : vector<1x8xi1> to vector<1x8xi1>
    %1001 = vector.broadcast %1000 : vector<1x8xi1> to vector<8x8xi1>
    %1002 = arith.select %1001, %998, %999 : vector<8x8xi1>, vector<8x8xbf16>
    %1003 = vector.extract_strided_slice %840 {offsets = [6, 0, 8], sizes = [1, 8, 8], strides = [1, 1, 1]} : vector<9x8x16xbf16> to vector<1x8x8xbf16>
    %1004 = vector.shape_cast %1003 : vector<1x8x8xbf16> to vector<8x8xbf16>
    %cst_363 = arith.constant dense<0.000000e+00> : vector<8x8xf32>
    %1005 = tpu.matmul %1004, %1002, %cst_363 {dimension_numbers = #tpu.dot_dimension_numbers<[1], [0], [0], [1], [0, 0, 1, 1], [], []>} : vector<8x8xbf16>, vector<8x8xbf16>, vector<8x8xf32> -> vector<8x8xf32>
    %1006 = arith.addf %995, %1005 : vector<8x8xf32>
    %c1_i32_364 = arith.constant 1 : i32
    %1007 = vector.broadcast %c1_i32_364 : i32 to vector<1x8xi32>
    %1008 = arith.cmpi slt, %841, %1007 : vector<1x8xi32>
    %cst_365 = arith.constant 0.000000e+00 : bf16
    %1009 = vector.broadcast %cst_365 : bf16 to vector<8x2xbf16>
    %1010 = vector.extract_strided_slice %843 {offsets = [0, 2], sizes = [8, 6], strides = [1, 1]} : vector<8x8xbf16> to vector<8x6xbf16>
    %1011 = tpu.concatenate %1010, %1009 in 1 : vector<8x6xbf16>, vector<8x2xbf16> -> vector<8x8xbf16>
    %cst_366 = arith.constant 0.000000e+00 : bf16
    %1012 = vector.broadcast %cst_366 : bf16 to vector<8x8xbf16>
    %1013 = vector.shape_cast %1008 : vector<1x8xi1> to vector<1x8xi1>
    %1014 = vector.broadcast %1013 : vector<1x8xi1> to vector<8x8xi1>
    %1015 = arith.select %1014, %1011, %1012 : vector<8x8xi1>, vector<8x8xbf16>
    %1016 = vector.extract_strided_slice %840 {offsets = [7, 0, 0], sizes = [1, 8, 8], strides = [1, 1, 1]} : vector<9x8x16xbf16> to vector<1x8x8xbf16>
    %1017 = vector.shape_cast %1016 : vector<1x8x8xbf16> to vector<8x8xbf16>
    %cst_367 = arith.constant dense<0.000000e+00> : vector<8x8xf32>
    %1018 = tpu.matmul %1017, %1015, %cst_367 {dimension_numbers = #tpu.dot_dimension_numbers<[1], [0], [0], [1], [0, 0, 1, 1], [], []>} : vector<8x8xbf16>, vector<8x8xbf16>, vector<8x8xf32> -> vector<8x8xf32>
    %1019 = arith.addf %1006, %1018 : vector<8x8xf32>
    %cst_368 = arith.constant 0.000000e+00 : bf16
    %1020 = vector.broadcast %cst_368 : bf16 to vector<8x2xbf16>
    %1021 = vector.extract_strided_slice %844 {offsets = [0, 2], sizes = [8, 6], strides = [1, 1]} : vector<8x8xbf16> to vector<8x6xbf16>
    %1022 = tpu.concatenate %1021, %1020 in 1 : vector<8x6xbf16>, vector<8x2xbf16> -> vector<8x8xbf16>
    %cst_369 = arith.constant 0.000000e+00 : bf16
    %1023 = vector.broadcast %cst_369 : bf16 to vector<8x8xbf16>
    %1024 = vector.shape_cast %1008 : vector<1x8xi1> to vector<1x8xi1>
    %1025 = vector.broadcast %1024 : vector<1x8xi1> to vector<8x8xi1>
    %1026 = arith.select %1025, %1022, %1023 : vector<8x8xi1>, vector<8x8xbf16>
    %1027 = vector.extract_strided_slice %840 {offsets = [7, 0, 8], sizes = [1, 8, 8], strides = [1, 1, 1]} : vector<9x8x16xbf16> to vector<1x8x8xbf16>
    %1028 = vector.shape_cast %1027 : vector<1x8x8xbf16> to vector<8x8xbf16>
    %cst_370 = arith.constant dense<0.000000e+00> : vector<8x8xf32>
    %1029 = tpu.matmul %1028, %1026, %cst_370 {dimension_numbers = #tpu.dot_dimension_numbers<[1], [0], [0], [1], [0, 0, 1, 1], [], []>} : vector<8x8xbf16>, vector<8x8xbf16>, vector<8x8xf32> -> vector<8x8xf32>
    %1030 = arith.addf %1019, %1029 : vector<8x8xf32>
    %c1_i32_371 = arith.constant 1 : i32
    %1031 = vector.broadcast %c1_i32_371 : i32 to vector<1x8xi32>
    %1032 = arith.cmpi slt, %841, %1031 : vector<1x8xi32>
    %c1_i32_372 = arith.constant 1 : i32
    %1033 = vector.broadcast %c1_i32_372 : i32 to vector<1x8xi32>
    %1034 = arith.cmpi slt, %842, %1033 : vector<1x8xi32>
    %1035 = arith.andi %1032, %1034 : vector<1x8xi1>
    %cst_373 = arith.constant 0.000000e+00 : bf16
    %1036 = vector.broadcast %cst_373 : bf16 to vector<8x3xbf16>
    %1037 = vector.extract_strided_slice %843 {offsets = [0, 3], sizes = [8, 5], strides = [1, 1]} : vector<8x8xbf16> to vector<8x5xbf16>
    %1038 = tpu.concatenate %1037, %1036 in 1 : vector<8x5xbf16>, vector<8x3xbf16> -> vector<8x8xbf16>
    %cst_374 = arith.constant 0.000000e+00 : bf16
    %1039 = vector.broadcast %cst_374 : bf16 to vector<8x8xbf16>
    %1040 = vector.shape_cast %1035 : vector<1x8xi1> to vector<1x8xi1>
    %1041 = vector.broadcast %1040 : vector<1x8xi1> to vector<8x8xi1>
    %1042 = arith.select %1041, %1038, %1039 : vector<8x8xi1>, vector<8x8xbf16>
    %1043 = vector.extract_strided_slice %840 {offsets = [8, 0, 0], sizes = [1, 8, 8], strides = [1, 1, 1]} : vector<9x8x16xbf16> to vector<1x8x8xbf16>
    %1044 = vector.shape_cast %1043 : vector<1x8x8xbf16> to vector<8x8xbf16>
    %cst_375 = arith.constant dense<0.000000e+00> : vector<8x8xf32>
    %1045 = tpu.matmul %1044, %1042, %cst_375 {dimension_numbers = #tpu.dot_dimension_numbers<[1], [0], [0], [1], [0, 0, 1, 1], [], []>} : vector<8x8xbf16>, vector<8x8xbf16>, vector<8x8xf32> -> vector<8x8xf32>
    %1046 = arith.addf %1030, %1045 : vector<8x8xf32>
    %cst_376 = arith.constant 0.000000e+00 : bf16
    %1047 = vector.broadcast %cst_376 : bf16 to vector<8x3xbf16>
    %1048 = vector.extract_strided_slice %844 {offsets = [0, 3], sizes = [8, 5], strides = [1, 1]} : vector<8x8xbf16> to vector<8x5xbf16>
    %1049 = tpu.concatenate %1048, %1047 in 1 : vector<8x5xbf16>, vector<8x3xbf16> -> vector<8x8xbf16>
    %cst_377 = arith.constant 0.000000e+00 : bf16
    %1050 = vector.broadcast %cst_377 : bf16 to vector<8x8xbf16>
    %1051 = vector.shape_cast %1035 : vector<1x8xi1> to vector<1x8xi1>
    %1052 = vector.broadcast %1051 : vector<1x8xi1> to vector<8x8xi1>
    %1053 = arith.select %1052, %1049, %1050 : vector<8x8xi1>, vector<8x8xbf16>
    %1054 = vector.extract_strided_slice %840 {offsets = [8, 0, 8], sizes = [1, 8, 8], strides = [1, 1, 1]} : vector<9x8x16xbf16> to vector<1x8x8xbf16>
    %1055 = vector.shape_cast %1054 : vector<1x8x8xbf16> to vector<8x8xbf16>
    %cst_378 = arith.constant dense<0.000000e+00> : vector<8x8xf32>
    %1056 = tpu.matmul %1055, %1053, %cst_378 {dimension_numbers = #tpu.dot_dimension_numbers<[1], [0], [0], [1], [0, 0, 1, 1], [], []>} : vector<8x8xbf16>, vector<8x8xbf16>, vector<8x8xf32> -> vector<8x8xf32>
    %1057 = arith.addf %1046, %1056 : vector<8x8xf32>
    %cst_379 = arith.constant dense<0.000000e+00> : vector<8xf32>
    %1058 = vector.multi_reduction <add>, %1057, %cst_379 [1] : vector<8x8xf32> to vector<8xf32>
    %1059 = vector.shape_cast %1058 : vector<8xf32> to vector<8x1xf32>
    %1060 = arith.mulf %1057, %1057 : vector<8x8xf32>
    %cst_380 = arith.constant dense<0.000000e+00> : vector<8xf32>
    %1061 = vector.multi_reduction <add>, %1060, %cst_380 [1] : vector<8x8xf32> to vector<8xf32>
    %1062 = vector.shape_cast %1061 : vector<8xf32> to vector<8x1xf32>
    %cst_381 = arith.constant 8.000000e+00 : f32
    %1063 = vector.broadcast %cst_381 : f32 to vector<8x1xf32>
    %1064 = arith.divf %1059, %1063 : vector<8x1xf32>
    %cst_382 = arith.constant 8.000000e+00 : f32
    %1065 = vector.broadcast %cst_382 : f32 to vector<8x1xf32>
    %1066 = arith.divf %1062, %1065 : vector<8x1xf32>
    %1067 = arith.mulf %1064, %1064 : vector<8x1xf32>
    %1068 = arith.subf %1066, %1067 : vector<8x1xf32>
    %cst_383 = arith.constant 0.000000e+00 : f32
    %1069 = vector.broadcast %cst_383 : f32 to vector<8x1xf32>
    %1070 = arith.maximumf %1068, %1069 : vector<8x1xf32>
    %c0_384 = arith.constant 0 : index
    %c0_385 = arith.constant 0 : index
    %1071 = vector.load %arg20[%c0_384, %c0_385] : memref<8x1xf32, #tpu.memory_space<vmem>>, vector<8x1xf32>
    %cst_386 = arith.constant 9.99999974E-6 : f32
    %1072 = vector.broadcast %cst_386 : f32 to vector<8x1xf32>
    %1073 = arith.addf %1070, %1072 : vector<8x1xf32>
    %1074 = math.rsqrt %1073 : vector<8x1xf32>
    %1075 = arith.mulf %1071, %1074 : vector<8x1xf32>
    %c0_387 = arith.constant 0 : index
    %c0_388 = arith.constant 0 : index
    %1076 = vector.load %arg21[%c0_387, %c0_388] : memref<8x1xf32, #tpu.memory_space<vmem>>, vector<8x1xf32>
    %1077 = arith.mulf %1064, %1075 : vector<8x1xf32>
    %1078 = arith.subf %1076, %1077 : vector<8x1xf32>
    %1079 = vector.broadcast %1075 : vector<8x1xf32> to vector<8x8xf32>
    %1080 = arith.mulf %1057, %1079 : vector<8x8xf32>
    %1081 = vector.broadcast %1078 : vector<8x1xf32> to vector<8x8xf32>
    %1082 = arith.addf %1080, %1081 : vector<8x8xf32>
    %cst_389 = arith.constant 0.000000e+00 : f32
    %1083 = vector.broadcast %cst_389 : f32 to vector<8x8xf32>
    %1084 = arith.maximumf %1082, %1083 : vector<8x8xf32>
    %1085 = arith.truncf %1084 : vector<8x8xf32> to vector<8x8xbf16>
    %c0_390 = arith.constant 0 : index
    %c0_391 = arith.constant 0 : index
    %1086 = vector.load %arg38[%c0_390, %c0_391] : memref<8x32xbf16, #tpu.memory_space<vmem>>, vector<8x32xbf16>
    %cst_392 = arith.constant dense<0.000000e+00> : vector<8x32xf32>
    %1087 = tpu.matmul %1085, %1086, %cst_392 {dimension_numbers = #tpu.dot_dimension_numbers<[1], [0], [0], [1], [0, 0, 1, 1], [], []>} : vector<8x8xbf16>, vector<8x32xbf16>, vector<8x32xf32> -> vector<8x32xf32>
    %c0_393 = arith.constant 0 : index
    %c0_394 = arith.constant 0 : index
    %c0_395 = arith.constant 0 : index
    %1088 = vector.load %arg22[%c0_393, %c0_394, %c0_395] : memref<9x8x16xbf16, #tpu.memory_space<vmem>>, vector<9x8x16xbf16>
    %c0_396 = arith.constant 0 : index
    %c0_397 = arith.constant 0 : index
    %1089 = vector.load %arg33[%c0_396, %c0_397] : memref<2x32xi32, #tpu.memory_space<vmem>>, vector<1x32xi32>
    %c1_398 = arith.constant 1 : index
    %c0_399 = arith.constant 0 : index
    %1090 = vector.load %arg33[%c1_398, %c0_399] : memref<2x32xi32, #tpu.memory_space<vmem>>, vector<1x32xi32>
    %1091 = arith.truncf %1087 : vector<8x32xf32> to vector<8x32xbf16>
    %1092 = arith.truncf %638 : vector<8x32xf32> to vector<8x32xbf16>
    %cst_400 = arith.constant 0.000000e+00 : f32
    %1093 = vector.broadcast %cst_400 : f32 to vector<8x32xf32>
    %c1_i32_401 = arith.constant 1 : i32
    %1094 = vector.broadcast %c1_i32_401 : i32 to vector<1x32xi32>
    %1095 = arith.cmpi sge, %1089, %1094 : vector<1x32xi32>
    %c1_i32_402 = arith.constant 1 : i32
    %1096 = vector.broadcast %c1_i32_402 : i32 to vector<1x32xi32>
    %1097 = arith.cmpi sge, %1090, %1096 : vector<1x32xi32>
    %1098 = arith.andi %1095, %1097 : vector<1x32xi1>
    %cst_403 = arith.constant 0.000000e+00 : bf16
    %1099 = vector.broadcast %cst_403 : bf16 to vector<8x5xbf16>
    %1100 = vector.extract_strided_slice %1091 {offsets = [0, 0], sizes = [8, 27], strides = [1, 1]} : vector<8x32xbf16> to vector<8x27xbf16>
    %1101 = tpu.concatenate %1099, %1100 in 1 : vector<8x5xbf16>, vector<8x27xbf16> -> vector<8x32xbf16>
    %cst_404 = arith.constant 0.000000e+00 : bf16
    %1102 = vector.broadcast %cst_404 : bf16 to vector<8x32xbf16>
    %1103 = vector.shape_cast %1098 : vector<1x32xi1> to vector<1x32xi1>
    %1104 = vector.broadcast %1103 : vector<1x32xi1> to vector<8x32xi1>
    %1105 = arith.select %1104, %1101, %1102 : vector<8x32xi1>, vector<8x32xbf16>
    %1106 = vector.extract_strided_slice %1088 {offsets = [0, 0, 0], sizes = [1, 8, 8], strides = [1, 1, 1]} : vector<9x8x16xbf16> to vector<1x8x8xbf16>
    %1107 = vector.shape_cast %1106 : vector<1x8x8xbf16> to vector<8x8xbf16>
    %cst_405 = arith.constant dense<0.000000e+00> : vector<8x32xf32>
    %1108 = tpu.matmul %1107, %1105, %cst_405 {dimension_numbers = #tpu.dot_dimension_numbers<[1], [0], [0], [1], [0, 0, 1, 1], [], []>} : vector<8x8xbf16>, vector<8x32xbf16>, vector<8x32xf32> -> vector<8x32xf32>
    %1109 = arith.addf %1093, %1108 : vector<8x32xf32>
    %cst_406 = arith.constant 0.000000e+00 : bf16
    %1110 = vector.broadcast %cst_406 : bf16 to vector<8x5xbf16>
    %1111 = vector.extract_strided_slice %1092 {offsets = [0, 0], sizes = [8, 27], strides = [1, 1]} : vector<8x32xbf16> to vector<8x27xbf16>
    %1112 = tpu.concatenate %1110, %1111 in 1 : vector<8x5xbf16>, vector<8x27xbf16> -> vector<8x32xbf16>
    %cst_407 = arith.constant 0.000000e+00 : bf16
    %1113 = vector.broadcast %cst_407 : bf16 to vector<8x32xbf16>
    %1114 = vector.shape_cast %1098 : vector<1x32xi1> to vector<1x32xi1>
    %1115 = vector.broadcast %1114 : vector<1x32xi1> to vector<8x32xi1>
    %1116 = arith.select %1115, %1112, %1113 : vector<8x32xi1>, vector<8x32xbf16>
    %1117 = vector.extract_strided_slice %1088 {offsets = [0, 0, 8], sizes = [1, 8, 8], strides = [1, 1, 1]} : vector<9x8x16xbf16> to vector<1x8x8xbf16>
    %1118 = vector.shape_cast %1117 : vector<1x8x8xbf16> to vector<8x8xbf16>
    %cst_408 = arith.constant dense<0.000000e+00> : vector<8x32xf32>
    %1119 = tpu.matmul %1118, %1116, %cst_408 {dimension_numbers = #tpu.dot_dimension_numbers<[1], [0], [0], [1], [0, 0, 1, 1], [], []>} : vector<8x8xbf16>, vector<8x32xbf16>, vector<8x32xf32> -> vector<8x32xf32>
    %1120 = arith.addf %1109, %1119 : vector<8x32xf32>
    %c1_i32_409 = arith.constant 1 : i32
    %1121 = vector.broadcast %c1_i32_409 : i32 to vector<1x32xi32>
    %1122 = arith.cmpi sge, %1089, %1121 : vector<1x32xi32>
    %cst_410 = arith.constant 0.000000e+00 : bf16
    %1123 = vector.broadcast %cst_410 : bf16 to vector<8x4xbf16>
    %1124 = vector.extract_strided_slice %1091 {offsets = [0, 0], sizes = [8, 28], strides = [1, 1]} : vector<8x32xbf16> to vector<8x28xbf16>
    %1125 = tpu.concatenate %1123, %1124 in 1 : vector<8x4xbf16>, vector<8x28xbf16> -> vector<8x32xbf16>
    %cst_411 = arith.constant 0.000000e+00 : bf16
    %1126 = vector.broadcast %cst_411 : bf16 to vector<8x32xbf16>
    %1127 = vector.shape_cast %1122 : vector<1x32xi1> to vector<1x32xi1>
    %1128 = vector.broadcast %1127 : vector<1x32xi1> to vector<8x32xi1>
    %1129 = arith.select %1128, %1125, %1126 : vector<8x32xi1>, vector<8x32xbf16>
    %1130 = vector.extract_strided_slice %1088 {offsets = [1, 0, 0], sizes = [1, 8, 8], strides = [1, 1, 1]} : vector<9x8x16xbf16> to vector<1x8x8xbf16>
    %1131 = vector.shape_cast %1130 : vector<1x8x8xbf16> to vector<8x8xbf16>
    %cst_412 = arith.constant dense<0.000000e+00> : vector<8x32xf32>
    %1132 = tpu.matmul %1131, %1129, %cst_412 {dimension_numbers = #tpu.dot_dimension_numbers<[1], [0], [0], [1], [0, 0, 1, 1], [], []>} : vector<8x8xbf16>, vector<8x32xbf16>, vector<8x32xf32> -> vector<8x32xf32>
    %1133 = arith.addf %1120, %1132 : vector<8x32xf32>
    %cst_413 = arith.constant 0.000000e+00 : bf16
    %1134 = vector.broadcast %cst_413 : bf16 to vector<8x4xbf16>
    %1135 = vector.extract_strided_slice %1092 {offsets = [0, 0], sizes = [8, 28], strides = [1, 1]} : vector<8x32xbf16> to vector<8x28xbf16>
    %1136 = tpu.concatenate %1134, %1135 in 1 : vector<8x4xbf16>, vector<8x28xbf16> -> vector<8x32xbf16>
    %cst_414 = arith.constant 0.000000e+00 : bf16
    %1137 = vector.broadcast %cst_414 : bf16 to vector<8x32xbf16>
    %1138 = vector.shape_cast %1122 : vector<1x32xi1> to vector<1x32xi1>
    %1139 = vector.broadcast %1138 : vector<1x32xi1> to vector<8x32xi1>
    %1140 = arith.select %1139, %1136, %1137 : vector<8x32xi1>, vector<8x32xbf16>
    %1141 = vector.extract_strided_slice %1088 {offsets = [1, 0, 8], sizes = [1, 8, 8], strides = [1, 1, 1]} : vector<9x8x16xbf16> to vector<1x8x8xbf16>
    %1142 = vector.shape_cast %1141 : vector<1x8x8xbf16> to vector<8x8xbf16>
    %cst_415 = arith.constant dense<0.000000e+00> : vector<8x32xf32>
    %1143 = tpu.matmul %1142, %1140, %cst_415 {dimension_numbers = #tpu.dot_dimension_numbers<[1], [0], [0], [1], [0, 0, 1, 1], [], []>} : vector<8x8xbf16>, vector<8x32xbf16>, vector<8x32xf32> -> vector<8x32xf32>
    %1144 = arith.addf %1133, %1143 : vector<8x32xf32>
    %c1_i32_416 = arith.constant 1 : i32
    %1145 = vector.broadcast %c1_i32_416 : i32 to vector<1x32xi32>
    %1146 = arith.cmpi sge, %1089, %1145 : vector<1x32xi32>
    %c3_i32_417 = arith.constant 3 : i32
    %1147 = vector.broadcast %c3_i32_417 : i32 to vector<1x32xi32>
    %1148 = arith.cmpi slt, %1090, %1147 : vector<1x32xi32>
    %1149 = arith.andi %1146, %1148 : vector<1x32xi1>
    %cst_418 = arith.constant 0.000000e+00 : bf16
    %1150 = vector.broadcast %cst_418 : bf16 to vector<8x3xbf16>
    %1151 = vector.extract_strided_slice %1091 {offsets = [0, 0], sizes = [8, 29], strides = [1, 1]} : vector<8x32xbf16> to vector<8x29xbf16>
    %1152 = tpu.concatenate %1150, %1151 in 1 : vector<8x3xbf16>, vector<8x29xbf16> -> vector<8x32xbf16>
    %cst_419 = arith.constant 0.000000e+00 : bf16
    %1153 = vector.broadcast %cst_419 : bf16 to vector<8x32xbf16>
    %1154 = vector.shape_cast %1149 : vector<1x32xi1> to vector<1x32xi1>
    %1155 = vector.broadcast %1154 : vector<1x32xi1> to vector<8x32xi1>
    %1156 = arith.select %1155, %1152, %1153 : vector<8x32xi1>, vector<8x32xbf16>
    %1157 = vector.extract_strided_slice %1088 {offsets = [2, 0, 0], sizes = [1, 8, 8], strides = [1, 1, 1]} : vector<9x8x16xbf16> to vector<1x8x8xbf16>
    %1158 = vector.shape_cast %1157 : vector<1x8x8xbf16> to vector<8x8xbf16>
    %cst_420 = arith.constant dense<0.000000e+00> : vector<8x32xf32>
    %1159 = tpu.matmul %1158, %1156, %cst_420 {dimension_numbers = #tpu.dot_dimension_numbers<[1], [0], [0], [1], [0, 0, 1, 1], [], []>} : vector<8x8xbf16>, vector<8x32xbf16>, vector<8x32xf32> -> vector<8x32xf32>
    %1160 = arith.addf %1144, %1159 : vector<8x32xf32>
    %cst_421 = arith.constant 0.000000e+00 : bf16
    %1161 = vector.broadcast %cst_421 : bf16 to vector<8x3xbf16>
    %1162 = vector.extract_strided_slice %1092 {offsets = [0, 0], sizes = [8, 29], strides = [1, 1]} : vector<8x32xbf16> to vector<8x29xbf16>
    %1163 = tpu.concatenate %1161, %1162 in 1 : vector<8x3xbf16>, vector<8x29xbf16> -> vector<8x32xbf16>
    %cst_422 = arith.constant 0.000000e+00 : bf16
    %1164 = vector.broadcast %cst_422 : bf16 to vector<8x32xbf16>
    %1165 = vector.shape_cast %1149 : vector<1x32xi1> to vector<1x32xi1>
    %1166 = vector.broadcast %1165 : vector<1x32xi1> to vector<8x32xi1>
    %1167 = arith.select %1166, %1163, %1164 : vector<8x32xi1>, vector<8x32xbf16>
    %1168 = vector.extract_strided_slice %1088 {offsets = [2, 0, 8], sizes = [1, 8, 8], strides = [1, 1, 1]} : vector<9x8x16xbf16> to vector<1x8x8xbf16>
    %1169 = vector.shape_cast %1168 : vector<1x8x8xbf16> to vector<8x8xbf16>
    %cst_423 = arith.constant dense<0.000000e+00> : vector<8x32xf32>
    %1170 = tpu.matmul %1169, %1167, %cst_423 {dimension_numbers = #tpu.dot_dimension_numbers<[1], [0], [0], [1], [0, 0, 1, 1], [], []>} : vector<8x8xbf16>, vector<8x32xbf16>, vector<8x32xf32> -> vector<8x32xf32>
    %1171 = arith.addf %1160, %1170 : vector<8x32xf32>
    %c1_i32_424 = arith.constant 1 : i32
    %1172 = vector.broadcast %c1_i32_424 : i32 to vector<1x32xi32>
    %1173 = arith.cmpi sge, %1090, %1172 : vector<1x32xi32>
    %cst_425 = arith.constant 0.000000e+00 : bf16
    %1174 = vector.broadcast %cst_425 : bf16 to vector<8x1xbf16>
    %1175 = vector.extract_strided_slice %1091 {offsets = [0, 0], sizes = [8, 31], strides = [1, 1]} : vector<8x32xbf16> to vector<8x31xbf16>
    %1176 = tpu.concatenate %1174, %1175 in 1 : vector<8x1xbf16>, vector<8x31xbf16> -> vector<8x32xbf16>
    %cst_426 = arith.constant 0.000000e+00 : bf16
    %1177 = vector.broadcast %cst_426 : bf16 to vector<8x32xbf16>
    %1178 = vector.shape_cast %1173 : vector<1x32xi1> to vector<1x32xi1>
    %1179 = vector.broadcast %1178 : vector<1x32xi1> to vector<8x32xi1>
    %1180 = arith.select %1179, %1176, %1177 : vector<8x32xi1>, vector<8x32xbf16>
    %1181 = vector.extract_strided_slice %1088 {offsets = [3, 0, 0], sizes = [1, 8, 8], strides = [1, 1, 1]} : vector<9x8x16xbf16> to vector<1x8x8xbf16>
    %1182 = vector.shape_cast %1181 : vector<1x8x8xbf16> to vector<8x8xbf16>
    %cst_427 = arith.constant dense<0.000000e+00> : vector<8x32xf32>
    %1183 = tpu.matmul %1182, %1180, %cst_427 {dimension_numbers = #tpu.dot_dimension_numbers<[1], [0], [0], [1], [0, 0, 1, 1], [], []>} : vector<8x8xbf16>, vector<8x32xbf16>, vector<8x32xf32> -> vector<8x32xf32>
    %1184 = arith.addf %1171, %1183 : vector<8x32xf32>
    %cst_428 = arith.constant 0.000000e+00 : bf16
    %1185 = vector.broadcast %cst_428 : bf16 to vector<8x1xbf16>
    %1186 = vector.extract_strided_slice %1092 {offsets = [0, 0], sizes = [8, 31], strides = [1, 1]} : vector<8x32xbf16> to vector<8x31xbf16>
    %1187 = tpu.concatenate %1185, %1186 in 1 : vector<8x1xbf16>, vector<8x31xbf16> -> vector<8x32xbf16>
    %cst_429 = arith.constant 0.000000e+00 : bf16
    %1188 = vector.broadcast %cst_429 : bf16 to vector<8x32xbf16>
    %1189 = vector.shape_cast %1173 : vector<1x32xi1> to vector<1x32xi1>
    %1190 = vector.broadcast %1189 : vector<1x32xi1> to vector<8x32xi1>
    %1191 = arith.select %1190, %1187, %1188 : vector<8x32xi1>, vector<8x32xbf16>
    %1192 = vector.extract_strided_slice %1088 {offsets = [3, 0, 8], sizes = [1, 8, 8], strides = [1, 1, 1]} : vector<9x8x16xbf16> to vector<1x8x8xbf16>
    %1193 = vector.shape_cast %1192 : vector<1x8x8xbf16> to vector<8x8xbf16>
    %cst_430 = arith.constant dense<0.000000e+00> : vector<8x32xf32>
    %1194 = tpu.matmul %1193, %1191, %cst_430 {dimension_numbers = #tpu.dot_dimension_numbers<[1], [0], [0], [1], [0, 0, 1, 1], [], []>} : vector<8x8xbf16>, vector<8x32xbf16>, vector<8x32xf32> -> vector<8x32xf32>
    %1195 = arith.addf %1184, %1194 : vector<8x32xf32>
    %1196 = vector.extract_strided_slice %1088 {offsets = [4, 0, 0], sizes = [1, 8, 8], strides = [1, 1, 1]} : vector<9x8x16xbf16> to vector<1x8x8xbf16>
    %1197 = vector.shape_cast %1196 : vector<1x8x8xbf16> to vector<8x8xbf16>
    %cst_431 = arith.constant dense<0.000000e+00> : vector<8x32xf32>
    %1198 = tpu.matmul %1197, %1091, %cst_431 {dimension_numbers = #tpu.dot_dimension_numbers<[1], [0], [0], [1], [0, 0, 1, 1], [], []>} : vector<8x8xbf16>, vector<8x32xbf16>, vector<8x32xf32> -> vector<8x32xf32>
    %1199 = arith.addf %1195, %1198 : vector<8x32xf32>
    %1200 = vector.extract_strided_slice %1088 {offsets = [4, 0, 8], sizes = [1, 8, 8], strides = [1, 1, 1]} : vector<9x8x16xbf16> to vector<1x8x8xbf16>
    %1201 = vector.shape_cast %1200 : vector<1x8x8xbf16> to vector<8x8xbf16>
    %cst_432 = arith.constant dense<0.000000e+00> : vector<8x32xf32>
    %1202 = tpu.matmul %1201, %1092, %cst_432 {dimension_numbers = #tpu.dot_dimension_numbers<[1], [0], [0], [1], [0, 0, 1, 1], [], []>} : vector<8x8xbf16>, vector<8x32xbf16>, vector<8x32xf32> -> vector<8x32xf32>
    %1203 = arith.addf %1199, %1202 : vector<8x32xf32>
    %c3_i32_433 = arith.constant 3 : i32
    %1204 = vector.broadcast %c3_i32_433 : i32 to vector<1x32xi32>
    %1205 = arith.cmpi slt, %1090, %1204 : vector<1x32xi32>
    %cst_434 = arith.constant 0.000000e+00 : bf16
    %1206 = vector.broadcast %cst_434 : bf16 to vector<8x1xbf16>
    %1207 = vector.extract_strided_slice %1091 {offsets = [0, 1], sizes = [8, 31], strides = [1, 1]} : vector<8x32xbf16> to vector<8x31xbf16>
    %1208 = tpu.concatenate %1207, %1206 in 1 : vector<8x31xbf16>, vector<8x1xbf16> -> vector<8x32xbf16>
    %cst_435 = arith.constant 0.000000e+00 : bf16
    %1209 = vector.broadcast %cst_435 : bf16 to vector<8x32xbf16>
    %1210 = vector.shape_cast %1205 : vector<1x32xi1> to vector<1x32xi1>
    %1211 = vector.broadcast %1210 : vector<1x32xi1> to vector<8x32xi1>
    %1212 = arith.select %1211, %1208, %1209 : vector<8x32xi1>, vector<8x32xbf16>
    %1213 = vector.extract_strided_slice %1088 {offsets = [5, 0, 0], sizes = [1, 8, 8], strides = [1, 1, 1]} : vector<9x8x16xbf16> to vector<1x8x8xbf16>
    %1214 = vector.shape_cast %1213 : vector<1x8x8xbf16> to vector<8x8xbf16>
    %cst_436 = arith.constant dense<0.000000e+00> : vector<8x32xf32>
    %1215 = tpu.matmul %1214, %1212, %cst_436 {dimension_numbers = #tpu.dot_dimension_numbers<[1], [0], [0], [1], [0, 0, 1, 1], [], []>} : vector<8x8xbf16>, vector<8x32xbf16>, vector<8x32xf32> -> vector<8x32xf32>
    %1216 = arith.addf %1203, %1215 : vector<8x32xf32>
    %cst_437 = arith.constant 0.000000e+00 : bf16
    %1217 = vector.broadcast %cst_437 : bf16 to vector<8x1xbf16>
    %1218 = vector.extract_strided_slice %1092 {offsets = [0, 1], sizes = [8, 31], strides = [1, 1]} : vector<8x32xbf16> to vector<8x31xbf16>
    %1219 = tpu.concatenate %1218, %1217 in 1 : vector<8x31xbf16>, vector<8x1xbf16> -> vector<8x32xbf16>
    %cst_438 = arith.constant 0.000000e+00 : bf16
    %1220 = vector.broadcast %cst_438 : bf16 to vector<8x32xbf16>
    %1221 = vector.shape_cast %1205 : vector<1x32xi1> to vector<1x32xi1>
    %1222 = vector.broadcast %1221 : vector<1x32xi1> to vector<8x32xi1>
    %1223 = arith.select %1222, %1219, %1220 : vector<8x32xi1>, vector<8x32xbf16>
    %1224 = vector.extract_strided_slice %1088 {offsets = [5, 0, 8], sizes = [1, 8, 8], strides = [1, 1, 1]} : vector<9x8x16xbf16> to vector<1x8x8xbf16>
    %1225 = vector.shape_cast %1224 : vector<1x8x8xbf16> to vector<8x8xbf16>
    %cst_439 = arith.constant dense<0.000000e+00> : vector<8x32xf32>
    %1226 = tpu.matmul %1225, %1223, %cst_439 {dimension_numbers = #tpu.dot_dimension_numbers<[1], [0], [0], [1], [0, 0, 1, 1], [], []>} : vector<8x8xbf16>, vector<8x32xbf16>, vector<8x32xf32> -> vector<8x32xf32>
    %1227 = arith.addf %1216, %1226 : vector<8x32xf32>
    %c3_i32_440 = arith.constant 3 : i32
    %1228 = vector.broadcast %c3_i32_440 : i32 to vector<1x32xi32>
    %1229 = arith.cmpi slt, %1089, %1228 : vector<1x32xi32>
    %c1_i32_441 = arith.constant 1 : i32
    %1230 = vector.broadcast %c1_i32_441 : i32 to vector<1x32xi32>
    %1231 = arith.cmpi sge, %1090, %1230 : vector<1x32xi32>
    %1232 = arith.andi %1229, %1231 : vector<1x32xi1>
    %cst_442 = arith.constant 0.000000e+00 : bf16
    %1233 = vector.broadcast %cst_442 : bf16 to vector<8x3xbf16>
    %1234 = vector.extract_strided_slice %1091 {offsets = [0, 3], sizes = [8, 29], strides = [1, 1]} : vector<8x32xbf16> to vector<8x29xbf16>
    %1235 = tpu.concatenate %1234, %1233 in 1 : vector<8x29xbf16>, vector<8x3xbf16> -> vector<8x32xbf16>
    %cst_443 = arith.constant 0.000000e+00 : bf16
    %1236 = vector.broadcast %cst_443 : bf16 to vector<8x32xbf16>
    %1237 = vector.shape_cast %1232 : vector<1x32xi1> to vector<1x32xi1>
    %1238 = vector.broadcast %1237 : vector<1x32xi1> to vector<8x32xi1>
    %1239 = arith.select %1238, %1235, %1236 : vector<8x32xi1>, vector<8x32xbf16>
    %1240 = vector.extract_strided_slice %1088 {offsets = [6, 0, 0], sizes = [1, 8, 8], strides = [1, 1, 1]} : vector<9x8x16xbf16> to vector<1x8x8xbf16>
    %1241 = vector.shape_cast %1240 : vector<1x8x8xbf16> to vector<8x8xbf16>
    %cst_444 = arith.constant dense<0.000000e+00> : vector<8x32xf32>
    %1242 = tpu.matmul %1241, %1239, %cst_444 {dimension_numbers = #tpu.dot_dimension_numbers<[1], [0], [0], [1], [0, 0, 1, 1], [], []>} : vector<8x8xbf16>, vector<8x32xbf16>, vector<8x32xf32> -> vector<8x32xf32>
    %1243 = arith.addf %1227, %1242 : vector<8x32xf32>
    %cst_445 = arith.constant 0.000000e+00 : bf16
    %1244 = vector.broadcast %cst_445 : bf16 to vector<8x3xbf16>
    %1245 = vector.extract_strided_slice %1092 {offsets = [0, 3], sizes = [8, 29], strides = [1, 1]} : vector<8x32xbf16> to vector<8x29xbf16>
    %1246 = tpu.concatenate %1245, %1244 in 1 : vector<8x29xbf16>, vector<8x3xbf16> -> vector<8x32xbf16>
    %cst_446 = arith.constant 0.000000e+00 : bf16
    %1247 = vector.broadcast %cst_446 : bf16 to vector<8x32xbf16>
    %1248 = vector.shape_cast %1232 : vector<1x32xi1> to vector<1x32xi1>
    %1249 = vector.broadcast %1248 : vector<1x32xi1> to vector<8x32xi1>
    %1250 = arith.select %1249, %1246, %1247 : vector<8x32xi1>, vector<8x32xbf16>
    %1251 = vector.extract_strided_slice %1088 {offsets = [6, 0, 8], sizes = [1, 8, 8], strides = [1, 1, 1]} : vector<9x8x16xbf16> to vector<1x8x8xbf16>
    %1252 = vector.shape_cast %1251 : vector<1x8x8xbf16> to vector<8x8xbf16>
    %cst_447 = arith.constant dense<0.000000e+00> : vector<8x32xf32>
    %1253 = tpu.matmul %1252, %1250, %cst_447 {dimension_numbers = #tpu.dot_dimension_numbers<[1], [0], [0], [1], [0, 0, 1, 1], [], []>} : vector<8x8xbf16>, vector<8x32xbf16>, vector<8x32xf32> -> vector<8x32xf32>
    %1254 = arith.addf %1243, %1253 : vector<8x32xf32>
    %c3_i32_448 = arith.constant 3 : i32
    %1255 = vector.broadcast %c3_i32_448 : i32 to vector<1x32xi32>
    %1256 = arith.cmpi slt, %1089, %1255 : vector<1x32xi32>
    %cst_449 = arith.constant 0.000000e+00 : bf16
    %1257 = vector.broadcast %cst_449 : bf16 to vector<8x4xbf16>
    %1258 = vector.extract_strided_slice %1091 {offsets = [0, 4], sizes = [8, 28], strides = [1, 1]} : vector<8x32xbf16> to vector<8x28xbf16>
    %1259 = tpu.concatenate %1258, %1257 in 1 : vector<8x28xbf16>, vector<8x4xbf16> -> vector<8x32xbf16>
    %cst_450 = arith.constant 0.000000e+00 : bf16
    %1260 = vector.broadcast %cst_450 : bf16 to vector<8x32xbf16>
    %1261 = vector.shape_cast %1256 : vector<1x32xi1> to vector<1x32xi1>
    %1262 = vector.broadcast %1261 : vector<1x32xi1> to vector<8x32xi1>
    %1263 = arith.select %1262, %1259, %1260 : vector<8x32xi1>, vector<8x32xbf16>
    %1264 = vector.extract_strided_slice %1088 {offsets = [7, 0, 0], sizes = [1, 8, 8], strides = [1, 1, 1]} : vector<9x8x16xbf16> to vector<1x8x8xbf16>
    %1265 = vector.shape_cast %1264 : vector<1x8x8xbf16> to vector<8x8xbf16>
    %cst_451 = arith.constant dense<0.000000e+00> : vector<8x32xf32>
    %1266 = tpu.matmul %1265, %1263, %cst_451 {dimension_numbers = #tpu.dot_dimension_numbers<[1], [0], [0], [1], [0, 0, 1, 1], [], []>} : vector<8x8xbf16>, vector<8x32xbf16>, vector<8x32xf32> -> vector<8x32xf32>
    %1267 = arith.addf %1254, %1266 : vector<8x32xf32>
    %cst_452 = arith.constant 0.000000e+00 : bf16
    %1268 = vector.broadcast %cst_452 : bf16 to vector<8x4xbf16>
    %1269 = vector.extract_strided_slice %1092 {offsets = [0, 4], sizes = [8, 28], strides = [1, 1]} : vector<8x32xbf16> to vector<8x28xbf16>
    %1270 = tpu.concatenate %1269, %1268 in 1 : vector<8x28xbf16>, vector<8x4xbf16> -> vector<8x32xbf16>
    %cst_453 = arith.constant 0.000000e+00 : bf16
    %1271 = vector.broadcast %cst_453 : bf16 to vector<8x32xbf16>
    %1272 = vector.shape_cast %1256 : vector<1x32xi1> to vector<1x32xi1>
    %1273 = vector.broadcast %1272 : vector<1x32xi1> to vector<8x32xi1>
    %1274 = arith.select %1273, %1270, %1271 : vector<8x32xi1>, vector<8x32xbf16>
    %1275 = vector.extract_strided_slice %1088 {offsets = [7, 0, 8], sizes = [1, 8, 8], strides = [1, 1, 1]} : vector<9x8x16xbf16> to vector<1x8x8xbf16>
    %1276 = vector.shape_cast %1275 : vector<1x8x8xbf16> to vector<8x8xbf16>
    %cst_454 = arith.constant dense<0.000000e+00> : vector<8x32xf32>
    %1277 = tpu.matmul %1276, %1274, %cst_454 {dimension_numbers = #tpu.dot_dimension_numbers<[1], [0], [0], [1], [0, 0, 1, 1], [], []>} : vector<8x8xbf16>, vector<8x32xbf16>, vector<8x32xf32> -> vector<8x32xf32>
    %1278 = arith.addf %1267, %1277 : vector<8x32xf32>
    %c3_i32_455 = arith.constant 3 : i32
    %1279 = vector.broadcast %c3_i32_455 : i32 to vector<1x32xi32>
    %1280 = arith.cmpi slt, %1089, %1279 : vector<1x32xi32>
    %c3_i32_456 = arith.constant 3 : i32
    %1281 = vector.broadcast %c3_i32_456 : i32 to vector<1x32xi32>
    %1282 = arith.cmpi slt, %1090, %1281 : vector<1x32xi32>
    %1283 = arith.andi %1280, %1282 : vector<1x32xi1>
    %cst_457 = arith.constant 0.000000e+00 : bf16
    %1284 = vector.broadcast %cst_457 : bf16 to vector<8x5xbf16>
    %1285 = vector.extract_strided_slice %1091 {offsets = [0, 5], sizes = [8, 27], strides = [1, 1]} : vector<8x32xbf16> to vector<8x27xbf16>
    %1286 = tpu.concatenate %1285, %1284 in 1 : vector<8x27xbf16>, vector<8x5xbf16> -> vector<8x32xbf16>
    %cst_458 = arith.constant 0.000000e+00 : bf16
    %1287 = vector.broadcast %cst_458 : bf16 to vector<8x32xbf16>
    %1288 = vector.shape_cast %1283 : vector<1x32xi1> to vector<1x32xi1>
    %1289 = vector.broadcast %1288 : vector<1x32xi1> to vector<8x32xi1>
    %1290 = arith.select %1289, %1286, %1287 : vector<8x32xi1>, vector<8x32xbf16>
    %1291 = vector.extract_strided_slice %1088 {offsets = [8, 0, 0], sizes = [1, 8, 8], strides = [1, 1, 1]} : vector<9x8x16xbf16> to vector<1x8x8xbf16>
    %1292 = vector.shape_cast %1291 : vector<1x8x8xbf16> to vector<8x8xbf16>
    %cst_459 = arith.constant dense<0.000000e+00> : vector<8x32xf32>
    %1293 = tpu.matmul %1292, %1290, %cst_459 {dimension_numbers = #tpu.dot_dimension_numbers<[1], [0], [0], [1], [0, 0, 1, 1], [], []>} : vector<8x8xbf16>, vector<8x32xbf16>, vector<8x32xf32> -> vector<8x32xf32>
    %1294 = arith.addf %1278, %1293 : vector<8x32xf32>
    %cst_460 = arith.constant 0.000000e+00 : bf16
    %1295 = vector.broadcast %cst_460 : bf16 to vector<8x5xbf16>
    %1296 = vector.extract_strided_slice %1092 {offsets = [0, 5], sizes = [8, 27], strides = [1, 1]} : vector<8x32xbf16> to vector<8x27xbf16>
    %1297 = tpu.concatenate %1296, %1295 in 1 : vector<8x27xbf16>, vector<8x5xbf16> -> vector<8x32xbf16>
    %cst_461 = arith.constant 0.000000e+00 : bf16
    %1298 = vector.broadcast %cst_461 : bf16 to vector<8x32xbf16>
    %1299 = vector.shape_cast %1283 : vector<1x32xi1> to vector<1x32xi1>
    %1300 = vector.broadcast %1299 : vector<1x32xi1> to vector<8x32xi1>
    %1301 = arith.select %1300, %1297, %1298 : vector<8x32xi1>, vector<8x32xbf16>
    %1302 = vector.extract_strided_slice %1088 {offsets = [8, 0, 8], sizes = [1, 8, 8], strides = [1, 1, 1]} : vector<9x8x16xbf16> to vector<1x8x8xbf16>
    %1303 = vector.shape_cast %1302 : vector<1x8x8xbf16> to vector<8x8xbf16>
    %cst_462 = arith.constant dense<0.000000e+00> : vector<8x32xf32>
    %1304 = tpu.matmul %1303, %1301, %cst_462 {dimension_numbers = #tpu.dot_dimension_numbers<[1], [0], [0], [1], [0, 0, 1, 1], [], []>} : vector<8x8xbf16>, vector<8x32xbf16>, vector<8x32xf32> -> vector<8x32xf32>
    %1305 = arith.addf %1294, %1304 : vector<8x32xf32>
    %cst_463 = arith.constant dense<0.000000e+00> : vector<8xf32>
    %1306 = vector.multi_reduction <add>, %1305, %cst_463 [1] : vector<8x32xf32> to vector<8xf32>
    %1307 = vector.shape_cast %1306 : vector<8xf32> to vector<8x1xf32>
    %1308 = arith.mulf %1305, %1305 : vector<8x32xf32>
    %cst_464 = arith.constant dense<0.000000e+00> : vector<8xf32>
    %1309 = vector.multi_reduction <add>, %1308, %cst_464 [1] : vector<8x32xf32> to vector<8xf32>
    %1310 = vector.shape_cast %1309 : vector<8xf32> to vector<8x1xf32>
    %cst_465 = arith.constant 3.200000e+01 : f32
    %1311 = vector.broadcast %cst_465 : f32 to vector<8x1xf32>
    %1312 = arith.divf %1307, %1311 : vector<8x1xf32>
    %cst_466 = arith.constant 3.200000e+01 : f32
    %1313 = vector.broadcast %cst_466 : f32 to vector<8x1xf32>
    %1314 = arith.divf %1310, %1313 : vector<8x1xf32>
    %1315 = arith.mulf %1312, %1312 : vector<8x1xf32>
    %1316 = arith.subf %1314, %1315 : vector<8x1xf32>
    %cst_467 = arith.constant 0.000000e+00 : f32
    %1317 = vector.broadcast %cst_467 : f32 to vector<8x1xf32>
    %1318 = arith.maximumf %1316, %1317 : vector<8x1xf32>
    %c0_468 = arith.constant 0 : index
    %c0_469 = arith.constant 0 : index
    %1319 = vector.load %arg23[%c0_468, %c0_469] : memref<8x1xf32, #tpu.memory_space<vmem>>, vector<8x1xf32>
    %cst_470 = arith.constant 9.99999974E-6 : f32
    %1320 = vector.broadcast %cst_470 : f32 to vector<8x1xf32>
    %1321 = arith.addf %1318, %1320 : vector<8x1xf32>
    %1322 = math.rsqrt %1321 : vector<8x1xf32>
    %1323 = arith.mulf %1319, %1322 : vector<8x1xf32>
    %c0_471 = arith.constant 0 : index
    %c0_472 = arith.constant 0 : index
    %1324 = vector.load %arg24[%c0_471, %c0_472] : memref<8x1xf32, #tpu.memory_space<vmem>>, vector<8x1xf32>
    %1325 = arith.mulf %1312, %1323 : vector<8x1xf32>
    %1326 = arith.subf %1324, %1325 : vector<8x1xf32>
    %1327 = vector.broadcast %1323 : vector<8x1xf32> to vector<8x32xf32>
    %1328 = arith.mulf %1305, %1327 : vector<8x32xf32>
    %1329 = vector.broadcast %1326 : vector<8x1xf32> to vector<8x32xf32>
    %1330 = arith.addf %1328, %1329 : vector<8x32xf32>
    %cst_473 = arith.constant 0.000000e+00 : f32
    %1331 = vector.broadcast %cst_473 : f32 to vector<8x32xf32>
    %1332 = arith.maximumf %1330, %1331 : vector<8x32xf32>
    %1333 = arith.truncf %1332 : vector<8x32xf32> to vector<8x32xbf16>
    %c0_474 = arith.constant 0 : index
    %c0_475 = arith.constant 0 : index
    %1334 = vector.load %arg39[%c0_474, %c0_475] : memref<32x128xbf16, #tpu.memory_space<vmem>>, vector<32x128xbf16>
    %cst_476 = arith.constant dense<0.000000e+00> : vector<8x128xf32>
    %1335 = tpu.matmul %1333, %1334, %cst_476 {dimension_numbers = #tpu.dot_dimension_numbers<[1], [0], [0], [1], [0, 0, 1, 1], [], []>} : vector<8x32xbf16>, vector<32x128xbf16>, vector<8x128xf32> -> vector<8x128xf32>
    %c0_477 = arith.constant 0 : index
    %c0_478 = arith.constant 0 : index
    %c0_479 = arith.constant 0 : index
    %1336 = vector.load %arg25[%c0_477, %c0_478, %c0_479] : memref<9x8x16xbf16, #tpu.memory_space<vmem>>, vector<9x8x16xbf16>
    %c0_480 = arith.constant 0 : index
    %c0_481 = arith.constant 0 : index
    %1337 = vector.load %arg32[%c0_480, %c0_481] : memref<2x128xi32, #tpu.memory_space<vmem>>, vector<1x128xi32>
    %c1_482 = arith.constant 1 : index
    %c0_483 = arith.constant 0 : index
    %1338 = vector.load %arg32[%c1_482, %c0_483] : memref<2x128xi32, #tpu.memory_space<vmem>>, vector<1x128xi32>
    %1339 = arith.truncf %1335 : vector<8x128xf32> to vector<8x128xbf16>
    %1340 = arith.truncf %471 : vector<8x128xf32> to vector<8x128xbf16>
    %cst_484 = arith.constant 0.000000e+00 : f32
    %1341 = vector.broadcast %cst_484 : f32 to vector<8x128xf32>
    %c1_i32_485 = arith.constant 1 : i32
    %1342 = vector.broadcast %c1_i32_485 : i32 to vector<1x128xi32>
    %1343 = arith.cmpi sge, %1337, %1342 : vector<1x128xi32>
    %c1_i32_486 = arith.constant 1 : i32
    %1344 = vector.broadcast %c1_i32_486 : i32 to vector<1x128xi32>
    %1345 = arith.cmpi sge, %1338, %1344 : vector<1x128xi32>
    %1346 = arith.andi %1343, %1345 : vector<1x128xi1>
    %cst_487 = arith.constant 0.000000e+00 : bf16
    %1347 = vector.broadcast %cst_487 : bf16 to vector<8x9xbf16>
    %1348 = vector.extract_strided_slice %1339 {offsets = [0, 0], sizes = [8, 119], strides = [1, 1]} : vector<8x128xbf16> to vector<8x119xbf16>
    %1349 = tpu.concatenate %1347, %1348 in 1 : vector<8x9xbf16>, vector<8x119xbf16> -> vector<8x128xbf16>
    %cst_488 = arith.constant 0.000000e+00 : bf16
    %1350 = vector.broadcast %cst_488 : bf16 to vector<8x128xbf16>
    %1351 = vector.shape_cast %1346 : vector<1x128xi1> to vector<1x128xi1>
    %1352 = vector.broadcast %1351 : vector<1x128xi1> to vector<8x128xi1>
    %1353 = arith.select %1352, %1349, %1350 : vector<8x128xi1>, vector<8x128xbf16>
    %1354 = vector.extract_strided_slice %1336 {offsets = [0, 0, 0], sizes = [1, 8, 8], strides = [1, 1, 1]} : vector<9x8x16xbf16> to vector<1x8x8xbf16>
    %1355 = vector.shape_cast %1354 : vector<1x8x8xbf16> to vector<8x8xbf16>
    %cst_489 = arith.constant dense<0.000000e+00> : vector<8x128xf32>
    %1356 = tpu.matmul %1355, %1353, %cst_489 {dimension_numbers = #tpu.dot_dimension_numbers<[1], [0], [0], [1], [0, 0, 1, 1], [], []>} : vector<8x8xbf16>, vector<8x128xbf16>, vector<8x128xf32> -> vector<8x128xf32>
    %1357 = arith.addf %1341, %1356 : vector<8x128xf32>
    %cst_490 = arith.constant 0.000000e+00 : bf16
    %1358 = vector.broadcast %cst_490 : bf16 to vector<8x9xbf16>
    %1359 = vector.extract_strided_slice %1340 {offsets = [0, 0], sizes = [8, 119], strides = [1, 1]} : vector<8x128xbf16> to vector<8x119xbf16>
    %1360 = tpu.concatenate %1358, %1359 in 1 : vector<8x9xbf16>, vector<8x119xbf16> -> vector<8x128xbf16>
    %cst_491 = arith.constant 0.000000e+00 : bf16
    %1361 = vector.broadcast %cst_491 : bf16 to vector<8x128xbf16>
    %1362 = vector.shape_cast %1346 : vector<1x128xi1> to vector<1x128xi1>
    %1363 = vector.broadcast %1362 : vector<1x128xi1> to vector<8x128xi1>
    %1364 = arith.select %1363, %1360, %1361 : vector<8x128xi1>, vector<8x128xbf16>
    %1365 = vector.extract_strided_slice %1336 {offsets = [0, 0, 8], sizes = [1, 8, 8], strides = [1, 1, 1]} : vector<9x8x16xbf16> to vector<1x8x8xbf16>
    %1366 = vector.shape_cast %1365 : vector<1x8x8xbf16> to vector<8x8xbf16>
    %cst_492 = arith.constant dense<0.000000e+00> : vector<8x128xf32>
    %1367 = tpu.matmul %1366, %1364, %cst_492 {dimension_numbers = #tpu.dot_dimension_numbers<[1], [0], [0], [1], [0, 0, 1, 1], [], []>} : vector<8x8xbf16>, vector<8x128xbf16>, vector<8x128xf32> -> vector<8x128xf32>
    %1368 = arith.addf %1357, %1367 : vector<8x128xf32>
    %c1_i32_493 = arith.constant 1 : i32
    %1369 = vector.broadcast %c1_i32_493 : i32 to vector<1x128xi32>
    %1370 = arith.cmpi sge, %1337, %1369 : vector<1x128xi32>
    %cst_494 = arith.constant 0.000000e+00 : bf16
    %1371 = vector.broadcast %cst_494 : bf16 to vector<8x8xbf16>
    %1372 = vector.extract_strided_slice %1339 {offsets = [0, 0], sizes = [8, 120], strides = [1, 1]} : vector<8x128xbf16> to vector<8x120xbf16>
    %1373 = tpu.concatenate %1371, %1372 in 1 : vector<8x8xbf16>, vector<8x120xbf16> -> vector<8x128xbf16>
    %cst_495 = arith.constant 0.000000e+00 : bf16
    %1374 = vector.broadcast %cst_495 : bf16 to vector<8x128xbf16>
    %1375 = vector.shape_cast %1370 : vector<1x128xi1> to vector<1x128xi1>
    %1376 = vector.broadcast %1375 : vector<1x128xi1> to vector<8x128xi1>
    %1377 = arith.select %1376, %1373, %1374 : vector<8x128xi1>, vector<8x128xbf16>
    %1378 = vector.extract_strided_slice %1336 {offsets = [1, 0, 0], sizes = [1, 8, 8], strides = [1, 1, 1]} : vector<9x8x16xbf16> to vector<1x8x8xbf16>
    %1379 = vector.shape_cast %1378 : vector<1x8x8xbf16> to vector<8x8xbf16>
    %cst_496 = arith.constant dense<0.000000e+00> : vector<8x128xf32>
    %1380 = tpu.matmul %1379, %1377, %cst_496 {dimension_numbers = #tpu.dot_dimension_numbers<[1], [0], [0], [1], [0, 0, 1, 1], [], []>} : vector<8x8xbf16>, vector<8x128xbf16>, vector<8x128xf32> -> vector<8x128xf32>
    %1381 = arith.addf %1368, %1380 : vector<8x128xf32>
    %cst_497 = arith.constant 0.000000e+00 : bf16
    %1382 = vector.broadcast %cst_497 : bf16 to vector<8x8xbf16>
    %1383 = vector.extract_strided_slice %1340 {offsets = [0, 0], sizes = [8, 120], strides = [1, 1]} : vector<8x128xbf16> to vector<8x120xbf16>
    %1384 = tpu.concatenate %1382, %1383 in 1 : vector<8x8xbf16>, vector<8x120xbf16> -> vector<8x128xbf16>
    %cst_498 = arith.constant 0.000000e+00 : bf16
    %1385 = vector.broadcast %cst_498 : bf16 to vector<8x128xbf16>
    %1386 = vector.shape_cast %1370 : vector<1x128xi1> to vector<1x128xi1>
    %1387 = vector.broadcast %1386 : vector<1x128xi1> to vector<8x128xi1>
    %1388 = arith.select %1387, %1384, %1385 : vector<8x128xi1>, vector<8x128xbf16>
    %1389 = vector.extract_strided_slice %1336 {offsets = [1, 0, 8], sizes = [1, 8, 8], strides = [1, 1, 1]} : vector<9x8x16xbf16> to vector<1x8x8xbf16>
    %1390 = vector.shape_cast %1389 : vector<1x8x8xbf16> to vector<8x8xbf16>
    %cst_499 = arith.constant dense<0.000000e+00> : vector<8x128xf32>
    %1391 = tpu.matmul %1390, %1388, %cst_499 {dimension_numbers = #tpu.dot_dimension_numbers<[1], [0], [0], [1], [0, 0, 1, 1], [], []>} : vector<8x8xbf16>, vector<8x128xbf16>, vector<8x128xf32> -> vector<8x128xf32>
    %1392 = arith.addf %1381, %1391 : vector<8x128xf32>
    %c1_i32_500 = arith.constant 1 : i32
    %1393 = vector.broadcast %c1_i32_500 : i32 to vector<1x128xi32>
    %1394 = arith.cmpi sge, %1337, %1393 : vector<1x128xi32>
    %c7_i32_501 = arith.constant 7 : i32
    %1395 = vector.broadcast %c7_i32_501 : i32 to vector<1x128xi32>
    %1396 = arith.cmpi slt, %1338, %1395 : vector<1x128xi32>
    %1397 = arith.andi %1394, %1396 : vector<1x128xi1>
    %cst_502 = arith.constant 0.000000e+00 : bf16
    %1398 = vector.broadcast %cst_502 : bf16 to vector<8x7xbf16>
    %1399 = vector.extract_strided_slice %1339 {offsets = [0, 0], sizes = [8, 121], strides = [1, 1]} : vector<8x128xbf16> to vector<8x121xbf16>
    %1400 = tpu.concatenate %1398, %1399 in 1 : vector<8x7xbf16>, vector<8x121xbf16> -> vector<8x128xbf16>
    %cst_503 = arith.constant 0.000000e+00 : bf16
    %1401 = vector.broadcast %cst_503 : bf16 to vector<8x128xbf16>
    %1402 = vector.shape_cast %1397 : vector<1x128xi1> to vector<1x128xi1>
    %1403 = vector.broadcast %1402 : vector<1x128xi1> to vector<8x128xi1>
    %1404 = arith.select %1403, %1400, %1401 : vector<8x128xi1>, vector<8x128xbf16>
    %1405 = vector.extract_strided_slice %1336 {offsets = [2, 0, 0], sizes = [1, 8, 8], strides = [1, 1, 1]} : vector<9x8x16xbf16> to vector<1x8x8xbf16>
    %1406 = vector.shape_cast %1405 : vector<1x8x8xbf16> to vector<8x8xbf16>
    %cst_504 = arith.constant dense<0.000000e+00> : vector<8x128xf32>
    %1407 = tpu.matmul %1406, %1404, %cst_504 {dimension_numbers = #tpu.dot_dimension_numbers<[1], [0], [0], [1], [0, 0, 1, 1], [], []>} : vector<8x8xbf16>, vector<8x128xbf16>, vector<8x128xf32> -> vector<8x128xf32>
    %1408 = arith.addf %1392, %1407 : vector<8x128xf32>
    %cst_505 = arith.constant 0.000000e+00 : bf16
    %1409 = vector.broadcast %cst_505 : bf16 to vector<8x7xbf16>
    %1410 = vector.extract_strided_slice %1340 {offsets = [0, 0], sizes = [8, 121], strides = [1, 1]} : vector<8x128xbf16> to vector<8x121xbf16>
    %1411 = tpu.concatenate %1409, %1410 in 1 : vector<8x7xbf16>, vector<8x121xbf16> -> vector<8x128xbf16>
    %cst_506 = arith.constant 0.000000e+00 : bf16
    %1412 = vector.broadcast %cst_506 : bf16 to vector<8x128xbf16>
    %1413 = vector.shape_cast %1397 : vector<1x128xi1> to vector<1x128xi1>
    %1414 = vector.broadcast %1413 : vector<1x128xi1> to vector<8x128xi1>
    %1415 = arith.select %1414, %1411, %1412 : vector<8x128xi1>, vector<8x128xbf16>
    %1416 = vector.extract_strided_slice %1336 {offsets = [2, 0, 8], sizes = [1, 8, 8], strides = [1, 1, 1]} : vector<9x8x16xbf16> to vector<1x8x8xbf16>
    %1417 = vector.shape_cast %1416 : vector<1x8x8xbf16> to vector<8x8xbf16>
    %cst_507 = arith.constant dense<0.000000e+00> : vector<8x128xf32>
    %1418 = tpu.matmul %1417, %1415, %cst_507 {dimension_numbers = #tpu.dot_dimension_numbers<[1], [0], [0], [1], [0, 0, 1, 1], [], []>} : vector<8x8xbf16>, vector<8x128xbf16>, vector<8x128xf32> -> vector<8x128xf32>
    %1419 = arith.addf %1408, %1418 : vector<8x128xf32>
    %c1_i32_508 = arith.constant 1 : i32
    %1420 = vector.broadcast %c1_i32_508 : i32 to vector<1x128xi32>
    %1421 = arith.cmpi sge, %1338, %1420 : vector<1x128xi32>
    %cst_509 = arith.constant 0.000000e+00 : bf16
    %1422 = vector.broadcast %cst_509 : bf16 to vector<8x1xbf16>
    %1423 = vector.extract_strided_slice %1339 {offsets = [0, 0], sizes = [8, 127], strides = [1, 1]} : vector<8x128xbf16> to vector<8x127xbf16>
    %1424 = tpu.concatenate %1422, %1423 in 1 : vector<8x1xbf16>, vector<8x127xbf16> -> vector<8x128xbf16>
    %cst_510 = arith.constant 0.000000e+00 : bf16
    %1425 = vector.broadcast %cst_510 : bf16 to vector<8x128xbf16>
    %1426 = vector.shape_cast %1421 : vector<1x128xi1> to vector<1x128xi1>
    %1427 = vector.broadcast %1426 : vector<1x128xi1> to vector<8x128xi1>
    %1428 = arith.select %1427, %1424, %1425 : vector<8x128xi1>, vector<8x128xbf16>
    %1429 = vector.extract_strided_slice %1336 {offsets = [3, 0, 0], sizes = [1, 8, 8], strides = [1, 1, 1]} : vector<9x8x16xbf16> to vector<1x8x8xbf16>
    %1430 = vector.shape_cast %1429 : vector<1x8x8xbf16> to vector<8x8xbf16>
    %cst_511 = arith.constant dense<0.000000e+00> : vector<8x128xf32>
    %1431 = tpu.matmul %1430, %1428, %cst_511 {dimension_numbers = #tpu.dot_dimension_numbers<[1], [0], [0], [1], [0, 0, 1, 1], [], []>} : vector<8x8xbf16>, vector<8x128xbf16>, vector<8x128xf32> -> vector<8x128xf32>
    %1432 = arith.addf %1419, %1431 : vector<8x128xf32>
    %cst_512 = arith.constant 0.000000e+00 : bf16
    %1433 = vector.broadcast %cst_512 : bf16 to vector<8x1xbf16>
    %1434 = vector.extract_strided_slice %1340 {offsets = [0, 0], sizes = [8, 127], strides = [1, 1]} : vector<8x128xbf16> to vector<8x127xbf16>
    %1435 = tpu.concatenate %1433, %1434 in 1 : vector<8x1xbf16>, vector<8x127xbf16> -> vector<8x128xbf16>
    %cst_513 = arith.constant 0.000000e+00 : bf16
    %1436 = vector.broadcast %cst_513 : bf16 to vector<8x128xbf16>
    %1437 = vector.shape_cast %1421 : vector<1x128xi1> to vector<1x128xi1>
    %1438 = vector.broadcast %1437 : vector<1x128xi1> to vector<8x128xi1>
    %1439 = arith.select %1438, %1435, %1436 : vector<8x128xi1>, vector<8x128xbf16>
    %1440 = vector.extract_strided_slice %1336 {offsets = [3, 0, 8], sizes = [1, 8, 8], strides = [1, 1, 1]} : vector<9x8x16xbf16> to vector<1x8x8xbf16>
    %1441 = vector.shape_cast %1440 : vector<1x8x8xbf16> to vector<8x8xbf16>
    %cst_514 = arith.constant dense<0.000000e+00> : vector<8x128xf32>
    %1442 = tpu.matmul %1441, %1439, %cst_514 {dimension_numbers = #tpu.dot_dimension_numbers<[1], [0], [0], [1], [0, 0, 1, 1], [], []>} : vector<8x8xbf16>, vector<8x128xbf16>, vector<8x128xf32> -> vector<8x128xf32>
    %1443 = arith.addf %1432, %1442 : vector<8x128xf32>
    %1444 = vector.extract_strided_slice %1336 {offsets = [4, 0, 0], sizes = [1, 8, 8], strides = [1, 1, 1]} : vector<9x8x16xbf16> to vector<1x8x8xbf16>
    %1445 = vector.shape_cast %1444 : vector<1x8x8xbf16> to vector<8x8xbf16>
    %cst_515 = arith.constant dense<0.000000e+00> : vector<8x128xf32>
    %1446 = tpu.matmul %1445, %1339, %cst_515 {dimension_numbers = #tpu.dot_dimension_numbers<[1], [0], [0], [1], [0, 0, 1, 1], [], []>} : vector<8x8xbf16>, vector<8x128xbf16>, vector<8x128xf32> -> vector<8x128xf32>
    %1447 = arith.addf %1443, %1446 : vector<8x128xf32>
    %1448 = vector.extract_strided_slice %1336 {offsets = [4, 0, 8], sizes = [1, 8, 8], strides = [1, 1, 1]} : vector<9x8x16xbf16> to vector<1x8x8xbf16>
    %1449 = vector.shape_cast %1448 : vector<1x8x8xbf16> to vector<8x8xbf16>
    %cst_516 = arith.constant dense<0.000000e+00> : vector<8x128xf32>
    %1450 = tpu.matmul %1449, %1340, %cst_516 {dimension_numbers = #tpu.dot_dimension_numbers<[1], [0], [0], [1], [0, 0, 1, 1], [], []>} : vector<8x8xbf16>, vector<8x128xbf16>, vector<8x128xf32> -> vector<8x128xf32>
    %1451 = arith.addf %1447, %1450 : vector<8x128xf32>
    %c7_i32_517 = arith.constant 7 : i32
    %1452 = vector.broadcast %c7_i32_517 : i32 to vector<1x128xi32>
    %1453 = arith.cmpi slt, %1338, %1452 : vector<1x128xi32>
    %cst_518 = arith.constant 0.000000e+00 : bf16
    %1454 = vector.broadcast %cst_518 : bf16 to vector<8x1xbf16>
    %1455 = vector.extract_strided_slice %1339 {offsets = [0, 1], sizes = [8, 127], strides = [1, 1]} : vector<8x128xbf16> to vector<8x127xbf16>
    %1456 = tpu.concatenate %1455, %1454 in 1 : vector<8x127xbf16>, vector<8x1xbf16> -> vector<8x128xbf16>
    %cst_519 = arith.constant 0.000000e+00 : bf16
    %1457 = vector.broadcast %cst_519 : bf16 to vector<8x128xbf16>
    %1458 = vector.shape_cast %1453 : vector<1x128xi1> to vector<1x128xi1>
    %1459 = vector.broadcast %1458 : vector<1x128xi1> to vector<8x128xi1>
    %1460 = arith.select %1459, %1456, %1457 : vector<8x128xi1>, vector<8x128xbf16>
    %1461 = vector.extract_strided_slice %1336 {offsets = [5, 0, 0], sizes = [1, 8, 8], strides = [1, 1, 1]} : vector<9x8x16xbf16> to vector<1x8x8xbf16>
    %1462 = vector.shape_cast %1461 : vector<1x8x8xbf16> to vector<8x8xbf16>
    %cst_520 = arith.constant dense<0.000000e+00> : vector<8x128xf32>
    %1463 = tpu.matmul %1462, %1460, %cst_520 {dimension_numbers = #tpu.dot_dimension_numbers<[1], [0], [0], [1], [0, 0, 1, 1], [], []>} : vector<8x8xbf16>, vector<8x128xbf16>, vector<8x128xf32> -> vector<8x128xf32>
    %1464 = arith.addf %1451, %1463 : vector<8x128xf32>
    %cst_521 = arith.constant 0.000000e+00 : bf16
    %1465 = vector.broadcast %cst_521 : bf16 to vector<8x1xbf16>
    %1466 = vector.extract_strided_slice %1340 {offsets = [0, 1], sizes = [8, 127], strides = [1, 1]} : vector<8x128xbf16> to vector<8x127xbf16>
    %1467 = tpu.concatenate %1466, %1465 in 1 : vector<8x127xbf16>, vector<8x1xbf16> -> vector<8x128xbf16>
    %cst_522 = arith.constant 0.000000e+00 : bf16
    %1468 = vector.broadcast %cst_522 : bf16 to vector<8x128xbf16>
    %1469 = vector.shape_cast %1453 : vector<1x128xi1> to vector<1x128xi1>
    %1470 = vector.broadcast %1469 : vector<1x128xi1> to vector<8x128xi1>
    %1471 = arith.select %1470, %1467, %1468 : vector<8x128xi1>, vector<8x128xbf16>
    %1472 = vector.extract_strided_slice %1336 {offsets = [5, 0, 8], sizes = [1, 8, 8], strides = [1, 1, 1]} : vector<9x8x16xbf16> to vector<1x8x8xbf16>
    %1473 = vector.shape_cast %1472 : vector<1x8x8xbf16> to vector<8x8xbf16>
    %cst_523 = arith.constant dense<0.000000e+00> : vector<8x128xf32>
    %1474 = tpu.matmul %1473, %1471, %cst_523 {dimension_numbers = #tpu.dot_dimension_numbers<[1], [0], [0], [1], [0, 0, 1, 1], [], []>} : vector<8x8xbf16>, vector<8x128xbf16>, vector<8x128xf32> -> vector<8x128xf32>
    %1475 = arith.addf %1464, %1474 : vector<8x128xf32>
    %c7_i32_524 = arith.constant 7 : i32
    %1476 = vector.broadcast %c7_i32_524 : i32 to vector<1x128xi32>
    %1477 = arith.cmpi slt, %1337, %1476 : vector<1x128xi32>
    %c1_i32_525 = arith.constant 1 : i32
    %1478 = vector.broadcast %c1_i32_525 : i32 to vector<1x128xi32>
    %1479 = arith.cmpi sge, %1338, %1478 : vector<1x128xi32>
    %1480 = arith.andi %1477, %1479 : vector<1x128xi1>
    %cst_526 = arith.constant 0.000000e+00 : bf16
    %1481 = vector.broadcast %cst_526 : bf16 to vector<8x7xbf16>
    %1482 = vector.extract_strided_slice %1339 {offsets = [0, 7], sizes = [8, 121], strides = [1, 1]} : vector<8x128xbf16> to vector<8x121xbf16>
    %1483 = tpu.concatenate %1482, %1481 in 1 : vector<8x121xbf16>, vector<8x7xbf16> -> vector<8x128xbf16>
    %cst_527 = arith.constant 0.000000e+00 : bf16
    %1484 = vector.broadcast %cst_527 : bf16 to vector<8x128xbf16>
    %1485 = vector.shape_cast %1480 : vector<1x128xi1> to vector<1x128xi1>
    %1486 = vector.broadcast %1485 : vector<1x128xi1> to vector<8x128xi1>
    %1487 = arith.select %1486, %1483, %1484 : vector<8x128xi1>, vector<8x128xbf16>
    %1488 = vector.extract_strided_slice %1336 {offsets = [6, 0, 0], sizes = [1, 8, 8], strides = [1, 1, 1]} : vector<9x8x16xbf16> to vector<1x8x8xbf16>
    %1489 = vector.shape_cast %1488 : vector<1x8x8xbf16> to vector<8x8xbf16>
    %cst_528 = arith.constant dense<0.000000e+00> : vector<8x128xf32>
    %1490 = tpu.matmul %1489, %1487, %cst_528 {dimension_numbers = #tpu.dot_dimension_numbers<[1], [0], [0], [1], [0, 0, 1, 1], [], []>} : vector<8x8xbf16>, vector<8x128xbf16>, vector<8x128xf32> -> vector<8x128xf32>
    %1491 = arith.addf %1475, %1490 : vector<8x128xf32>
    %cst_529 = arith.constant 0.000000e+00 : bf16
    %1492 = vector.broadcast %cst_529 : bf16 to vector<8x7xbf16>
    %1493 = vector.extract_strided_slice %1340 {offsets = [0, 7], sizes = [8, 121], strides = [1, 1]} : vector<8x128xbf16> to vector<8x121xbf16>
    %1494 = tpu.concatenate %1493, %1492 in 1 : vector<8x121xbf16>, vector<8x7xbf16> -> vector<8x128xbf16>
    %cst_530 = arith.constant 0.000000e+00 : bf16
    %1495 = vector.broadcast %cst_530 : bf16 to vector<8x128xbf16>
    %1496 = vector.shape_cast %1480 : vector<1x128xi1> to vector<1x128xi1>
    %1497 = vector.broadcast %1496 : vector<1x128xi1> to vector<8x128xi1>
    %1498 = arith.select %1497, %1494, %1495 : vector<8x128xi1>, vector<8x128xbf16>
    %1499 = vector.extract_strided_slice %1336 {offsets = [6, 0, 8], sizes = [1, 8, 8], strides = [1, 1, 1]} : vector<9x8x16xbf16> to vector<1x8x8xbf16>
    %1500 = vector.shape_cast %1499 : vector<1x8x8xbf16> to vector<8x8xbf16>
    %cst_531 = arith.constant dense<0.000000e+00> : vector<8x128xf32>
    %1501 = tpu.matmul %1500, %1498, %cst_531 {dimension_numbers = #tpu.dot_dimension_numbers<[1], [0], [0], [1], [0, 0, 1, 1], [], []>} : vector<8x8xbf16>, vector<8x128xbf16>, vector<8x128xf32> -> vector<8x128xf32>
    %1502 = arith.addf %1491, %1501 : vector<8x128xf32>
    %c7_i32_532 = arith.constant 7 : i32
    %1503 = vector.broadcast %c7_i32_532 : i32 to vector<1x128xi32>
    %1504 = arith.cmpi slt, %1337, %1503 : vector<1x128xi32>
    %cst_533 = arith.constant 0.000000e+00 : bf16
    %1505 = vector.broadcast %cst_533 : bf16 to vector<8x8xbf16>
    %1506 = vector.extract_strided_slice %1339 {offsets = [0, 8], sizes = [8, 120], strides = [1, 1]} : vector<8x128xbf16> to vector<8x120xbf16>
    %1507 = tpu.concatenate %1506, %1505 in 1 : vector<8x120xbf16>, vector<8x8xbf16> -> vector<8x128xbf16>
    %cst_534 = arith.constant 0.000000e+00 : bf16
    %1508 = vector.broadcast %cst_534 : bf16 to vector<8x128xbf16>
    %1509 = vector.shape_cast %1504 : vector<1x128xi1> to vector<1x128xi1>
    %1510 = vector.broadcast %1509 : vector<1x128xi1> to vector<8x128xi1>
    %1511 = arith.select %1510, %1507, %1508 : vector<8x128xi1>, vector<8x128xbf16>
    %1512 = vector.extract_strided_slice %1336 {offsets = [7, 0, 0], sizes = [1, 8, 8], strides = [1, 1, 1]} : vector<9x8x16xbf16> to vector<1x8x8xbf16>
    %1513 = vector.shape_cast %1512 : vector<1x8x8xbf16> to vector<8x8xbf16>
    %cst_535 = arith.constant dense<0.000000e+00> : vector<8x128xf32>
    %1514 = tpu.matmul %1513, %1511, %cst_535 {dimension_numbers = #tpu.dot_dimension_numbers<[1], [0], [0], [1], [0, 0, 1, 1], [], []>} : vector<8x8xbf16>, vector<8x128xbf16>, vector<8x128xf32> -> vector<8x128xf32>
    %1515 = arith.addf %1502, %1514 : vector<8x128xf32>
    %cst_536 = arith.constant 0.000000e+00 : bf16
    %1516 = vector.broadcast %cst_536 : bf16 to vector<8x8xbf16>
    %1517 = vector.extract_strided_slice %1340 {offsets = [0, 8], sizes = [8, 120], strides = [1, 1]} : vector<8x128xbf16> to vector<8x120xbf16>
    %1518 = tpu.concatenate %1517, %1516 in 1 : vector<8x120xbf16>, vector<8x8xbf16> -> vector<8x128xbf16>
    %cst_537 = arith.constant 0.000000e+00 : bf16
    %1519 = vector.broadcast %cst_537 : bf16 to vector<8x128xbf16>
    %1520 = vector.shape_cast %1504 : vector<1x128xi1> to vector<1x128xi1>
    %1521 = vector.broadcast %1520 : vector<1x128xi1> to vector<8x128xi1>
    %1522 = arith.select %1521, %1518, %1519 : vector<8x128xi1>, vector<8x128xbf16>
    %1523 = vector.extract_strided_slice %1336 {offsets = [7, 0, 8], sizes = [1, 8, 8], strides = [1, 1, 1]} : vector<9x8x16xbf16> to vector<1x8x8xbf16>
    %1524 = vector.shape_cast %1523 : vector<1x8x8xbf16> to vector<8x8xbf16>
    %cst_538 = arith.constant dense<0.000000e+00> : vector<8x128xf32>
    %1525 = tpu.matmul %1524, %1522, %cst_538 {dimension_numbers = #tpu.dot_dimension_numbers<[1], [0], [0], [1], [0, 0, 1, 1], [], []>} : vector<8x8xbf16>, vector<8x128xbf16>, vector<8x128xf32> -> vector<8x128xf32>
    %1526 = arith.addf %1515, %1525 : vector<8x128xf32>
    %c7_i32_539 = arith.constant 7 : i32
    %1527 = vector.broadcast %c7_i32_539 : i32 to vector<1x128xi32>
    %1528 = arith.cmpi slt, %1337, %1527 : vector<1x128xi32>
    %c7_i32_540 = arith.constant 7 : i32
    %1529 = vector.broadcast %c7_i32_540 : i32 to vector<1x128xi32>
    %1530 = arith.cmpi slt, %1338, %1529 : vector<1x128xi32>
    %1531 = arith.andi %1528, %1530 : vector<1x128xi1>
    %cst_541 = arith.constant 0.000000e+00 : bf16
    %1532 = vector.broadcast %cst_541 : bf16 to vector<8x9xbf16>
    %1533 = vector.extract_strided_slice %1339 {offsets = [0, 9], sizes = [8, 119], strides = [1, 1]} : vector<8x128xbf16> to vector<8x119xbf16>
    %1534 = tpu.concatenate %1533, %1532 in 1 : vector<8x119xbf16>, vector<8x9xbf16> -> vector<8x128xbf16>
    %cst_542 = arith.constant 0.000000e+00 : bf16
    %1535 = vector.broadcast %cst_542 : bf16 to vector<8x128xbf16>
    %1536 = vector.shape_cast %1531 : vector<1x128xi1> to vector<1x128xi1>
    %1537 = vector.broadcast %1536 : vector<1x128xi1> to vector<8x128xi1>
    %1538 = arith.select %1537, %1534, %1535 : vector<8x128xi1>, vector<8x128xbf16>
    %1539 = vector.extract_strided_slice %1336 {offsets = [8, 0, 0], sizes = [1, 8, 8], strides = [1, 1, 1]} : vector<9x8x16xbf16> to vector<1x8x8xbf16>
    %1540 = vector.shape_cast %1539 : vector<1x8x8xbf16> to vector<8x8xbf16>
    %cst_543 = arith.constant dense<0.000000e+00> : vector<8x128xf32>
    %1541 = tpu.matmul %1540, %1538, %cst_543 {dimension_numbers = #tpu.dot_dimension_numbers<[1], [0], [0], [1], [0, 0, 1, 1], [], []>} : vector<8x8xbf16>, vector<8x128xbf16>, vector<8x128xf32> -> vector<8x128xf32>
    %1542 = arith.addf %1526, %1541 : vector<8x128xf32>
    %cst_544 = arith.constant 0.000000e+00 : bf16
    %1543 = vector.broadcast %cst_544 : bf16 to vector<8x9xbf16>
    %1544 = vector.extract_strided_slice %1340 {offsets = [0, 9], sizes = [8, 119], strides = [1, 1]} : vector<8x128xbf16> to vector<8x119xbf16>
    %1545 = tpu.concatenate %1544, %1543 in 1 : vector<8x119xbf16>, vector<8x9xbf16> -> vector<8x128xbf16>
    %cst_545 = arith.constant 0.000000e+00 : bf16
    %1546 = vector.broadcast %cst_545 : bf16 to vector<8x128xbf16>
    %1547 = vector.shape_cast %1531 : vector<1x128xi1> to vector<1x128xi1>
    %1548 = vector.broadcast %1547 : vector<1x128xi1> to vector<8x128xi1>
    %1549 = arith.select %1548, %1545, %1546 : vector<8x128xi1>, vector<8x128xbf16>
    %1550 = vector.extract_strided_slice %1336 {offsets = [8, 0, 8], sizes = [1, 8, 8], strides = [1, 1, 1]} : vector<9x8x16xbf16> to vector<1x8x8xbf16>
    %1551 = vector.shape_cast %1550 : vector<1x8x8xbf16> to vector<8x8xbf16>
    %cst_546 = arith.constant dense<0.000000e+00> : vector<8x128xf32>
    %1552 = tpu.matmul %1551, %1549, %cst_546 {dimension_numbers = #tpu.dot_dimension_numbers<[1], [0], [0], [1], [0, 0, 1, 1], [], []>} : vector<8x8xbf16>, vector<8x128xbf16>, vector<8x128xf32> -> vector<8x128xf32>
    %1553 = arith.addf %1542, %1552 : vector<8x128xf32>
    %cst_547 = arith.constant dense<0.000000e+00> : vector<8xf32>
    %1554 = vector.multi_reduction <add>, %1553, %cst_547 [1] : vector<8x128xf32> to vector<8xf32>
    %1555 = vector.shape_cast %1554 : vector<8xf32> to vector<8x1xf32>
    %1556 = arith.mulf %1553, %1553 : vector<8x128xf32>
    %cst_548 = arith.constant dense<0.000000e+00> : vector<8xf32>
    %1557 = vector.multi_reduction <add>, %1556, %cst_548 [1] : vector<8x128xf32> to vector<8xf32>
    %1558 = vector.shape_cast %1557 : vector<8xf32> to vector<8x1xf32>
    %cst_549 = arith.constant 1.280000e+02 : f32
    %1559 = vector.broadcast %cst_549 : f32 to vector<8x1xf32>
    %1560 = arith.divf %1555, %1559 : vector<8x1xf32>
    %cst_550 = arith.constant 1.280000e+02 : f32
    %1561 = vector.broadcast %cst_550 : f32 to vector<8x1xf32>
    %1562 = arith.divf %1558, %1561 : vector<8x1xf32>
    %1563 = arith.mulf %1560, %1560 : vector<8x1xf32>
    %1564 = arith.subf %1562, %1563 : vector<8x1xf32>
    %cst_551 = arith.constant 0.000000e+00 : f32
    %1565 = vector.broadcast %cst_551 : f32 to vector<8x1xf32>
    %1566 = arith.maximumf %1564, %1565 : vector<8x1xf32>
    %c0_552 = arith.constant 0 : index
    %c0_553 = arith.constant 0 : index
    %1567 = vector.load %arg26[%c0_552, %c0_553] : memref<8x1xf32, #tpu.memory_space<vmem>>, vector<8x1xf32>
    %cst_554 = arith.constant 9.99999974E-6 : f32
    %1568 = vector.broadcast %cst_554 : f32 to vector<8x1xf32>
    %1569 = arith.addf %1566, %1568 : vector<8x1xf32>
    %1570 = math.rsqrt %1569 : vector<8x1xf32>
    %1571 = arith.mulf %1567, %1570 : vector<8x1xf32>
    %c0_555 = arith.constant 0 : index
    %c0_556 = arith.constant 0 : index
    %1572 = vector.load %arg27[%c0_555, %c0_556] : memref<8x1xf32, #tpu.memory_space<vmem>>, vector<8x1xf32>
    %1573 = arith.mulf %1560, %1571 : vector<8x1xf32>
    %1574 = arith.subf %1572, %1573 : vector<8x1xf32>
    %1575 = vector.broadcast %1571 : vector<8x1xf32> to vector<8x128xf32>
    %1576 = arith.mulf %1553, %1575 : vector<8x128xf32>
    %1577 = vector.broadcast %1574 : vector<8x1xf32> to vector<8x128xf32>
    %1578 = arith.addf %1576, %1577 : vector<8x128xf32>
    %cst_557 = arith.constant 0.000000e+00 : f32
    %1579 = vector.broadcast %cst_557 : f32 to vector<8x128xf32>
    %1580 = arith.maximumf %1578, %1579 : vector<8x128xf32>
    %1581 = arith.truncf %1580 : vector<8x128xf32> to vector<8x128xbf16>
    %c0_558 = arith.constant 0 : index
    %c0_559 = arith.constant 0 : index
    %1582 = vector.load %arg40[%c0_558, %c0_559] : memref<128x512xbf16, #tpu.memory_space<vmem>>, vector<128x512xbf16>
    %cst_560 = arith.constant dense<0.000000e+00> : vector<8x512xf32>
    %1583 = tpu.matmul %1581, %1582, %cst_560 {dimension_numbers = #tpu.dot_dimension_numbers<[1], [0], [0], [1], [0, 0, 1, 1], [], []>} : vector<8x128xbf16>, vector<128x512xbf16>, vector<8x512xf32> -> vector<8x512xf32>
    %c0_561 = arith.constant 0 : index
    %c0_562 = arith.constant 0 : index
    %c0_563 = arith.constant 0 : index
    %1584 = vector.load %arg28[%c0_561, %c0_562, %c0_563] : memref<9x4x16xbf16, #tpu.memory_space<vmem>>, vector<9x4x16xbf16>
    %c0_564 = arith.constant 0 : index
    %c0_565 = arith.constant 0 : index
    %1585 = vector.load %arg31[%c0_564, %c0_565] : memref<2x512xi32, #tpu.memory_space<vmem>>, vector<1x512xi32>
    %c1_566 = arith.constant 1 : index
    %c0_567 = arith.constant 0 : index
    %1586 = vector.load %arg31[%c1_566, %c0_567] : memref<2x512xi32, #tpu.memory_space<vmem>>, vector<1x512xi32>
    %1587 = arith.truncf %1583 : vector<8x512xf32> to vector<8x512xbf16>
    %1588 = arith.truncf %304 : vector<8x512xf32> to vector<8x512xbf16>
    %cst_568 = arith.constant 0.000000e+00 : f32
    %1589 = vector.broadcast %cst_568 : f32 to vector<4x512xf32>
    %c1_i32_569 = arith.constant 1 : i32
    %1590 = vector.broadcast %c1_i32_569 : i32 to vector<1x512xi32>
    %1591 = arith.cmpi sge, %1585, %1590 : vector<1x512xi32>
    %c1_i32_570 = arith.constant 1 : i32
    %1592 = vector.broadcast %c1_i32_570 : i32 to vector<1x512xi32>
    %1593 = arith.cmpi sge, %1586, %1592 : vector<1x512xi32>
    %1594 = arith.andi %1591, %1593 : vector<1x512xi1>
    %cst_571 = arith.constant 0.000000e+00 : bf16
    %1595 = vector.broadcast %cst_571 : bf16 to vector<8x17xbf16>
    %1596 = vector.extract_strided_slice %1587 {offsets = [0, 0], sizes = [8, 495], strides = [1, 1]} : vector<8x512xbf16> to vector<8x495xbf16>
    %1597 = tpu.concatenate %1595, %1596 in 1 : vector<8x17xbf16>, vector<8x495xbf16> -> vector<8x512xbf16>
    %cst_572 = arith.constant 0.000000e+00 : bf16
    %1598 = vector.broadcast %cst_572 : bf16 to vector<8x512xbf16>
    %1599 = vector.shape_cast %1594 : vector<1x512xi1> to vector<1x512xi1>
    %1600 = vector.broadcast %1599 : vector<1x512xi1> to vector<8x512xi1>
    %1601 = arith.select %1600, %1597, %1598 : vector<8x512xi1>, vector<8x512xbf16>
    %1602 = vector.extract_strided_slice %1584 {offsets = [0, 0, 0], sizes = [1, 4, 8], strides = [1, 1, 1]} : vector<9x4x16xbf16> to vector<1x4x8xbf16>
    %1603 = vector.shape_cast %1602 : vector<1x4x8xbf16> to vector<4x8xbf16>
    %cst_573 = arith.constant dense<0.000000e+00> : vector<4x512xf32>
    %1604 = tpu.matmul %1603, %1601, %cst_573 {dimension_numbers = #tpu.dot_dimension_numbers<[1], [0], [0], [1], [0, 0, 1, 1], [], []>} : vector<4x8xbf16>, vector<8x512xbf16>, vector<4x512xf32> -> vector<4x512xf32>
    %1605 = arith.addf %1589, %1604 : vector<4x512xf32>
    %cst_574 = arith.constant 0.000000e+00 : bf16
    %1606 = vector.broadcast %cst_574 : bf16 to vector<8x17xbf16>
    %1607 = vector.extract_strided_slice %1588 {offsets = [0, 0], sizes = [8, 495], strides = [1, 1]} : vector<8x512xbf16> to vector<8x495xbf16>
    %1608 = tpu.concatenate %1606, %1607 in 1 : vector<8x17xbf16>, vector<8x495xbf16> -> vector<8x512xbf16>
    %cst_575 = arith.constant 0.000000e+00 : bf16
    %1609 = vector.broadcast %cst_575 : bf16 to vector<8x512xbf16>
    %1610 = vector.shape_cast %1594 : vector<1x512xi1> to vector<1x512xi1>
    %1611 = vector.broadcast %1610 : vector<1x512xi1> to vector<8x512xi1>
    %1612 = arith.select %1611, %1608, %1609 : vector<8x512xi1>, vector<8x512xbf16>
    %1613 = vector.extract_strided_slice %1584 {offsets = [0, 0, 8], sizes = [1, 4, 8], strides = [1, 1, 1]} : vector<9x4x16xbf16> to vector<1x4x8xbf16>
    %1614 = vector.shape_cast %1613 : vector<1x4x8xbf16> to vector<4x8xbf16>
    %cst_576 = arith.constant dense<0.000000e+00> : vector<4x512xf32>
    %1615 = tpu.matmul %1614, %1612, %cst_576 {dimension_numbers = #tpu.dot_dimension_numbers<[1], [0], [0], [1], [0, 0, 1, 1], [], []>} : vector<4x8xbf16>, vector<8x512xbf16>, vector<4x512xf32> -> vector<4x512xf32>
    %1616 = arith.addf %1605, %1615 : vector<4x512xf32>
    %c1_i32_577 = arith.constant 1 : i32
    %1617 = vector.broadcast %c1_i32_577 : i32 to vector<1x512xi32>
    %1618 = arith.cmpi sge, %1585, %1617 : vector<1x512xi32>
    %cst_578 = arith.constant 0.000000e+00 : bf16
    %1619 = vector.broadcast %cst_578 : bf16 to vector<8x16xbf16>
    %1620 = vector.extract_strided_slice %1587 {offsets = [0, 0], sizes = [8, 496], strides = [1, 1]} : vector<8x512xbf16> to vector<8x496xbf16>
    %1621 = tpu.concatenate %1619, %1620 in 1 : vector<8x16xbf16>, vector<8x496xbf16> -> vector<8x512xbf16>
    %cst_579 = arith.constant 0.000000e+00 : bf16
    %1622 = vector.broadcast %cst_579 : bf16 to vector<8x512xbf16>
    %1623 = vector.shape_cast %1618 : vector<1x512xi1> to vector<1x512xi1>
    %1624 = vector.broadcast %1623 : vector<1x512xi1> to vector<8x512xi1>
    %1625 = arith.select %1624, %1621, %1622 : vector<8x512xi1>, vector<8x512xbf16>
    %1626 = vector.extract_strided_slice %1584 {offsets = [1, 0, 0], sizes = [1, 4, 8], strides = [1, 1, 1]} : vector<9x4x16xbf16> to vector<1x4x8xbf16>
    %1627 = vector.shape_cast %1626 : vector<1x4x8xbf16> to vector<4x8xbf16>
    %cst_580 = arith.constant dense<0.000000e+00> : vector<4x512xf32>
    %1628 = tpu.matmul %1627, %1625, %cst_580 {dimension_numbers = #tpu.dot_dimension_numbers<[1], [0], [0], [1], [0, 0, 1, 1], [], []>} : vector<4x8xbf16>, vector<8x512xbf16>, vector<4x512xf32> -> vector<4x512xf32>
    %1629 = arith.addf %1616, %1628 : vector<4x512xf32>
    %cst_581 = arith.constant 0.000000e+00 : bf16
    %1630 = vector.broadcast %cst_581 : bf16 to vector<8x16xbf16>
    %1631 = vector.extract_strided_slice %1588 {offsets = [0, 0], sizes = [8, 496], strides = [1, 1]} : vector<8x512xbf16> to vector<8x496xbf16>
    %1632 = tpu.concatenate %1630, %1631 in 1 : vector<8x16xbf16>, vector<8x496xbf16> -> vector<8x512xbf16>
    %cst_582 = arith.constant 0.000000e+00 : bf16
    %1633 = vector.broadcast %cst_582 : bf16 to vector<8x512xbf16>
    %1634 = vector.shape_cast %1618 : vector<1x512xi1> to vector<1x512xi1>
    %1635 = vector.broadcast %1634 : vector<1x512xi1> to vector<8x512xi1>
    %1636 = arith.select %1635, %1632, %1633 : vector<8x512xi1>, vector<8x512xbf16>
    %1637 = vector.extract_strided_slice %1584 {offsets = [1, 0, 8], sizes = [1, 4, 8], strides = [1, 1, 1]} : vector<9x4x16xbf16> to vector<1x4x8xbf16>
    %1638 = vector.shape_cast %1637 : vector<1x4x8xbf16> to vector<4x8xbf16>
    %cst_583 = arith.constant dense<0.000000e+00> : vector<4x512xf32>
    %1639 = tpu.matmul %1638, %1636, %cst_583 {dimension_numbers = #tpu.dot_dimension_numbers<[1], [0], [0], [1], [0, 0, 1, 1], [], []>} : vector<4x8xbf16>, vector<8x512xbf16>, vector<4x512xf32> -> vector<4x512xf32>
    %1640 = arith.addf %1629, %1639 : vector<4x512xf32>
    %c1_i32_584 = arith.constant 1 : i32
    %1641 = vector.broadcast %c1_i32_584 : i32 to vector<1x512xi32>
    %1642 = arith.cmpi sge, %1585, %1641 : vector<1x512xi32>
    %c15_i32_585 = arith.constant 15 : i32
    %1643 = vector.broadcast %c15_i32_585 : i32 to vector<1x512xi32>
    %1644 = arith.cmpi slt, %1586, %1643 : vector<1x512xi32>
    %1645 = arith.andi %1642, %1644 : vector<1x512xi1>
    %cst_586 = arith.constant 0.000000e+00 : bf16
    %1646 = vector.broadcast %cst_586 : bf16 to vector<8x15xbf16>
    %1647 = vector.extract_strided_slice %1587 {offsets = [0, 0], sizes = [8, 497], strides = [1, 1]} : vector<8x512xbf16> to vector<8x497xbf16>
    %1648 = tpu.concatenate %1646, %1647 in 1 : vector<8x15xbf16>, vector<8x497xbf16> -> vector<8x512xbf16>
    %cst_587 = arith.constant 0.000000e+00 : bf16
    %1649 = vector.broadcast %cst_587 : bf16 to vector<8x512xbf16>
    %1650 = vector.shape_cast %1645 : vector<1x512xi1> to vector<1x512xi1>
    %1651 = vector.broadcast %1650 : vector<1x512xi1> to vector<8x512xi1>
    %1652 = arith.select %1651, %1648, %1649 : vector<8x512xi1>, vector<8x512xbf16>
    %1653 = vector.extract_strided_slice %1584 {offsets = [2, 0, 0], sizes = [1, 4, 8], strides = [1, 1, 1]} : vector<9x4x16xbf16> to vector<1x4x8xbf16>
    %1654 = vector.shape_cast %1653 : vector<1x4x8xbf16> to vector<4x8xbf16>
    %cst_588 = arith.constant dense<0.000000e+00> : vector<4x512xf32>
    %1655 = tpu.matmul %1654, %1652, %cst_588 {dimension_numbers = #tpu.dot_dimension_numbers<[1], [0], [0], [1], [0, 0, 1, 1], [], []>} : vector<4x8xbf16>, vector<8x512xbf16>, vector<4x512xf32> -> vector<4x512xf32>
    %1656 = arith.addf %1640, %1655 : vector<4x512xf32>
    %cst_589 = arith.constant 0.000000e+00 : bf16
    %1657 = vector.broadcast %cst_589 : bf16 to vector<8x15xbf16>
    %1658 = vector.extract_strided_slice %1588 {offsets = [0, 0], sizes = [8, 497], strides = [1, 1]} : vector<8x512xbf16> to vector<8x497xbf16>
    %1659 = tpu.concatenate %1657, %1658 in 1 : vector<8x15xbf16>, vector<8x497xbf16> -> vector<8x512xbf16>
    %cst_590 = arith.constant 0.000000e+00 : bf16
    %1660 = vector.broadcast %cst_590 : bf16 to vector<8x512xbf16>
    %1661 = vector.shape_cast %1645 : vector<1x512xi1> to vector<1x512xi1>
    %1662 = vector.broadcast %1661 : vector<1x512xi1> to vector<8x512xi1>
    %1663 = arith.select %1662, %1659, %1660 : vector<8x512xi1>, vector<8x512xbf16>
    %1664 = vector.extract_strided_slice %1584 {offsets = [2, 0, 8], sizes = [1, 4, 8], strides = [1, 1, 1]} : vector<9x4x16xbf16> to vector<1x4x8xbf16>
    %1665 = vector.shape_cast %1664 : vector<1x4x8xbf16> to vector<4x8xbf16>
    %cst_591 = arith.constant dense<0.000000e+00> : vector<4x512xf32>
    %1666 = tpu.matmul %1665, %1663, %cst_591 {dimension_numbers = #tpu.dot_dimension_numbers<[1], [0], [0], [1], [0, 0, 1, 1], [], []>} : vector<4x8xbf16>, vector<8x512xbf16>, vector<4x512xf32> -> vector<4x512xf32>
    %1667 = arith.addf %1656, %1666 : vector<4x512xf32>
    %c1_i32_592 = arith.constant 1 : i32
    %1668 = vector.broadcast %c1_i32_592 : i32 to vector<1x512xi32>
    %1669 = arith.cmpi sge, %1586, %1668 : vector<1x512xi32>
    %cst_593 = arith.constant 0.000000e+00 : bf16
    %1670 = vector.broadcast %cst_593 : bf16 to vector<8x1xbf16>
    %1671 = vector.extract_strided_slice %1587 {offsets = [0, 0], sizes = [8, 511], strides = [1, 1]} : vector<8x512xbf16> to vector<8x511xbf16>
    %1672 = tpu.concatenate %1670, %1671 in 1 : vector<8x1xbf16>, vector<8x511xbf16> -> vector<8x512xbf16>
    %cst_594 = arith.constant 0.000000e+00 : bf16
    %1673 = vector.broadcast %cst_594 : bf16 to vector<8x512xbf16>
    %1674 = vector.shape_cast %1669 : vector<1x512xi1> to vector<1x512xi1>
    %1675 = vector.broadcast %1674 : vector<1x512xi1> to vector<8x512xi1>
    %1676 = arith.select %1675, %1672, %1673 : vector<8x512xi1>, vector<8x512xbf16>
    %1677 = vector.extract_strided_slice %1584 {offsets = [3, 0, 0], sizes = [1, 4, 8], strides = [1, 1, 1]} : vector<9x4x16xbf16> to vector<1x4x8xbf16>
    %1678 = vector.shape_cast %1677 : vector<1x4x8xbf16> to vector<4x8xbf16>
    %cst_595 = arith.constant dense<0.000000e+00> : vector<4x512xf32>
    %1679 = tpu.matmul %1678, %1676, %cst_595 {dimension_numbers = #tpu.dot_dimension_numbers<[1], [0], [0], [1], [0, 0, 1, 1], [], []>} : vector<4x8xbf16>, vector<8x512xbf16>, vector<4x512xf32> -> vector<4x512xf32>
    %1680 = arith.addf %1667, %1679 : vector<4x512xf32>
    %cst_596 = arith.constant 0.000000e+00 : bf16
    %1681 = vector.broadcast %cst_596 : bf16 to vector<8x1xbf16>
    %1682 = vector.extract_strided_slice %1588 {offsets = [0, 0], sizes = [8, 511], strides = [1, 1]} : vector<8x512xbf16> to vector<8x511xbf16>
    %1683 = tpu.concatenate %1681, %1682 in 1 : vector<8x1xbf16>, vector<8x511xbf16> -> vector<8x512xbf16>
    %cst_597 = arith.constant 0.000000e+00 : bf16
    %1684 = vector.broadcast %cst_597 : bf16 to vector<8x512xbf16>
    %1685 = vector.shape_cast %1669 : vector<1x512xi1> to vector<1x512xi1>
    %1686 = vector.broadcast %1685 : vector<1x512xi1> to vector<8x512xi1>
    %1687 = arith.select %1686, %1683, %1684 : vector<8x512xi1>, vector<8x512xbf16>
    %1688 = vector.extract_strided_slice %1584 {offsets = [3, 0, 8], sizes = [1, 4, 8], strides = [1, 1, 1]} : vector<9x4x16xbf16> to vector<1x4x8xbf16>
    %1689 = vector.shape_cast %1688 : vector<1x4x8xbf16> to vector<4x8xbf16>
    %cst_598 = arith.constant dense<0.000000e+00> : vector<4x512xf32>
    %1690 = tpu.matmul %1689, %1687, %cst_598 {dimension_numbers = #tpu.dot_dimension_numbers<[1], [0], [0], [1], [0, 0, 1, 1], [], []>} : vector<4x8xbf16>, vector<8x512xbf16>, vector<4x512xf32> -> vector<4x512xf32>
    %1691 = arith.addf %1680, %1690 : vector<4x512xf32>
    %1692 = vector.extract_strided_slice %1584 {offsets = [4, 0, 0], sizes = [1, 4, 8], strides = [1, 1, 1]} : vector<9x4x16xbf16> to vector<1x4x8xbf16>
    %1693 = vector.shape_cast %1692 : vector<1x4x8xbf16> to vector<4x8xbf16>
    %cst_599 = arith.constant dense<0.000000e+00> : vector<4x512xf32>
    %1694 = tpu.matmul %1693, %1587, %cst_599 {dimension_numbers = #tpu.dot_dimension_numbers<[1], [0], [0], [1], [0, 0, 1, 1], [], []>} : vector<4x8xbf16>, vector<8x512xbf16>, vector<4x512xf32> -> vector<4x512xf32>
    %1695 = arith.addf %1691, %1694 : vector<4x512xf32>
    %1696 = vector.extract_strided_slice %1584 {offsets = [4, 0, 8], sizes = [1, 4, 8], strides = [1, 1, 1]} : vector<9x4x16xbf16> to vector<1x4x8xbf16>
    %1697 = vector.shape_cast %1696 : vector<1x4x8xbf16> to vector<4x8xbf16>
    %cst_600 = arith.constant dense<0.000000e+00> : vector<4x512xf32>
    %1698 = tpu.matmul %1697, %1588, %cst_600 {dimension_numbers = #tpu.dot_dimension_numbers<[1], [0], [0], [1], [0, 0, 1, 1], [], []>} : vector<4x8xbf16>, vector<8x512xbf16>, vector<4x512xf32> -> vector<4x512xf32>
    %1699 = arith.addf %1695, %1698 : vector<4x512xf32>
    %c15_i32_601 = arith.constant 15 : i32
    %1700 = vector.broadcast %c15_i32_601 : i32 to vector<1x512xi32>
    %1701 = arith.cmpi slt, %1586, %1700 : vector<1x512xi32>
    %cst_602 = arith.constant 0.000000e+00 : bf16
    %1702 = vector.broadcast %cst_602 : bf16 to vector<8x1xbf16>
    %1703 = vector.extract_strided_slice %1587 {offsets = [0, 1], sizes = [8, 511], strides = [1, 1]} : vector<8x512xbf16> to vector<8x511xbf16>
    %1704 = tpu.concatenate %1703, %1702 in 1 : vector<8x511xbf16>, vector<8x1xbf16> -> vector<8x512xbf16>
    %cst_603 = arith.constant 0.000000e+00 : bf16
    %1705 = vector.broadcast %cst_603 : bf16 to vector<8x512xbf16>
    %1706 = vector.shape_cast %1701 : vector<1x512xi1> to vector<1x512xi1>
    %1707 = vector.broadcast %1706 : vector<1x512xi1> to vector<8x512xi1>
    %1708 = arith.select %1707, %1704, %1705 : vector<8x512xi1>, vector<8x512xbf16>
    %1709 = vector.extract_strided_slice %1584 {offsets = [5, 0, 0], sizes = [1, 4, 8], strides = [1, 1, 1]} : vector<9x4x16xbf16> to vector<1x4x8xbf16>
    %1710 = vector.shape_cast %1709 : vector<1x4x8xbf16> to vector<4x8xbf16>
    %cst_604 = arith.constant dense<0.000000e+00> : vector<4x512xf32>
    %1711 = tpu.matmul %1710, %1708, %cst_604 {dimension_numbers = #tpu.dot_dimension_numbers<[1], [0], [0], [1], [0, 0, 1, 1], [], []>} : vector<4x8xbf16>, vector<8x512xbf16>, vector<4x512xf32> -> vector<4x512xf32>
    %1712 = arith.addf %1699, %1711 : vector<4x512xf32>
    %cst_605 = arith.constant 0.000000e+00 : bf16
    %1713 = vector.broadcast %cst_605 : bf16 to vector<8x1xbf16>
    %1714 = vector.extract_strided_slice %1588 {offsets = [0, 1], sizes = [8, 511], strides = [1, 1]} : vector<8x512xbf16> to vector<8x511xbf16>
    %1715 = tpu.concatenate %1714, %1713 in 1 : vector<8x511xbf16>, vector<8x1xbf16> -> vector<8x512xbf16>
    %cst_606 = arith.constant 0.000000e+00 : bf16
    %1716 = vector.broadcast %cst_606 : bf16 to vector<8x512xbf16>
    %1717 = vector.shape_cast %1701 : vector<1x512xi1> to vector<1x512xi1>
    %1718 = vector.broadcast %1717 : vector<1x512xi1> to vector<8x512xi1>
    %1719 = arith.select %1718, %1715, %1716 : vector<8x512xi1>, vector<8x512xbf16>
    %1720 = vector.extract_strided_slice %1584 {offsets = [5, 0, 8], sizes = [1, 4, 8], strides = [1, 1, 1]} : vector<9x4x16xbf16> to vector<1x4x8xbf16>
    %1721 = vector.shape_cast %1720 : vector<1x4x8xbf16> to vector<4x8xbf16>
    %cst_607 = arith.constant dense<0.000000e+00> : vector<4x512xf32>
    %1722 = tpu.matmul %1721, %1719, %cst_607 {dimension_numbers = #tpu.dot_dimension_numbers<[1], [0], [0], [1], [0, 0, 1, 1], [], []>} : vector<4x8xbf16>, vector<8x512xbf16>, vector<4x512xf32> -> vector<4x512xf32>
    %1723 = arith.addf %1712, %1722 : vector<4x512xf32>
    %c15_i32_608 = arith.constant 15 : i32
    %1724 = vector.broadcast %c15_i32_608 : i32 to vector<1x512xi32>
    %1725 = arith.cmpi slt, %1585, %1724 : vector<1x512xi32>
    %c1_i32_609 = arith.constant 1 : i32
    %1726 = vector.broadcast %c1_i32_609 : i32 to vector<1x512xi32>
    %1727 = arith.cmpi sge, %1586, %1726 : vector<1x512xi32>
    %1728 = arith.andi %1725, %1727 : vector<1x512xi1>
    %cst_610 = arith.constant 0.000000e+00 : bf16
    %1729 = vector.broadcast %cst_610 : bf16 to vector<8x15xbf16>
    %1730 = vector.extract_strided_slice %1587 {offsets = [0, 15], sizes = [8, 497], strides = [1, 1]} : vector<8x512xbf16> to vector<8x497xbf16>
    %1731 = tpu.concatenate %1730, %1729 in 1 : vector<8x497xbf16>, vector<8x15xbf16> -> vector<8x512xbf16>
    %cst_611 = arith.constant 0.000000e+00 : bf16
    %1732 = vector.broadcast %cst_611 : bf16 to vector<8x512xbf16>
    %1733 = vector.shape_cast %1728 : vector<1x512xi1> to vector<1x512xi1>
    %1734 = vector.broadcast %1733 : vector<1x512xi1> to vector<8x512xi1>
    %1735 = arith.select %1734, %1731, %1732 : vector<8x512xi1>, vector<8x512xbf16>
    %1736 = vector.extract_strided_slice %1584 {offsets = [6, 0, 0], sizes = [1, 4, 8], strides = [1, 1, 1]} : vector<9x4x16xbf16> to vector<1x4x8xbf16>
    %1737 = vector.shape_cast %1736 : vector<1x4x8xbf16> to vector<4x8xbf16>
    %cst_612 = arith.constant dense<0.000000e+00> : vector<4x512xf32>
    %1738 = tpu.matmul %1737, %1735, %cst_612 {dimension_numbers = #tpu.dot_dimension_numbers<[1], [0], [0], [1], [0, 0, 1, 1], [], []>} : vector<4x8xbf16>, vector<8x512xbf16>, vector<4x512xf32> -> vector<4x512xf32>
    %1739 = arith.addf %1723, %1738 : vector<4x512xf32>
    %cst_613 = arith.constant 0.000000e+00 : bf16
    %1740 = vector.broadcast %cst_613 : bf16 to vector<8x15xbf16>
    %1741 = vector.extract_strided_slice %1588 {offsets = [0, 15], sizes = [8, 497], strides = [1, 1]} : vector<8x512xbf16> to vector<8x497xbf16>
    %1742 = tpu.concatenate %1741, %1740 in 1 : vector<8x497xbf16>, vector<8x15xbf16> -> vector<8x512xbf16>
    %cst_614 = arith.constant 0.000000e+00 : bf16
    %1743 = vector.broadcast %cst_614 : bf16 to vector<8x512xbf16>
    %1744 = vector.shape_cast %1728 : vector<1x512xi1> to vector<1x512xi1>
    %1745 = vector.broadcast %1744 : vector<1x512xi1> to vector<8x512xi1>
    %1746 = arith.select %1745, %1742, %1743 : vector<8x512xi1>, vector<8x512xbf16>
    %1747 = vector.extract_strided_slice %1584 {offsets = [6, 0, 8], sizes = [1, 4, 8], strides = [1, 1, 1]} : vector<9x4x16xbf16> to vector<1x4x8xbf16>
    %1748 = vector.shape_cast %1747 : vector<1x4x8xbf16> to vector<4x8xbf16>
    %cst_615 = arith.constant dense<0.000000e+00> : vector<4x512xf32>
    %1749 = tpu.matmul %1748, %1746, %cst_615 {dimension_numbers = #tpu.dot_dimension_numbers<[1], [0], [0], [1], [0, 0, 1, 1], [], []>} : vector<4x8xbf16>, vector<8x512xbf16>, vector<4x512xf32> -> vector<4x512xf32>
    %1750 = arith.addf %1739, %1749 : vector<4x512xf32>
    %c15_i32_616 = arith.constant 15 : i32
    %1751 = vector.broadcast %c15_i32_616 : i32 to vector<1x512xi32>
    %1752 = arith.cmpi slt, %1585, %1751 : vector<1x512xi32>
    %cst_617 = arith.constant 0.000000e+00 : bf16
    %1753 = vector.broadcast %cst_617 : bf16 to vector<8x16xbf16>
    %1754 = vector.extract_strided_slice %1587 {offsets = [0, 16], sizes = [8, 496], strides = [1, 1]} : vector<8x512xbf16> to vector<8x496xbf16>
    %1755 = tpu.concatenate %1754, %1753 in 1 : vector<8x496xbf16>, vector<8x16xbf16> -> vector<8x512xbf16>
    %cst_618 = arith.constant 0.000000e+00 : bf16
    %1756 = vector.broadcast %cst_618 : bf16 to vector<8x512xbf16>
    %1757 = vector.shape_cast %1752 : vector<1x512xi1> to vector<1x512xi1>
    %1758 = vector.broadcast %1757 : vector<1x512xi1> to vector<8x512xi1>
    %1759 = arith.select %1758, %1755, %1756 : vector<8x512xi1>, vector<8x512xbf16>
    %1760 = vector.extract_strided_slice %1584 {offsets = [7, 0, 0], sizes = [1, 4, 8], strides = [1, 1, 1]} : vector<9x4x16xbf16> to vector<1x4x8xbf16>
    %1761 = vector.shape_cast %1760 : vector<1x4x8xbf16> to vector<4x8xbf16>
    %cst_619 = arith.constant dense<0.000000e+00> : vector<4x512xf32>
    %1762 = tpu.matmul %1761, %1759, %cst_619 {dimension_numbers = #tpu.dot_dimension_numbers<[1], [0], [0], [1], [0, 0, 1, 1], [], []>} : vector<4x8xbf16>, vector<8x512xbf16>, vector<4x512xf32> -> vector<4x512xf32>
    %1763 = arith.addf %1750, %1762 : vector<4x512xf32>
    %cst_620 = arith.constant 0.000000e+00 : bf16
    %1764 = vector.broadcast %cst_620 : bf16 to vector<8x16xbf16>
    %1765 = vector.extract_strided_slice %1588 {offsets = [0, 16], sizes = [8, 496], strides = [1, 1]} : vector<8x512xbf16> to vector<8x496xbf16>
    %1766 = tpu.concatenate %1765, %1764 in 1 : vector<8x496xbf16>, vector<8x16xbf16> -> vector<8x512xbf16>
    %cst_621 = arith.constant 0.000000e+00 : bf16
    %1767 = vector.broadcast %cst_621 : bf16 to vector<8x512xbf16>
    %1768 = vector.shape_cast %1752 : vector<1x512xi1> to vector<1x512xi1>
    %1769 = vector.broadcast %1768 : vector<1x512xi1> to vector<8x512xi1>
    %1770 = arith.select %1769, %1766, %1767 : vector<8x512xi1>, vector<8x512xbf16>
    %1771 = vector.extract_strided_slice %1584 {offsets = [7, 0, 8], sizes = [1, 4, 8], strides = [1, 1, 1]} : vector<9x4x16xbf16> to vector<1x4x8xbf16>
    %1772 = vector.shape_cast %1771 : vector<1x4x8xbf16> to vector<4x8xbf16>
    %cst_622 = arith.constant dense<0.000000e+00> : vector<4x512xf32>
    %1773 = tpu.matmul %1772, %1770, %cst_622 {dimension_numbers = #tpu.dot_dimension_numbers<[1], [0], [0], [1], [0, 0, 1, 1], [], []>} : vector<4x8xbf16>, vector<8x512xbf16>, vector<4x512xf32> -> vector<4x512xf32>
    %1774 = arith.addf %1763, %1773 : vector<4x512xf32>
    %c15_i32_623 = arith.constant 15 : i32
    %1775 = vector.broadcast %c15_i32_623 : i32 to vector<1x512xi32>
    %1776 = arith.cmpi slt, %1585, %1775 : vector<1x512xi32>
    %c15_i32_624 = arith.constant 15 : i32
    %1777 = vector.broadcast %c15_i32_624 : i32 to vector<1x512xi32>
    %1778 = arith.cmpi slt, %1586, %1777 : vector<1x512xi32>
    %1779 = arith.andi %1776, %1778 : vector<1x512xi1>
    %cst_625 = arith.constant 0.000000e+00 : bf16
    %1780 = vector.broadcast %cst_625 : bf16 to vector<8x17xbf16>
    %1781 = vector.extract_strided_slice %1587 {offsets = [0, 17], sizes = [8, 495], strides = [1, 1]} : vector<8x512xbf16> to vector<8x495xbf16>
    %1782 = tpu.concatenate %1781, %1780 in 1 : vector<8x495xbf16>, vector<8x17xbf16> -> vector<8x512xbf16>
    %cst_626 = arith.constant 0.000000e+00 : bf16
    %1783 = vector.broadcast %cst_626 : bf16 to vector<8x512xbf16>
    %1784 = vector.shape_cast %1779 : vector<1x512xi1> to vector<1x512xi1>
    %1785 = vector.broadcast %1784 : vector<1x512xi1> to vector<8x512xi1>
    %1786 = arith.select %1785, %1782, %1783 : vector<8x512xi1>, vector<8x512xbf16>
    %1787 = vector.extract_strided_slice %1584 {offsets = [8, 0, 0], sizes = [1, 4, 8], strides = [1, 1, 1]} : vector<9x4x16xbf16> to vector<1x4x8xbf16>
    %1788 = vector.shape_cast %1787 : vector<1x4x8xbf16> to vector<4x8xbf16>
    %cst_627 = arith.constant dense<0.000000e+00> : vector<4x512xf32>
    %1789 = tpu.matmul %1788, %1786, %cst_627 {dimension_numbers = #tpu.dot_dimension_numbers<[1], [0], [0], [1], [0, 0, 1, 1], [], []>} : vector<4x8xbf16>, vector<8x512xbf16>, vector<4x512xf32> -> vector<4x512xf32>
    %1790 = arith.addf %1774, %1789 : vector<4x512xf32>
    %cst_628 = arith.constant 0.000000e+00 : bf16
    %1791 = vector.broadcast %cst_628 : bf16 to vector<8x17xbf16>
    %1792 = vector.extract_strided_slice %1588 {offsets = [0, 17], sizes = [8, 495], strides = [1, 1]} : vector<8x512xbf16> to vector<8x495xbf16>
    %1793 = tpu.concatenate %1792, %1791 in 1 : vector<8x495xbf16>, vector<8x17xbf16> -> vector<8x512xbf16>
    %cst_629 = arith.constant 0.000000e+00 : bf16
    %1794 = vector.broadcast %cst_629 : bf16 to vector<8x512xbf16>
    %1795 = vector.shape_cast %1779 : vector<1x512xi1> to vector<1x512xi1>
    %1796 = vector.broadcast %1795 : vector<1x512xi1> to vector<8x512xi1>
    %1797 = arith.select %1796, %1793, %1794 : vector<8x512xi1>, vector<8x512xbf16>
    %1798 = vector.extract_strided_slice %1584 {offsets = [8, 0, 8], sizes = [1, 4, 8], strides = [1, 1, 1]} : vector<9x4x16xbf16> to vector<1x4x8xbf16>
    %1799 = vector.shape_cast %1798 : vector<1x4x8xbf16> to vector<4x8xbf16>
    %cst_630 = arith.constant dense<0.000000e+00> : vector<4x512xf32>
    %1800 = tpu.matmul %1799, %1797, %cst_630 {dimension_numbers = #tpu.dot_dimension_numbers<[1], [0], [0], [1], [0, 0, 1, 1], [], []>} : vector<4x8xbf16>, vector<8x512xbf16>, vector<4x512xf32> -> vector<4x512xf32>
    %1801 = arith.addf %1790, %1800 : vector<4x512xf32>
    %cst_631 = arith.constant dense<0.000000e+00> : vector<4xf32>
    %1802 = vector.multi_reduction <add>, %1801, %cst_631 [1] : vector<4x512xf32> to vector<4xf32>
    %1803 = vector.shape_cast %1802 : vector<4xf32> to vector<4x1xf32>
    %1804 = arith.mulf %1801, %1801 : vector<4x512xf32>
    %cst_632 = arith.constant dense<0.000000e+00> : vector<4xf32>
    %1805 = vector.multi_reduction <add>, %1804, %cst_632 [1] : vector<4x512xf32> to vector<4xf32>
    %1806 = vector.shape_cast %1805 : vector<4xf32> to vector<4x1xf32>
    %cst_633 = arith.constant 5.120000e+02 : f32
    %1807 = vector.broadcast %cst_633 : f32 to vector<4x1xf32>
    %1808 = arith.divf %1803, %1807 : vector<4x1xf32>
    %cst_634 = arith.constant 5.120000e+02 : f32
    %1809 = vector.broadcast %cst_634 : f32 to vector<4x1xf32>
    %1810 = arith.divf %1806, %1809 : vector<4x1xf32>
    %1811 = arith.mulf %1808, %1808 : vector<4x1xf32>
    %1812 = arith.subf %1810, %1811 : vector<4x1xf32>
    %cst_635 = arith.constant 0.000000e+00 : f32
    %1813 = vector.broadcast %cst_635 : f32 to vector<4x1xf32>
    %1814 = arith.maximumf %1812, %1813 : vector<4x1xf32>
    %c0_636 = arith.constant 0 : index
    %c0_637 = arith.constant 0 : index
    %1815 = vector.load %arg29[%c0_636, %c0_637] : memref<4x1xf32, #tpu.memory_space<vmem>>, vector<4x1xf32>
    %cst_638 = arith.constant 9.99999974E-6 : f32
    %1816 = vector.broadcast %cst_638 : f32 to vector<4x1xf32>
    %1817 = arith.addf %1814, %1816 : vector<4x1xf32>
    %1818 = math.rsqrt %1817 : vector<4x1xf32>
    %1819 = arith.mulf %1815, %1818 : vector<4x1xf32>
    %c0_639 = arith.constant 0 : index
    %c0_640 = arith.constant 0 : index
    %1820 = vector.load %arg30[%c0_639, %c0_640] : memref<4x1xf32, #tpu.memory_space<vmem>>, vector<4x1xf32>
    %1821 = arith.mulf %1808, %1819 : vector<4x1xf32>
    %1822 = arith.subf %1820, %1821 : vector<4x1xf32>
    %1823 = vector.broadcast %1819 : vector<4x1xf32> to vector<4x512xf32>
    %1824 = arith.mulf %1801, %1823 : vector<4x512xf32>
    %1825 = vector.broadcast %1822 : vector<4x1xf32> to vector<4x512xf32>
    %1826 = arith.addf %1824, %1825 : vector<4x512xf32>
    %cst_641 = arith.constant 0.000000e+00 : f32
    %1827 = vector.broadcast %cst_641 : f32 to vector<4x512xf32>
    %1828 = arith.maximumf %1826, %1827 : vector<4x512xf32>
    %1829 = arith.addf %1828, %152 : vector<4x512xf32>
    %c0_642 = arith.constant 0 : index
    %c0_643 = arith.constant 0 : index
    %1830 = vector.load %arg41[%c0_642, %c0_643] : memref<4x512xf32, #tpu.memory_space<vmem>>, vector<4x512xf32>
    tpu.vector_store %arg41[%c0_642, %c0_643], %1829 {strides = array<i32>} : memref<4x512xf32, #tpu.memory_space<vmem>>, vector<4x512xf32>,
    return
  }
}

</mosaic_0001>

<bundles_post_ra>
// kernel: tpu_custom_call.1
= control target key start
LH: loop header
LB: loop body
LE: loop exit
PB: predicated region body
PF: predicated region fallthrough
CT: control target
= control target key end

     0   :  { %s13046_s6 = smov 1   ;;  %s13047_s10 = smov 2   ;;  %s16415_s0 = inlined_call_operand.smem [shape: u32[42], index: -1, kind: input, shape index: {}] }
   0x1   :  { %s13123_s5 = sld [smem:[%s16415_s0]]   ;;  %s13048_s14 = smov 3  }
   0x2   :  { %s13128_s9 = sld [smem:[%s16415_s0 + %s13046_s6]]   ;;  %s13049_s18 = smov 4  }
   0x3   :  { %s13133_s13 = sld [smem:[%s16415_s0 + %s13047_s10]]   ;;  %s13050_s22 = smov 5  }
   0x4   :  { %s13138_s17 = sld [smem:[%s16415_s0 + %s13048_s14]]   ;;  %s13051_s26 = smov 6  }
   0x5   :  { %s13143_s21 = sld [smem:[%s16415_s0 + %s13049_s18]]   ;;  %s13052_s30 = smov 7  }
   0x6   :  { %s13148_s25 = sld [smem:[%s16415_s0 + %s13050_s22]]   ;;  %s13053_s4 = smov 8  }
   0x7   :  { %s13153_s29 = sld [smem:[%s16415_s0 + %s13051_s26]]   ;;  %s13054_s10 = smov 9  }
   0x8   :  { %s13158_s3 = sld [smem:[%s16415_s0 + %s13052_s30]]   ;;  %s13055_s15 = smov 10  }
   0x9   :  { %s13163_s8 = sld [smem:[%s16415_s0 + %s13053_s4]]   ;;  %s13056_s20 = smov 11  }
   0xa   :  { %s13168_s14 = sld [smem:[%s16415_s0 + %s13054_s10]]   ;;  %s13057_s26 = smov 12  }
   0xb   :  { %s13173_s19 = sld [smem:[%s16415_s0 + %s13055_s15]]   ;;  %s13058_s1 = smov 13  }
   0xc   :  { %s13178_s24 = sld [smem:[%s16415_s0 + %s13056_s20]]   ;;  %s13059_s7 = smov 14  }
   0xd   :  { %s13183_s30 = sld [smem:[%s16415_s0 + %s13057_s26]]   ;;  %s13060_s15 = smov 15  }
   0xe   :  { %s13188_s6 = sld [smem:[%s16415_s0 + %s13058_s1]]   ;;  %s13061_s22 = smov 16  }
   0xf   :  { %s13193_s12 = sld [smem:[%s16415_s0 + %s13059_s7]]   ;;  %s13062_s28 = smov 17  }
  0x10   :  { %s13198_s20 = sld [smem:[%s16415_s0 + %s13060_s15]]   ;;  %s13063_s7 = smov 18  }
  0x11   :  { %16603 = sst [smem:[#allocation8_spill]] %s13173_s19  ;;  %s13064_s15 = smov 19  }
  0x12   :  { %16604 = sst [smem:[#allocation9_spill]] %s13178_s24 }
  0x13   :  { %16605 = sst [smem:[#allocation10_spill]] %s13183_s30 }
  0x14   :  { %16606 = sst [smem:[#allocation11_spill]] %s13188_s6 }
  0x15   :  { %16607 = sst [smem:[#allocation12_spill]] %s13193_s12 }
  0x16   :  { %16608 = sst [smem:[#allocation13_spill]] %s13198_s20 }
  0x17   :  { %s13203_s27 = sld [smem:[%s16415_s0 + %s13061_s22]]   ;;  %s13065_s22 = smov 20  }
  0x18   :  { %s13208_s4 = sld [smem:[%s16415_s0 + %s13062_s28]]   ;;  %s13066_s28 = smov 21  }
  0x19   :  { %s13213_s12 = sld [smem:[%s16415_s0 + %s13063_s7]]   ;;  %s13067_s7 = smov 22  }
  0x1a   :  { %s13218_s20 = sld [smem:[%s16415_s0 + %s13064_s15]]   ;;  %s13068_s15 = smov 23  }
  0x1d   :  { %16609 = sst [smem:[#allocation14_spill]] %s13203_s27 }
  0x1e   :  { %16610 = sst [smem:[#allocation15_spill]] %s13208_s4 }
  0x1f   :  { %16611 = sst [smem:[#allocation16_spill]] %s13213_s12 }
  0x20   :  { %16612 = sst [smem:[#allocation17_spill]] %s13218_s20 }
  0x21   :  { %s13223_s27 = sld [smem:[%s16415_s0 + %s13065_s22]]   ;;  %s13069_s22 = smov 24  }
  0x22   :  { %s13228_s4 = sld [smem:[%s16415_s0 + %s13066_s28]]   ;;  %s13070_s28 = smov 25  }
  0x23   :  { %s13233_s12 = sld [smem:[%s16415_s0 + %s13067_s7]]   ;;  %s13071_s7 = smov 26  }
  0x24   :  { %s13238_s20 = sld [smem:[%s16415_s0 + %s13068_s15]]   ;;  %s13072_s15 = smov 27  }
  0x27   :  { %16613 = sst [smem:[#allocation18_spill]] %s13223_s27 }
  0x28   :  { %16614 = sst [smem:[#allocation19_spill]] %s13228_s4 }
  0x29   :  { %16615 = sst [smem:[#allocation20_spill]] %s13233_s12 }
  0x2a   :  { %16616 = sst [smem:[#allocation21_spill]] %s13238_s20 }
  0x2b   :  { %s13243_s27 = sld [smem:[%s16415_s0 + %s13069_s22]]   ;;  %s13073_s22 = smov 28  }
  0x2c   :  { %s13248_s4 = sld [smem:[%s16415_s0 + %s13070_s28]]   ;;  %s13074_s28 = smov 29  }
  0x2d   :  { %s13253_s12 = sld [smem:[%s16415_s0 + %s13071_s7]]   ;;  %s13075_s7 = smov 30  }
  0x2e   :  { %s13258_s20 = sld [smem:[%s16415_s0 + %s13072_s15]]   ;;  %s13076_s15 = smov 31  }
  0x31   :  { %16617 = sst [smem:[#allocation22_spill]] %s13243_s27 }
  0x32   :  { %16618 = sst [smem:[#allocation23_spill]] %s13248_s4 }
  0x33   :  { %16619 = sst [smem:[#allocation24_spill]] %s13253_s12 }
  0x34   :  { %16620 = sst [smem:[#allocation25_spill]] %s13258_s20 }
  0x35   :  { %s13263_s27 = sld [smem:[%s16415_s0 + %s13073_s22]]   ;;  %s13077_s22 = smov 32  }
  0x36   :  { %s13268_s4 = sld [smem:[%s16415_s0 + %s13074_s28]]   ;;  %s13078_s28 = smov 33  }
  0x37   :  { %s13273_s12 = sld [smem:[%s16415_s0 + %s13075_s7]]   ;;  %s13079_s7 = smov 34  }
  0x38   :  { %s13278_s20 = sld [smem:[%s16415_s0 + %s13076_s15]]   ;;  %s13080_s15 = smov 35  }
  0x39   :  { %s13298_s6 = sld [smem:[%s16415_s0 + %s13080_s15]]   ;;  %s13084_s15 = smov 39  }
  0x3a   :  { %s13318_s19 = sld [smem:[%s16415_s0 + %s13084_s15]]  }
  0x3b   :  { %16621 = sst [smem:[#allocation26_spill]] %s13263_s27 }
  0x3c   :  { %16622 = sst [smem:[#allocation27_spill]] %s13268_s4 }
  0x3d   :  { %16623 = sst [smem:[#allocation28_spill]] %s13273_s12 }
  0x3e   :  { %s13283_s27 = sld [smem:[%s16415_s0 + %s13077_s22]]   ;;  %s13081_s22 = smov 36  }
  0x3f   :  { %s13288_s4 = sld [smem:[%s16415_s0 + %s13078_s28]]   ;;  %s13082_s28 = smov 37  }
  0x40   :  { %s13293_s12 = sld [smem:[%s16415_s0 + %s13079_s7]]   ;;  %s13083_s7 = smov 38  }
  0x41   :  { %s13303_s30 = sld [smem:[%s16415_s0 + %s13081_s22]]   ;;  %s13085_s22 = smov 40  }
  0x42   :  { %s13308_s24 = sld [smem:[%s16415_s0 + %s13082_s28]]   ;;  %s13086_s28 = smov 41  }
  0x45   :  { %16624 = sst [smem:[#allocation29_spill]] %s13288_s4 }
  0x46   :  { %16625 = sst [smem:[#allocation30_spill]] %s13293_s12 }
  0x47   :  { %s13313_s12 = sld [smem:[%s16415_s0 + %s13083_s7]]  }
  0x48   :  { %16626 = sst [smem:[#allocation31_spill]] %s13308_s24 }
  0x49   :  { %s13323_s4 = sld [smem:[%s16415_s0 + %s13085_s22]]  }
  0x4a   :  { %s13328_s24 = sld [smem:[%s16415_s0 + %s13086_s28]]  }
  0x4b   :  { %88 = vsyncpa [#allocation3], 0 }
  0x4c   :  { %89 = vsyncpa [#allocation4], 0  ;;  %s13087_s7 = smov [#allocation2]   ;;  %s12998_s11 = scalar_lea.hbm %s13123_s5, 256 }
  0x4d   :  { %s96_s10 = sshll.u32 %s13087_s7, 4  ;;  %p12999_p0 = scmp.ne.s32.totalorder %s13123_s5, %s12998_s11  ;;  %s97_s10 = int_to_ptr.vmem [resolvable:$true] %s96_s10 }
  0x4e   :  { %p13002_p1 = scmp.lt.u32.totalorder %s12998_s11, %s13123_s5 }
  0x50   :  { %p13004_p2 = pnand %p13002_p1, %p12999_p0 }
  0x52   :  { %13007 = shalt.err (!%p13004_p2)
}
  0x53   :  { %s13008_s15 = scalar_lea.vmem %s97_s10, 256  ;;  %p13013_p4 = scmp.lt.s32.totalorder %s97_s10, %s97_s10 }
  0x54   :  { %p13009_p3 = scmp.ne.s32.totalorder %s97_s10, %s13008_s15  ;;  %p13014_p5 = scmp.lt.s32.totalorder %s13008_s15, %s13008_s15 }
  0x56   :  { %p13015_p6 = por %p13014_p5, %p13013_p4 }
  0x58   :  { %p13016_p7 = pnand %p13015_p6, %p13009_p3 }
  0x5a   :  { %13019 = shalt.err (!%p13016_p7)
}
  0x5b   :  { %99 = dma.hbm_to_vmem [thread:$0]  %s13123_s5, 256, %s97_s10, [#allocation3]  }
  0x5c   :  { %13042 = dma.done.wait [#allocation3], 256  }
  0x5d   :  { %13043 = vsyncadd [#allocation3], 4294967040  ;;  %v16497_v0 = vmov 0   ;;  %v187_v1 = vld [vmem:[#allocation2 + $0x8] sm:$0xff]  ;;  %v186_v2 = vld [vmem:[#allocation2] sm:$0xff]  ;;  %s13089_s0 = smov 16   ;;  %v238_v9 = vlaneseq }
  0x5e   :  { %403 = vmatprep.mubr.bf16.mxu1 %v16497_v0  ;;  %836 = vmatprep.mubr.bf16.mxu0 %v16497_v0  ;;  %v13338_v3 = vpack.c.bf16 %v187_v1, %v187_v1  ;;  %v13340_v4 = vpack.c.bf16 %v186_v2, %v186_v2  ;;  %v203_v5 = vcombine.high %v187_v1, %v187_v1  ;;  %s13090_s5 = smov 17   ;;  %s13091_s16 = smov 15   ;;  %v13411_v10 = vld [vmem:[%s13278_s20] ss:$2 sm:$0xf]  ;;  %vm16425_vm13 = vcmask 130048  }
  0x5f   :  { %12840 = vset.pattern.permute.xlu0 %v16497_v0  ;;  %12841 = vset.pattern.permute.xlu1 %v16497_v0  ;;  %v202_v6 = vcombine.high %v186_v2, %v186_v2  ;;  %s13092_s18 = smov 1   ;;  %s13093_s22 = smov 127   ;;  %v13413_v11 = vshrl.u32 %v238_v9, 7  ;;  %vm210_vm0 = vcmp.ge.s32.totalorder %v13411_v10, 1  ;;  %v16627_v38 = vmov 0 }
  0x60   :  { %290 = vrot.lane.b32.xlu1 %v13338_v3, %s13089_s0  ;;  %286 = vrot.lane.b32.xlu0 %v13340_v4, %s13089_s0  ;;  %v13346_v7 = vpack.c.bf16 %v203_v5, %v203_v5  ;;  %s13094_s23 = smov 113   ;;  %s13095_s26 = smov 112   ;;  %v13417_v12 = vld [vmem:[%s13278_s20 + $0x1] ss:$2 sm:$0xf]  ;;  %v305_v15 = vsel %vm210_vm0, 1, %v16497_v0 }
  0x61   :  { %v13348_v8 = vpack.c.bf16 %v202_v6, %v202_v6  ;;  %s13096_s28 = smov 111   ;;  %v13420_v13 = vsub.s32 0, %v13413_v11  ;;  %v13423_v14 = vsub.s32 1, %v13413_v11  ;;  %vm16426_vm1 = vcmp.ge.s32.totalorder %v13417_v12, 1  ;;  %v189_v1 = vld [vmem:[%s13128_s9 + $0x2] sm:$0x3] }
  0x62   :  { %v13430_v16 = vsub.s32 2, %v13413_v11  ;;  %v13433_v17 = vsub.s32 3, %v13413_v11  ;;  %vm212_vm2 = vmand %vm210_vm0, %vm16426_vm1  ;;  %v13448_v26 = vsub.s32 4, %v13413_v11  ;;  %vm16427_vm12 = vcmp.lt.s32.totalorder %v13417_v12, 15  ;;  %s13109_s20 = smov 123   ;;  %s16969_s1 = sld [smem:[#allocation8_spill]] }
  0x63   :  { %v309_v18 = vrot.slane %v305_v15, %v13420_v13  ;;  %v313_v19 = vrot.slane %v305_v15, %v13423_v14  ;;  %v237_v20 = vsel %vm212_vm2, 1, %v16497_v0  ;;  %v13458_v31 = vsel %vm16426_vm1, 1, %v16497_v0  ;;  %vm551_vm14 = vmand %vm210_vm0, %vm16427_vm12  ;;  %s17007_s2 = sld [smem:[#allocation9_spill]]  ;;  %s17008_s7 = sld [smem:[#allocation10_spill]] }
  0x64   :  { %292 = vrot.lane.b32.xlu1 %v13346_v7, %s13089_s0  ;;  %288 = vrot.lane.b32.xlu0 %v13348_v8, %s13089_s0  ;;  %v317_v21 = vrot.slane %v305_v15, %v13430_v16  ;;  %v321_v22 = vrot.slane %v305_v15, %v13433_v17  ;;  %v241_v23 = vrot.slane %v237_v20, %v13420_v13  ;;  %vm16428_vm2 = vcmask 1041408   ;;  %s17009_s10 = sld [smem:[#allocation31_spill]]  ;;  %s17011_s11 = sld [smem:[#allocation30_spill]] }
  0x65   :  { %vm322_vm3 = vcmp.eq.s32.totalorder %v309_v18, 1  ;;  %vm323_vm4 = vcmp.eq.s32.totalorder %v313_v19, 1  ;;  %v245_v24 = vrot.slane %v237_v20, %v13423_v14  ;;  %v249_v35 = vrot.slane %v237_v20, %v13430_v16  ;;  %v188_v19 = vld [vmem:[%s13128_s9] sm:$0x3]  ;;  %s13111_s15 = smov 2  }
  0x66   :  { %vm326_vm5 = vmpackc.low %vm323_vm4, %vm322_vm3  ;;  %vm324_vm6 = vcmp.eq.s32.totalorder %v317_v21, 1  ;;  %vm325_vm7 = vcmp.eq.s32.totalorder %v321_v22, 1  ;;  %vm254_vm8 = vcmp.eq.s32.totalorder %v241_v23, 1  ;;  %v253_v36 = vrot.slane %v237_v20, %v13433_v17 }
  0x67   :  { %v328_v25 = vsel %vm326_vm5, 65537, %v16497_v0  ;;  %vm255_vm9 = vcmp.eq.s32.totalorder %v245_v24, 1  ;;  %vm327_vm10 = vmpackc.low %vm325_vm7, %vm324_vm6  ;;  %vm16431_vm3 = vcmask 138240   ;;  %v744_v40 = vrot.slane %v13458_v31, %v13420_v13 }
  0x68   :  { %219 = vrot.lane.b32.xlu1 %v13348_v8, %s13090_s5  ;;  %217 = vrot.lane.b32.xlu0 %v13340_v4, %s13090_s5  ;;  %v333_v27 = vrot.slane %v328_v25, %v13420_v13  ;;  %vm258_vm11 = vmpackc.low %vm255_vm9, %vm254_vm8  ;;  %v329_v28 = vsel %vm327_vm10, 65537, %v16497_v0  ;;  %v337_v30 = vrot.slane %v328_v25, %v13448_v26  ;;  %v16629_v41 = vmov 0 }
  0x69   :  { %v345_v29 = vrot.slane %v329_v28, %v13448_v26  ;;  %v260_v34 = vsel %vm258_vm11, 65537, %v16497_v0  ;;  %v341_v39 = vrot.slane %v329_v28, %v13420_v13  ;;  %v16631_v42 = vmov 0 }
  0x6a   :  { %vm13468_vm15 = vcmp.ne.s16.totalorder %v333_v27, 0  ;;  %vm13479_vm5 = vcmp.ne.s16.totalorder %v337_v30, 0  ;;  %v269_v43 = vrot.slane %v260_v34, %v13448_v26  ;;  %v571_v44 = vsel %vm551_vm14, 1, %v16497_v0 }
  0x6b   :  { %v16628_v38 = vsel %vm13468_vm15, 4294967295, %v16627_v38  ;;  %vm13475_vm4 = vcmp.ne.s16.totalorder %v345_v29, 0  ;;  %v16632_v42 = vsel %vm13479_vm5, 4294967295, %v16631_v42  ;;  %vm13487_vm0 = vcmp.eq.s32.totalorder %v249_v35, 1 }
  0x6c   :  { %223 = vrot.lane.b32.xlu1 %v13346_v7, %s13090_s5  ;;  %221 = vrot.lane.b32.xlu0 %v13338_v3, %s13090_s5  ;;  %v16630_v41 = vsel %vm13475_vm4, 4294967295, %v16629_v41  ;;  %vm13491_vm6 = vcmp.eq.s32.totalorder %v253_v36, 1  ;;  %v748_v50 = vrot.slane %v13458_v31, %v13423_v14  ;;  %vm13500_vm7 = vcmp.ne.s16.totalorder %v341_v39, 0 }
  0x6d   :  { %v16637_v54 = vmov 0  ;;  %v575_v57 = vrot.slane %v571_v44, %v13420_v13  ;;  %v579_v58 = vrot.slane %v571_v44, %v13423_v14  ;;  %vm13512_vm8 = vcmp.ne.s16.totalorder %v269_v43, 0  ;;  %vm259_vm9 = vmpackc.low %vm13491_vm6, %vm13487_vm0 }
  0x6e   :  { %v16638_v54 = vsel %vm13500_vm7, 4294967295, %v16637_v54  ;;  %v16639_v60 = vmov 0  ;;  %v265_v61 = vrot.slane %v260_v34, %v13420_v13  ;;  %vm16429_vm10 = vcmask 31744  }
  0x6f   :  { %v16640_v60 = vsel %vm13512_vm8, 4294967295, %v16639_v60  ;;  %vm13524_vm11 = vcmp.eq.s32.totalorder %v744_v40, 1  ;;  %vm13528_vm14 = vcmp.eq.s32.totalorder %v748_v50, 1  ;;  %v261_v18 = vsel %vm259_vm9, 65537, %v16497_v0 }
  0x70   :  { %554 = vrot.lane.b32.xlu1 %v13348_v8, %s13091_s16  ;;  %552 = vrot.lane.b32.xlu0 %v13340_v4, %s13091_s16  ;;  %vm13537_vm0 = vcmp.eq.s32.totalorder %v575_v57, 1  ;;  %vm13541_vm6 = vcmp.eq.s32.totalorder %v579_v58, 1  ;;  %v16649_v23 = vmov 0  ;;  %v277_v24 = vrot.slane %v261_v18, %v13448_v26  ;;  %vm761_vm9 = vmpackc.low %vm13528_vm14, %vm13524_vm11 }
  0x71   :  { %vm592_vm1 = vmpackc.low %vm13541_vm6, %vm13537_vm0  ;;  %v583_v28 = vrot.slane %v571_v44, %v13430_v16  ;;  %v587_v29 = vrot.slane %v571_v44, %v13433_v17  ;;  %v16651_v34 = vmov 0  ;;  %v13576_v35 = vsel %vm16427_vm12, 1, %v16497_v0 }
  0x72   :  { %vm13569_vm11 = vcmp.ne.s16.totalorder %v277_v24, 0  ;;  %v273_v39 = vrot.slane %v261_v18, %v13420_v13  ;;  %v594_v40 = vsel %vm592_vm1, 65537, %v16497_v0  ;;  %vm16430_vm14 = vcmp.lt.s32.totalorder %v13411_v10, 15 }
  0x73   :  { %v16652_v34 = vsel %vm13569_vm11, 4294967295, %v16651_v34  ;;  %vm13585_vm0 = vcmp.eq.s32.totalorder %v583_v28, 1  ;;  %vm13589_vm6 = vcmp.eq.s32.totalorder %v587_v29, 1  ;;  %v1014_v49 = vrot.slane %v13576_v35, %v13420_v13 }
  0x74   :  { %558 = vrot.lane.b32.xlu1 %v13346_v7, %s13091_s16  ;;  %556 = vrot.lane.b32.xlu0 %v13338_v3, %s13091_s16  ;;  %v1018_v50 = vrot.slane %v13576_v35, %v13423_v14  ;;  %vm16657_vm1 = vcmp.ge.s32.totalorder %v13417_v12, 1  ;;  %v16661_v58 = vmov 0  ;;  %v16674_v5 = vmov 0 }
  0x75   :  { %v599_v6 = vrot.slane %v594_v40, %v13420_v13 }
  0x78   :  { %723 = vrot.lane.b32.xlu1 %v13348_v8, %s13092_s18  ;;  %721 = vrot.lane.b32.xlu0 %v13340_v4, %s13092_s18 }
  0x7c   :  { %725 = vrot.lane.b32.xlu0 %v13338_v3, %s13092_s18  ;;  %727 = vrot.lane.b32.xlu1 %v13346_v7, %s13092_s18 }
  0x80   :  { %991 = vrot.lane.b32.xlu0 %v13340_v4, %s13093_s22  ;;  %993 = vrot.lane.b32.xlu1 %v13348_v8, %s13093_s22 }
  0x84   :  { %995 = vrot.lane.b32.xlu0 %v13338_v3, %s13093_s22  ;;  %997 = vrot.lane.b32.xlu1 %v13346_v7, %s13093_s22 }
  0x88   :  { %1162 = vrot.lane.b32.xlu0 %v13340_v4, %s13094_s23  ;;  %1164 = vrot.lane.b32.xlu1 %v13348_v8, %s13094_s23 }
  0x8c   :  { %1166 = vrot.lane.b32.xlu0 %v13338_v3, %s13094_s23  ;;  %1168 = vrot.lane.b32.xlu1 %v13346_v7, %s13094_s23 }
  0x90   :  { %1331 = vrot.lane.b32.xlu0 %v13340_v4, %s13095_s26  ;;  %1333 = vrot.lane.b32.xlu1 %v13348_v8, %s13095_s26 }
  0x94   :  { %1335 = vrot.lane.b32.xlu0 %v13338_v3, %s13095_s26  ;;  %1337 = vrot.lane.b32.xlu1 %v13346_v7, %s13095_s26 }
  0x98   :  { %1501 = vrot.lane.b32.xlu0 %v13340_v4, %s13096_s28  ;;  %1503 = vrot.lane.b32.xlu1 %v13348_v8, %s13096_s28 }
  0x9c   :  { %1505 = vrot.lane.b32.xlu0 %v13338_v3, %s13096_s28  ;;  %1507 = vrot.lane.b32.xlu1 %v13346_v7, %s13096_s28 }
  0xd2   :  { %v291_v32 = vpop.permute.xlu1 %290  ;;  %v287_v33 = vpop.permute.xlu0 %286 }
  0xd3   :  { %v303_v37 = vsel %vm16425_vm13, 0, %v287_v33 }
  0xd4   :  { %v350_v47 = vsel %vm13468_vm15, %v303_v37, 0 }
  0xd5   :  { %v360_v59 = vsel %vm16428_vm2, %v350_v47, 0 }
  0xd6   :  { %v293_v45 = vpop.permute.xlu1 %292  ;;  %v289_v46 = vpop.permute.xlu0 %288 }
  0xd7   :  { %v297_v51 = vsel %vm16425_vm13, %v291_v32, %v293_v45  ;;  %v296_v52 = vsel %vm16425_vm13, %v289_v46, %v291_v32  ;;  %v295_v53 = vsel %vm16425_vm13, %v287_v33, %v289_v46  ;;  %vm13548_vm13 = vcmp.ne.s16.totalorder %v265_v61, 0  ;;  %v13700_v45 = vld [vmem:[%s13128_s9 + $0x6] sm:$0x3] }
  0xd8   :  { %v353_v55 = vsel %vm13475_vm4, %v297_v51, 0  ;;  %v351_v56 = vsel %vm13479_vm5, %v295_v53, 0  ;;  %v352_v2 = vsel %vm13500_vm7, %v296_v52, 0  ;;  %v16650_v23 = vsel %vm13548_vm13, 4294967295, %v16649_v23 }
  0xd9   :  { %11118 = vmatprep.subr.msk.bf16.mxu1 %vm16428_vm2, %v351_v56  ;;  %v366_v22 = vsel %vm16428_vm2, %v352_v2, 0  ;;  %v763_v32 = vsel %vm761_vm9, 65537, %v16497_v0  ;;  %v603_v51 = vrot.slane %v594_v40, %v13448_v26  ;;  %vm13606_vm9 = vmand %vm16430_vm14, %vm16657_vm1  ;;  %v752_v56 = vrot.slane %v13458_v31, %v13430_v16 }
  0xda   :  { %v220_v62 = vpop.permute.xlu1 %219  ;;  %372 = vmatpush1.bf16.msra.mxu1 %v360_v59  ;;  %v218_v63 = vpop.permute.xlu0 %217  ;;  %v772_v44 = vrot.slane %v763_v32, %v13448_v26  ;;  %v768_v48 = vrot.slane %v763_v32, %v13420_v13  ;;  %vm16660_vm1 = vcmask 1041408   ;;  %vm13621_vm14 = vcmp.ne.s16.totalorder %v273_v39, 0 }
  0xdb   :  { %v226_v9 = vsel %vm16431_vm3, %v218_v63, %v220_v62  ;;  %11120 = vmatprep.subr.msk.bf16.mxu1 %vm16428_vm2, %v353_v55  ;;  %v235_v21 = vsel %vm16431_vm3, 0, %v218_v63  ;;  %v16662_v58 = vsel %vm13621_vm14, 4294967295, %v16661_v58  ;;  %v16663_v59 = vmov 0 }
  0xdc   :  { %v283_v15 = vsel %vm13512_vm8, %v226_v9, 0  ;;  %v282_v30 = vsel %vm13548_vm13, %v235_v21, 0  ;;  %vm13625_vm12 = vcmp.ne.s16.totalorder %v772_v44, 0  ;;  %v756_v61 = vrot.slane %v13458_v31, %v13433_v17 }
  0xdd   :  { %11119 = vmatmul.mubr.msk.bf16.vlgmr.msra.gmra.mrb[0].mxu1 %vm16429_vm10, %v189_v1  ;;  %v457_v43 = vsel %vm16428_vm2, %v282_v30, 0  ;;  %v16664_v59 = vsel %vm13625_vm12, 4294967295, %v16663_v59  ;;  %v16666_v63 = vmov 0  ;;  %v13646_v2 = vsel %vm13606_vm9, 1, %v16497_v0 }
  0xde   :  { %v224_v25 = vpop.permute.xlu1 %223  ;;  %413 = vmatpush1.bf16.msra.mxu1 %v366_v22  ;;  %v222_v27 = vpop.permute.xlu0 %221  ;;  %444 = vmatprep.mubr.bf16.mxu1 %v16497_v0  ;;  %16665 = vst [vmem:[#allocation32_spill] sm:$0xff] %v16664_v59  ;;  %vm16678_vm9 = vcmask 7168   ;;  %v1185_v28 = vrot.slane %v13646_v2, %v13420_v13  ;;  %v16687_v44 = vmov 0  ;;  %v16698_v52 = vmov 0 }
  0xdf   :  { %11122 = vmatprep.subr.msk.bf16.mxu1 %vm16428_vm2, %v283_v15  ;;  %v228_v33 = vsel %vm16431_vm3, %v222_v27, %v224_v25  ;;  %v227_v57 = vsel %vm16431_vm3, %v220_v62, %v222_v27  ;;  %vm16673_vm3 = vcmask 121856   ;;  %vm13650_vm2 = vcmp.ne.s16.totalorder %v603_v51, 0 }
  0xe0   :  { %v285_v47 = vsel %vm13569_vm11, %v228_v33, 0  ;;  %v16675_v5 = vsel %vm13650_vm2, 4294967295, %v16674_v5  ;;  %v284_v20 = vsel %vm13621_vm14, %v227_v57, 0  ;;  %vm16679_vm11 = vmmov %vm16678_vm9  ;;  %v1189_v33 = vrot.slane %v13646_v2, %v13423_v14 }
  0xe1   :  { %vm16684_vm14 = vcmask 1041408  }
  0xe2   :  { %v13578_v36 = vpop.permute.xlu1 %554  ;;  %v553_v37 = vpop.permute.xlu0 %552  ;;  %v463_v40 = vsel %vm16684_vm14, %v284_v20, 0  ;;  %vm16685_vm8 = vmmov %vm16684_vm14 }
  0xe3   :  { %v561_v31 = vsel %vm16673_vm3, %v553_v37, %v13578_v36  ;;  %vm13665_vm3 = vcmp.eq.s32.totalorder %v752_v56, 1  ;;  %vm16686_vm13 = vmmov %vm16685_vm8 }
  0xe4   :  { %v617_v32 = vsel %vm13650_vm2, %v561_v31, 0 }
  0xe5   :  { %11121 = vmatmul.mubr.msk.bf16.vlgmr.msra.gmra.mrb[4].mxu1 %vm16429_vm10, %v189_v1  ;;  %vm593_vm10 = vmpackc.low %vm13589_vm6, %vm13585_vm0  ;;  %vm13631_vm0 = vcmp.ne.s16.totalorder %v768_v48, 0  ;;  %vm13635_vm6 = vcmp.eq.s32.totalorder %v1014_v49, 1  ;;  %v894_v48 = vsel %vm16685_vm8, %v13340_v4, 0 }
  0xe6   :  { %v559_v53 = vpop.permute.xlu1 %558  ;;  %v13610_v55 = vpop.permute.xlu0 %556  ;;  %469 = vmatpush1.bf16.msra.mxu1 %v457_v43  ;;  %500 = vmatprep.mubr.bf16.mxu1 %v16497_v0  ;;  %v16667_v63 = vsel %vm13631_vm0, 4294967295, %v16666_v63  ;;  %v13656_v9 = vsel %vm593_vm10, 65537, %v16497_v0  ;;  %vm13672_vm10 = vcmp.eq.s32.totalorder %v756_v61, 1 }
  0xe7   :  { %11124 = vmatprep.subr.msk.bf16.mxu1 %vm16660_vm1, %v285_v47  ;;  %16668 = vst [vmem:[#allocation33_spill] sm:$0xff] %v16667_v63  ;;  %vm13639_vm1 = vcmp.eq.s32.totalorder %v1018_v50, 1  ;;  %v611_v21 = vrot.slane %v13656_v9, %v13448_v26  ;;  %v607_v31 = vrot.slane %v13656_v9, %v13420_v13  ;;  %v16702_v9 = vmov 0  ;;  %v13812_v50 = vld [vmem:[%s13128_s9 + $0x8] sm:$0x3] }
  0xe8   :  { %vm16689_vm14 = vmpackc.low %vm13639_vm1, %vm13635_vm6  ;;  %vm13722_vm6 = vcmp.eq.s32.totalorder %v1185_v28, 1  ;;  %vm13726_vm1 = vcmp.eq.s32.totalorder %v1189_v33, 1 }
  0xea   :  { %v13658_v15 = vpop.permute.xlu1 %723  ;;  %v722_v18 = vpop.permute.xlu0 %721 }
  0xeb   :  { %v730_v24 = vsel %vm16678_vm9, %v722_v18, %v13658_v15  ;;  %v738_v25 = vsel %vm16679_vm11, 0, %v722_v18  ;;  %vm16682_vm11 = vcmask 121856   ;;  %vm16683_vm9 = vcmask 31744  }
  0xec   :  { %v786_v29 = vsel %vm13625_vm12, %v730_v24, 0  ;;  %v785_v30 = vsel %vm13631_vm0, %v738_v25, 0  ;;  %v569_v39 = vsel %vm16682_vm11, 0, %v553_v37  ;;  %vm13695_vm12 = vcmp.ne.s16.totalorder %v599_v6, 0  ;;  %vm762_vm11 = vmpackc.low %vm13672_vm10, %vm13665_vm3 }
  0xed   :  { %11123 = vmatmul.mubr.msk.bf16.vlgmr.msra.gmra.mrb[0].mxu1 %vm16683_vm9, %v188_v19  ;;  %11130 = vmatprep.subr.msk.bf16.mxu0 %vm16685_vm8, %v786_v29  ;;  %v793_v43 = vsel %vm16686_vm13, %v785_v30, 0  ;;  %v16688_v44 = vsel %vm13695_vm12, 4294967295, %v16687_v44  ;;  %v1033_v37 = vsel %vm16689_vm14, 65537, %v16497_v0  ;;  %vm16690_vm13 = vmmov %vm16685_vm8  ;;  %v616_v49 = vsel %vm13695_vm12, %v569_v39, 0 }
  0xee   :  { %510 = vmatpush1.bf16.msra.mxu1 %v463_v40  ;;  %805 = vmatpush1.bf16.msra.mxu0 %v793_v43  ;;  %v13702_v46 = vpop.permute.xlu0 %725  ;;  %v728_v47 = vpop.permute.xlu1 %727  ;;  %vm16691_vm9 = vmmov %vm16685_vm8  ;;  %vm16696_vm14 = vcmask 121856   ;;  %vm13734_vm3 = vcmp.ne.s16.totalorder %v611_v21, 0  ;;  %vm16700_vm10 = vcmp.lt.s32.totalorder %v13411_v10, 15  ;;  %v764_v57 = vsel %vm762_vm11, 65537, %v16497_v0 }
  0xef   :  { %541 = vmatprep.mubr.bf16.mxu1 %v16497_v0  ;;  %11126 = vmatprep.subr.msk.bf16.mxu1 %vm16690_vm13, %v617_v32  ;;  %v563_v4 = vsel %vm16696_vm14, %v13610_v55, %v559_v53  ;;  %vm16697_vm13 = vcmask 31744   ;;  %v16699_v52 = vsel %vm13734_vm3, 4294967295, %v16698_v52  ;;  %v13742_v56 = vsel %vm16700_vm10, 1, %v16497_v0  ;;  %vm1202_vm14 = vmpackc.low %vm13726_vm1, %vm13722_vm6 }
  0xf0   :  { %11134 = vmatprep.subr.msk.bf16.mxu0 %vm16691_vm9, %v13348_v8  ;;  %v1042_v8 = vrot.slane %v1033_v37, %v13448_v26  ;;  %v1038_v1 = vrot.slane %v1033_v37, %v13420_v13  ;;  %v624_v62 = vsel %vm16685_vm8, %v616_v49, 0  ;;  %vm16442_vm9 = vcmask 1039360   ;;  %vm16701_vm11 = vmmov %vm16697_vm13 }
  0xf1   :  { %11131 = vmatmul.mubr.msk.bf16.vlgmr.msra.gmra.mrb[0].mxu0 %vm16697_vm13, %v13700_v45  ;;  %v619_v6 = vsel %vm13734_vm3, %v563_v4, 0  ;;  %v1354_v18 = vrot.slane %v13742_v56, %v13420_v13  ;;  %v1358_v20 = vrot.slane %v13742_v56, %v13423_v14  ;;  %v780_v21 = vrot.slane %v764_v57, %v13448_v26  ;;  %vm16709_vm10 = vmmov %vm16685_vm8 }
  0xf2   :  { %906 = vmatpush1.bf16.msra.mxu0 %v894_v48  ;;  %937 = vmatprep.mubr.bf16.mxu0 %v16497_v0  ;;  %v992_v53 = vpop.permute.xlu0 %991  ;;  %v994_v61 = vpop.permute.xlu1 %993  ;;  %vm13762_vm13 = vcmp.ne.s16.totalorder %v1042_v8, 0  ;;  %vm13770_vm6 = vcmp.ne.s16.totalorder %v1038_v1, 0  ;;  %v16705_v25 = vmov 0  ;;  %vm16708_vm1 = vcmask 121856   ;;  %v190_v48 = vld [vmem:[%s13128_s9 + $0x4] sm:$0x3] }
  0xf3   :  { %v16703_v9 = vsel %vm13762_vm13, 4294967295, %v16702_v9  ;;  %v1000_v22 = vsel %vm16442_vm9, %v992_v53, %v994_v61  ;;  %v16706_v25 = vsel %vm13770_vm6, 4294967295, %v16705_v25  ;;  %v562_v28 = vsel %vm16708_vm1, %v13578_v36, %v13610_v55 }
  0xf4   :  { %16704 = vst [vmem:[#allocation34_spill] sm:$0xff] %v16703_v9  ;;  %16707 = vst [vmem:[#allocation35_spill] sm:$0xff] %v16706_v25  ;;  %vm13781_vm8 = vcmp.ne.s16.totalorder %v607_v31, 0  ;;  %v16710_v29 = vmov 0  ;;  %v776_v32 = vrot.slane %v764_v57, %v13420_v13  ;;  %vm13798_vm1 = vcmp.ne.s16.totalorder %v780_v21, 0 }
  0xf5   :  { %11125 = vmatmul.mubr.msk.bf16.vlgmr.msra.gmra.mrb[4].mxu1 %vm16701_vm11, %v188_v19  ;;  %v1204_v19 = vsel %vm1202_vm14, 65537, %v16497_v0  ;;  %v16711_v29 = vsel %vm13781_vm8, 4294967295, %v16710_v29  ;;  %vm13790_vm14 = vcmp.eq.s32.totalorder %v1354_v18, 1  ;;  %vm13794_vm11 = vcmp.eq.s32.totalorder %v1358_v20, 1 }
  0xf6   :  { %636 = vmatpush1.bf16.msra.mxu1 %v624_v62  ;;  %667 = vmatprep.mubr.bf16.mxu1 %v16497_v0  ;;  %v13768_v24 = vpop.permute.xlu0 %995  ;;  %v13774_v27 = vpop.permute.xlu1 %997  ;;  %16712 = vst [vmem:[#allocation36_spill] sm:$0xff] %v16711_v29  ;;  %v16717_v55 = vmov 0  ;;  %v1055_v43 = vsel %vm13770_vm6, %v1000_v22, 0  ;;  %v1213_v37 = vrot.slane %v1204_v19, %v13448_v26  ;;  %v618_v49 = vsel %vm13781_vm8, %v562_v28, 0 }
  0xf7   :  { %11128 = vmatprep.subr.msk.bf16.mxu1 %vm16709_vm10, %v619_v6  ;;  %v1001_v30 = vsel %vm16442_vm9, %v994_v61, %v13768_v24  ;;  %v16718_v55 = vsel %vm13798_vm1, 4294967295, %v16717_v55  ;;  %vm16720_vm10 = vcmask 7168   ;;  %vm16721_vm9 = vcmask 1041408  }
  0xf8   :  { %v1056_v33 = vsel %vm13762_vm13, %v1001_v30, 0  ;;  %16719 = vst [vmem:[#allocation37_spill] sm:$0xff] %v16718_v55  ;;  %v732_v40 = vsel %vm16720_vm10, %v13702_v46, %v728_v47  ;;  %vm16722_vm13 = vcmp.lt.s32.totalorder %v13417_v12, 15  ;;  %vm16723_vm0 = vcmp.lt.s32.totalorder %v13411_v10, 15  ;;  %vm16727_vm6 = vmmov %vm16721_vm9 }
  0xf9   :  { %11138 = vmatprep.subr.msk.bf16.mxu0 %vm16721_vm9, %v1056_v33  ;;  %vm1500_vm10 = vmand %vm16723_vm0, %vm16722_vm13  ;;  %vm13818_vm3 = vcmp.ne.s16.totalorder %v776_v32, 0  ;;  %v16724_v47 = vmov 0  ;;  %v1022_v8 = vrot.slane %v13576_v35, %v13430_v16  ;;  %v1026_v57 = vrot.slane %v13576_v35, %v13433_v17 }
  0xfa   :  { %v1163_v51 = vpop.permute.xlu0 %1162  ;;  %v1165_v4 = vpop.permute.xlu1 %1164  ;;  %v16725_v47 = vsel %vm13818_vm3, 4294967295, %v16724_v47  ;;  %v788_v12 = vsel %vm13798_vm1, %v732_v40, 0  ;;  %v1063_v10 = vsel %vm16727_vm6, %v1055_v43, 0  ;;  %vm16457_vm0 = vcmask 924672   ;;  %vm16730_vm9 = vmmov %vm16727_vm6 }
  0xfb   :  { %16726 = vst [vmem:[#allocation38_spill] sm:$0xff] %v16725_v47  ;;  %v1209_v53 = vrot.slane %v1204_v19, %v13420_v13  ;;  %vm16728_vm13 = vcmask 7168   ;;  %vm16729_vm8 = vcmask 31744   ;;  %v630_v1 = vsel %vm16730_vm9, %v618_v49, 0  ;;  %vm16744_vm9 = vmmov %vm16727_vm6 }
  0xfc   :  { %v731_v61 = vsel %vm16728_vm13, %v13658_v15, %v13702_v46  ;;  %vm16731_vm2 = vmmov %vm16729_vm8  ;;  %vm13841_vm12 = vcmp.ne.s16.totalorder %v1213_v37, 0  ;;  %v16732_v35 = vmov 0  ;;  %v13846_v62 = vsel %vm1500_vm10, 1, %v16497_v0  ;;  %v13979_v37 = vld [vmem:[%s13128_s9 + $0xc] sm:$0x3] }
  0xfd   :  { %11127 = vmatmul.mubr.msk.bf16.vlgmr.msra.gmra.mrb[0].mxu1 %vm16729_vm8, %v190_v48  ;;  %11135 = vmatmul.mubr.msk.bf16.vlgmr.msra.gmra.mrb[0].mxu0 %vm16731_vm2, %v13812_v50  ;;  %v16733_v35 = vsel %vm13841_vm12, 4294967295, %v16732_v35  ;;  %vm16735_vm2 = vmpackc.low %vm13794_vm11, %vm13790_vm14  ;;  %vm13862_vm8 = vcmp.eq.s32.totalorder %v1022_v8, 1  ;;  %vm13866_vm10 = vcmp.eq.s32.totalorder %v1026_v57, 1  ;;  %v787_v21 = vsel %vm13818_vm3, %v731_v61, 0 }
  0xfe   :  { %16734 = vst [vmem:[#allocation39_spill] sm:$0xff] %v16733_v35  ;;  %677 = vmatpush1.bf16.msra.mxu1 %v630_v1  ;;  %708 = vmatprep.mubr.bf16.mxu1 %v16497_v0  ;;  %v13849_v31 = vpop.permute.xlu0 %1166  ;;  %v13851_v15 = vpop.permute.xlu1 %1168  ;;  %v1373_v46 = vsel %vm16735_vm2, 65537, %v16497_v0  ;;  %v1524_v19 = vrot.slane %v13846_v62, %v13420_v13  ;;  %v1528_v28 = vrot.slane %v13846_v62, %v13423_v14  ;;  %vm16740_vm14 = vmmov %vm16727_vm6  ;;  %vm13881_vm11 = vcmp.ne.s16.totalorder %v1209_v53, 0 }
  0xff   :  { %1075 = vmatpush1.bf16.msra.mxu0 %v1063_v10  ;;  %11132 = vmatprep.subr.msk.bf16.mxu1 %vm16727_vm6, %v788_v12  ;;  %v1172_v6 = vsel %vm16457_vm0, %v1165_v4, %v13849_v31  ;;  %v1171_v30 = vsel %vm16457_vm0, %v1163_v51, %v1165_v4  ;;  %v16741_v32 = vmov 0  ;;  %v1382_v33 = vrot.slane %v1373_v46, %v13448_v26  ;;  %vm1032_vm13 = vmpackc.low %vm13866_vm10, %vm13862_vm8  ;;  %v13907_v51 = vld [vmem:[%s13128_s9 + $0xa] sm:$0x3] }
 0x100   :  { %1106 = vmatprep.mubr.bf16.mxu0 %v16497_v0  ;;  %v1227_v22 = vsel %vm13841_vm12, %v1172_v6, 0  ;;  %v16742_v32 = vsel %vm13881_vm11, 4294967295, %v16741_v32  ;;  %v799_v36 = vsel %vm16744_vm9, %v787_v21, 0  ;;  %v1226_v14 = vsel %vm13881_vm11, %v1171_v30, 0 }
 0x101   :  { %11142 = vmatprep.subr.msk.bf16.mxu0 %vm16740_vm14, %v1227_v22  ;;  %16743 = vst [vmem:[#allocation40_spill] sm:$0xff] %v16742_v32  ;;  %vm16460_vm2 = vcmask 916480   ;;  %vm13893_vm6 = vcmp.eq.s32.totalorder %v1524_v19, 1  ;;  %vm13897_vm14 = vcmp.eq.s32.totalorder %v1528_v28, 1  ;;  %vm16749_vm0 = vcmask 31744  }
 0x102   :  { %v1332_v39 = vpop.permute.xlu0 %1331  ;;  %v1334_v40 = vpop.permute.xlu1 %1333  ;;  %vm13902_vm9 = vcmp.ne.s16.totalorder %v1382_v33, 0  ;;  %v16750_v49 = vmov 0  ;;  %v1034_v8 = vsel %vm1032_vm13, 65537, %v16497_v0  ;;  %vm16753_vm8 = vcmask 1041408  }
 0x103   :  { %v16751_v49 = vsel %vm13902_vm9, 4294967295, %v16750_v49  ;;  %v1234_v57 = vsel %vm16753_vm8, %v1226_v14, 0  ;;  %vm16754_vm10 = vmmov %vm16753_vm8  ;;  %v1378_v10 = vrot.slane %v1373_v46, %v13420_v13  ;;  %v1193_v61 = vrot.slane %v13646_v2, %v13430_v16 }
 0x104   :  { %16752 = vst [vmem:[#allocation41_spill] sm:$0xff] %v16751_v49  ;;  %vm16755_vm13 = vcmask 31744   ;;  %v1050_v1 = vrot.slane %v1034_v8, %v13448_v26  ;;  %v16757_v46 = vmov 0  ;;  %v1340_v22 = vsel %vm16460_vm2, %v1332_v39, %v1334_v40 }
 0x105   :  { %11129 = vmatmul.mubr.msk.bf16.vlgmr.msra.gmra.mrb[4].mxu1 %vm16749_vm0, %v190_v48  ;;  %vm1541_vm0 = vmpackc.low %vm13897_vm14, %vm13893_vm6  ;;  %vm13937_vm14 = vcmp.ne.s16.totalorder %v1378_v10, 0  ;;  %v16765_v19 = vmov 0  ;;  %v16784_v20 = vmov 0 }
 0x106   :  { %846 = vmatpush1.bf16.msra.mxu1 %v799_v36  ;;  %877 = vmatprep.mubr.bf16.mxu1 %v16497_v0  ;;  %v13910_v4 = vpop.permute.xlu0 %1335  ;;  %v13925_v53 = vpop.permute.xlu1 %1337  ;;  %v1543_v18 = vsel %vm1541_vm0, 65537, %v16497_v0  ;;  %vm16756_vm6 = vmmov %vm16753_vm8  ;;  %v16758_v46 = vsel %vm13937_vm14, 4294967295, %v16757_v46  ;;  %vm13941_vm8 = vcmp.eq.s32.totalorder %v1193_v61, 1  ;;  %vm13952_vm0 = vcmp.ne.s16.totalorder %v1050_v1, 0 }
 0x107   :  { %11136 = vmatprep.subr.msk.bf16.mxu1 %vm16754_vm10, %v13346_v7  ;;  %v1341_v48 = vsel %vm16460_vm2, %v1334_v40, %v13910_v4  ;;  %v1197_v7 = vrot.slane %v13646_v2, %v13433_v17  ;;  %16759 = vst [vmem:[#allocation42_spill] sm:$0xff] %v16758_v46  ;;  %v16766_v19 = vsel %vm13952_vm0, 4294967295, %v16765_v19  ;;  %v1552_v28 = vrot.slane %v1543_v18, %v13448_v26 }
 0x108   :  { %v1396_v12 = vsel %vm13902_vm9, %v1341_v48, 0  ;;  %16767 = vst [vmem:[#allocation43_spill] sm:$0xff] %v16766_v19  ;;  %vm16768_vm9 = vcmask 1041408   ;;  %v1395_v39 = vsel %vm13937_vm14, %v1340_v22, 0  ;;  %vm16769_vm2 = vcmask 31744  }
 0x109   :  { %11139 = vmatmul.mubr.msk.bf16.vlgmr.msra.gmra.mrb[0].mxu0 %vm16755_vm13, %v13907_v51  ;;  %vm13945_vm10 = vcmp.eq.s32.totalorder %v1197_v7, 1  ;;  %vm16764_vm13 = vcmask 1039360   ;;  %v900_v36 = vsel %vm16768_vm9, %v13338_v3, 0  ;;  %v1046_v40 = vrot.slane %v1034_v8, %v13420_v13 }
 0x10a   :  { %1246 = vmatpush1.bf16.msra.mxu0 %v1234_v57  ;;  %1277 = vmatprep.mubr.bf16.mxu0 %v16497_v0  ;;  %v1502_v6 = vpop.permute.xlu0 %1501  ;;  %v1008_v21 = vsel %vm16764_vm13, %v13774_v27, 0  ;;  %v1504_v30 = vpop.permute.xlu1 %1503  ;;  %vm1203_vm13 = vmpackc.low %vm13945_vm10, %vm13941_vm8  ;;  %vm13974_vm9 = vcmp.ne.s16.totalorder %v1552_v28, 0  ;;  %v16770_v3 = vmov 0  ;;  %vm16773_vm8 = vcmask 1041408  }
 0x10b   :  { %11146 = vmatprep.subr.msk.bf16.mxu0 %vm16756_vm6, %v1396_v12  ;;  %vm16461_vm6 = vcmask 908288   ;;  %v1058_v14 = vsel %vm13952_vm0, %v1008_v21, 0  ;;  %v16771_v3 = vsel %vm13974_vm9, 4294967295, %v16770_v3  ;;  %v1205_v57 = vsel %vm1203_vm13, 65537, %v16497_v0  ;;  %vm16774_vm10 = vmmov %vm16773_vm8 }
 0x10c   :  { %16772 = vst [vmem:[#allocation44_spill] sm:$0xff] %v16771_v3  ;;  %v1403_v48 = vsel %vm16773_vm8, %v1395_v39, 0  ;;  %v1362_v8 = vrot.slane %v13742_v56, %v13430_v16  ;;  %v1366_v12 = vrot.slane %v13742_v56, %v13433_v17  ;;  %vm13996_vm13 = vcmp.ne.s16.totalorder %v1046_v40, 0 }
 0x10d   :  { %v16777_v61 = vmov 0  ;;  %v1548_v7 = vrot.slane %v1543_v18, %v13420_v13  ;;  %v1221_v1 = vrot.slane %v1205_v57, %v13448_v26  ;;  %v16787_v2 = vmov 0 }
 0x10e   :  { %v13957_v33 = vpop.permute.xlu0 %1505  ;;  %v16778_v61 = vsel %vm13996_vm13, 4294967295, %v16777_v61  ;;  %v1536_v40 = vrot.slane %v13846_v62, %v13433_v17 }
 0x10f   :  { %v1511_v43 = vsel %vm16461_vm6, %v1504_v30, %v13957_v33  ;;  %vm16776_vm6 = vcmask 31744   ;;  %16779 = vst [vmem:[#allocation45_spill] sm:$0xff] %v16778_v61  ;;  %vm14013_vm14 = vcmp.ne.s16.totalorder %v1548_v7, 0  ;;  %vm14017_vm11 = vcmp.ne.s16.totalorder %v1221_v1, 0  ;;  %v1508_v7 = vpop.permute.xlu1 %1507 }
 0x110   :  { %v16785_v20 = vsel %vm14013_vm14, 4294967295, %v16784_v20  ;;  %v16788_v2 = vsel %vm14017_vm11, 4294967295, %v16787_v2 }
 0x111   :  { %11133 = vmatmul.mubr.msk.bf16.vlgmr.msra.gmra.mrb[4].mxu1 %vm16769_vm2, %v13700_v45  ;;  %v1566_v45 = vsel %vm13974_vm9, %v1511_v43, 0  ;;  %vm16775_vm2 = vcmask 1039360   ;;  %vm16783_vm9 = vcmask 908288   ;;  %16786 = vst [vmem:[#allocation46_spill] sm:$0xff] %v16785_v20  ;;  %16789 = vst [vmem:[#allocation47_spill] sm:$0xff] %v16788_v2  ;;  %v16795_v43 = vmov 0 }
 0x112   :  { %947 = vmatpush1.bf16.msra.mxu1 %v900_v36  ;;  %978 = vmatprep.mubr.bf16.mxu1 %v16497_v0  ;;  %v1002_v10 = vsel %vm16775_vm2, %v13768_v24, %v13774_v27  ;;  %vm16782_vm2 = vcmask 924672   ;;  %v1510_v18 = vsel %vm16783_vm9, %v1502_v6, %v1504_v30  ;;  %vm16790_vm9 = vcmask 31744   ;;  %v195_v30 = vld [vmem:[%s13128_s9 + $0xe] sm:$0x3] }
 0x113   :  { %11140 = vmatprep.subr.msk.bf16.mxu1 %vm16774_vm10, %v1058_v14  ;;  %v1057_v56 = vsel %vm13996_vm13, %v1002_v10, 0  ;;  %vm14006_vm10 = vcmp.eq.s32.totalorder %v1362_v8, 1  ;;  %v1179_v27 = vsel %vm16782_vm2, %v13851_v15, 0  ;;  %v1565_v22 = vsel %vm14013_vm14, %v1510_v18, 0  ;;  %vm16791_vm2 = vmmov %vm16773_vm8 }
 0x114   :  { %v1069_v21 = vsel %vm16773_vm8, %v1057_v56, 0  ;;  %v1229_v28 = vsel %vm14017_vm11, %v1179_v27, 0  ;;  %v1217_v6 = vrot.slane %v1205_v57, %v13420_v13  ;;  %v1573_v39 = vsel %vm16791_vm2, %v1565_v22, 0 }
 0x115   :  { %11143 = vmatmul.mubr.msk.bf16.vlgmr.msra.gmra.mrb[0].mxu0 %vm16776_vm6, %v13979_v37  ;;  %vm1370_vm6 = vcmp.eq.s32.totalorder %v1366_v12, 1  ;;  %v1532_v14 = vrot.slane %v13846_v62, %v13430_v16  ;;  %v16799_v62 = vmov 0  ;;  %vm16803_vm11 = vcmask 31744  }
 0x116   :  { %1415 = vmatpush1.bf16.msra.mxu0 %v1403_v48  ;;  %1446 = vmatprep.mubr.bf16.mxu0 %v16497_v0  ;;  %vm1372_vm13 = vmpackc.low %vm1370_vm6, %vm14006_vm10  ;;  %vm16793_vm6 = vcmask 924672   ;;  %v16807_v10 = vmov 0  ;;  %v16811_v24 = vmov 0  ;;  %v16816_v18 = vmov 0 }
 0x117   :  { %11150 = vmatprep.subr.msk.bf16.mxu0 %vm16773_vm8, %v1566_v45  ;;  %v1374_v36 = vsel %vm1372_vm13, 65537, %v16497_v0  ;;  %vm16792_vm10 = vmmov %vm16791_vm2  ;;  %vm1539_vm13 = vcmp.eq.s32.totalorder %v1532_v14, 1  ;;  %vm1540_vm2 = vcmp.eq.s32.totalorder %v1536_v40, 1  ;;  %v196_v45 = vld [vmem:[%s13128_s9 + $0x10] sm:$0x3]  ;;  %s13099_s9 = smov 9  }
 0x118   :  { %vm16794_vm8 = vmmov %vm16790_vm9  ;;  %v1390_v57 = vrot.slane %v1374_v36, %v13448_v26  ;;  %v1386_v48 = vrot.slane %v1374_v36, %v13420_v13 }
 0x119   :  { %vm1542_vm14 = vmpackc.low %vm1540_vm2, %vm1539_vm13 }
 0x11a   :  { %v1544_v8 = vsel %vm1542_vm14, 65537, %v16497_v0  ;;  %vm16806_vm13 = vmmov %vm16803_vm11  ;;  %vm14072_vm2 = vcmp.ne.s16.totalorder %v1386_v48, 0 }
 0x11b   :  { %v16808_v10 = vsel %vm14072_vm2, 4294967295, %v16807_v10 }
 0x11c   :  { %16809 = vst [vmem:[#allocation50_spill] sm:$0xff] %v16808_v10 }
 0x11d   :  { %11137 = vmatmul.mubr.msk.bf16.vlgmr.msra.gmra.mrb[4].mxu1 %vm16790_vm9, %v13812_v50  ;;  %v1173_v50 = vsel %vm16793_vm6, %v13849_v31, %v13851_v15  ;;  %vm14044_vm9 = vcmp.ne.s16.totalorder %v1217_v6, 0  ;;  %vm14054_vm6 = vcmp.ne.s16.totalorder %v1390_v57, 0 }
 0x11e   :  { %1116 = vmatpush1.bf16.msra.mxu1 %v1069_v21  ;;  %1147 = vmatprep.mubr.bf16.mxu1 %v16497_v0  ;;  %v16796_v43 = vsel %vm14044_vm9, 4294967295, %v16795_v43  ;;  %v1228_v16 = vsel %vm14044_vm9, %v1173_v50, 0  ;;  %v16800_v62 = vsel %vm14054_vm6, 4294967295, %v16799_v62 }
 0x11f   :  { %11144 = vmatprep.subr.msk.bf16.mxu1 %vm16792_vm10, %v1229_v28  ;;  %16797 = vst [vmem:[#allocation48_spill] sm:$0xff] %v16796_v43  ;;  %vm16798_vm10 = vcmask 916480   ;;  %16801 = vst [vmem:[#allocation49_spill] sm:$0xff] %v16800_v62 }
 0x120   :  { %v1348_v17 = vsel %vm16798_vm10, %v13925_v53, 0 }
 0x121   :  { %11147 = vmatmul.mubr.msk.bf16.vlgmr.msra.gmra.mrb[0].mxu0 %vm16794_vm8, %v195_v30  ;;  %vm16802_vm8 = vcmask 1041408   ;;  %v1398_v15 = vsel %vm14054_vm6, %v1348_v17, 0 }
 0x122   :  { %1585 = vmatpush1.bf16.msra.mxu0 %v1573_v39  ;;  %1616 = vmatprep.mubr.bf16.mxu0 %v16497_v0  ;;  %v1240_v31 = vsel %vm16802_vm8, %v1228_v16, 0  ;;  %vm16804_vm10 = vmmov %vm16802_vm8  ;;  %vm16805_vm8 = vcmask 916480  }
 0x123   :  { %v1342_v12 = vsel %vm16805_vm8, %v13910_v4, %v13925_v53  ;;  %vm16814_vm8 = vmmov %vm16806_vm13 }
 0x124   :  { %v1397_v1 = vsel %vm14072_vm2, %v1342_v12, 0 }
 0x125   :  { %v1409_v4 = vsel %vm16804_vm10, %v1397_v1, 0 }
 0x129   :  { %11141 = vmatmul.mubr.msk.bf16.vlgmr.msra.gmra.mrb[4].mxu1 %vm16803_vm11, %v13907_v51  ;;  %v1560_v51 = vrot.slane %v1544_v8, %v13448_v26  ;;  %vm16810_vm11 = vcmask 908288   ;;  %v1556_v26 = vrot.slane %v1544_v8, %v13420_v13 }
 0x12a   :  { %1287 = vmatpush1.bf16.msra.mxu1 %v1240_v31  ;;  %1318 = vmatprep.mubr.bf16.mxu1 %v16497_v0  ;;  %v1518_v56 = vsel %vm16810_vm11, %v1508_v7, 0  ;;  %v1512_v27 = vsel %vm16810_vm11, %v13957_v33, %v1508_v7 }
 0x12b   :  { %11148 = vmatprep.subr.msk.bf16.mxu1 %vm16804_vm10, %v1398_v15  ;;  %vm14081_vm14 = vcmp.ne.s16.totalorder %v1560_v51, 0  ;;  %vm14095_vm2 = vcmp.ne.s16.totalorder %v1556_v26, 0 }
 0x12c   :  { %v16812_v24 = vsel %vm14081_vm14, 4294967295, %v16811_v24  ;;  %v1568_v53 = vsel %vm14081_vm14, %v1518_v56, 0  ;;  %v16817_v18 = vsel %vm14095_vm2, 4294967295, %v16816_v18  ;;  %v1567_v21 = vsel %vm14095_vm2, %v1512_v27, 0  ;;  %vm16819_vm14 = vmmov %vm16814_vm8 }
 0x12d   :  { %11151 = vmatmul.mubr.msk.bf16.vlgmr.msra.gmra.mrb[0].mxu0 %vm16806_vm13, %v196_v45  ;;  %16813 = vst [vmem:[#allocation51_spill] sm:$0xff] %v16812_v24  ;;  %vm16815_vm13 = vmmov %vm16804_vm10  ;;  %v1579_v22 = vsel %vm16804_vm10, %v1567_v21, 0  ;;  %vm16828_vm2 = vcmask 31744  }
 0x12e   :  { %1834 = vmatprep.mubr.bf16.mxu0 %v16497_v0  ;;  %16818 = vst [vmem:[#allocation52_spill] sm:$0xff] %v16817_v18 }
 0x135   :  { %11145 = vmatmul.mubr.msk.bf16.vlgmr.msra.gmra.mrb[4].mxu1 %vm16814_vm8, %v13979_v37 }
 0x136   :  { %1456 = vmatpush1.bf16.msra.mxu1 %v1409_v4  ;;  %1487 = vmatprep.mubr.bf16.mxu1 %v16497_v0 }
 0x137   :  { %11152 = vmatprep.subr.msk.bf16.mxu1 %vm16815_vm13, %v1568_v53  ;;  %vm16478_vm13 = vcmask 1043456  }
 0x141   :  { %11149 = vmatmul.mubr.msk.bf16.vlgmr.msra.gmra.mrb[4].mxu1 %vm16814_vm8, %v195_v30  ;;  %vm16826_vm8 = vmmov %vm16804_vm10 }
 0x142   :  { %1626 = vmatpush1.bf16.msra.mxu1 %v1579_v22  ;;  %1657 = vmatprep.mubr.bf16.mxu1 %v16497_v0 }
 0x14d   :  { %11153 = vmatmul.mubr.msk.bf16.vlgmr.msra.gmra.mrb[4].mxu1 %vm16819_vm14, %v196_v45  ;;  %vm16824_vm14 = vcmask 130048  }
 0x14e   :  { %1875 = vmatprep.mubr.bf16.mxu1 %v16497_v0  ;;  %vm16825_vm11 = vmmov %vm16824_vm14 }
 0x1d0   :  { %v669_v37 = vpop.f32.mrb[0].mxu1 }
 0x1d1   :  { %v671_v33 = vpop.f32.mrb[1].mxu1 }
 0x1d2   :  { %v673_v28 = vpop.f32.mrb[2].mxu1 }
 0x1d3   :  { %v674_v6 = vpop.f32.mrb[3].mxu1 }
 0x200   :  { %v1618_v36 = vpop.f32.mrb[0].mxu0 }
 0x201   :  { %v12209_v39 = vadd.f32 %v1618_v36, %v669_v37  ;;  %v1620_v14 = vpop.f32.mrb[1].mxu0 }
 0x202   :  { %v12210_v40 = vadd.f32 %v1620_v14, %v671_v33  ;;  %v1622_v50 = vpop.f32.mrb[2].mxu0 }
 0x203   :  { %v1623_v57 = vpop.f32.mrb[3].mxu0  ;;  %v1680_v16 = vmul.f32 %v12209_v39, %v12209_v39  ;;  %v1671_v17 = vsel %vm16478_vm13, %v12209_v39, 0.0 }
 0x204   :  { %v1681_v30 = vmul.f32 %v12210_v40, %v12210_v40  ;;  %v1672_v31 = vsel %vm16478_vm13, %v12210_v40, 0.0 }
 0x205   :  { %v1684_v15 = vsel %vm16478_vm13, %v1680_v16, 0.0  ;;  %v1673_v8 = vadd.f32 %v1672_v31, %v1671_v17  ;;  %v1699_v31 = vld [vmem:[%s13133_s13] sm:$0xf]  ;;  %s13100_s13 = smov 8  }
 0x206   :  { %v1685_v48 = vsel %vm16478_vm13, %v1681_v30, 0.0 }
 0x207   :  { %v1686_v26 = vadd.f32 %v1685_v48, %v1684_v15 }
 0x220   :  { %v1659_v45 = vpop.f32.mrb[4].mxu1 }
 0x221   :  { %v1674_v12 = vsel %vm16478_vm13, %v1659_v45, 0.0  ;;  %v1682_v51 = vmul.f32 %v1659_v45, %v1659_v45  ;;  %v1661_v7 = vpop.f32.mrb[5].mxu1 }
 0x222   :  { %v1683_v1 = vmul.f32 %v1661_v7, %v1661_v7  ;;  %v1663_v56 = vpop.f32.mrb[6].mxu1  ;;  %v1675_v4 = vadd.f32 %v1674_v12, %v1673_v8  ;;  %v1676_v53 = vsel %vm16478_vm13, %v1661_v7, 0.0  ;;  %v1703_v8 = vld [vmem:[%s13138_s17] sm:$0xf]  ;;  %s13101_s17 = smov 7  }
 0x223   :  { %v1664_v27 = vpop.f32.mrb[7].mxu1  ;;  %v1687_v21 = vsel %vm16478_vm13, %v1682_v51, 0.0 }
 0x224   :  { %v1677_v22 = vadd.f32 %v1676_v53, %v1675_v4  ;;  %v1688_v37 = vadd.f32 %v1687_v21, %v1686_v26  ;;  %v1689_v33 = vsel %vm16478_vm13, %v1683_v1, 0.0  ;;  %vm16827_vm13 = vmmov %vm16825_vm11 }
 0x226   :  { %1678 = vadd.xlane.f32.xlu0 %v1677_v22  ;;  %v1690_v28 = vadd.f32 %v1689_v33, %v1688_v37 }
 0x228   :  { %1691 = vadd.xlane.f32.xlu1 %v1690_v28 }
 0x2b3   :  { %v1679_v6 = vpop.xlane.xlu0 %1678 }
 0x2b4   :  { %v1694_v36 = vmul.f32 0.001953125, %v1679_v6 }
 0x2b5   :  { %v1692_v14 = vpop.xlane.xlu1 %1691 }
 0x2b6   :  { %v1696_v50 = vmul.f32 %v1694_v36, %v1694_v36  ;;  %v1695_v57 = vmul.f32 0.001953125, %v1692_v14 }
 0x2b8   :  { %v1697_v16 = vsub.f32 %v1695_v57, %v1696_v50 }
 0x2ba   :  { %v1698_v30 = vmax.f32 %v1697_v16, 0.0 }
 0x2bc   :  { %v1700_v17 = vadd.f32 1e-05, %v1698_v30 }
 0x2be   :  { %12978 = vrsqrt.f32 %v1700_v17 }
 0x2c8   :  { %v12979_v15 = vpop.eup %12978 }
 0x2c9   :  { %v1702_v48 = vmul.f32 %v12979_v15, %v1699_v31 }
 0x2cb   :  { %1708 = vperm.xlu0 %12840, %v1702_v48   ;;  %v1704_v12 = vmul.f32 %v1702_v48, %v1694_v36 }
 0x2cd   :  { %v1705_v51 = vsub.f32 %v1703_v8, %v1704_v12  ;;  %v1729_v8 = vld [vmem:[%s13143_s21 + $0x4] sm:$0xf] }
 0x2cf   :  { %1717 = vperm.xlu1 %12841, %v1705_v51  }
 0x34a   :  { %v1709_v1 = vpop.permute.xlu0 %1708 }
 0x34b   :  { %v1711_v56 = vmul.f32 %v12209_v39, %v1709_v1  ;;  %v1712_v4 = vmul.f32 %v12210_v40, %v1709_v1  ;;  %v1713_v53 = vmul.f32 %v1709_v1, %v1659_v45  ;;  %v1714_v39 = vmul.f32 %v1709_v1, %v1661_v7 }
 0x34e   :  { %v1718_v26 = vpop.permute.xlu1 %1717 }
 0x34f   :  { %v1720_v27 = vadd.f32 %v1718_v26, %v1711_v56  ;;  %v1721_v21 = vadd.f32 %v1718_v26, %v1712_v4  ;;  %v1722_v22 = vadd.f32 %v1718_v26, %v1713_v53  ;;  %v1723_v40 = vadd.f32 %v1718_v26, %v1714_v39 }
 0x351   :  { %v14116_v37 = vmax.f32 %v1720_v27, 0.0  ;;  %v14118_v33 = vmax.f32 %v1722_v22, 0.0  ;;  %v14120_v28 = vmax.f32 %v1721_v21, 0.0  ;;  %v14142_v14 = vmax.f32 %v1723_v40, 0.0 }
 0x353   :  { %16820 = vst [vmem:[#allocation53_spill] sm:$0xff] %v14116_v37  ;;  %16821 = vst [vmem:[#allocation54_spill] sm:$0xff] %v14118_v33  ;;  %v14124_v6 = vpack.c.bf16 %v14116_v37, %v14116_v37  ;;  %v14128_v36 = vpack.c.bf16 %v14118_v33, %v14118_v33  ;;  %v14136_v45 = vpack.c.bf16 %v14120_v28, %v14120_v28 }
 0x354   :  { %16822 = vst [vmem:[#allocation55_spill] sm:$0xff] %v14120_v28  ;;  %16823 = vst [vmem:[#allocation56_spill] sm:$0xff] %v14142_v14  ;;  %v14150_v7 = vpack.c.bf16 %v14142_v14, %v14142_v14  ;;  %v3833_v28 = vld [vmem:[%s13168_s14] sm:$0xff]  ;;  %s13106_s14 = smov 4  }
 0x355   :  { %1749 = vrot.lane.b32.xlu0 %v14128_v36, %s13090_s5  ;;  %1766 = vrot.lane.b32.xlu1 %v14124_v6, %s13089_s0 }
 0x359   :  { %1981 = vrot.lane.b32.xlu0 %v14124_v6, %s13091_s16  ;;  %1768 = vrot.lane.b32.xlu1 %v14136_v45, %s13089_s0 }
 0x35d   :  { %1985 = vrot.lane.b32.xlu0 %v14128_v36, %s13091_s16  ;;  %1770 = vrot.lane.b32.xlu1 %v14128_v36, %s13089_s0 }
 0x361   :  { %2103 = vrot.lane.b32.xlu0 %v14124_v6, %s13092_s18  ;;  %1772 = vrot.lane.b32.xlu1 %v14150_v7, %s13089_s0 }
 0x365   :  { %2107 = vrot.lane.b32.xlu0 %v14128_v36, %s13092_s18  ;;  %1745 = vrot.lane.b32.xlu1 %v14124_v6, %s13090_s5 }
 0x369   :  { %2326 = vrot.lane.b32.xlu0 %v14124_v6, %s13093_s22  ;;  %1747 = vrot.lane.b32.xlu1 %v14136_v45, %s13090_s5 }
 0x36d   :  { %2330 = vrot.lane.b32.xlu0 %v14128_v36, %s13093_s22  ;;  %1751 = vrot.lane.b32.xlu1 %v14150_v7, %s13090_s5 }
 0x371   :  { %2448 = vrot.lane.b32.xlu0 %v14124_v6, %s13094_s23  ;;  %1983 = vrot.lane.b32.xlu1 %v14136_v45, %s13091_s16 }
 0x375   :  { %2452 = vrot.lane.b32.xlu0 %v14128_v36, %s13094_s23  ;;  %1987 = vrot.lane.b32.xlu1 %v14150_v7, %s13091_s16 }
 0x379   :  { %2570 = vrot.lane.b32.xlu0 %v14124_v6, %s13095_s26  ;;  %2105 = vrot.lane.b32.xlu1 %v14136_v45, %s13092_s18 }
 0x37d   :  { %2574 = vrot.lane.b32.xlu0 %v14128_v36, %s13095_s26  ;;  %2109 = vrot.lane.b32.xlu1 %v14150_v7, %s13092_s18 }
 0x381   :  { %2692 = vrot.lane.b32.xlu0 %v14124_v6, %s13096_s28  ;;  %2328 = vrot.lane.b32.xlu1 %v14136_v45, %s13093_s22 }
 0x385   :  { %2696 = vrot.lane.b32.xlu0 %v14128_v36, %s13096_s28  ;;  %2332 = vrot.lane.b32.xlu1 %v14150_v7, %s13093_s22 }
 0x389   :  { %2450 = vrot.lane.b32.xlu1 %v14136_v45, %s13094_s23 }
 0x38d   :  { %2454 = vrot.lane.b32.xlu1 %v14150_v7, %s13094_s23 }
 0x391   :  { %2572 = vrot.lane.b32.xlu1 %v14136_v45, %s13095_s26 }
 0x395   :  { %2576 = vrot.lane.b32.xlu1 %v14150_v7, %s13095_s26 }
 0x399   :  { %2694 = vrot.lane.b32.xlu1 %v14136_v45, %s13096_s28 }
 0x39d   :  { %2698 = vrot.lane.b32.xlu1 %v14150_v7, %s13096_s28 }
 0x3c7   :  { %v1767_v50 = vpop.permute.xlu1 %1766  ;;  %v1750_v51 = vpop.permute.xlu0 %1749 }
 0x3c8   :  { %v1781_v57 = vsel %vm16824_vm14, 0, %v1767_v50  ;;  %vm16829_vm14 = vmmov %vm16825_vm11 }
 0x3c9   :  { %v1783_v30 = vsel %vm13468_vm15, %v1781_v57, 0 }
 0x3ca   :  { %v1791_v15 = vsel %vm16826_vm8, %v1783_v30, 0 }
 0x3cb   :  { %v1769_v16 = vpop.permute.xlu1 %1768  ;;  %v1982_v22 = vpop.permute.xlu0 %1981 }
 0x3cc   :  { %v1774_v17 = vsel %vm16825_vm11, %v1767_v50, %v1769_v16  ;;  %vm16830_vm11 = vmmov %vm16826_vm8 }
 0x3cd   :  { %v1784_v31 = vsel %vm13479_vm5, %v1774_v17, 0 }
 0x3ce   :  { %11154 = vmatprep.subr.msk.bf16.mxu0 %vm16804_vm10, %v1784_v31  ;;  %vm16831_vm10 = vmmov %vm16826_vm8  ;;  %vm16834_vm8 = vnez %v16650_v23 }
 0x3cf   :  { %1803 = vmatpush1.bf16.msra.mxu0 %v1791_v15  ;;  %v1771_v48 = vpop.permute.xlu1 %1770  ;;  %v1986_v17 = vpop.permute.xlu0 %1985  ;;  %v1728_v15 = vld [vmem:[%s13143_s21] sm:$0xf] }
 0x3d0   :  { %v1775_v12 = vsel %vm16827_vm13, %v1769_v16, %v1771_v48  ;;  %vm16833_vm13 = vcmask 31744  }
 0x3d1   :  { %v1785_v56 = vsel %vm13500_vm7, %v1775_v12, 0 }
 0x3d2   :  { %11155 = vmatmul.mubr.msk.bf16.vlgmr.msra.gmra.mrb[4].mxu0 %vm16828_vm2, %v1729_v8  ;;  %v1797_v26 = vsel %vm16831_vm10, %v1785_v56, 0  ;;  %vm16832_vm2 = vcmask 138240  }
 0x3d3   :  { %v1773_v1 = vpop.permute.xlu1 %1772  ;;  %1931 = vmatprep.mubr.bf16.mxu0 %v16497_v0  ;;  %vm16836_vm7 = vmmov %vm16832_vm2 }
 0x3d4   :  { %v1776_v4 = vsel %vm16829_vm14, %v1771_v48, %v1773_v1  ;;  %vm16835_vm14 = vmmov %vm16832_vm2 }
 0x3d5   :  { %v1786_v53 = vsel %vm13475_vm4, %v1776_v4, 0  ;;  %vm16838_vm4 = vmmov %vm16831_vm10 }
 0x3d6   :  { %11156 = vmatprep.subr.msk.bf16.mxu1 %vm16830_vm11, %v1786_v53  ;;  %vm16837_vm11 = vnez %v16640_v60  ;;  %vm16841_vm5 = vmmov %vm16836_vm7 }
 0x3d7   :  { %1844 = vmatpush1.bf16.msra.mxu1 %v1797_v26  ;;  %v1746_v27 = vpop.permute.xlu1 %1745  ;;  %vm16844_vm15 = vmmov %vm16838_vm4 }
 0x3d8   :  { %v1760_v21 = vsel %vm16832_vm2, 0, %v1746_v27  ;;  %vm16839_vm2 = vnez %v16662_v58 }
 0x3d9   :  { %v1762_v40 = vsel %vm16834_vm8, %v1760_v21, 0 }
 0x3da   :  { %11157 = vmatmul.mubr.msk.bf16.vlgmr.msra.gmra.mrb[8].mxu1 %vm16833_vm13, %v1729_v8  ;;  %v1888_v30 = vsel %vm16838_vm4, %v1762_v40, 0  ;;  %vm16840_vm13 = vcmask 121856  }
 0x3db   :  { %v1748_v39 = vpop.permute.xlu1 %1747  ;;  %1972 = vmatprep.mubr.bf16.mxu1 %v16497_v0  ;;  %v1996_v8 = vsel %vm16840_vm13, 0, %v1982_v22 }
 0x3dc   :  { %v1753_v50 = vsel %vm16835_vm14, %v1746_v27, %v1748_v39  ;;  %v1754_v57 = vsel %vm16836_vm7, %v1748_v39, %v1750_v51  ;;  %vm16842_vm7 = vnez %v16652_v34  ;;  %vm16843_vm14 = vcmask 31744   ;;  %v2104_v27 = vpop.permute.xlu0 %2103 }
 0x3dd   :  { %v1763_v16 = vsel %vm16837_vm11, %v1753_v50, 0  ;;  %v1764_v48 = vsel %vm16839_vm2, %v1754_v57, 0  ;;  %vm16847_vm2 = vmmov %vm16840_vm13 }
 0x3de   :  { %11158 = vmatprep.subr.msk.bf16.mxu0 %vm16831_vm10, %v1763_v16  ;;  %vm16845_vm10 = vmmov %vm16838_vm4  ;;  %vm16846_vm4 = vnez %v16688_v44 }
 0x3df   :  { %1900 = vmatpush1.bf16.msra.mxu0 %v1888_v30  ;;  %v1752_v31 = vpop.permute.xlu1 %1751  ;;  %v1894_v56 = vsel %vm16845_vm10, %v1764_v48, 0  ;;  %v1998_v53 = vsel %vm16846_vm4, %v1996_v8, 0  ;;  %vm16848_vm13 = vmmov %vm16847_vm2  ;;  %vm16851_vm4 = vnez %v16711_v29  ;;  %v1730_v48 = vld [vmem:[%s13143_s21 + $0x8] sm:$0xf] }
 0x3e0   :  { %v1755_v12 = vsel %vm16841_vm5, %v1750_v51, %v1752_v31  ;;  %vm16849_vm5 = vnez %v16675_v5  ;;  %v2006_v39 = vsel %vm16845_vm10, %v1998_v53, 0  ;;  %v2108_v31 = vpop.permute.xlu0 %2107 }
 0x3e1   :  { %v1765_v1 = vsel %vm16842_vm7, %v1755_v12, 0  ;;  %vm16854_vm7 = vmmov %vm16845_vm10 }
 0x3e2   :  { %11159 = vmatmul.mubr.msk.bf16.vlgmr.msra.gmra.mrb[4].mxu0 %vm16843_vm14, %v1728_v15  ;;  %11160 = vmatprep.subr.msk.bf16.mxu1 %vm16844_vm15, %v1765_v1  ;;  %vm16850_vm15 = vmmov %vm16845_vm10 }
 0x3e3   :  { %1941 = vmatpush1.bf16.msra.mxu1 %v1894_v56  ;;  %v1984_v4 = vpop.permute.xlu1 %1983  ;;  %2049 = vmatprep.mubr.bf16.mxu0 %v16497_v0 }
 0x3e4   :  { %v1989_v26 = vsel %vm16847_vm2, %v1982_v22, %v1984_v4  ;;  %v1990_v51 = vsel %vm16848_vm13, %v1984_v4, %v1986_v17  ;;  %vm16852_vm2 = vcmask 7168  }
 0x3e5   :  { %v1999_v21 = vsel %vm16849_vm5, %v1989_v26, 0  ;;  %v2000_v50 = vsel %vm16851_vm4, %v1990_v51, 0  ;;  %v2118_v22 = vsel %vm16852_vm2, 0, %v2104_v27  ;;  %vm16853_vm5 = vnez %v16699_v52  ;;  %vm16857_vm10 = vmmov %vm16852_vm2  ;;  %v2327_v51 = vpop.permute.xlu0 %2326 }
 0x3e6   :  { %11161 = vmatmul.mubr.msk.bf16.vlgmr.msra.gmra.mrb[8].mxu1 %vm16843_vm14, %v1728_v15  ;;  %11162 = vmatprep.subr.msk.bf16.mxu0 %vm16850_vm15, %v1999_v21  ;;  %vm16855_vm14 = vmmov %vm16854_vm7  ;;  %vm16856_vm15 = vnez %v16667_v63 }
 0x3e7   :  { %2018 = vmatpush1.bf16.msra.mxu0 %v2006_v39  ;;  %v1988_v40 = vpop.permute.xlu1 %1987  ;;  %2090 = vmatprep.mubr.bf16.mxu1 %v16497_v0  ;;  %v2012_v30 = vsel %vm16855_vm14, %v2000_v50, 0  ;;  %v2120_v8 = vsel %vm16856_vm15, %v2118_v22, 0  ;;  %vm16858_vm4 = vmmov %vm16852_vm2  ;;  %vm16859_vm2 = vnez %v16664_v59  ;;  %v1731_v50 = vld [vmem:[%s13143_s21 + $0xc] sm:$0xf]  ;;  %vm16957_vm15 = vcmask 1043456  }
 0x3e8   :  { %v1991_v57 = vsel %vm16848_vm13, %v1986_v17, %v1988_v40  ;;  %vm16860_vm13 = vcmask 31744   ;;  %vm16863_vm14 = vmmov %vm16858_vm4 }
 0x3e9   :  { %v2001_v16 = vsel %vm16853_vm5, %v1991_v57, 0  ;;  %vm16861_vm5 = vmmov %vm16854_vm7  ;;  %v2331_v40 = vpop.permute.xlu0 %2330 }
 0x3ea   :  { %11164 = vmatprep.subr.msk.bf16.mxu1 %vm16854_vm7, %v2001_v16  ;;  %vm16862_vm7 = vmmov %vm16861_vm5 }
 0x3eb   :  { %2059 = vmatpush1.bf16.msra.mxu1 %v2012_v30  ;;  %v2106_v15 = vpop.permute.xlu1 %2105  ;;  %v2128_v56 = vsel %vm16862_vm7, %v2120_v8, 0 }
 0x3ec   :  { %v2111_v12 = vsel %vm16857_vm10, %v2104_v27, %v2106_v15  ;;  %v2112_v1 = vsel %vm16858_vm4, %v2106_v15, %v2108_v31  ;;  %vm16864_vm4 = vmmov %vm16861_vm5 }
 0x3ed   :  { %v2121_v17 = vsel %vm16859_vm2, %v2111_v12, 0  ;;  %v2122_v53 = vsel %vm13818_vm3, %v2112_v1, 0  ;;  %vm16866_vm10 = vmmov %vm16864_vm4  ;;  %v1732_v12 = vld [vmem:[%s13143_s21 + $0x10] sm:$0xf] }
 0x3ee   :  { %11163 = vmatmul.mubr.msk.bf16.vlgmr.msra.gmra.mrb[4].mxu0 %vm16860_vm13, %v1730_v48  ;;  %11166 = vmatprep.subr.msk.bf16.mxu0 %vm16861_vm5, %v2121_v17  ;;  %vm16865_vm5 = vmmov %vm16860_vm13 }
 0x3ef   :  { %2140 = vmatpush1.bf16.msra.mxu0 %v2128_v56  ;;  %v2110_v4 = vpop.permute.xlu1 %2109  ;;  %2171 = vmatprep.mubr.bf16.mxu0 %v16497_v0  ;;  %vm16867_vm13 = vmmov %vm16864_vm4 }
 0x3f0   :  { %v2113_v26 = vsel %vm16863_vm14, %v2108_v31, %v2110_v4  ;;  %11170 = vmatprep.subr.msk.bf16.mxu0 %vm16864_vm4, %v14136_v45  ;;  %v2134_v21 = vsel %vm16867_vm13, %v2122_v53, 0  ;;  %vm16868_vm7 = vmmov %vm16864_vm4  ;;  %vm16869_vm14 = vcmask 1039360  }
 0x3f1   :  { %v2123_v27 = vsel %vm13798_vm1, %v2113_v26, 0  ;;  %vm16870_vm4 = vmmov %vm16865_vm5 }
 0x3f2   :  { %11165 = vmatmul.mubr.msk.bf16.vlgmr.msra.gmra.mrb[8].mxu1 %vm16865_vm5, %v1730_v48  ;;  %11168 = vmatprep.subr.msk.bf16.mxu1 %vm16866_vm10, %v2123_v27  ;;  %vm16871_vm5 = vmmov %vm16868_vm7  ;;  %vm16872_vm10 = vnez %v16703_v9 }
 0x3f3   :  { %2181 = vmatpush1.bf16.msra.mxu1 %v2134_v21  ;;  %v2329_v39 = vpop.permute.xlu1 %2328  ;;  %2212 = vmatprep.mubr.bf16.mxu1 %v16497_v0  ;;  %v2229_v57 = vsel %vm16871_vm5, %v14124_v6, 0  ;;  %vm16873_vm13 = vmmov %vm16869_vm14 }
 0x3f4   :  { %11172 = vmatprep.subr.msk.bf16.mxu1 %vm16868_vm7, %v14150_v7  ;;  %v2335_v45 = vsel %vm16869_vm14, %v2329_v39, %v2331_v40  ;;  %vm16874_vm7 = vmmov %vm16871_vm5  ;;  %v2449_v7 = vpop.permute.xlu0 %2448 }
 0x3f5   :  { %v2344_v16 = vsel %vm16872_vm10, %v2335_v45, 0  ;;  %vm16875_vm3 = vmmov %vm16870_vm4 }
 0x3f6   :  { %vm16876_vm14 = vmmov %vm16871_vm5 }
 0x3f7   :  { %v2333_v22 = vpop.permute.xlu1 %2332  ;;  %v2235_v31 = vsel %vm16876_vm14, %v14128_v36, 0  ;;  %vm16881_vm14 = vcmask 31744   ;;  %vm16882_vm10 = vmmov %vm16871_vm5 }
 0x3f8   :  { %v2341_v30 = vsel %vm16873_vm13, %v2333_v22, 0  ;;  %v2453_v8 = vpop.permute.xlu0 %2452 }
 0x3f9   :  { %v2346_v6 = vsel %vm13952_vm0, %v2341_v30, 0 }
 0x3fa   :  { %11167 = vmatmul.mubr.msk.bf16.vlgmr.msra.gmra.mrb[4].mxu0 %vm16870_vm4, %v1731_v50  ;;  %vm16877_vm4 = vmmov %vm16873_vm13  ;;  %vm16878_vm13 = vnez %v16706_v25 }
 0x3fb   :  { %2241 = vmatpush1.bf16.msra.mxu0 %v2229_v57  ;;  %2272 = vmatprep.mubr.bf16.mxu0 %v16497_v0  ;;  %v2451_v15 = vpop.permute.xlu1 %2450  ;;  %v2334_v48 = vsel %vm16877_vm4, %v2327_v51, %v2329_v39 }
 0x3fc   :  { %11174 = vmatprep.subr.msk.bf16.mxu0 %vm16874_vm7, %v2344_v16  ;;  %v2343_v1 = vsel %vm16878_vm13, %v2334_v48, 0  ;;  %vm16880_vm7 = vcmask 924672   ;;  %v2571_v27 = vpop.permute.xlu0 %2570 }
 0x3fd   :  { %v2457_v36 = vsel %vm16880_vm7, %v2451_v15, %v2453_v8  ;;  %v2351_v4 = vsel %vm16882_vm10, %v2343_v1, 0 }
 0x3fe   :  { %11169 = vmatmul.mubr.msk.bf16.vlgmr.msra.gmra.mrb[8].mxu1 %vm16875_vm3, %v1731_v50  ;;  %vm16879_vm3 = vmmov %vm16877_vm4  ;;  %v2466_v53 = vsel %vm13841_vm12, %v2457_v36, 0  ;;  %vm16883_vm4 = vnez %v16778_v61 }
 0x3ff   :  { %2282 = vmatpush1.bf16.msra.mxu1 %v2235_v31  ;;  %2313 = vmatprep.mubr.bf16.mxu1 %v16497_v0  ;;  %v2336_v17 = vsel %vm16879_vm3, %v2331_v40, %v2333_v22  ;;  %v2455_v56 = vpop.permute.xlu1 %2454  ;;  %vm16885_vm3 = vmmov %vm16882_vm10  ;;  %vm16888_vm10 = vnez %v16788_v2  ;;  %v1733_v22 = vld [vmem:[%s13143_s21 + $0x14] sm:$0xf] }
 0x400   :  { %11176 = vmatprep.subr.msk.bf16.mxu1 %vm16871_vm5, %v2346_v6  ;;  %v2345_v26 = vsel %vm16883_vm4, %v2336_v17, 0  ;;  %vm16884_vm5 = vmmov %vm16880_vm7  ;;  %v2575_v45 = vpop.permute.xlu0 %2574 }
 0x401   :  { %v2463_v51 = vsel %vm16884_vm5, %v2455_v56, 0  ;;  %vm16886_vm7 = vmmov %vm16881_vm14 }
 0x402   :  { %v2468_v40 = vsel %vm16888_vm10, %v2463_v51, 0  ;;  %vm16889_vm12 = vmmov %vm16884_vm5  ;;  %vm16891_vm5 = vnez %v16742_v32  ;;  %vm16896_vm10 = vnez %v16751_v49  ;;  %v4536_v49 = vld [vmem:[%s17007_s2] sm:$0xff]  ;;  %s17053_s2 = sld [smem:[#allocation12_spill]] }
 0x403   :  { %v2573_v39 = vpop.permute.xlu1 %2572  ;;  %v2456_v50 = vsel %vm16889_vm12, %v2449_v7, %v2451_v15  ;;  %vm16890_vm4 = vmmov %vm16885_vm3 }
 0x404   :  { %v2465_v57 = vsel %vm16891_vm5, %v2456_v50, 0  ;;  %vm16895_vm0 = vmmov %vm16890_vm4 }
 0x405   :  { %v2473_v6 = vsel %vm16895_vm0, %v2465_v57, 0 }
 0x406   :  { %11171 = vmatmul.mubr.msk.bf16.vlgmr.msra.gmra.mrb[4].mxu0 %vm16881_vm14, %v1732_v12  ;;  %vm16887_vm14 = vmmov %vm16885_vm3 }
 0x407   :  { %2363 = vmatpush1.bf16.msra.mxu0 %v2351_v4  ;;  %2394 = vmatprep.mubr.bf16.mxu0 %v16497_v0  ;;  %v2357_v21 = vsel %vm16887_vm14, %v2345_v26, 0  ;;  %v2577_v31 = vpop.permute.xlu1 %2576  ;;  %vm16894_vm14 = vcmask 31744   ;;  %v1734_v4 = vld [vmem:[%s13143_s21 + $0x18] sm:$0xf] }
 0x408   :  { %11178 = vmatprep.subr.msk.bf16.mxu0 %vm16885_vm3, %v2466_v53  ;;  %vm16892_vm3 = vmmov %vm16889_vm12 }
 0x409   :  { %v2458_v16 = vsel %vm16892_vm3, %v2453_v8, %v2455_v56  ;;  %v2693_v8 = vpop.permute.xlu0 %2692  ;;  %vm16899_vm3 = vmmov %vm16894_vm14 }
 0x40a   :  { %11173 = vmatmul.mubr.msk.bf16.vlgmr.msra.gmra.mrb[8].mxu1 %vm16886_vm7, %v1732_v12  ;;  %vm16893_vm7 = vcmask 916480   ;;  %v2467_v15 = vsel %vm14044_vm9, %v2458_v16, 0  ;;  %v1735_v16 = vld [vmem:[%s13143_s21 + $0x1c] sm:$0xf] }
 0x40b   :  { %2404 = vmatpush1.bf16.msra.mxu1 %v2357_v21  ;;  %2435 = vmatprep.mubr.bf16.mxu1 %v16497_v0  ;;  %v2579_v30 = vsel %vm16893_vm7, %v2573_v39, %v2575_v45  ;;  %vm16897_vm12 = vmmov %vm16893_vm7  ;;  %v2695_v1 = vpop.permute.xlu1 %2694 }
 0x40c   :  { %11180 = vmatprep.subr.msk.bf16.mxu1 %vm16890_vm4, %v2468_v40  ;;  %v2588_v7 = vsel %vm16896_vm10, %v2579_v30, 0  ;;  %v2585_v48 = vsel %vm16897_vm12, %v2577_v31, 0  ;;  %vm16898_vm4 = vmmov %vm16895_vm0 }
 0x40d   :  { %vm16900_vm7 = vmmov %vm16895_vm0  ;;  %v2590_v17 = vsel %vm14054_vm6, %v2585_v48, 0  ;;  %v2697_v56 = vpop.permute.xlu0 %2696  ;;  %v1736_v48 = vld [vmem:[%s13143_s21 + $0x20] sm:$0xf]  ;;  %s13102_s21 = smov 121  }
 0x40e   :  { %v2479_v12 = vsel %vm16900_vm7, %v2467_v15, 0  ;;  %vm16901_vm0 = vmmov %vm16897_vm12  ;;  %vm16903_vm12 = vnez %v16758_v46  ;;  %vm16906_vm7 = vcmask 31744  }
 0x40f   :  { %v2578_v36 = vsel %vm16901_vm0, %v2571_v27, %v2573_v39  ;;  %v2699_v21 = vpop.permute.xlu1 %2698 }
 0x410   :  { %v2587_v53 = vsel %vm16903_vm12, %v2578_v36, 0 }
 0x412   :  { %11175 = vmatmul.mubr.msk.bf16.vlgmr.msra.gmra.mrb[4].mxu0 %vm16894_vm14, %v1733_v22  ;;  %vm16902_vm14 = vmmov %vm16898_vm4 }
 0x413   :  { %2485 = vmatpush1.bf16.msra.mxu0 %v2473_v6  ;;  %2516 = vmatprep.mubr.bf16.mxu0 %v16497_v0  ;;  %vm16907_vm6 = vmmov %vm16902_vm14 }
 0x414   :  { %11182 = vmatprep.subr.msk.bf16.mxu0 %vm16898_vm4, %v2588_v7  ;;  %vm16904_vm4 = vmmov %vm16901_vm0  ;;  %v2595_v40 = vsel %vm16907_vm6, %v2587_v53, 0  ;;  %vm16908_vm0 = vnez %v16771_v3 }
 0x415   :  { %v2580_v26 = vsel %vm16904_vm4, %v2575_v45, %v2577_v31  ;;  %vm16911_vm4 = vmmov %vm16907_vm6  ;;  %vm16914_vm6 = vnez %v16812_v24 }
 0x416   :  { %11177 = vmatmul.mubr.msk.bf16.vlgmr.msra.gmra.mrb[8].mxu1 %vm16899_vm3, %v1733_v22  ;;  %vm16905_vm3 = vcmask 908288   ;;  %vm16913_vm10 = vmmov %vm16911_vm4 }
 0x417   :  { %2526 = vmatpush1.bf16.msra.mxu1 %v2479_v12  ;;  %2557 = vmatprep.mubr.bf16.mxu1 %v16497_v0  ;;  %v2701_v51 = vsel %vm16905_vm3, %v2695_v1, %v2697_v56  ;;  %vm16910_vm12 = vmmov %vm16905_vm3 }
 0x418   :  { %11184 = vmatprep.subr.msk.bf16.mxu1 %vm16902_vm14, %v2590_v17  ;;  %v2710_v27 = vsel %vm16908_vm0, %v2701_v51, 0  ;;  %vm16909_vm14 = vnez %v16808_v10  ;;  %v2707_v50 = vsel %vm16910_vm12, %v2699_v21, 0  ;;  %vm16912_vm3 = vmmov %vm16906_vm7 }
 0x419   :  { %v2589_v39 = vsel %vm16909_vm14, %v2580_v26, 0  ;;  %v2712_v22 = vsel %vm16914_vm6, %v2707_v50, 0  ;;  %vm16916_vm0 = vmmov %vm16911_vm4  ;;  %vm16920_vm6 = vnez %v16817_v18 }
 0x41a   :  { %v2601_v45 = vsel %vm16913_vm10, %v2589_v39, 0  ;;  %vm16919_vm10 = vmmov %vm16916_vm0 }
 0x41b   :  { %vm16921_vm14 = vmmov %vm16912_vm3 }
 0x41e   :  { %11179 = vmatmul.mubr.msk.bf16.vlgmr.msra.gmra.mrb[4].mxu0 %vm16906_vm7, %v1734_v4  ;;  %vm16915_vm7 = vmmov %vm16910_vm12  ;;  %vm16917_vm12 = vnez %v16785_v20 }
 0x41f   :  { %2607 = vmatpush1.bf16.msra.mxu0 %v2595_v40  ;;  %2638 = vmatprep.mubr.bf16.mxu0 %v16497_v0  ;;  %v2700_v57 = vsel %vm16915_vm7, %v2693_v8, %v2695_v1 }
 0x420   :  { %11186 = vmatprep.subr.msk.bf16.mxu0 %vm16911_vm4, %v2710_v27  ;;  %v2709_v30 = vsel %vm16917_vm12, %v2700_v57, 0  ;;  %vm16918_vm4 = vmmov %vm16915_vm7  ;;  %vm16517_vm12 = vcmask 64512  }
 0x421   :  { %v2702_v31 = vsel %vm16918_vm4, %v2697_v56, %v2699_v21  ;;  %v2717_v6 = vsel %vm16919_vm10, %v2709_v30, 0  ;;  %vm16922_vm7 = vmmov %vm16916_vm0  ;;  %vm16927_vm10 = vcmask 916480  }
 0x422   :  { %11181 = vmatmul.mubr.msk.bf16.vlgmr.msra.gmra.mrb[8].mxu1 %vm16912_vm3, %v1734_v4  ;;  %v2711_v7 = vsel %vm16920_vm6, %v2702_v31, 0 }
 0x423   :  { %2648 = vmatpush1.bf16.msra.mxu1 %v2601_v45  ;;  %2679 = vmatprep.mubr.bf16.mxu1 %v16497_v0  ;;  %v2723_v15 = vsel %vm16922_vm7, %v2711_v7, 0  ;;  %vm16928_vm7 = vcmask 908288  }
 0x424   :  { %11188 = vmatprep.subr.msk.bf16.mxu1 %vm16916_vm0, %v2712_v22  ;;  %vm16923_vm0 = vmmov %vm16912_vm3 }
 0x425   :  { %vm16924_vm4 = vmmov %vm16923_vm0 }
 0x42a   :  { %11183 = vmatmul.mubr.msk.bf16.vlgmr.msra.gmra.mrb[4].mxu0 %vm16912_vm3, %v1735_v16 }
 0x42b   :  { %2729 = vmatpush1.bf16.msra.mxu0 %v2717_v6  ;;  %2760 = vmatprep.mubr.bf16.mxu0 %v16497_v0 }
 0x42e   :  { %11185 = vmatmul.mubr.msk.bf16.vlgmr.msra.gmra.mrb[8].mxu1 %vm16921_vm14, %v1735_v16  ;;  %vm16925_vm14 = vcmask 1039360  }
 0x42f   :  { %2770 = vmatpush1.bf16.msra.mxu1 %v2723_v15  ;;  %2801 = vmatprep.mubr.bf16.mxu1 %v16497_v0  ;;  %vm16926_vm3 = vmmov %vm16925_vm14  ;;  %v12876_v0 = vld [vmem:[%s13298_s6 + $0x80] sm:$0xff]  }
 0x436   :  { %11187 = vmatmul.mubr.msk.bf16.vlgmr.msra.gmra.mrb[4].mxu0 %vm16923_vm0, %v1736_v48  ;;  %vm16929_vm0 = vmmov %vm16927_vm10 }
 0x43a   :  { %11189 = vmatmul.mubr.msk.bf16.vlgmr.msra.gmra.mrb[8].mxu1 %vm16924_vm4, %v1736_v48  ;;  %vm16930_vm4 = vmmov %vm16928_vm7 }
 0x509   :  { %v14383_v8 = vpop.f32.mrb[4].mxu0 }
 0x50a   :  { %v2819_v12 = vmul.f32 %v14383_v8, %v14383_v8  ;;  %v2764_v1 = vpop.f32.mrb[5].mxu0 }
 0x50b   :  { %v2814_v17 = vadd.f32 %v2764_v1, %v14383_v8  ;;  %v2820_v36 = vmul.f32 %v2764_v1, %v2764_v1  ;;  %v2766_v56 = vpop.f32.mrb[6].mxu0 }
 0x50c   :  { %v2767_v4 = vpop.f32.mrb[7].mxu0 }
 0x50d   :  { %v2803_v53 = vpop.f32.mrb[8].mxu1  ;;  %v2823_v26 = vadd.f32 %v2820_v36, %v2819_v12  ;;  %v2837_v4 = vld [vmem:[%s13153_s29] sm:$0xff]  ;;  %s13104_s29 = smov 120  }
 0x50e   :  { %v2821_v51 = vmul.f32 %v2803_v53, %v2803_v53  ;;  %v14388_v21 = vpop.f32.mrb[9].mxu1  ;;  %v2815_v40 = vadd.f32 %v2814_v17, %v2803_v53  ;;  %v2833_v17 = vld [vmem:[%s13148_s25] sm:$0xff]  ;;  %s13103_s25 = smov 119  }
 0x50f   :  { %v2807_v27 = vpop.f32.mrb[10].mxu1  ;;  %v2822_v39 = vmul.f32 %v14388_v21, %v14388_v21 }
 0x510   :  { %v2808_v50 = vpop.f32.mrb[11].mxu1  ;;  %v2816_v45 = vadd.f32 %v2815_v40, %v14388_v21  ;;  %v2824_v22 = vadd.f32 %v2823_v26, %v2821_v51  ;;  %v12859_v40 = vld [vmem:[%s13298_s6 + $0x40] sm:$0xff]  }
 0x511   :  { %v12860_v27 = vld [vmem:[%s13298_s6] sm:$0xff]   ;;  %11450 = vmatprep.subr.bf16.mxu1 %v12859_v40  ;;  %v12862_v50 = vld [vmem:[%s13298_s6 + $0x8] sm:$0xff]  }
 0x512   :  { %2817 = vadd.xlane.f32.xlu0 %v2816_v45  ;;  %v2825_v57 = vadd.f32 %v2824_v22, %v2822_v39  ;;  %v12861_v39 = vld [vmem:[%s13298_s6 + $0x48] sm:$0xff]   ;;  %11451 = vmatpush3.bf16.msra.mxu1 %v12860_v27  ;;  %v12863_v45 = vld [vmem:[%s13298_s6 + $0x50] sm:$0xff]   ;;  %v12873_v27 = vld [vmem:[%s13298_s6 + $0x78] sm:$0xff]  }
 0x513   :  { %11452 = vmatprep.subr.bf16.mxu1 %v12861_v39  ;;  %v12864_v22 = vld [vmem:[%s13298_s6 + $0x10] sm:$0xff]  }
 0x514   :  { %2826 = vadd.xlane.f32.xlu1 %v2825_v57  ;;  %v12865_v57 = vld [vmem:[%s13298_s6 + $0x58] sm:$0xff]  }
 0x516   :  { %11453 = vmatpush3.bf16.msra.mxu1 %v12862_v50  ;;  %v12874_v50 = vld [vmem:[%s13298_s6 + $0x38] sm:$0xff]  }
 0x517   :  { %11454 = vmatprep.subr.bf16.mxu1 %v12863_v45 }
 0x51a   :  { %11455 = vmatpush3.bf16.msra.mxu1 %v12864_v22 }
 0x51b   :  { %11456 = vmatprep.subr.bf16.mxu1 %v12865_v57 }
 0x59f   :  { %v2818_v16 = vpop.xlane.xlu0 %2817 }
 0x5a0   :  { %v2828_v30 = vmul.f32 0.001953125, %v2818_v16  ;;  %v12866_v16 = vld [vmem:[%s13298_s6 + $0x18] sm:$0xff]  }
 0x5a1   :  { %v2827_v31 = vpop.xlane.xlu1 %2826  ;;  %11457 = vmatpush3.bf16.msra.mxu1 %v12866_v16 }
 0x5a2   :  { %v2830_v6 = vmul.f32 %v2828_v30, %v2828_v30  ;;  %v2829_v7 = vmul.f32 0.001953125, %v2827_v31  ;;  %v12868_v31 = vld [vmem:[%s13298_s6 + $0x20] sm:$0xff]  }
 0x5a4   :  { %v2831_v15 = vsub.f32 %v2829_v7, %v2830_v6  ;;  %v12869_v6 = vld [vmem:[%s13298_s6 + $0x68] sm:$0xff]  }
 0x5a5   :  { %v12870_v7 = vld [vmem:[%s13298_s6 + $0x28] sm:$0xff]  }
 0x5a6   :  { %v2832_v48 = vmax.f32 %v2831_v15, 0.0 }
 0x5a8   :  { %v2834_v12 = vadd.f32 1e-05, %v2832_v48 }
 0x5aa   :  { %12980 = vrsqrt.f32 %v2834_v12 }
 0x5b4   :  { %v12981_v36 = vpop.eup %12980 }
 0x5b5   :  { %v2836_v56 = vmul.f32 %v12981_v36, %v2833_v17  ;;  %v12871_v17 = vld [vmem:[%s13298_s6 + $0x70] sm:$0xff]  }
 0x5b7   :  { %2842 = vperm.xlu0 %12840, %v2836_v56   ;;  %v2838_v26 = vmul.f32 %v2836_v56, %v2828_v30  ;;  %v12867_v30 = vld [vmem:[%s13298_s6 + $0x60] sm:$0xff]   ;;  %v12872_v56 = vld [vmem:[%s13298_s6 + $0x30] sm:$0xff]  }
 0x5b8   :  { %11458 = vmatprep.subr.bf16.mxu1 %v12867_v30 }
 0x5b9   :  { %v2839_v51 = vsub.f32 %v2837_v4, %v2838_v26  ;;  %11459 = vmatpush3.bf16.msra.mxu1 %v12868_v31 }
 0x5ba   :  { %11460 = vmatprep.subr.bf16.mxu1 %v12869_v6 }
 0x5bb   :  { %2851 = vperm.xlu1 %12841, %v2839_v51  }
 0x5bd   :  { %11461 = vmatpush3.bf16.msra.mxu1 %v12870_v7 }
 0x5be   :  { %11462 = vmatprep.subr.bf16.mxu1 %v12871_v17 }
 0x5c1   :  { %11463 = vmatpush3.bf16.msra.mxu1 %v12872_v56 }
 0x5c2   :  { %11464 = vmatprep.subr.bf16.mxu1 %v12873_v27 }
 0x5c5   :  { %11465 = vmatpush3.bf16.msra.mxu1 %v12874_v50 }
 0x636   :  { %v2843_v15 = vpop.permute.xlu0 %2842 }
 0x637   :  { %v2846_v48 = vmul.f32 %v2843_v15, %v2764_v1  ;;  %v2847_v12 = vmul.f32 %v2843_v15, %v2803_v53  ;;  %v2845_v39 = vmul.f32 %v2843_v15, %v14383_v8  ;;  %v12875_v53 = vld [vmem:[%s13298_s6 + $0xc0] sm:$0xff]   ;;  %v2848_v57 = vmul.f32 %v2843_v15, %v14388_v21 }
 0x638   :  { %11472 = vmatprep.subr.bf16.mxu1 %v12875_v53 }
 0x63a   :  { %v2852_v36 = vpop.permute.xlu1 %2851 }
 0x63b   :  { %v2855_v4 = vadd.f32 %v2852_v36, %v2846_v48  ;;  %v2856_v26 = vadd.f32 %v2852_v36, %v2847_v12  ;;  %v2854_v45 = vadd.f32 %v2852_v36, %v2845_v39  ;;  %v2857_v8 = vadd.f32 %v2852_v36, %v2848_v57 }
 0x63d   :  { %v14409_v51 = vmax.f32 %v2855_v4, 0.0  ;;  %v14411_v40 = vmax.f32 %v2856_v26, 0.0  ;;  %v14421_v22 = vmax.f32 %v2854_v45, 0.0  ;;  %v14431_v16 = vmax.f32 %v2857_v8, 0.0 }
 0x63f   :  { %v12847_v1 = vpack.i.bf16 %v14411_v40, %v14409_v51 }
 0x641   :  { %12848 = vrot.lane.b32.xlu1 %v12847_v1, %s13095_s26  ;;  %12843 = vrot.lane.b32.xlu0 %v12847_v1, %s13093_s22 }
 0x645   :  { %12853 = vrot.lane.b32.xlu0 %v12847_v1, %s13096_s28  ;;  %2866 = vrot.lane.b32.xlu1 %v14421_v22, %s13093_s22 }
 0x649   :  { %2886 = vrot.lane.b32.xlu0 %v14421_v22, %s13095_s26  ;;  %2902 = vrot.lane.b32.xlu1 %v14421_v22, %s13096_s28 }
 0x64d   :  { %2872 = vrot.lane.b32.xlu0 %v14431_v16, %s13093_s22  ;;  %2892 = vrot.lane.b32.xlu1 %v14431_v16, %s13095_s26 }
 0x651   :  { %2908 = vrot.lane.b32.xlu0 %v14431_v16, %s13096_s28 }
 0x6b3   :  { %v14439_v21 = vpop.permute.xlu1 %12848  ;;  %v14441_v30 = vpop.permute.xlu0 %12843 }
 0x6b4   :  { %v12846_v31 = vunpack.i.h.bf16 %v14441_v30  ;;  %v12845_v6 = vunpack.i.l.bf16 %v14441_v30  ;;  %v12851_v7 = vunpack.i.h.bf16 %v14439_v21  ;;  %v12850_v15 = vunpack.i.l.bf16 %v14439_v21 }
 0x6b6   :  { %v2875_v56 = vsel %vm16925_vm14, %v12845_v6, %v12846_v31  ;;  %v2895_v26 = vsel %vm16927_vm10, %v12850_v15, %v12851_v7  ;;  %vm16931_vm14 = vmmov %vm16926_vm3 }
 0x6b7   :  { %v12854_v48 = vpop.permute.xlu0 %12853  ;;  %v2867_v12 = vpop.permute.xlu1 %2866  ;;  %v2883_v45 = vmax.f32 %v14409_v51, %v2875_v56  ;;  %v12877_v56 = vld [vmem:[%s13298_s6 + $0xc8] sm:$0xff]   ;;  %vm16933_vm10 = vmmov %vm16930_vm4 }
 0x6b8   :  { %v12856_v17 = vunpack.i.h.bf16 %v12854_v48  ;;  %v12855_v36 = vunpack.i.l.bf16 %v12854_v48  ;;  %v2874_v4 = vsel %vm16926_vm3, %v2867_v12, %v12845_v6  ;;  %vm16932_vm3 = vmmov %vm16929_vm0 }
 0x6b9   :  { %v2882_v8 = vmax.f32 %v14421_v22, %v2874_v4 }
 0x6ba   :  { %v2911_v27 = vsel %vm16928_vm7, %v12855_v36, %v12856_v17  ;;  %vm16934_vm7 = vmmov %vm16930_vm4 }
 0x6bb   :  { %v2887_v39 = vpop.permute.xlu0 %2886  ;;  %v2903_v50 = vpop.permute.xlu1 %2902  ;;  %v2919_v1 = vmax.f32 %v2895_v26, %v2911_v27  ;;  %v12878_v27 = vld [vmem:[%s13298_s6 + $0x88] sm:$0xff]  }
 0x6bc   :  { %v2894_v53 = vsel %vm16929_vm0, %v2887_v39, %v12850_v15  ;;  %v2910_v57 = vsel %vm16930_vm4, %v2903_v50, %v12855_v36  ;;  %vm16935_vm0 = vmmov %vm16931_vm14 }
 0x6bd   :  { %v2918_v21 = vmax.f32 %v2894_v53, %v2910_v57  ;;  %v2923_v30 = vmax.f32 %v2883_v45, %v2919_v1  ;;  %v12879_v45 = vld [vmem:[%s13298_s6 + $0xd0] sm:$0xff]   ;;  %v12881_v57 = vld [vmem:[%s13298_s6 + $0xd8] sm:$0xff]   ;;  %vm16936_vm4 = vmmov %vm16932_vm3 }
 0x6be   :  { %v12880_v53 = vld [vmem:[%s13298_s6 + $0x90] sm:$0xff]  }
 0x6bf   :  { %v2922_v6 = vmax.f32 %v2882_v8, %v2918_v21  ;;  %v2873_v48 = vpop.permute.xlu0 %2872  ;;  %v2927_v12 = vpack.c.bf16 %v2923_v30, %v2923_v30  ;;  %v2893_v33 = vpop.permute.xlu1 %2892  ;;  %v12883_v8 = vld [vmem:[%s13298_s6 + $0xe0] sm:$0xff]   ;;  %v12885_v30 = vld [vmem:[%s13298_s6 + $0xe8] sm:$0xff]  }
 0x6c0   :  { %v2881_v26 = vsel %vm16931_vm14, %v2873_v48, 0.0  ;;  %v2901_v36 = vsel %vm16932_vm3, %v2893_v33, 0.0  ;;  %v12884_v21 = vld [vmem:[%s13298_s6 + $0xa0] sm:$0xff]   ;;  %vm16501_vm14 = vmmov 0  }
 0x6c1   :  { %v2926_v14 = vpack.c.bf16 %v2922_v6, %v2922_v6  ;;  %3218 = vmatprep.mubr.bf16.mxu1 %v2927_v12  ;;  %v2885_v39 = vmax.f32 %v14431_v16, %v2881_v26  ;;  %v12886_v6 = vld [vmem:[%s13298_s6 + $0xa8] sm:$0xff]   ;;  %v12887_v12 = vld [vmem:[%s13298_s6 + $0xf0] sm:$0xff]   ;;  %v2876_v26 = vsel %vm16935_vm0, %v12846_v31, %v2873_v48 }
 0x6c3   :  { %v2909_v15 = vpop.permute.xlu0 %2908  ;;  %3219 = vmatmul.mubr.bf16.vlgmr.msra.gmra.mrb[12].mxu1 %v2926_v14 }
 0x6c4   :  { %v2917_v4 = vsel %vm16933_vm10, %v2909_v15, 0.0  ;;  %11473 = vmatpush3.bf16.msra.mxu1 %v12876_v0  ;;  %v12882_v0 = vld [vmem:[%s13298_s6 + $0x98] sm:$0xff]  }
 0x6c5   :  { %v2921_v50 = vmax.f32 %v2901_v36, %v2917_v4  ;;  %11474 = vmatprep.subr.bf16.mxu1 %v12877_v56  ;;  %v2912_v56 = vsel %vm16934_vm7, %v12856_v17, %v2909_v15  ;;  %v2896_v36 = vsel %vm16936_vm4, %v12851_v7, %v2893_v33  ;;  %v12888_v4 = vld [vmem:[%s13298_s6 + $0xb0] sm:$0xff]   ;;  %v16512_v33 = vmov 0.0  }
 0x6c6   :  { %11675 = vmatprep.subr.bf16.mxu0 %v16512_v33  ;;  %11677 = vmatprep.mubr.msk.bf16.mxu0 %vm16501_vm14, %v16512_v33 }
 0x6c7   :  { %v2925_v1 = vmax.f32 %v2885_v39, %v2921_v50  ;;  %v12889_v39 = vld [vmem:[%s13298_s6 + $0xf8] sm:$0xff]   ;;  %v2884_v50 = vmax.f32 %v14411_v40, %v2876_v26  ;;  %v16937_v26 = vmov 0  }
 0x6c8   :  { %11475 = vmatpush3.bf16.msra.mxu1 %v12878_v27  ;;  %v2920_v27 = vmax.f32 %v2896_v36, %v2912_v56  ;;  %v14506_v56 = vld [vmem:[%s13283_s27 + $0x1] sm:$0x1] }
 0x6c9   :  { %11476 = vmatprep.subr.bf16.mxu1 %v12879_v45  ;;  %v2929_v14 = vpack.c.bf16 %v2925_v1, %v2925_v1  ;;  %v12890_v45 = vld [vmem:[%s13298_s6 + $0xb8] sm:$0xff]   ;;  %vm16505_vm10 = vcmp.ge.s32.totalorder %v14506_v56, 1  ;;  %vm16507_vm4 = vcmp.lt.s32.totalorder %v14506_v56, 7  ;;  %s13108_s6 = smov 125  }
 0x6ca   :  { %v2924_v1 = vmax.f32 %v2884_v50, %v2920_v27  ;;  %v16938_v50 = vmov 0 }
 0x6cb   :  { %3258 = vmatprep.mubr.bf16.mxu1 %v2929_v14 }
 0x6cc   :  { %11477 = vmatpush3.bf16.msra.mxu1 %v12880_v53  ;;  %v2928_v53 = vpack.c.bf16 %v2924_v1, %v2924_v1 }
 0x6cd   :  { %11478 = vmatprep.subr.bf16.mxu1 %v12881_v57 }
 0x6d0   :  { %11479 = vmatpush3.bf16.msra.mxu1 %v12882_v0 }
 0x6d1   :  { %11480 = vmatprep.subr.bf16.mxu1 %v12883_v8 }
 0x6d4   :  { %11481 = vmatpush3.bf16.msra.mxu1 %v12884_v21 }
 0x6d5   :  { %11482 = vmatprep.subr.bf16.mxu1 %v12885_v30 }
 0x6d8   :  { %11483 = vmatpush3.bf16.msra.mxu1 %v12886_v6 }
 0x6d9   :  { %11484 = vmatprep.subr.bf16.mxu1 %v12887_v12  ;;  %v14503_v12 = vld [vmem:[%s13283_s27] sm:$0x1]  ;;  %s13110_s27 = smov 124  }
 0x6da   :  { %vm3278_vm3 = vcmp.ge.s32.totalorder %v14503_v12, 1 }
 0x6db   :  { %vm3280_vm7 = vmand %vm3278_vm3, %vm16505_vm10  ;;  %v3302_v36 = vsel %vm3278_vm3, 1, %v16937_v26 }
 0x6dc   :  { %11485 = vmatpush3.bf16.msra.mxu1 %v12888_v4  ;;  %v3288_v4 = vsel %vm3280_vm7, 1, %v16937_v26  ;;  %v3306_v27 = vrot.slane %v3302_v36, %v13420_v13  ;;  %vm3403_vm7 = vmand %vm3278_vm3, %vm16507_vm4  ;;  %vm16944_vm3 = vmmov 0   ;;  %vm16947_vm4 = vcmp.ge.s32.totalorder %v14506_v56, 1 }
 0x6dd   :  { %11486 = vmatprep.subr.bf16.mxu1 %v12889_v39  ;;  %v3292_v39 = vrot.slane %v3288_v4, %v13420_v13  ;;  %v3470_v4 = vsel %vm16947_vm4, 1, %v16937_v26 }
 0x6de   :  { %vm3307_vm0 = vcmp.eq.s32.totalorder %v3306_v27, 1 }
 0x6df   :  { %vm3293_vm6 = vcmp.eq.s32.totalorder %v3292_v39, 1  ;;  %vm14521_vm9 = vmpackc.low %vm3307_vm0, %vm3307_vm0  ;;  %vm16942_vm0 = vcmask 1043456   ;;  %v3266_v39 = vld [vmem:[%s13158_s3] sm:$0xf] }
 0x6e0   :  { %11487 = vmatpush3.bf16.msra.mxu1 %v12890_v45  ;;  %v16939_v50 = vsel %vm14521_vm9, 4294967295, %v16938_v50  ;;  %vm14529_vm10 = vmpackc.low %vm3293_vm6, %vm3293_vm6 }
 0x6e1   :  { %11729 = vmatprep.subr.bf16.mxu1 %v16512_v33  ;;  %vm16943_vm6 = vmmov %vm16942_vm0 }
 0x6e3   :  { %3259 = vmatmul.mubr.bf16.vlgmr.msra.gmra.mrb[16].mxu1 %v2928_v53  ;;  %v16940_v53 = vmov 0 }
 0x6e4   :  { %11745 = vmatprep.mubr.msk.bf16.mxu1 %vm16501_vm14, %v16512_v33  ;;  %vm16506_vm14 = vcmask 72704   ;;  %v16941_v53 = vsel %vm14529_vm10, 4294967295, %v16940_v53 }
 0x796   :  { %v11466_v14 = vpop.f32.mrb[12].mxu1 }
 0x797   :  { %v11467_v17 = vpop.f32.mrb[13].mxu1 }
 0x798   :  { %v11468_v15 = vadd.f32 %v11467_v17, %v11466_v14  ;;  %v11469_v31 = vpop.f32.mrb[14].mxu1 }
 0x799   :  { %v11470_v48 = vpop.f32.mrb[15].mxu1 }
 0x79a   :  { %v3410_v48 = vsel %vm3403_vm7, 1, %v16937_v26  ;;  %vm16508_vm7 = vcmask 56320  }
 0x7b6   :  { %v11488_v7 = vpop.f32.mrb[16].mxu1 }
 0x7b7   :  { %v11489_v57 = vpop.f32.mrb[17].mxu1 }
 0x7b8   :  { %v11490_v0 = vadd.f32 %v11489_v57, %v11488_v7  ;;  %v11491_v8 = vpop.f32.mrb[18].mxu1  ;;  %v3267_v57 = vld [vmem:[%s13158_s3 + $0x4] sm:$0xf] }
 0x7b9   :  { %v11492_v21 = vpop.f32.mrb[19].mxu1 }
 0x7ba   :  { %v3261_v30 = vadd.f32 %v11490_v0, %v11468_v15  ;;  %v3414_v0 = vrot.slane %v3410_v48, %v13420_v13  ;;  %v3268_v48 = vld [vmem:[%s13158_s3 + $0x8] sm:$0xf] }
 0x7bc   :  { %v14484_v6 = vpack.c.bf16 %v3261_v30, %v3261_v30  ;;  %v16945_v30 = vmov 0 }
 0x7be   :  { %3282 = vrot.lane.b32.xlu0 %v14484_v6, %s13099_s9  ;;  %3296 = vrot.lane.b32.xlu1 %v14484_v6, %s13100_s13 }
 0x7c2   :  { %3465 = vrot.lane.b32.xlu0 %v14484_v6, %s13092_s18  ;;  %3404 = vrot.lane.b32.xlu1 %v14484_v6, %s13101_s17 }
 0x7c6   :  { %3634 = vrot.lane.b32.xlu0 %v14484_v6, %s13102_s21  ;;  %3572 = vrot.lane.b32.xlu1 %v14484_v6, %s13093_s22 }
 0x7ca   :  { %3757 = vrot.lane.b32.xlu0 %v14484_v6, %s13103_s25  ;;  %3695 = vrot.lane.b32.xlu1 %v14484_v6, %s13104_s29 }
 0x830   :  { %v3283_v45 = vpop.permute.xlu0 %3282  ;;  %v3297_v1 = vpop.permute.xlu1 %3296 }
 0x831   :  { %v3286_v14 = vsel %vm16506_vm14, 0, %v3283_v45  ;;  %v3300_v17 = vsel %vm16517_vm12, 0, %v3297_v1  ;;  %v3474_v45 = vrot.slane %v3470_v4, %v13420_v13  ;;  %v16954_v4 = vmov 0 }
 0x832   :  { %v3309_v15 = vsel %vm14521_vm9, %v3300_v17, 0  ;;  %v3295_v7 = vsel %vm14529_vm10, %v3286_v14, 0  ;;  %v16948_v17 = vmov 0  ;;  %vm16569_vm10 = vcmask 15360  }
 0x833   :  { %v3314_v31 = vsel %vm16942_vm0, %v3309_v15, 0  ;;  %v3360_v8 = vsel %vm16943_vm6, %v3295_v7, 0  ;;  %vm3415_vm0 = vcmp.eq.s32.totalorder %v3414_v0, 1  ;;  %v3269_v0 = vld [vmem:[%s13158_s3 + $0xc] sm:$0xf] }
 0x834   :  { %11676 = vmatpush3.bf16.msra.mxu0 %v3314_v31  ;;  %v3405_v21 = vpop.permute.xlu1 %3404  ;;  %vm14549_vm14 = vmpackc.low %vm3415_vm0, %vm3415_vm0  ;;  %vm3475_vm0 = vcmp.eq.s32.totalorder %v3474_v45, 1  ;;  %v3466_v14 = vpop.permute.xlu0 %3465  ;;  %v3270_v45 = vld [vmem:[%s13158_s3 + $0x10] sm:$0xf] }
 0x835   :  { %11681 = vmatprep.subr.bf16.mxu0 %v16512_v33  ;;  %v16946_v30 = vsel %vm14549_vm14, 4294967295, %v16945_v30  ;;  %v3408_v36 = vsel %vm16508_vm7, 0, %v3405_v21  ;;  %vm14566_vm4 = vmpackc.low %vm3475_vm0, %vm3475_vm0  ;;  %vm16950_vm7 = vcmask 7168   ;;  %vm16951_vm0 = vcmp.lt.s32.totalorder %v14506_v56, 7 }
 0x836   :  { %v3417_v27 = vsel %vm14549_vm14, %v3408_v36, 0  ;;  %v16949_v17 = vsel %vm14566_vm4, 4294967295, %v16948_v17  ;;  %v3468_v15 = vsel %vm16950_vm7, 0, %v3466_v14  ;;  %vm16952_vm7 = vmmov %vm16943_vm6 }
 0x837   :  { %11678 = vmatmul.mubr.msk.bf16.vlgmr.msra.gmra.mrb[8].mxu0 %vm16517_vm12, %v3267_v57  ;;  %v3422_v1 = vsel %vm16943_vm6, %v3417_v27, 0  ;;  %v3477_v31 = vsel %vm14566_vm4, %v3468_v15, 0  ;;  %v3577_v57 = vsel %vm16951_vm0, 1, %v16937_v26  ;;  %v3529_v21 = vsel %vm16952_vm7, %v14484_v6, 0 }
 0x838   :  { %11682 = vmatpush3.bf16.msra.mxu0 %v3360_v8  ;;  %11683 = vmatprep.mubr.msk.bf16.mxu0 %vm16944_vm3, %v16512_v33  ;;  %v3482_v7 = vsel %vm16943_vm6, %v3477_v31, 0  ;;  %v3581_v8 = vrot.slane %v3577_v57, %v13420_v13  ;;  %vm3632_vm6 = vcmp.lt.s32.totalorder %v14503_v12, 7  ;;  %v3573_v36 = vpop.permute.xlu1 %3572  ;;  %vm16953_vm0 = vcmp.ge.s32.totalorder %v14506_v56, 1  ;;  %v3635_v15 = vpop.permute.xlu0 %3634 }
 0x839   :  { %11687 = vmatprep.subr.bf16.mxu0 %v16512_v33  ;;  %vm3633_vm13 = vmand %vm3632_vm6, %vm16953_vm0  ;;  %vm16956_vm7 = vcmask 1039360   ;;  %v16958_v31 = vmov 0  ;;  %vm16994_vm4 = vcmask 1043456  }
 0x83a   :  { %vm3582_vm5 = vcmp.eq.s32.totalorder %v3581_v8, 1  ;;  %v3575_v6 = vsel %vm16956_vm7, %v3573_v36, 0  ;;  %v3640_v27 = vsel %vm3633_vm13, 1, %v16937_v26  ;;  %vm16516_vm7 = vcmask 982016  }
 0x83b   :  { %vm14595_vm1 = vmpackc.low %vm3582_vm5, %vm3582_vm5  ;;  %vm16511_vm5 = vcmask 990208  }
 0x83c   :  { %v16955_v4 = vsel %vm14595_vm1, 4294967295, %v16954_v4  ;;  %v3696_v36 = vpop.permute.xlu1 %3695 }
 0x843   :  { %11684 = vmatmul.mubr.msk.bf16.vlgmr.msra.gmra.mrb[8].mxu0 %vm16517_vm12, %v3266_v39  ;;  %v3584_v39 = vsel %vm14595_vm1, %v3575_v6, 0  ;;  %v16961_v6 = vmov 0 }
 0x844   :  { %11688 = vmatpush3.bf16.msra.mxu0 %v3422_v1  ;;  %11689 = vmatprep.mubr.msk.bf16.mxu0 %vm16944_vm3, %v16512_v33  ;;  %v3644_v1 = vrot.slane %v3640_v27, %v13420_v13  ;;  %v3589_v14 = vsel %vm16957_vm15, %v3584_v39, 0  ;;  %v3699_v27 = vsel %vm16516_vm7, %v3696_v36, 0 }
 0x845   :  { %11693 = vmatprep.subr.bf16.mxu0 %v16512_v33 }
 0x846   :  { %vm3645_vm0 = vcmp.eq.s32.totalorder %v3644_v1, 1  ;;  %v3272_v1 = vld [vmem:[%s13158_s3 + $0x18] sm:$0xf] }
 0x847   :  { %vm14610_vm13 = vmpackc.low %vm3645_vm0, %vm3645_vm0 }
 0x848   :  { %v16959_v31 = vsel %vm14610_vm13, 4294967295, %v16958_v31 }
 0x84f   :  { %11690 = vmatmul.mubr.msk.bf16.vlgmr.msra.gmra.mrb[8].mxu0 %vm16517_vm12, %v3268_v48  ;;  %v3638_v48 = vsel %vm16511_vm5, %v3635_v15, 0  ;;  %vm16960_vm5 = vcmp.lt.s32.totalorder %v14506_v56, 7  ;;  %v3758_v56 = vpop.permute.xlu0 %3757  ;;  %v16963_v15 = vmov 0 }
 0x850   :  { %11694 = vmatpush3.bf16.msra.mxu0 %v3482_v7  ;;  %11695 = vmatprep.mubr.msk.bf16.mxu0 %vm16944_vm3, %v16512_v33  ;;  %v3701_v7 = vsel %vm3632_vm6, 1, %v16937_v26  ;;  %v3647_v57 = vsel %vm14610_vm13, %v3638_v48, 0  ;;  %vm3756_vm2 = vmand %vm3632_vm6, %vm16960_vm5  ;;  %vm16515_vm6 = vcmask 973824  }
 0x851   :  { %11699 = vmatprep.subr.bf16.mxu0 %v16512_v33  ;;  %v3705_v8 = vrot.slane %v3701_v7, %v13420_v13  ;;  %v3763_v39 = vsel %vm3756_vm2, 1, %v16937_v26  ;;  %v3761_v48 = vsel %vm16515_vm6, %v3758_v56, 0 }
 0x853   :  { %vm3706_vm0 = vcmp.eq.s32.totalorder %v3705_v8, 1  ;;  %v3274_v8 = vld [vmem:[%s13158_s3 + $0x20] sm:$0xf] }
 0x854   :  { %vm14631_vm11 = vmpackc.low %vm3706_vm0, %vm3706_vm0 }
 0x855   :  { %v16962_v6 = vsel %vm14631_vm11, 4294967295, %v16961_v6  ;;  %vm16965_vm0 = vmmov %vm16957_vm15 }
 0x85b   :  { %11696 = vmatmul.mubr.msk.bf16.vlgmr.msra.gmra.mrb[8].mxu0 %vm16517_vm12, %v3269_v0  ;;  %v3271_v0 = vld [vmem:[%s13158_s3 + $0x14] sm:$0xf] }
 0x85c   :  { %11700 = vmatpush3.bf16.msra.mxu0 %v3529_v21  ;;  %11701 = vmatprep.mubr.msk.bf16.mxu0 %vm16944_vm3, %v16512_v33  ;;  %v3652_v21 = vsel %vm16957_vm15, %v3647_v57, 0  ;;  %v3273_v57 = vld [vmem:[%s13158_s3 + $0x1c] sm:$0xf]  ;;  %s16968_s3 = sld [smem:[#allocation29_spill]] }
 0x85d   :  { %11705 = vmatprep.subr.bf16.mxu0 %v16512_v33 }
 0x867   :  { %11702 = vmatmul.mubr.msk.bf16.vlgmr.msra.gmra.mrb[8].mxu0 %vm16517_vm12, %v3270_v45  ;;  %v3708_v45 = vsel %vm14631_vm11, %v3699_v27, 0  ;;  %vm16974_vm11 = vcmask 31744  }
 0x868   :  { %11706 = vmatpush3.bf16.msra.mxu0 %v3589_v14  ;;  %11707 = vmatprep.mubr.msk.bf16.mxu0 %vm16944_vm3, %v16512_v33  ;;  %v3767_v14 = vrot.slane %v3763_v39, %v13420_v13  ;;  %v3713_v12 = vsel %vm16957_vm15, %v3708_v45, 0  ;;  %vm16967_vm15 = vcmask 1039360  }
 0x869   :  { %11711 = vmatprep.subr.bf16.mxu0 %v16512_v33 }
 0x86a   :  { %vm3768_vm5 = vcmp.eq.s32.totalorder %v3767_v14, 1 }
 0x86b   :  { %vm14646_vm2 = vmpackc.low %vm3768_vm5, %vm3768_vm5 }
 0x86c   :  { %v16964_v15 = vsel %vm14646_vm2, 4294967295, %v16963_v15  ;;  %v3770_v7 = vsel %vm14646_vm2, %v3761_v48, 0 }
 0x873   :  { %11708 = vmatmul.mubr.msk.bf16.vlgmr.msra.gmra.mrb[8].mxu0 %vm16517_vm12, %v3271_v0  ;;  %v3775_v0 = vsel %vm16965_vm0, %v3770_v7, 0 }
 0x874   :  { %11712 = vmatpush3.bf16.msra.mxu0 %v3652_v21  ;;  %11713 = vmatprep.mubr.msk.bf16.mxu0 %vm16944_vm3, %v16512_v33 }
 0x875   :  { %11717 = vmatprep.subr.bf16.mxu0 %v16512_v33 }
 0x87f   :  { %11714 = vmatmul.mubr.msk.bf16.vlgmr.msra.gmra.mrb[8].mxu0 %vm16517_vm12, %v3272_v1 }
 0x880   :  { %11718 = vmatpush3.bf16.msra.mxu0 %v3713_v12  ;;  %11719 = vmatprep.mubr.msk.bf16.mxu0 %vm16944_vm3, %v16512_v33 }
 0x881   :  { %11723 = vmatprep.subr.bf16.mxu0 %v16512_v33 }
 0x88b   :  { %11720 = vmatmul.mubr.msk.bf16.vlgmr.msra.gmra.mrb[8].mxu0 %vm16517_vm12, %v3273_v57 }
 0x88c   :  { %11724 = vmatpush3.bf16.msra.mxu0 %v3775_v0  ;;  %11725 = vmatprep.mubr.msk.bf16.mxu0 %vm16944_vm3, %v16512_v33 }
 0x88d   :  { %11803 = vmatprep.subr.bf16.mxu0 %v16512_v33 }
 0x897   :  { %11726 = vmatmul.mubr.msk.bf16.vlgmr.msra.gmra.mrb[8].mxu0 %vm16517_vm12, %v3274_v8  ;;  %v3829_v8 = vld [vmem:[%s13163_s8] sm:$0xff]  ;;  %s13105_s8 = smov 5   ;;  %vm16524_vm12 = vcmask 39936  }
 0x898   :  { %11807 = vmatprep.mubr.msk.bf16.mxu0 %vm16944_vm3, %v16512_v33 }
 0x96a   :  { %v3811_v21 = vpop.f32.mrb[8].mxu0 }
 0x96b   :  { %3818 = vadd.xlane.f32.xlu1 %v3811_v21  ;;  %v11727_v36 = vpop.f32.mrb[9].mxu0  ;;  %v3820_v27 = vmul.f32 %v3811_v21, %v3811_v21 }
 0x96c   :  { %v3814_v39 = vpop.f32.mrb[10].mxu0 }
 0x96d   :  { %3821 = vadd.xlane.f32.xlu0 %v3820_v27  ;;  %v11728_v45 = vpop.f32.mrb[11].mxu0 }
 0x96e   :  { %v12891_v45 = vld [vmem:[%s13303_s30] sm:$0xff]  }
 0x96f   :  { %11730 = vmatpush3.bf16.msra.mxu1 %v12891_v45 }
 0x9f8   :  { %v3819_v1 = vpop.xlane.xlu1 %3818 }
 0x9f9   :  { %v3824_v14 = vmul.f32 0.0078125, %v3819_v1  ;;  %v12892_v1 = vld [vmem:[%s13303_s30 + $0x8] sm:$0xff]  }
 0x9fa   :  { %v3822_v12 = vpop.xlane.xlu0 %3821 }
 0x9fb   :  { %v3826_v56 = vmul.f32 %v3824_v14, %v3824_v14  ;;  %v3825_v48 = vmul.f32 0.0078125, %v3822_v12  ;;  %v16966_v12 = vmov 0.0  }
 0x9fc   :  { %11731 = vmatprep.subr.bf16.mxu1 %v16966_v12 }
 0x9fd   :  { %v3827_v7 = vsub.f32 %v3825_v48, %v3826_v56  ;;  %11732 = vmatpush3.bf16.msra.mxu1 %v12892_v1  ;;  %v12893_v56 = vld [vmem:[%s13303_s30 + $0x10] sm:$0xff]   ;;  %v12894_v48 = vld [vmem:[%s13303_s30 + $0x18] sm:$0xff]  }
 0x9fe   :  { %11733 = vmatprep.subr.bf16.mxu1 %v16966_v12 }
 0x9ff   :  { %v3828_v57 = vmax.f32 %v3827_v7, 0.0 }
 0xa01   :  { %v3830_v0 = vadd.f32 1e-05, %v3828_v57  ;;  %11734 = vmatpush3.bf16.msra.mxu1 %v12893_v56 }
 0xa02   :  { %11735 = vmatprep.subr.bf16.mxu1 %v16966_v12 }
 0xa03   :  { %12982 = vrsqrt.f32 %v3830_v0  ;;  %v12898_v0 = vld [vmem:[%s13303_s30 + $0x38] sm:$0xff]  }
 0xa05   :  { %11736 = vmatpush3.bf16.msra.mxu1 %v12894_v48 }
 0xa06   :  { %11737 = vmatprep.subr.bf16.mxu1 %v16966_v12 }
 0xa0d   :  { %v12983_v36 = vpop.eup %12982 }
 0xa0e   :  { %v3832_v33 = vmul.f32 %v12983_v36, %v3829_v8 }
 0xa10   :  { %3838 = vperm.xlu0 %12840, %v3832_v33   ;;  %v3834_v27 = vmul.f32 %v3832_v33, %v3824_v14  ;;  %v12895_v33 = vld [vmem:[%s13303_s30 + $0x20] sm:$0xff]   ;;  %v12897_v14 = vld [vmem:[%s13303_s30 + $0x30] sm:$0xff]  }
 0xa11   :  { %11738 = vmatpush3.bf16.msra.mxu1 %v12895_v33 }
 0xa12   :  { %v3835_v39 = vsub.f32 %v3833_v28, %v3834_v27  ;;  %11739 = vmatprep.subr.bf16.mxu1 %v16966_v12  ;;  %v12896_v28 = vld [vmem:[%s13303_s30 + $0x28] sm:$0xff]   ;;  %s13107_s30 = smov 3  }
 0xa14   :  { %3844 = vperm.xlu1 %12841, %v3835_v39  }
 0xa15   :  { %11740 = vmatpush3.bf16.msra.mxu1 %v12896_v28 }
 0xa16   :  { %11741 = vmatprep.subr.bf16.mxu1 %v16966_v12 }
 0xa19   :  { %11742 = vmatpush3.bf16.msra.mxu1 %v12897_v14 }
 0xa1a   :  { %11743 = vmatprep.subr.bf16.mxu1 %v16966_v12 }
 0xa1d   :  { %11744 = vmatpush3.bf16.msra.mxu1 %v12898_v0 }
 0xa1e   :  { %11749 = vmatprep.subr.bf16.mxu1 %v16966_v12 }
 0xa8f   :  { %v3839_v7 = vpop.permute.xlu0 %3838 }
 0xa90   :  { %v3841_v57 = vmul.f32 %v3839_v7, %v3811_v21 }
 0xa93   :  { %v3845_v8 = vpop.permute.xlu1 %3844 }
 0xa94   :  { %v3847_v36 = vadd.f32 %v3845_v8, %v3841_v57 }
 0xa96   :  { %v14681_v27 = vmax.f32 %v3847_v36, 0.0 }
 0xa98   :  { %3855 = vrot.lane.b32.xlu0 %v14681_v27, %s13104_s29  ;;  %3850 = vrot.lane.b32.xlu1 %v14681_v27, %s13093_s22 }
 0xa9c   :  { %3859 = vrot.lane.b32.xlu1 %v14681_v27, %s13103_s25 }
 0xb0a   :  { %v3851_v39 = vpop.permute.xlu1 %3850  ;;  %v3856_v45 = vpop.permute.xlu0 %3855 }
 0xb0b   :  { %v3853_v21 = vsel %vm16967_vm15, %v3851_v39, 0.0  ;;  %v3858_v56 = vsel %vm16516_vm7, %v3856_v45, 0.0  ;;  %v14714_v45 = vld [vmem:[%s16968_s3] sm:$0x1] }
 0xb0c   :  { %v3854_v33 = vmax.f32 %v14681_v27, %v3853_v21  ;;  %v14717_v21 = vld [vmem:[%s16968_s3 + $0x1] sm:$0x1]  ;;  %vm3982_vm5 = vcmp.ge.s32.totalorder %v14714_v45, 1  ;;  %s13112_s3 = smov 126  }
 0xb0d   :  { %vm16520_vm0 = vcmp.ge.s32.totalorder %v14717_v21, 1  ;;  %vm16528_vm7 = vcmp.lt.s32.totalorder %v14717_v21, 3 }
 0xb0e   :  { %v3860_v1 = vpop.permute.xlu1 %3859  ;;  %vm3984_vm15 = vmand %vm3982_vm5, %vm16520_vm0 }
 0xb0f   :  { %v3862_v48 = vsel %vm16515_vm6, %v3860_v1, 0.0  ;;  %v4005_v1 = vsel %vm3982_vm5, 1, %v16937_v26  ;;  %vm4106_vm0 = vmand %vm3982_vm5, %vm16528_vm7  ;;  %vm16525_vm5 = vcmask 23552  }
 0xb10   :  { %v3863_v28 = vmax.f32 %v3858_v56, %v3862_v48  ;;  %v3992_v56 = vsel %vm3984_vm15, 1, %v16937_v26  ;;  %v4009_v48 = vrot.slane %v4005_v1, %v13420_v13 }
 0xb12   :  { %v3864_v14 = vmax.f32 %v3854_v33, %v3863_v28  ;;  %v3996_v33 = vrot.slane %v3992_v56, %v13420_v13  ;;  %vm4010_vm6 = vcmp.eq.s32.totalorder %v4009_v48, 1  ;;  %v16970_v28 = vmov 0 }
 0xb13   :  { %vm14728_vm2 = vmpackc.low %vm4010_vm6, %vm4010_vm6  ;;  %vm16975_vm6 = vcmask 1043456   ;;  %v4113_v56 = vsel %vm4106_vm0, 1, %v16937_v26 }
 0xb14   :  { %v3865_v7 = vpack.c.bf16 %v3864_v14, %v3864_v14  ;;  %vm3997_vm8 = vcmp.eq.s32.totalorder %v3996_v33, 1  ;;  %v16971_v28 = vsel %vm14728_vm2, 4294967295, %v16970_v28  ;;  %v3971_v33 = vld [vmem:[%s16969_s1 + $0x4] sm:$0xf]  ;;  %v4117_v37 = vrot.slane %v4113_v56, %v13420_v13  ;;  %v3970_v56 = vld [vmem:[%s16969_s1] sm:$0xf] }
 0xb15   :  { %vm14734_vm15 = vmpackc.low %vm3997_vm8, %vm3997_vm8  ;;  %vm16976_vm8 = vcmask 64512  }
 0xb16   :  { %11746 = vmatmul.mubr.bf16.vlgmr.msra.gmra.mrb[20].mxu1 %v3865_v7  ;;  %vm4118_vm0 = vcmp.eq.s32.totalorder %v4117_v37, 1 }
 0xb17   :  { %11751 = vmatprep.mubr.msk.bf16.mxu1 %vm16944_vm3, %v16966_v12 }
 0xbe9   :  { %v3964_v57 = vpop.f32.mrb[20].mxu1 }
 0xbea   :  { %v14695_v0 = vpack.c.bf16 %v3964_v57, %v3964_v57  ;;  %v11747_v8 = vpop.f32.mrb[21].mxu1 }
 0xbeb   :  { %v3967_v36 = vpop.f32.mrb[22].mxu1 }
 0xbec   :  { %3986 = vrot.lane.b32.xlu1 %v14695_v0, %s13105_s8  ;;  %4000 = vrot.lane.b32.xlu0 %v14695_v0, %s13106_s14  ;;  %v11748_v39 = vpop.f32.mrb[23].mxu1 }
 0xbf0   :  { %4168 = vrot.lane.b32.xlu1 %v14695_v0, %s13092_s18  ;;  %4107 = vrot.lane.b32.xlu0 %v14695_v0, %s13107_s30 }
 0xbf4   :  { %4338 = vrot.lane.b32.xlu1 %v14695_v0, %s13108_s6  ;;  %4275 = vrot.lane.b32.xlu0 %v14695_v0, %s13093_s22 }
 0xbf8   :  { %4461 = vrot.lane.b32.xlu1 %v14695_v0, %s13109_s20  ;;  %4399 = vrot.lane.b32.xlu0 %v14695_v0, %s13110_s27 }
 0xc5e   :  { %v3987_v14 = vpop.permute.xlu1 %3986  ;;  %v4001_v7 = vpop.permute.xlu0 %4000 }
 0xc5f   :  { %v3990_v8 = vsel %vm16524_vm12, 0, %v3987_v14  ;;  %v4003_v36 = vsel %vm16974_vm11, 0, %v4001_v7  ;;  %vm16977_vm11 = vmmov %vm16975_vm6  ;;  %vm16982_vm12 = vcmask 1043456  }
 0xc60   :  { %v4012_v39 = vsel %vm14728_vm2, %v4003_v36, 0  ;;  %v3999_v48 = vsel %vm14734_vm15, %v3990_v8, 0  ;;  %v16978_v8 = vmov 0 }
 0xc61   :  { %v4017_v1 = vsel %vm16975_vm6, %v4012_v39, 0  ;;  %v4063_v14 = vsel %vm16977_vm11, %v3999_v48, 0  ;;  %vm14754_vm6 = vmpackc.low %vm4118_vm0, %vm4118_vm0  ;;  %vm16981_vm11 = vcmask 64512  }
 0xc62   :  { %11750 = vmatpush3.bf16.msra.mxu1 %v4017_v1  ;;  %v4108_v7 = vpop.permute.xlu0 %4107  ;;  %v16979_v8 = vsel %vm14754_vm6, 4294967295, %v16978_v8 }
 0xc63   :  { %11755 = vmatprep.subr.bf16.mxu1 %v16966_v12  ;;  %v4111_v36 = vsel %vm16525_vm5, 0, %v4108_v7  ;;  %vm16985_vm5 = vcmask 7168  }
 0xc64   :  { %v4120_v1 = vsel %vm14754_vm6, %v4111_v36, 0 }
 0xc65   :  { %11752 = vmatmul.mubr.msk.bf16.vlgmr.msra.gmra.mrb[24].mxu1 %vm16976_vm8, %v3971_v33  ;;  %vm16980_vm8 = vcmp.ge.s32.totalorder %v14717_v21, 1  ;;  %v4125_v37 = vsel %vm16982_vm12, %v4120_v1, 0  ;;  %v4169_v33 = vpop.permute.xlu1 %4168  ;;  %vm16986_vm12 = vmmov %vm16981_vm11 }
 0xc66   :  { %11756 = vmatpush3.bf16.msra.mxu1 %v4063_v14  ;;  %11757 = vmatprep.mubr.msk.bf16.mxu1 %vm16944_vm3, %v16966_v12  ;;  %v4173_v39 = vsel %vm16980_vm8, 1, %v16937_v26  ;;  %v16983_v14 = vmov 0  ;;  %v4171_v7 = vsel %vm16985_vm5, 0, %v4169_v33  ;;  %vm16988_vm5 = vmmov %vm16986_vm12 }
 0xc67   :  { %11761 = vmatprep.subr.bf16.mxu1 %v16966_v12  ;;  %v4177_v48 = vrot.slane %v4173_v39, %v13420_v13  ;;  %v3972_v39 = vld [vmem:[%s16969_s1 + $0x8] sm:$0xf] }
 0xc69   :  { %vm4178_vm0 = vcmp.eq.s32.totalorder %v4177_v48, 1  ;;  %v3973_v48 = vld [vmem:[%s16969_s1 + $0xc] sm:$0xf] }
 0xc6a   :  { %vm14771_vm8 = vmpackc.low %vm4178_vm0, %vm4178_vm0 }
 0xc6b   :  { %v16984_v14 = vsel %vm14771_vm8, 4294967295, %v16983_v14  ;;  %v4180_v36 = vsel %vm14771_vm8, %v4171_v7, 0  ;;  %v4276_v7 = vpop.permute.xlu0 %4275  ;;  %vm17038_vm8 = vcmask 1043456  }
 0xc71   :  { %11758 = vmatmul.mubr.msk.bf16.vlgmr.msra.gmra.mrb[24].mxu1 %vm16981_vm11, %v3970_v56  ;;  %vm16987_vm11 = vcmask 1043456   ;;  %v4281_v56 = vsel %vm16528_vm7, 1, %v16937_v26  ;;  %vm16990_vm7 = vcmp.ge.s32.totalorder %v14717_v21, 1 }
 0xc72   :  { %11762 = vmatpush3.bf16.msra.mxu1 %v4125_v37  ;;  %11763 = vmatprep.mubr.msk.bf16.mxu1 %vm16944_vm3, %v16966_v12  ;;  %v4185_v1 = vsel %vm16987_vm11, %v4180_v36, 0  ;;  %v4285_v37 = vrot.slane %v4281_v56, %v13420_v13  ;;  %vm16989_vm0 = vmmov %vm16987_vm11  ;;  %vm16534_vm11 = vcmask 252928   ;;  %v16991_v36 = vmov 0  ;;  %v3974_v56 = vld [vmem:[%s16969_s1 + $0x10] sm:$0xf] }
 0xc73   :  { %11767 = vmatprep.subr.bf16.mxu1 %v16966_v12  ;;  %v4232_v33 = vsel %vm16989_vm0, %v14695_v0, 0  ;;  %v4279_v0 = vsel %vm16534_vm11, %v4276_v7, 0  ;;  %vm16993_vm0 = vcmask 64512   ;;  %v16995_v7 = vmov 0 }
 0xc74   :  { %vm4286_vm13 = vcmp.eq.s32.totalorder %v4285_v37, 1  ;;  %vm16999_vm11 = vcmp.lt.s32.totalorder %v14717_v21, 3 }
 0xc7d   :  { %11764 = vmatmul.mubr.msk.bf16.vlgmr.msra.gmra.mrb[24].mxu1 %vm16986_vm12, %v3972_v39  ;;  %vm4336_vm12 = vcmp.lt.s32.totalorder %v14714_v45, 3 }
 0xc7e   :  { %11768 = vmatpush3.bf16.msra.mxu1 %v4185_v1  ;;  %11769 = vmatprep.mubr.msk.bf16.mxu1 %vm16944_vm3, %v16966_v12  ;;  %vm4337_vm1 = vmand %vm4336_vm12, %vm16990_vm7 }
 0xc7f   :  { %11773 = vmatprep.subr.bf16.mxu1 %v16966_v12  ;;  %v4344_v39 = vsel %vm4337_vm1, 1, %v16937_v26  ;;  %vm4460_vm14 = vmand %vm4336_vm12, %vm16999_vm11 }
 0xc89   :  { %11770 = vmatmul.mubr.msk.bf16.vlgmr.msra.gmra.mrb[24].mxu1 %vm16988_vm5, %v3973_v48  ;;  %vm14800_vm5 = vmpackc.low %vm4286_vm13, %vm4286_vm13  ;;  %v4348_v48 = vrot.slane %v4344_v39, %v13420_v13  ;;  %vm16533_vm13 = vcmask 236544   ;;  %v4405_v39 = vsel %vm4336_vm12, 1, %v16937_v26  ;;  %vm16560_vm12 = vcmask 220160  }
 0xc8a   :  { %11774 = vmatpush3.bf16.msra.mxu1 %v4232_v33  ;;  %11775 = vmatprep.mubr.msk.bf16.mxu1 %vm16944_vm3, %v16966_v12  ;;  %v16992_v36 = vsel %vm14800_vm5, 4294967295, %v16991_v36  ;;  %v4288_v1 = vsel %vm14800_vm5, %v4279_v0, 0  ;;  %v4339_v33 = vpop.permute.xlu1 %4338  ;;  %vm17037_vm5 = vcmask 64512  }
 0xc8b   :  { %11779 = vmatprep.subr.bf16.mxu1 %v16966_v12  ;;  %v4293_v37 = vsel %vm16994_vm4, %v4288_v1, 0  ;;  %vm4349_vm7 = vcmp.eq.s32.totalorder %v4348_v48, 1  ;;  %v4342_v0 = vsel %vm16533_vm13, %v4339_v33, 0  ;;  %vm16997_vm4 = vmmov %vm16993_vm0  ;;  %v4400_v33 = vpop.permute.xlu0 %4399 }
 0xc8c   :  { %vm14815_vm1 = vmpackc.low %vm4349_vm7, %vm4349_vm7  ;;  %vm16561_vm7 = vcmask 228352  }
 0xc8d   :  { %v16996_v7 = vsel %vm14815_vm1, 4294967295, %v16995_v7  ;;  %v4351_v1 = vsel %vm14815_vm1, %v4342_v0, 0  ;;  %v17000_v0 = vmov 0 }
 0xc8e   :  { %v4462_v21 = vpop.permute.xlu1 %4461 }
 0xc95   :  { %11776 = vmatmul.mubr.msk.bf16.vlgmr.msra.gmra.mrb[24].mxu1 %vm16993_vm0, %v3974_v56  ;;  %v3975_v56 = vld [vmem:[%s16969_s1 + $0x14] sm:$0xf]  ;;  %vm16998_vm0 = vcmask 1043456  }
 0xc96   :  { %11780 = vmatpush3.bf16.msra.mxu1 %v4293_v37  ;;  %11781 = vmatprep.mubr.msk.bf16.mxu1 %vm16944_vm3, %v16966_v12  ;;  %v4409_v37 = vrot.slane %v4405_v39, %v13420_v13  ;;  %v4356_v48 = vsel %vm16998_vm0, %v4351_v1, 0  ;;  %v4403_v39 = vsel %vm16561_vm7, %v4400_v33, 0  ;;  %v4467_v1 = vsel %vm4460_vm14, 1, %v16937_v26 }
 0xc97   :  { %11785 = vmatprep.subr.bf16.mxu1 %v16966_v12  ;;  %v17002_v33 = vmov 0 }
 0xc98   :  { %vm4410_vm13 = vcmp.eq.s32.totalorder %v4409_v37, 1  ;;  %v4471_v37 = vrot.slane %v4467_v1, %v13420_v13 }
 0xc99   :  { %vm14836_vm9 = vmpackc.low %vm4410_vm13, %vm4410_vm13 }
 0xc9a   :  { %v17001_v0 = vsel %vm14836_vm9, 4294967295, %v17000_v0  ;;  %vm4472_vm11 = vcmp.eq.s32.totalorder %v4471_v37, 1  ;;  %vm17004_vm13 = vmmov %vm16997_vm4  ;;  %v3978_v37 = vld [vmem:[%s16969_s1 + $0x20] sm:$0xf] }
 0xc9b   :  { %vm14851_vm14 = vmpackc.low %vm4472_vm11, %vm4472_vm11  ;;  %vm16559_vm11 = vcmask 261120  }
 0xc9c   :  { %v17003_v33 = vsel %vm14851_vm14, 4294967295, %v17002_v33 }
 0xca1   :  { %11782 = vmatmul.mubr.msk.bf16.vlgmr.msra.gmra.mrb[24].mxu1 %vm16997_vm4, %v3975_v56  ;;  %v4412_v56 = vsel %vm14836_vm9, %v4403_v39, 0  ;;  %v4465_v39 = vsel %vm16560_vm12, %v4462_v21, 0  ;;  %vm17017_vm9 = vcmask 23552  }
 0xca2   :  { %11786 = vmatpush3.bf16.msra.mxu1 %v4356_v48  ;;  %11787 = vmatprep.mubr.msk.bf16.mxu1 %vm16944_vm3, %v16966_v12  ;;  %v3976_v48 = vld [vmem:[%s16969_s1 + $0x18] sm:$0xf]  ;;  %v4417_v45 = vsel %vm16998_vm0, %v4412_v56, 0  ;;  %v4474_v1 = vsel %vm14851_vm14, %v4465_v39, 0  ;;  %v3977_v56 = vld [vmem:[%s16969_s1 + $0x1c] sm:$0xf] }
 0xca3   :  { %11791 = vmatprep.subr.bf16.mxu1 %v16966_v12  ;;  %s17012_s1 = sld [smem:[#allocation11_spill]] }
 0xcad   :  { %11788 = vmatmul.mubr.msk.bf16.vlgmr.msra.gmra.mrb[24].mxu1 %vm16997_vm4, %v3976_v48  ;;  %vm17005_vm4 = vmmov %vm16998_vm0 }
 0xcae   :  { %11792 = vmatpush3.bf16.msra.mxu1 %v4417_v45  ;;  %11793 = vmatprep.mubr.msk.bf16.mxu1 %vm16944_vm3, %v16966_v12  ;;  %v4479_v48 = vsel %vm17005_vm4, %v4474_v1, 0  ;;  %vm17006_vm0 = vmmov %vm17004_vm13 }
 0xcaf   :  { %11797 = vmatprep.subr.bf16.mxu1 %v16966_v12 }
 0xcb9   :  { %11794 = vmatmul.mubr.msk.bf16.vlgmr.msra.gmra.mrb[24].mxu1 %vm17004_vm13, %v3977_v56  ;;  %vm17010_vm13 = vcmask 252928  }
 0xcba   :  { %11798 = vmatpush3.bf16.msra.mxu1 %v4479_v48  ;;  %11799 = vmatprep.mubr.msk.bf16.mxu1 %vm16944_vm3, %v16966_v12 }
 0xcbb   :  { %11865 = vmatprep.subr.bf16.mxu1 %v16966_v12 }
 0xcc5   :  { %11800 = vmatmul.mubr.msk.bf16.vlgmr.msra.gmra.mrb[24].mxu1 %vm17006_vm0, %v3978_v37 }
 0xcc6   :  { %11867 = vmatprep.mubr.msk.bf16.mxu1 %vm16944_vm3, %v16966_v12 }
 0xd98   :  { %v4515_v45 = vpop.f32.mrb[24].mxu1 }
 0xd99   :  { %v4526_v21 = vmul.f32 %v4515_v45, %v4515_v45  ;;  %v11801_v39 = vpop.f32.mrb[25].mxu1  ;;  %v4523_v56 = vsel %vm16559_vm11, %v4515_v45, 0.0 }
 0xd9a   :  { %4524 = vadd.xlane.f32.xlu0 %v4523_v56  ;;  %v4518_v1 = vpop.f32.mrb[26].mxu1 }
 0xd9b   :  { %v11802_v48 = vpop.f32.mrb[27].mxu1  ;;  %v4527_v18 = vsel %vm16559_vm11, %v4526_v21, 0.0  ;;  %v4540_v1 = vld [vmem:[%s17008_s7] sm:$0xff]  ;;  %s17054_s7 = sld [smem:[#allocation13_spill]] }
 0xd9c   :  { %4528 = vadd.xlane.f32.xlu1 %v4527_v18  ;;  %v12899_v18 = vld [vmem:[%s17009_s10] sm:$0xff]  }
 0xd9d   :  { %11804 = vmatpush3.bf16.msra.mxu0 %v12899_v18 }
 0xd9e   :  { %11805 = vmatprep.subr.bf16.mxu0 %v16966_v12 }
 0xe27   :  { %v4525_v24 = vpop.xlane.xlu0 %4524 }
 0xe28   :  { %v4531_v20 = vmul.f32 0.03125, %v4525_v24 }
 0xe29   :  { %v4529_v37 = vpop.xlane.xlu1 %4528 }
 0xe2a   :  { %v4533_v3 = vmul.f32 %v4531_v20, %v4531_v20  ;;  %v4532_v10 = vmul.f32 0.03125, %v4529_v37  ;;  %v12900_v37 = vld [vmem:[%s17009_s10 + $0x8] sm:$0xff]   ;;  %s17056_s10 = sld [smem:[#allocation14_spill]] }
 0xe2b   :  { %11806 = vmatpush3.bf16.msra.mxu0 %v12900_v37 }
 0xe2c   :  { %v4534_v62 = vsub.f32 %v4532_v10, %v4533_v3  ;;  %11811 = vmatprep.subr.bf16.mxu0 %v16966_v12 }
 0xe2e   :  { %v4535_v46 = vmax.f32 %v4534_v62, 0.0 }
 0xe30   :  { %v4537_v39 = vadd.f32 1e-05, %v4535_v46 }
 0xe32   :  { %12984 = vrsqrt.f32 %v4537_v39 }
 0xe3c   :  { %v12985_v43 = vpop.eup %12984 }
 0xe3d   :  { %v4539_v56 = vmul.f32 %v12985_v43, %v4536_v49 }
 0xe3f   :  { %4545 = vperm.xlu0 %12840, %v4539_v56   ;;  %v4541_v48 = vmul.f32 %v4539_v56, %v4531_v20 }
 0xe41   :  { %v4542_v2 = vsub.f32 %v4540_v1, %v4541_v48 }
 0xe43   :  { %4551 = vperm.xlu1 %12841, %v4542_v2  }
 0xebe   :  { %v4546_v21 = vpop.permute.xlu0 %4545 }
 0xebf   :  { %v4548_v24 = vmul.f32 %v4546_v21, %v4515_v45 }
 0xec2   :  { %v4552_v3 = vpop.permute.xlu1 %4551 }
 0xec3   :  { %v4554_v62 = vadd.f32 %v4552_v3, %v4548_v24 }
 0xec5   :  { %v14876_v46 = vmax.f32 %v4554_v62, 0.0  ;;  %v14906_v62 = vld [vmem:[%s17011_s11] sm:$0x1] }
 0xec6   :  { %vm4644_vm4 = vcmp.ge.s32.totalorder %v14906_v62, 1 }
 0xec7   :  { %4562 = vrot.lane.b32.xlu1 %v14876_v46, %s13110_s27  ;;  %4557 = vrot.lane.b32.xlu0 %v14876_v46, %s13093_s22 }
 0xecb   :  { %4566 = vrot.lane.b32.xlu0 %v14876_v46, %s13109_s20 }
 0xf39   :  { %v4558_v49 = vpop.permute.xlu0 %4557  ;;  %v4563_v20 = vpop.permute.xlu1 %4562 }
 0xf3a   :  { %v4560_v2 = vsel %vm17010_vm13, %v4558_v49, 0.0  ;;  %v4565_v10 = vsel %vm16561_vm7, %v4563_v20, 0.0  ;;  %v14909_v49 = vld [vmem:[%s17011_s11 + $0x1] sm:$0x1]  ;;  %v4667_v20 = vsel %vm4644_vm4, 1, %v16937_v26  ;;  %s17060_s11 = sld [smem:[#allocation15_spill]] }
 0xf3b   :  { %v4561_v39 = vmax.f32 %v14876_v46, %v4560_v2  ;;  %vm16566_vm0 = vcmp.ge.s32.totalorder %v14909_v49, 1 }
 0xf3c   :  { %vm4646_vm13 = vmand %vm4644_vm4, %vm16566_vm0 }
 0xf3d   :  { %v4567_v43 = vpop.permute.xlu0 %4566  ;;  %v4653_v2 = vsel %vm4646_vm13, 1, %v16937_v26 }
 0xf3e   :  { %v4569_v45 = vsel %vm16560_vm12, %v4567_v43, 0.0  ;;  %v4671_v43 = vrot.slane %v4667_v20, %v13420_v13  ;;  %vm16570_vm12 = vcmp.lt.s32.totalorder %v14909_v49, 1 }
 0xf3f   :  { %v4570_v56 = vmax.f32 %v4565_v10, %v4569_v45  ;;  %v4657_v10 = vrot.slane %v4653_v2, %v13420_v13  ;;  %vm4768_vm0 = vmand %vm4644_vm4, %vm16570_vm12  ;;  %v4633_v2 = vld [vmem:[%s17012_s1 + $0x4] sm:$0xf] }
 0xf41   :  { %v4571_v1 = vmax.f32 %v4561_v39, %v4570_v56  ;;  %vm4658_vm7 = vcmp.eq.s32.totalorder %v4657_v10, 1 }
 0xf42   :  { %vm14926_vm13 = vmpackc.low %vm4658_vm7, %vm4658_vm7 }
 0xf43   :  { %v4572_v48 = vpack.c.bf16 %v4571_v1, %v4571_v1 }
 0xf45   :  { %11808 = vmatmul.mubr.msk.bf16.vlgmr.msra.gmra.mrb[12].mxu0 %vm16559_vm11, %v4572_v48  ;;  %vm4672_vm11 = vcmp.eq.s32.totalorder %v4671_v43, 1 }
 0xf46   :  { %11813 = vmatprep.mubr.msk.bf16.mxu0 %vm16944_vm3, %v16966_v12  ;;  %vm14920_vm14 = vmpackc.low %vm4672_vm11, %vm4672_vm11  ;;  %vm17018_vm11 = vcmask 1043456  }
 0xf47   :  { %vm17020_vm7 = vmmov %vm17018_vm11 }
0x1018   :  { %v4626_v18 = vpop.f32.mrb[12].mxu0 }
0x1019   :  { %v14891_v21 = vpack.c.bf16 %v4626_v18, %v4626_v18  ;;  %v11809_v24 = vpop.f32.mrb[13].mxu0 }
0x101a   :  { %v4629_v37 = vpop.f32.mrb[14].mxu0 }
0x101b   :  { %4648 = vrot.lane.b32.xlu0 %v14891_v21, %s13107_s30  ;;  %4661 = vrot.lane.b32.xlu1 %v14891_v21, %s13111_s15  ;;  %v11810_v3 = vpop.f32.mrb[15].mxu0 }
0x101c   :  { %v4774_v3 = vsel %vm4768_vm0, 1, %v16937_v26 }
0x101d   :  { %v4778_v43 = vrot.slane %v4774_v3, %v13420_v13 }
0x101f   :  { %4931 = vrot.lane.b32.xlu0 %v14891_v21, %s13093_s22  ;;  %4769 = vrot.lane.b32.xlu1 %v14891_v21, %s13092_s18  ;;  %vm4779_vm4 = vcmp.eq.s32.totalorder %v4778_v43, 1 }
0x1020   :  { %vm14946_vm0 = vmpackc.low %vm4779_vm4, %vm4779_vm4 }
0x1023   :  { %5110 = vrot.lane.b32.xlu0 %v14891_v21, %s13108_s6  ;;  %5048 = vrot.lane.b32.xlu1 %v14891_v21, %s13112_s3 }
0x108d   :  { %v4649_v39 = vpop.permute.xlu0 %4648  ;;  %v4662_v56 = vpop.permute.xlu1 %4661 }
0x108e   :  { %v4651_v48 = vsel %vm17017_vm9, 0, %v4649_v39  ;;  %v4665_v18 = vsel %vm16569_vm10, 0, %v4662_v56  ;;  %vm17019_vm9 = vcmask 64512   ;;  %vm17026_vm10 = vcmask 1043456  }
0x108f   :  { %v4674_v24 = vsel %vm14920_vm14, %v4665_v18, 0  ;;  %v4660_v20 = vsel %vm14926_vm13, %v4651_v48, 0 }
0x1090   :  { %v4679_v37 = vsel %vm17018_vm11, %v4674_v24, 0  ;;  %v4725_v10 = vsel %vm17020_vm7, %v4660_v20, 0  ;;  %vm17023_vm11 = vcmask 7168   ;;  %vm17025_vm7 = vcmask 64512  }
0x1091   :  { %11812 = vmatpush3.bf16.msra.mxu0 %v4679_v37  ;;  %v4770_v39 = vpop.permute.xlu1 %4769  ;;  %v4632_v37 = vld [vmem:[%s17012_s1] sm:$0xf] }
0x1092   :  { %11817 = vmatprep.subr.bf16.mxu0 %v16966_v12  ;;  %v4772_v48 = vsel %vm17023_vm11, 0, %v4770_v39 }
0x1093   :  { %v4781_v24 = vsel %vm14946_vm0, %v4772_v48, 0 }
0x1094   :  { %11814 = vmatmul.mubr.msk.bf16.vlgmr.msra.gmra.mrb[16].mxu0 %vm17019_vm9, %v4633_v2  ;;  %vm17024_vm9 = vcmp.ge.s32.totalorder %v14909_v49, 1  ;;  %v4786_v20 = vsel %vm17026_vm10, %v4781_v24, 0  ;;  %v4635_v24 = vld [vmem:[%s17012_s1 + $0xc] sm:$0xf] }
0x1095   :  { %11818 = vmatpush3.bf16.msra.mxu0 %v4725_v10  ;;  %11819 = vmatprep.mubr.msk.bf16.mxu0 %vm16944_vm3, %v16966_v12  ;;  %v4829_v18 = vsel %vm17024_vm9, 1, %v16937_v26  ;;  %v4634_v10 = vld [vmem:[%s17012_s1 + $0x8] sm:$0xf]  ;;  %vm17029_vm9 = vmmov %vm17025_vm7 }
0x1096   :  { %11823 = vmatprep.subr.bf16.mxu0 %v16966_v12  ;;  %v4833_v3 = vrot.slane %v4829_v18, %v13420_v13  ;;  %v4936_v18 = vsel %vm16570_vm12, 1, %v16937_v26  ;;  %vm17033_vm12 = vcmp.ge.s32.totalorder %v14909_v49, 1 }
0x1098   :  { %vm4834_vm4 = vcmp.eq.s32.totalorder %v4833_v3, 1  ;;  %v4932_v3 = vpop.permute.xlu0 %4931 }
0x1099   :  { %vm14963_vm11 = vmpackc.low %vm4834_vm4, %vm4834_vm4 }
0x109a   :  { %v4836_v43 = vsel %vm14963_vm11, %v4772_v48, 0 }
0x10a0   :  { %11820 = vmatmul.mubr.msk.bf16.vlgmr.msra.gmra.mrb[16].mxu0 %vm17025_vm7, %v4632_v37  ;;  %vm17030_vm7 = vmmov %vm17026_vm10  ;;  %v4940_v37 = vrot.slane %v4936_v18, %v13420_v13 }
0x10a1   :  { %11824 = vmatpush3.bf16.msra.mxu0 %v4786_v20  ;;  %11825 = vmatprep.mubr.msk.bf16.mxu0 %vm16944_vm3, %v16966_v12  ;;  %v4841_v39 = vsel %vm17030_vm7, %v4836_v43, 0  ;;  %vm17031_vm10 = vmmov %vm17029_vm9 }
0x10a2   :  { %11829 = vmatprep.subr.bf16.mxu0 %v16966_v12  ;;  %vm17032_vm4 = vmmov %vm17030_vm7  ;;  %vm4941_vm7 = vcmp.eq.s32.totalorder %v4940_v37, 1 }
0x10a3   :  { %v4888_v48 = vsel %vm17032_vm4, %v14891_v21, 0  ;;  %vm17036_vm4 = vcmask 56320  }
0x10a4   :  { %v4934_v21 = vsel %vm17036_vm4, %v4932_v3, 0 }
0x10ac   :  { %11826 = vmatmul.mubr.msk.bf16.vlgmr.msra.gmra.mrb[16].mxu0 %vm17029_vm9, %v4634_v10  ;;  %vm4991_vm9 = vcmp.lt.s32.totalorder %v14906_v62, 1 }
0x10ad   :  { %11830 = vmatpush3.bf16.msra.mxu0 %v4841_v39  ;;  %11831 = vmatprep.mubr.msk.bf16.mxu0 %vm16944_vm3, %v16966_v12  ;;  %vm4992_vm1 = vmand %vm4991_vm9, %vm17033_vm12  ;;  %v4636_v39 = vld [vmem:[%s17012_s1 + $0x10] sm:$0xf] }
0x10ae   :  { %11835 = vmatprep.subr.bf16.mxu0 %v16966_v12  ;;  %v4993_v43 = vsel %vm4992_vm1, 1, %v16937_v26  ;;  %vm5050_vm1 = vcmask 48128  }
0x10af   :  { %v4997_v18 = vrot.slane %v4993_v43, %v13420_v13  ;;  %v4637_v43 = vld [vmem:[%s17012_s1 + $0x14] sm:$0xf] }
0x10b1   :  { %vm4998_vm12 = vcmp.eq.s32.totalorder %v4997_v18, 1  ;;  %v5049_v18 = vpop.permute.xlu1 %5048 }
0x10b8   :  { %11832 = vmatmul.mubr.msk.bf16.vlgmr.msra.gmra.mrb[16].mxu0 %vm17031_vm10, %v4635_v24  ;;  %vm14991_vm10 = vmpackc.low %vm4941_vm7, %vm4941_vm7 }
0x10b9   :  { %11836 = vmatpush3.bf16.msra.mxu0 %v4888_v48  ;;  %11837 = vmatprep.mubr.msk.bf16.mxu0 %vm16944_vm3, %v16966_v12  ;;  %v4943_v10 = vsel %vm14991_vm10, %v4934_v21, 0  ;;  %vm15006_vm7 = vmpackc.low %vm4998_vm12, %vm4998_vm12  ;;  %v5054_v48 = vsel %vm4991_vm9, 1, %v16937_v26  ;;  %vm17043_vm12 = vcmp.lt.s32.totalorder %v14909_v49, 1  ;;  %v5111_v49 = vpop.permute.xlu0 %5110 }
0x10ba   :  { %11841 = vmatprep.subr.bf16.mxu0 %v16966_v12  ;;  %v4948_v24 = vsel %vm17038_vm8, %v4943_v10, 0  ;;  %v5000_v3 = vsel %vm15006_vm7, %v4934_v21, 0  ;;  %v5058_v10 = vrot.slane %v5054_v48, %v13420_v13  ;;  %vm17041_vm8 = vmmov %vm17037_vm5 }
0x10bb   :  { %vm5109_vm6 = vmand %vm4991_vm9, %vm17043_vm12 }
0x10bc   :  { %vm5059_vm4 = vcmp.eq.s32.totalorder %v5058_v10, 1  ;;  %v5115_v48 = vsel %vm5109_vm6, 1, %v16937_v26  ;;  %vm17049_vm12 = vmmov %vm17041_vm8 }
0x10bd   :  { %vm15026_vm2 = vmpackc.low %vm5059_vm4, %vm5059_vm4  ;;  %v5119_v10 = vrot.slane %v5115_v48, %v13420_v13  ;;  %vm17048_vm4 = vcmask 39936  }
0x10bf   :  { %vm5120_vm9 = vcmp.eq.s32.totalorder %v5119_v10, 1 }
0x10c0   :  { %vm15041_vm6 = vmpackc.low %vm5120_vm9, %vm5120_vm9 }
0x10c4   :  { %11838 = vmatmul.mubr.msk.bf16.vlgmr.msra.gmra.mrb[16].mxu0 %vm17037_vm5, %v4636_v39  ;;  %vm17042_vm5 = vcmask 1043456  }
0x10c5   :  { %11842 = vmatpush3.bf16.msra.mxu0 %v4948_v24  ;;  %11843 = vmatprep.mubr.msk.bf16.mxu0 %vm16944_vm3, %v16966_v12  ;;  %v5005_v39 = vsel %vm17042_vm5, %v5000_v3, 0  ;;  %v5052_v24 = vsel %vm5050_vm1, %v5049_v18, 0  ;;  %v5113_v18 = vsel %vm17048_vm4, %v5111_v49, 0 }
0x10c6   :  { %11847 = vmatprep.subr.bf16.mxu0 %v16966_v12  ;;  %v5061_v3 = vsel %vm15026_vm2, %v5052_v24, 0  ;;  %v5122_v13 = vsel %vm15041_vm6, %v5113_v18, 0  ;;  %v4639_v24 = vld [vmem:[%s17012_s1 + $0x1c] sm:$0xf] }
0x10c7   :  { %v5066_v62 = vsel %vm17042_vm5, %v5061_v3, 0  ;;  %v4640_v3 = vld [vmem:[%s17012_s1 + $0x20] sm:$0xf] }
0x10d0   :  { %11844 = vmatmul.mubr.msk.bf16.vlgmr.msra.gmra.mrb[16].mxu0 %vm17041_vm8, %v4637_v43  ;;  %v4638_v43 = vld [vmem:[%s17012_s1 + $0x18] sm:$0xf]  ;;  %s17061_s1 = sld [smem:[#allocation16_spill]] }
0x10d1   :  { %11848 = vmatpush3.bf16.msra.mxu0 %v5005_v39  ;;  %11849 = vmatprep.mubr.msk.bf16.mxu0 %vm16944_vm3, %v16966_v12 }
0x10d2   :  { %11853 = vmatprep.subr.bf16.mxu0 %v16966_v12 }
0x10dc   :  { %11850 = vmatmul.mubr.msk.bf16.vlgmr.msra.gmra.mrb[16].mxu0 %vm17041_vm8, %v4638_v43  ;;  %vm17050_vm8 = vmmov %vm17042_vm5 }
0x10dd   :  { %11854 = vmatpush3.bf16.msra.mxu0 %v5066_v62  ;;  %11855 = vmatprep.mubr.msk.bf16.mxu0 %vm16944_vm3, %v16966_v12  ;;  %v5127_v48 = vsel %vm17050_vm8, %v5122_v13, 0  ;;  %vm17051_vm5 = vmmov %vm17049_vm12 }
0x10de   :  { %11859 = vmatprep.subr.bf16.mxu0 %v16966_v12  ;;  %vm17052_vm9 = vmmov %vm17051_vm5 }
0x10df   :  { %vm17055_vm4 = vmmov %vm17051_vm5 }
0x10e8   :  { %11856 = vmatmul.mubr.msk.bf16.vlgmr.msra.gmra.mrb[16].mxu0 %vm17049_vm12, %v4639_v24  ;;  %vm17057_vm12 = vmmov %vm17050_vm8 }
0x10e9   :  { %11860 = vmatpush3.bf16.msra.mxu0 %v5127_v48  ;;  %11861 = vmatprep.mubr.msk.bf16.mxu0 %vm16944_vm3, %v16966_v12  ;;  %vm17058_vm8 = vmmov %vm17055_vm4 }
0x10ea   :  { %11979 = vmatprep.subr.bf16.mxu0 %v16966_v12 }
0x10f4   :  { %11862 = vmatmul.mubr.msk.bf16.vlgmr.msra.gmra.mrb[16].mxu0 %vm17051_vm5, %v4640_v3  ;;  %vm17059_vm5 = vmmov %vm17055_vm4 }
0x10f5   :  { %11981 = vmatprep.mubr.msk.bf16.mxu0 %vm16944_vm3, %v16966_v12 }
0x11c7   :  { %v5163_v43 = vpop.f32.mrb[16].mxu0 }
0x11c8   :  { %v5173_v10 = vmul.f32 %v5163_v43, %v5163_v43  ;;  %v11863_v62 = vpop.f32.mrb[17].mxu0  ;;  %v5170_v49 = vsel %vm17052_vm9, %v5163_v43, 0.0  ;;  %vm17062_vm9 = vmmov %vm17055_vm4 }
0x11c9   :  { %5171 = vadd.xlane.f32.xlu1 %v5170_v49  ;;  %v5166_v18 = vpop.f32.mrb[18].mxu0  ;;  %v5183_v62 = vld [vmem:[%s17053_s2] sm:$0xff]  ;;  %s17063_s2 = sld [smem:[#allocation17_spill]] }
0x11ca   :  { %v11864_v13 = vpop.f32.mrb[19].mxu0  ;;  %v5174_v24 = vsel %vm17055_vm4, %v5173_v10, 0.0  ;;  %v5187_v49 = vld [vmem:[%s17054_s7] sm:$0xff]  ;;  %vm17064_vm4 = vcmask 23552   ;;  %s17110_s7 = sld [smem:[#allocation20_spill]] }
0x11cb   :  { %5175 = vadd.xlane.f32.xlu0 %v5174_v24 }
0x1256   :  { %v5172_v48 = vpop.xlane.xlu1 %5171 }
0x1257   :  { %v5178_v32 = vmul.f32 0.125, %v5172_v48 }
0x1258   :  { %v5176_v35 = vpop.xlane.xlu0 %5175 }
0x1259   :  { %v5180_v3 = vmul.f32 %v5178_v32, %v5178_v32  ;;  %v5179_v61 = vmul.f32 0.125, %v5176_v35 }
0x125b   :  { %v5181_v19 = vsub.f32 %v5179_v61, %v5180_v3 }
0x125d   :  { %v5182_v25 = vmax.f32 %v5181_v19, 0.0 }
0x125f   :  { %v5184_v9 = vadd.f32 1e-05, %v5182_v25 }
0x1261   :  { %12986 = vrsqrt.f32 %v5184_v9  ;;  %v5203_v9 = vld [vmem:[%s17056_s10 + $0x10] sm:$0xf] }
0x126b   :  { %v12987_v47 = vpop.eup %12986 }
0x126c   :  { %v5186_v55 = vmul.f32 %v12987_v47, %v5183_v62 }
0x126e   :  { %5192 = vperm.xlu0 %12840, %v5186_v55   ;;  %v5188_v18 = vmul.f32 %v5186_v55, %v5178_v32 }
0x1270   :  { %v5189_v13 = vsub.f32 %v5187_v49, %v5188_v18 }
0x1272   :  { %5198 = vperm.xlu1 %12841, %v5189_v13  }
0x12ed   :  { %v5193_v10 = vpop.permute.xlu0 %5192 }
0x12ee   :  { %v5195_v24 = vmul.f32 %v5193_v10, %v5163_v43 }
0x12f1   :  { %v5199_v63 = vpop.permute.xlu1 %5198 }
0x12f2   :  { %v5201_v48 = vadd.f32 %v5199_v63, %v5195_v24  ;;  %v5263_v24 = vld [vmem:[%s17060_s11] sm:$0xff] }
0x12f4   :  { %v5202_v59 = vmax.f32 %v5201_v48, 0.0 }
0x12f6   :  { %v15062_v29 = vpack.c.bf16 %v5202_v59, %v5202_v59 }
0x12f8   :  { %v15066_v25 = vsel %vm17057_vm12, %v15062_v29, 0 }
0x12f9   :  { %11866 = vmatpush3.bf16.msra.mxu1 %v15066_v25 }
0x12fa   :  { %11871 = vmatprep.subr.bf16.mxu1 %v16966_v12 }
0x12fc   :  { %11868 = vmatmul.mubr.msk.bf16.vlgmr.msra.gmra.mrb[28].mxu1 %vm17058_vm8, %v5203_v9  ;;  %vm17065_vm8 = vmmov %vm17059_vm5 }
0x12fd   :  { %11873 = vmatprep.mubr.msk.bf16.mxu1 %vm16944_vm3, %v16966_v12 }
0x13cf   :  { %v5245_v55 = vpop.f32.mrb[28].mxu1 }
0x13d0   :  { %v5254_v47 = vmul.f32 %v5245_v55, %v5245_v55  ;;  %v11869_v63 = vpop.f32.mrb[29].mxu1  ;;  %v5251_v59 = vsel %vm17059_vm5, %v5245_v55, 0.0  ;;  %vm17066_vm5 = vcmask 15360  }
0x13d1   :  { %5252 = vadd.xlane.f32.xlu1 %v5251_v59  ;;  %v5248_v35 = vpop.f32.mrb[30].mxu1  ;;  %v5267_v63 = vld [vmem:[%s17061_s1] sm:$0xff] }
0x13d2   :  { %v11870_v32 = vpop.f32.mrb[31].mxu1  ;;  %v5255_v19 = vsel %vm17062_vm9, %v5254_v47, 0.0  ;;  %v15079_v47 = vld [vmem:[%s17063_s2] sm:$0xf]  ;;  %vm17067_vm9 = vmmov %vm17064_vm4 }
0x13d3   :  { %5256 = vadd.xlane.f32.xlu0 %v5255_v19  ;;  %v11261_v32 = vcombine.low %v15079_v47, %v15079_v47 }
0x145e   :  { %v5253_v61 = vpop.xlane.xlu1 %5252 }
0x145f   :  { %v5258_v43 = vmul.f32 0.125, %v5253_v61 }
0x1460   :  { %v5257_v3 = vpop.xlane.xlu0 %5256 }
0x1461   :  { %v5260_v62 = vmul.f32 %v5258_v43, %v5258_v43  ;;  %v5259_v49 = vmul.f32 0.125, %v5257_v3 }
0x1463   :  { %v5261_v18 = vsub.f32 %v5259_v49, %v5260_v62 }
0x1465   :  { %v5262_v13 = vmax.f32 %v5261_v18, 0.0  ;;  %v5284_v18 = vld [vmem:[%s17063_s2 + $0x4] sm:$0xf] }
0x1467   :  { %v5264_v10 = vadd.f32 1e-05, %v5262_v13 }
0x1469   :  { %12988 = vrsqrt.f32 %v5264_v10 }
0x1473   :  { %v12989_v48 = vpop.eup %12988 }
0x1474   :  { %v5266_v9 = vmul.f32 %v12989_v48, %v5263_v24  ;;  %v11265_v48 = vcombine.low %v5284_v18, %v5284_v18 }
0x1476   :  { %5272 = vperm.xlu0 %12840, %v5266_v9   ;;  %v5268_v59 = vmul.f32 %v5266_v9, %v5258_v43 }
0x1478   :  { %v5269_v35 = vsub.f32 %v5267_v63, %v5268_v59  ;;  %v15102_v63 = vld [vmem:[%s17063_s2 + $0xc] sm:$0xf]  ;;  %v15105_v59 = vld [vmem:[%s17063_s2 + $0x8] sm:$0xf] }
0x147a   :  { %5278 = vperm.xlu1 %12841, %v5269_v35   ;;  %5310 = vrot.lane.b32.xlu0 %v11261_v32, %s13104_s29  ;;  %v11271_v35 = vcombine.low %v15102_v63, %v15102_v63  ;;  %v11268_v32 = vcombine.low %v15105_v59, %v15105_v59 }
0x147e   :  { %5301 = vrot.lane.b32.xlu1 %v15062_v29, %s13107_s30 }
0x14f5   :  { %v5273_v19 = vpop.permute.xlu0 %5272 }
0x14f6   :  { %v5275_v61 = vmul.f32 %v5273_v19, %v5245_v55  ;;  %v15119_v19 = vld [vmem:[%s17063_s2 + $0x10] sm:$0xf] }
0x14f9   :  { %v5279_v3 = vpop.permute.xlu1 %5278  ;;  %v5311_v9 = vpop.permute.xlu0 %5310 }
0x14fa   :  { %v5281_v62 = vadd.f32 %v5279_v3, %v5275_v61  ;;  %v11274_v61 = vcombine.low %v15119_v19, %v15119_v19  ;;  %v15126_v3 = vld [vmem:[%s17063_s2 + $0x14] sm:$0xf] }
0x14fc   :  { %v5282_v49 = vmax.f32 %v5281_v62, 0.0  ;;  %v11277_v62 = vcombine.low %v15126_v3, %v15126_v3 }
0x14fd   :  { %v5302_v43 = vpop.permute.xlu1 %5301 }
0x14fe   :  { %v15087_v13 = vpack.c.bf16 %v5282_v49, %v5282_v49  ;;  %v5304_v10 = vsel %vm17064_vm4, 0, %v5302_v43  ;;  %v15134_v49 = vld [vmem:[%s17063_s2 + $0x18] sm:$0xf]  ;;  %vm17068_vm4 = vmmov %vm17057_vm12 }
0x14ff   :  { %v5306_v24 = vsel %vm14926_vm13, %v5304_v10, 0  ;;  %v11280_v43 = vcombine.low %v15134_v49, %v15134_v49  ;;  %v15142_v10 = vld [vmem:[%s17063_s2 + $0x1c] sm:$0xf] }
0x1500   :  { %5404 = vrot.lane.b32.xlu0 %v15087_v13, %s13111_s15  ;;  %5294 = vrot.lane.b32.xlu1 %v15087_v13, %s13107_s30  ;;  %v5316_v55 = vsel %vm17057_vm12, %v5306_v24, 0  ;;  %v11283_v24 = vcombine.low %v15142_v10, %v15142_v10  ;;  %vm17069_vm12 = vmmov %vm17065_vm8 }
0x1501   :  { %11872 = vmatpush3.bf16.msra.mxu1 %v5316_v55  ;;  %v15157_v55 = vld [vmem:[%s17063_s2 + $0x20] sm:$0xf] }
0x1502   :  { %11877 = vmatprep.subr.bf16.mxu1 %v16966_v12 }
0x1504   :  { %5466 = vrot.lane.b32.xlu0 %v11265_v48, %s13104_s29  ;;  %5457 = vrot.lane.b32.xlu1 %v15062_v29, %s13111_s15  ;;  %v11286_v48 = vcombine.low %v15157_v55, %v15157_v55  ;;  %s17107_s15 = sld [smem:[#allocation18_spill]] }
0x1505   :  { %11874 = vmatmul.mubr.msk.bf16.vlgmr.msra.gmra.mrb[32].mxu1 %vm17065_vm8, %v5311_v9  ;;  %vm17070_vm8 = vmmov %vm17068_vm4 }
0x1506   :  { %11879 = vmatprep.mubr.msk.bf16.mxu1 %vm16944_vm3, %v16966_v12 }
0x1508   :  { %5568 = vrot.lane.b32.xlu0 %v15062_v29, %s13092_s18  ;;  %5515 = vrot.lane.b32.xlu1 %v15087_v13, %s13092_s18 }
0x150c   :  { %5678 = vrot.lane.b32.xlu0 %v11271_v35, %s13104_s29  ;;  %5577 = vrot.lane.b32.xlu1 %v11268_v32, %s13104_s29 }
0x1510   :  { %5823 = vrot.lane.b32.xlu0 %v15087_v13, %s13093_s22  ;;  %5777 = vrot.lane.b32.xlu1 %v11274_v61, %s13104_s29 }
0x1514   :  { %5885 = vrot.lane.b32.xlu0 %v11277_v62, %s13104_s29  ;;  %5876 = vrot.lane.b32.xlu1 %v15062_v29, %s13093_s22 }
0x1518   :  { %6035 = vrot.lane.b32.xlu0 %v15087_v13, %s13112_s3  ;;  %5986 = vrot.lane.b32.xlu1 %v11280_v43, %s13104_s29 }
0x151c   :  { %6097 = vrot.lane.b32.xlu0 %v11283_v24, %s13104_s29  ;;  %6088 = vrot.lane.b32.xlu1 %v15062_v29, %s13112_s3  ;;  %s17108_s3 = sld [smem:[#allocation19_spill]] }
0x1520   :  { %6199 = vrot.lane.b32.xlu0 %v15062_v29, %s13108_s6  ;;  %6146 = vrot.lane.b32.xlu1 %v15087_v13, %s13108_s6 }
0x1524   :  { %6208 = vrot.lane.b32.xlu1 %v11286_v48, %s13104_s29 }
0x1572   :  { %v5405_v9 = vpop.permute.xlu0 %5404  ;;  %v5295_v35 = vpop.permute.xlu1 %5294 }
0x1573   :  { %v5407_v32 = vsel %vm17066_vm5, 0, %v5405_v9  ;;  %v5297_v61 = vsel %vm17067_vm9, 0, %v5295_v35  ;;  %vm17073_vm9 = vmmov %vm17068_vm4 }
0x1574   :  { %v5299_v62 = vsel %vm14926_vm13, %v5297_v61, 0  ;;  %v5409_v43 = vsel %vm14920_vm14, %v5407_v32, 0  ;;  %vm17071_vm13 = vmmov %vm17066_vm5 }
0x1575   :  { %v5362_v29 = vsel %vm17068_vm4, %v5299_v62, 0  ;;  %v5414_v24 = vsel %vm17070_vm8, %v5409_v43, 0  ;;  %vm17072_vm5 = vmmov %vm17069_vm12  ;;  %vm17074_vm4 = vcmask 7168  }
0x1576   :  { %11878 = vmatpush3.bf16.msra.mxu1 %v5362_v29  ;;  %v5458_v1 = vpop.permute.xlu1 %5457  ;;  %v5467_v61 = vpop.permute.xlu0 %5466 }
0x1577   :  { %11883 = vmatprep.subr.bf16.mxu1 %v16966_v12  ;;  %v5460_v48 = vsel %vm17071_vm13, 0, %v5458_v1  ;;  %vm17078_vm13 = vmmov %vm17072_vm5 }
0x1578   :  { %v5462_v9 = vsel %vm14920_vm14, %v5460_v48, 0  ;;  %vm17076_vm14 = vmmov %vm17070_vm8 }
0x1579   :  { %11880 = vmatmul.mubr.msk.bf16.vlgmr.msra.gmra.mrb[32].mxu1 %vm17069_vm12, %v15079_v47  ;;  %v5472_v35 = vsel %vm17073_vm9, %v5462_v9, 0  ;;  %vm17075_vm12 = vmmov %vm17072_vm5 }
0x157a   :  { %11884 = vmatpush3.bf16.msra.mxu1 %v5414_v24  ;;  %11885 = vmatprep.mubr.msk.bf16.mxu1 %vm16944_vm3, %v16966_v12  ;;  %v5516_v47 = vpop.permute.xlu1 %5515  ;;  %vm17077_vm8 = vmmov %vm17074_vm4 }
0x157b   :  { %11889 = vmatprep.subr.bf16.mxu1 %v16966_v12  ;;  %v5518_v32 = vsel %vm17074_vm4, 0, %v5516_v47 }
0x157c   :  { %v5520_v62 = vsel %vm14946_vm0, %v5518_v32, 0  ;;  %v5626_v1 = vsel %vm14963_vm11, %v5518_v32, 0 }
0x157d   :  { %v5525_v45 = vsel %vm17076_vm14, %v5520_v62, 0 }
0x157e   :  { %v5578_v48 = vpop.permute.xlu1 %5577 }
0x1582   :  { %v5778_v32 = vpop.permute.xlu1 %5777 }
0x1585   :  { %11886 = vmatmul.mubr.msk.bf16.vlgmr.msra.gmra.mrb[32].mxu1 %vm17072_vm5, %v5284_v18  ;;  %v5569_v18 = vpop.permute.xlu0 %5568  ;;  %vm17079_vm5 = vmmov %vm17073_vm9 }
0x1586   :  { %11890 = vmatpush3.bf16.msra.mxu1 %v5472_v35  ;;  %11891 = vmatprep.mubr.msk.bf16.mxu1 %vm16944_vm3, %v16966_v12  ;;  %v5571_v29 = vsel %vm17077_vm8, 0, %v5569_v18  ;;  %vm17080_vm9 = vmmov %vm17075_vm12 }
0x1587   :  { %11895 = vmatprep.subr.bf16.mxu1 %v16966_v12  ;;  %v5573_v43 = vsel %vm14946_vm0, %v5571_v29, 0  ;;  %vm17081_vm4 = vmmov %vm17079_vm5 }
0x1588   :  { %v5583_v24 = vsel %vm17079_vm5, %v5573_v43, 0  ;;  %v5631_v56 = vsel %vm17081_vm4, %v5626_v1, 0  ;;  %vm17082_vm0 = vmmov %vm17080_vm9 }
0x1589   :  { %v5679_v35 = vpop.permute.xlu0 %5678  ;;  %vm17084_vm14 = vmmov %vm17082_vm0 }
0x158a   :  { %vm17085_vm8 = vmmov %vm17081_vm4 }
0x158b   :  { %v5731_v47 = vsel %vm17085_vm8, %v15087_v13, 0  ;;  %vm17088_vm5 = vmmov %vm17082_vm0 }
0x158d   :  { %v5824_v2 = vpop.permute.xlu0 %5823 }
0x1591   :  { %11892 = vmatmul.mubr.msk.bf16.vlgmr.msra.gmra.mrb[32].mxu1 %vm17075_vm12, %v5467_v61  ;;  %vm17083_vm12 = vmmov %vm17081_vm4 }
0x1592   :  { %11896 = vmatpush3.bf16.msra.mxu1 %v5525_v45  ;;  %11897 = vmatprep.mubr.msk.bf16.mxu1 %vm16944_vm3, %v16966_v12 }
0x1593   :  { %11901 = vmatprep.subr.bf16.mxu1 %v16966_v12 }
0x159d   :  { %11898 = vmatmul.mubr.msk.bf16.vlgmr.msra.gmra.mrb[32].mxu1 %vm17078_vm13, %v15105_v59  ;;  %v5674_v59 = vsel %vm14963_vm11, %v5571_v29, 0  ;;  %vm17086_vm11 = vmmov %vm17082_vm0  ;;  %vm17087_vm13 = vcmask 56320   ;;  %v5886_v29 = vpop.permute.xlu0 %5885 }
0x159e   :  { %11902 = vmatpush3.bf16.msra.mxu1 %v5583_v24  ;;  %11903 = vmatprep.mubr.msk.bf16.mxu1 %vm16944_vm3, %v16966_v12  ;;  %v5684_v9 = vsel %vm17083_vm12, %v5674_v59, 0  ;;  %vm17091_vm12 = vmmov %vm17085_vm8 }
0x159f   :  { %11907 = vmatprep.subr.bf16.mxu1 %v16966_v12 }
0x15a1   :  { %v6036_v24 = vpop.permute.xlu0 %6035 }
0x15a2   :  { %v6038_v1 = vsel %vm5050_vm1, %v6036_v24, 0 }
0x15a9   :  { %11904 = vmatmul.mubr.msk.bf16.vlgmr.msra.gmra.mrb[32].mxu1 %vm17080_vm9, %v5578_v48  ;;  %vm17089_vm9 = vmmov %vm17081_vm4  ;;  %v6040_v48 = vsel %vm15026_vm2, %v6038_v1, 0 }
0x15aa   :  { %11908 = vmatpush3.bf16.msra.mxu1 %v5631_v56  ;;  %11909 = vmatprep.mubr.msk.bf16.mxu1 %vm16944_vm3, %v16966_v12  ;;  %vm17090_vm4 = vmmov %vm17087_vm13 }
0x15ab   :  { %11913 = vmatprep.subr.bf16.mxu1 %v16966_v12 }
0x15b5   :  { %11910 = vmatmul.mubr.msk.bf16.vlgmr.msra.gmra.mrb[32].mxu1 %vm17082_vm0, %v15102_v63  ;;  %v5826_v63 = vsel %vm17087_vm13, %v5824_v2, 0  ;;  %vm17095_vm13 = vmmov %vm17082_vm0 }
0x15b6   :  { %11914 = vmatpush3.bf16.msra.mxu1 %v5684_v9  ;;  %11915 = vmatprep.mubr.msk.bf16.mxu1 %vm16944_vm3, %v16966_v12  ;;  %v5828_v13 = vsel %vm14991_vm10, %v5826_v63, 0  ;;  %v5934_v18 = vsel %vm15006_vm7, %v5826_v63, 0  ;;  %v6098_v63 = vpop.permute.xlu0 %6097 }
0x15b7   :  { %11919 = vmatprep.subr.bf16.mxu1 %v16966_v12  ;;  %v5833_v61 = vsel %vm17089_vm9, %v5828_v13, 0  ;;  %v5939_v20 = vsel %vm17085_vm8, %v5934_v18, 0 }
0x15c1   :  { %11916 = vmatmul.mubr.msk.bf16.vlgmr.msra.gmra.mrb[32].mxu1 %vm17084_vm14, %v5679_v35  ;;  %vm17092_vm14 = vmmov %vm17082_vm0 }
0x15c2   :  { %11920 = vmatpush3.bf16.msra.mxu1 %v5731_v47  ;;  %11921 = vmatprep.mubr.msk.bf16.mxu1 %vm16944_vm3, %v16966_v12 }
0x15c3   :  { %11925 = vmatprep.subr.bf16.mxu1 %v16966_v12 }
0x15cd   :  { %11922 = vmatmul.mubr.msk.bf16.vlgmr.msra.gmra.mrb[32].mxu1 %vm17086_vm11, %v15119_v19  ;;  %vm17094_vm11 = vmmov %vm17085_vm8 }
0x15ce   :  { %11926 = vmatpush3.bf16.msra.mxu1 %v15066_v25  ;;  %11927 = vmatprep.mubr.msk.bf16.mxu1 %vm16944_vm3, %v16966_v12  ;;  %v5877_v25 = vpop.permute.xlu1 %5876 }
0x15cf   :  { %11931 = vmatprep.subr.bf16.mxu1 %v16966_v12  ;;  %v5879_v19 = vsel %vm17090_vm4, %v5877_v25, 0  ;;  %vm17099_vm4 = vcmask 39936  }
0x15d0   :  { %v5881_v62 = vsel %vm14991_vm10, %v5879_v19, 0  ;;  %vm17093_vm10 = vmmov %vm17082_vm0 }
0x15d1   :  { %v5891_v45 = vsel %vm17091_vm12, %v5881_v62, 0 }
0x15d2   :  { %v5987_v56 = vpop.permute.xlu1 %5986 }
0x15d9   :  { %11928 = vmatmul.mubr.msk.bf16.vlgmr.msra.gmra.mrb[32].mxu1 %vm17088_vm5, %v5778_v32  ;;  %vm17097_vm5 = vmmov %vm17082_vm0 }
0x15da   :  { %11932 = vmatpush3.bf16.msra.mxu1 %v5833_v61  ;;  %11933 = vmatprep.mubr.msk.bf16.mxu1 %vm16944_vm3, %v16966_v12 }
0x15db   :  { %11937 = vmatprep.subr.bf16.mxu1 %v16966_v12 }
0x15e5   :  { %11934 = vmatmul.mubr.msk.bf16.vlgmr.msra.gmra.mrb[32].mxu1 %vm17082_vm0, %v15126_v3  ;;  %v5982_v3 = vsel %vm15006_vm7, %v5879_v19, 0  ;;  %vm17096_vm7 = vmmov %vm17085_vm8 }
0x15e6   :  { %11938 = vmatpush3.bf16.msra.mxu1 %v5891_v45  ;;  %11939 = vmatprep.mubr.msk.bf16.mxu1 %vm16944_vm3, %v16966_v12  ;;  %v5992_v43 = vsel %vm17094_vm11, %v5982_v3, 0  ;;  %v6045_v37 = vsel %vm17096_vm7, %v6040_v48, 0  ;;  %vm17098_vm9 = vmmov %vm17096_vm7 }
0x15e7   :  { %11943 = vmatprep.subr.bf16.mxu1 %v16966_v12 }
0x15f1   :  { %11940 = vmatmul.mubr.msk.bf16.vlgmr.msra.gmra.mrb[32].mxu1 %vm17092_vm14, %v5886_v29 }
0x15f2   :  { %11944 = vmatpush3.bf16.msra.mxu1 %v5939_v20  ;;  %11945 = vmatprep.mubr.msk.bf16.mxu1 %vm16944_vm3, %v16966_v12 }
0x15f3   :  { %11949 = vmatprep.subr.bf16.mxu1 %v16966_v12 }
0x15fd   :  { %11946 = vmatmul.mubr.msk.bf16.vlgmr.msra.gmra.mrb[32].mxu1 %vm17093_vm10, %v15134_v49  ;;  %v6089_v49 = vpop.permute.xlu1 %6088 }
0x15fe   :  { %11950 = vmatpush3.bf16.msra.mxu1 %v5992_v43  ;;  %11951 = vmatprep.mubr.msk.bf16.mxu1 %vm16944_vm3, %v16966_v12  ;;  %v6091_v59 = vsel %vm5050_vm1, %v6089_v49, 0  ;;  %vm17100_vm1 = vmmov %vm17082_vm0 }
0x15ff   :  { %11955 = vmatprep.subr.bf16.mxu1 %v16966_v12  ;;  %v6093_v9 = vsel %vm15026_vm2, %v6091_v59, 0  ;;  %vm17101_vm2 = vmmov %vm17096_vm7  ;;  %v6269_v59 = vld [vmem:[%s17107_s15] sm:$0xff] }
0x1600   :  { %v6103_v35 = vsel %vm17098_vm9, %v6093_v9, 0  ;;  %vm17102_vm0 = vmmov %vm17099_vm4 }
0x1601   :  { %v6147_v47 = vpop.permute.xlu1 %6146  ;;  %vm17103_vm12 = vmmov %vm17100_vm1 }
0x1602   :  { %v6149_v2 = vsel %vm17099_vm4, %v6147_v47, 0  ;;  %vm17104_vm14 = vmmov %vm17101_vm2  ;;  %v6273_v47 = vld [vmem:[%s17108_s3] sm:$0xff]  ;;  %vm17116_vm4 = vcmask 31744  }
0x1603   :  { %v6151_v13 = vsel %vm15041_vm6, %v6149_v2, 0  ;;  %vm17105_vm8 = vmmov %vm17100_vm1 }
0x1604   :  { %v6156_v21 = vsel %vm17101_vm2, %v6151_v13, 0  ;;  %vm17109_vm10 = vmmov %vm17100_vm1 }
0x1605   :  { %v6209_v19 = vpop.permute.xlu1 %6208  ;;  %vm17111_vm11 = vmmov %vm17101_vm2 }
0x1606   :  { %vm17113_vm7 = vmmov %vm17100_vm1 }
0x1607   :  { %vm17115_vm9 = vmmov %vm17100_vm1 }
0x1609   :  { %11952 = vmatmul.mubr.msk.bf16.vlgmr.msra.gmra.mrb[32].mxu1 %vm17095_vm13, %v5987_v56  ;;  %vm17112_vm13 = vmmov %vm17102_vm0 }
0x160a   :  { %11956 = vmatpush3.bf16.msra.mxu1 %v6045_v37  ;;  %11957 = vmatprep.mubr.msk.bf16.mxu1 %vm16944_vm3, %v16966_v12 }
0x160b   :  { %11961 = vmatprep.subr.bf16.mxu1 %v16966_v12 }
0x1615   :  { %11958 = vmatmul.mubr.msk.bf16.vlgmr.msra.gmra.mrb[32].mxu1 %vm17097_vm5, %v15142_v10  ;;  %v6200_v10 = vpop.permute.xlu0 %6199  ;;  %vm17114_vm5 = vmmov %vm17101_vm2 }
0x1616   :  { %11962 = vmatpush3.bf16.msra.mxu1 %v6103_v35  ;;  %11963 = vmatprep.mubr.msk.bf16.mxu1 %vm16944_vm3, %v16966_v12  ;;  %v6202_v32 = vsel %vm17102_vm0, %v6200_v10, 0 }
0x1617   :  { %11967 = vmatprep.subr.bf16.mxu1 %v16966_v12  ;;  %v6204_v61 = vsel %vm15041_vm6, %v6202_v32, 0  ;;  %vm17106_vm6 = vmmov %vm17100_vm1  ;;  %v15311_v32 = vld [vmem:[%s17110_s7] sm:$0xf] }
0x1618   :  { %v6214_v25 = vsel %vm17104_vm14, %v6204_v61, 0  ;;  %v11289_v61 = vcombine.low %v15311_v32, %v15311_v32  ;;  %vm17120_vm14 = vmmov %vm17101_vm2 }
0x1621   :  { %11964 = vmatmul.mubr.msk.bf16.vlgmr.msra.gmra.mrb[32].mxu1 %vm17100_vm1, %v6098_v63  ;;  %v15303_v63 = vpack.c.bf16 %v14876_v46, %v14876_v46  ;;  %vm17117_vm1 = vmmov %vm17102_vm0  ;;  %vm17118_vm0 = vnez %v16971_v28 }
0x1622   :  { %11968 = vmatpush3.bf16.msra.mxu1 %v6156_v21  ;;  %11969 = vmatprep.mubr.msk.bf16.mxu1 %vm16944_vm3, %v16966_v12  ;;  %v6290_v21 = vld [vmem:[%s13313_s12] sm:$0xf]  ;;  %s17171_s12 = sld [smem:[#allocation21_spill]] }
0x1623   :  { %11973 = vmatprep.subr.bf16.mxu1 %v16966_v12  ;;  %v6295_v10 = vsel %vm17111_vm11, %v6290_v21, 0  ;;  %v15363_v21 = vld [vmem:[%s17110_s7 + $0x14] sm:$0xf]  ;;  %vm17125_vm11 = vnez %v16979_v8 }
0x1624   :  { %11980 = vmatpush3.bf16.msra.mxu0 %v6295_v10  ;;  %v11305_v10 = vcombine.low %v15363_v21, %v15363_v21 }
0x1625   :  { %11985 = vmatprep.subr.bf16.mxu0 %v16966_v12 }
0x162d   :  { %11970 = vmatmul.mubr.msk.bf16.vlgmr.msra.gmra.mrb[32].mxu1 %vm17103_vm12, %v15157_v55  ;;  %vm17119_vm12 = vmmov %vm17106_vm6 }
0x162e   :  { %11974 = vmatpush3.bf16.msra.mxu1 %v6214_v25  ;;  %11975 = vmatprep.mubr.msk.bf16.mxu1 %vm16944_vm3, %v16966_v12 }
0x162f   :  { %12093 = vmatprep.subr.bf16.mxu1 %v16966_v12 }
0x1639   :  { %11976 = vmatmul.mubr.msk.bf16.vlgmr.msra.gmra.mrb[32].mxu1 %vm17105_vm8, %v6209_v19  ;;  %vm17122_vm8 = vmmov %vm17106_vm6 }
0x163a   :  { %12097 = vmatprep.mubr.msk.bf16.mxu1 %vm16944_vm3, %v16966_v12 }
0x170c   :  { %v6250_v62 = vpop.f32.mrb[32].mxu1 }
0x170d   :  { %v6260_v39 = vmul.f32 %v6250_v62, %v6250_v62  ;;  %v11977_v45 = vpop.f32.mrb[33].mxu1  ;;  %v6257_v55 = vsel %vm17106_vm6, %v6250_v62, 0.0  ;;  %vm17123_vm6 = vmmov %vm17101_vm2 }
0x170e   :  { %6258 = vadd.xlane.f32.xlu0 %v6257_v55  ;;  %v6253_v18 = vpop.f32.mrb[34].mxu1 }
0x170f   :  { %v11978_v29 = vpop.f32.mrb[35].mxu1  ;;  %v6261_v20 = vsel %vm17109_vm10, %v6260_v39, 0.0  ;;  %vm17124_vm10 = vcmask 23552  }
0x1710   :  { %6262 = vadd.xlane.f32.xlu1 %v6261_v20 }
0x179b   :  { %v6259_v3 = vpop.xlane.xlu0 %6258 }
0x179c   :  { %v6264_v43 = vmul.f32 0.125, %v6259_v3 }
0x179d   :  { %v6263_v24 = vpop.xlane.xlu1 %6262 }
0x179e   :  { %v6266_v1 = vmul.f32 %v6264_v43, %v6264_v43  ;;  %v6265_v48 = vmul.f32 0.125, %v6263_v24  ;;  %v6338_v24 = vld [vmem:[%s17110_s7 + $0x4] sm:$0xf] }
0x17a0   :  { %v6267_v56 = vsub.f32 %v6265_v48, %v6266_v1 }
0x17a2   :  { %v6268_v37 = vmax.f32 %v6267_v56, 0.0 }
0x17a4   :  { %v6270_v49 = vadd.f32 1e-05, %v6268_v37 }
0x17a6   :  { %12990 = vrsqrt.f32 %v6270_v49  ;;  %v11293_v49 = vcombine.low %v6338_v24, %v6338_v24 }
0x17b0   :  { %v12991_v9 = vpop.eup %12990 }
0x17b1   :  { %v6272_v35 = vmul.f32 %v12991_v9, %v6269_v59  ;;  %v15338_v59 = vld [vmem:[%s17110_s7 + $0x8] sm:$0xf] }
0x17b2   :  { %v11296_v9 = vcombine.low %v15338_v59, %v15338_v59 }
0x17b3   :  { %6278 = vperm.xlu0 %12840, %v6272_v35   ;;  %v6274_v2 = vmul.f32 %v6272_v35, %v6264_v43  ;;  %v15347_v35 = vld [vmem:[%s17110_s7 + $0xc] sm:$0xf] }
0x17b5   :  { %v6275_v13 = vsub.f32 %v6273_v47, %v6274_v2  ;;  %v11299_v47 = vcombine.low %v15347_v35, %v15347_v35  ;;  %v15355_v2 = vld [vmem:[%s17110_s7 + $0x10] sm:$0xf] }
0x17b7   :  { %6356 = vrot.lane.b32.xlu0 %v15303_v63, %s13105_s8  ;;  %6284 = vperm.xlu1 %12841, %v6275_v13   ;;  %v11302_v13 = vcombine.low %v15355_v2, %v15355_v2 }
0x17bb   :  { %6365 = vrot.lane.b32.xlu1 %v11289_v61, %s13104_s29  ;;  %v15374_v61 = vld [vmem:[%s17110_s7 + $0x18] sm:$0xf] }
0x1832   :  { %v6279_v46 = vpop.permute.xlu0 %6278 }
0x1833   :  { %v6281_v25 = vmul.f32 %v6279_v46, %v6250_v62  ;;  %v11308_v46 = vcombine.low %v15374_v61, %v15374_v61 }
0x1836   :  { %v6357_v19 = vpop.permute.xlu0 %6356  ;;  %v6285_v39 = vpop.permute.xlu1 %6284 }
0x1837   :  { %v6359_v45 = vsel %vm17112_vm13, 0, %v6357_v19  ;;  %v6287_v55 = vadd.f32 %v6285_v39, %v6281_v25  ;;  %v15383_v25 = vld [vmem:[%s17110_s7 + $0x1c] sm:$0xf]  ;;  %v15398_v39 = vld [vmem:[%s17110_s7 + $0x20] sm:$0xf]  ;;  %vm17126_vm13 = vmmov %vm17113_vm7 }
0x1838   :  { %v6361_v29 = vsel %vm14734_vm15, %v6359_v45, 0  ;;  %v11311_v19 = vcombine.low %v15383_v25, %v15383_v25  ;;  %v11314_v45 = vcombine.low %v15398_v39, %v15398_v39 }
0x1839   :  { %v6288_v18 = vmax.f32 %v6287_v55, 0.0  ;;  %v6371_v3 = vsel %vm17114_vm5, %v6361_v29, 0  ;;  %vm17128_vm5 = vmmov %vm17124_vm10 }
0x183a   :  { %v6366_v62 = vpop.permute.xlu1 %6365 }
0x183b   :  { %v6289_v20 = vpack.c.bf16 %v6288_v18, %v6288_v18 }
0x183d   :  { %11982 = vmatmul.mubr.msk.bf16.vlgmr.msra.gmra.mrb[20].mxu0 %vm17113_vm7, %v6289_v20  ;;  %vm17127_vm7 = vmmov %vm17101_vm2 }
0x183e   :  { %11986 = vmatpush3.bf16.msra.mxu0 %v6371_v3  ;;  %11987 = vmatprep.mubr.msk.bf16.mxu0 %vm16944_vm3, %v16966_v12 }
0x183f   :  { %11991 = vmatprep.subr.bf16.mxu0 %v16966_v12 }
0x1845   :  { %11988 = vmatmul.mubr.msk.bf16.vlgmr.msra.gmra.mrb[24].mxu0 %vm17115_vm9, %v6366_v62  ;;  %vm17129_vm9 = vmmov %vm17122_vm8 }
0x1846   :  { %11993 = vmatprep.mubr.msk.bf16.mxu0 %vm16944_vm3, %v16966_v12 }
0x1910   :  { %v6331_v43 = vpop.f32.mrb[20].mxu0 }
0x1911   :  { %v15328_v1 = vpack.c.bf16 %v6331_v43, %v6331_v43  ;;  %v11983_v48 = vpop.f32.mrb[21].mxu0 }
0x1912   :  { %v6334_v56 = vpop.f32.mrb[22].mxu0 }
0x1913   :  { %6459 = vrot.lane.b32.xlu1 %v15328_v1, %s13106_s14  ;;  %6349 = vrot.lane.b32.xlu0 %v15328_v1, %s13105_s8  ;;  %v11984_v37 = vpop.f32.mrb[23].mxu0  ;;  %s17172_s8 = sld [smem:[#allocation22_spill]] }
0x1917   :  { %6521 = vrot.lane.b32.xlu1 %v11293_v49, %s13104_s29  ;;  %6512 = vrot.lane.b32.xlu0 %v15303_v63, %s13106_s14  ;;  %s17174_s14 = sld [smem:[#allocation23_spill]] }
0x191b   :  { %6623 = vrot.lane.b32.xlu1 %v15303_v63, %s13107_s30  ;;  %6570 = vrot.lane.b32.xlu0 %v15328_v1, %s13107_s30 }
0x191f   :  { %6681 = vrot.lane.b32.xlu1 %v15328_v1, %s13092_s18  ;;  %6632 = vrot.lane.b32.xlu0 %v11296_v9, %s13104_s29 }
0x1923   :  { %6743 = vrot.lane.b32.xlu1 %v11299_v47, %s13104_s29  ;;  %6734 = vrot.lane.b32.xlu0 %v15303_v63, %s13092_s18 }
0x1927   :  { %6891 = vrot.lane.b32.xlu1 %v15328_v1, %s13093_s22  ;;  %6842 = vrot.lane.b32.xlu0 %v11302_v13, %s13104_s29 }
0x192b   :  { %6953 = vrot.lane.b32.xlu1 %v11305_v10, %s13104_s29  ;;  %6944 = vrot.lane.b32.xlu0 %v15303_v63, %s13093_s22 }
0x192f   :  { %7055 = vrot.lane.b32.xlu1 %v15303_v63, %s13108_s6  ;;  %7002 = vrot.lane.b32.xlu0 %v15328_v1, %s13108_s6 }
0x1933   :  { %7113 = vrot.lane.b32.xlu1 %v15328_v1, %s13110_s27  ;;  %7064 = vrot.lane.b32.xlu0 %v11308_v46, %s13104_s29 }
0x1937   :  { %7175 = vrot.lane.b32.xlu1 %v11311_v19, %s13104_s29  ;;  %7166 = vrot.lane.b32.xlu0 %v15303_v63, %s13110_s27 }
0x193b   :  { %7277 = vrot.lane.b32.xlu1 %v15303_v63, %s13109_s20  ;;  %7224 = vrot.lane.b32.xlu0 %v15328_v1, %s13109_s20 }
0x193f   :  { %7286 = vrot.lane.b32.xlu0 %v11314_v45, %s13104_s29 }
0x1985   :  { %v6460_v55 = vpop.permute.xlu1 %6459  ;;  %v6350_v18 = vpop.permute.xlu0 %6349 }
0x1986   :  { %v6462_v29 = vsel %vm17116_vm4, 0, %v6460_v55  ;;  %v6352_v20 = vsel %vm17117_vm1, 0, %v6350_v18  ;;  %vm17131_vm1 = vcmask 7168  }
0x1987   :  { %v6354_v3 = vsel %vm14734_vm15, %v6352_v20, 0  ;;  %v6464_v43 = vsel %vm17118_vm0, %v6462_v29, 0  ;;  %vm17121_vm15 = vmmov %vm17116_vm4 }
0x1988   :  { %v6417_v62 = vsel %vm17101_vm2, %v6354_v3, 0  ;;  %v6469_v48 = vsel %vm17120_vm14, %v6464_v43, 0  ;;  %vm17130_vm4 = vmmov %vm17101_vm2  ;;  %vm17132_vm2 = vnez %v16984_v14 }
0x1989   :  { %11992 = vmatpush3.bf16.msra.mxu0 %v6417_v62  ;;  %v6513_v57 = vpop.permute.xlu0 %6512  ;;  %v6522_v47 = vpop.permute.xlu1 %6521  ;;  %vm17135_vm14 = vmmov %vm17131_vm1 }
0x198a   :  { %11997 = vmatprep.subr.bf16.mxu0 %v16966_v12  ;;  %v6515_v56 = vsel %vm17121_vm15, 0, %v6513_v57 }
0x198b   :  { %v6517_v37 = vsel %vm17118_vm0, %v6515_v56, 0  ;;  %vm17133_vm0 = vmmov %vm17122_vm8 }
0x198c   :  { %11994 = vmatmul.mubr.msk.bf16.vlgmr.msra.gmra.mrb[24].mxu0 %vm17119_vm12, %v15311_v32  ;;  %v6527_v49 = vsel %vm17123_vm6, %v6517_v37, 0  ;;  %vm17134_vm12 = vmmov %vm17130_vm4 }
0x198d   :  { %11998 = vmatpush3.bf16.msra.mxu0 %v6469_v48  ;;  %11999 = vmatprep.mubr.msk.bf16.mxu0 %vm16944_vm3, %v16966_v12  ;;  %v6571_v32 = vpop.permute.xlu0 %6570  ;;  %vm17136_vm15 = vmmov %vm17133_vm0 }
0x198e   :  { %12003 = vmatprep.subr.bf16.mxu0 %v16966_v12  ;;  %v6573_v9 = vsel %vm17124_vm10, 0, %v6571_v32  ;;  %vm17138_vm6 = vmmov %vm17133_vm0 }
0x198f   :  { %v6575_v13 = vsel %vm17125_vm11, %v6573_v9, 0  ;;  %vm17139_vm10 = vmmov %vm17130_vm4 }
0x1990   :  { %v6580_v28 = vsel %vm17127_vm7, %v6575_v13, 0  ;;  %v6796_v48 = vsel %vm17139_vm10, %v15328_v1, 0  ;;  %vm17142_vm7 = vcmask 252928  }
0x1991   :  { %v6633_v29 = vpop.permute.xlu0 %6632 }
0x1998   :  { %12000 = vmatmul.mubr.msk.bf16.vlgmr.msra.gmra.mrb[24].mxu0 %vm17122_vm8, %v6338_v24  ;;  %v6624_v24 = vpop.permute.xlu1 %6623  ;;  %vm17137_vm8 = vmmov %vm17130_vm4 }
0x1999   :  { %12004 = vmatpush3.bf16.msra.mxu0 %v6527_v49  ;;  %12005 = vmatprep.mubr.msk.bf16.mxu0 %vm16944_vm3, %v16966_v12  ;;  %v6626_v10 = vsel %vm17128_vm5, 0, %v6624_v24  ;;  %vm17143_vm5 = vnez %v16992_v36 }
0x199a   :  { %12009 = vmatprep.subr.bf16.mxu0 %v16966_v12  ;;  %v6628_v46 = vsel %vm17125_vm11, %v6626_v10, 0  ;;  %vm17140_vm11 = vmmov %vm17133_vm0 }
0x199b   :  { %v6638_v19 = vsel %vm17130_vm4, %v6628_v46, 0 }
0x199c   :  { %v6682_v45 = vpop.permute.xlu1 %6681 }
0x199d   :  { %v6684_v55 = vsel %vm17131_vm1, 0, %v6682_v45  ;;  %vm17145_vm1 = vmmov %vm17142_vm7 }
0x199e   :  { %v6686_v18 = vsel %vm17132_vm2, %v6684_v55, 0 }
0x199f   :  { %v6691_v8 = vsel %vm17134_vm12, %v6686_v18, 0  ;;  %vm17148_vm12 = vcmask 236544  }
0x19a0   :  { %v6744_v43 = vpop.permute.xlu1 %6743 }
0x19a4   :  { %12006 = vmatmul.mubr.msk.bf16.vlgmr.msra.gmra.mrb[24].mxu0 %vm17126_vm13, %v6522_v47  ;;  %vm17141_vm13 = vmmov %vm17130_vm4 }
0x19a5   :  { %12010 = vmatpush3.bf16.msra.mxu0 %v6580_v28  ;;  %12011 = vmatprep.mubr.msk.bf16.mxu0 %vm16944_vm3, %v16966_v12  ;;  %v6848_v14 = vsel %vm17141_vm13, %v15303_v63, 0  ;;  %vm17155_vm13 = vcmask 228352  }
0x19a6   :  { %12015 = vmatprep.subr.bf16.mxu0 %v16966_v12 }
0x19b0   :  { %12012 = vmatmul.mubr.msk.bf16.vlgmr.msra.gmra.mrb[24].mxu0 %vm17129_vm9, %v15338_v59  ;;  %v6735_v59 = vpop.permute.xlu0 %6734  ;;  %vm17144_vm9 = vmmov %vm17133_vm0 }
0x19b1   :  { %12016 = vmatpush3.bf16.msra.mxu0 %v6638_v19  ;;  %12017 = vmatprep.mubr.msk.bf16.mxu0 %vm16944_vm3, %v16966_v12  ;;  %v6737_v20 = vsel %vm17135_vm14, 0, %v6735_v59  ;;  %vm17149_vm14 = vnez %v16996_v7 }
0x19b2   :  { %12021 = vmatprep.subr.bf16.mxu0 %v16966_v12  ;;  %v6739_v3 = vsel %vm17132_vm2, %v6737_v20, 0  ;;  %vm17146_vm2 = vmmov %vm17133_vm0 }
0x19b3   :  { %v6749_v62 = vsel %vm17137_vm8, %v6739_v3, 0  ;;  %vm17153_vm10 = vmmov %vm17146_vm2 }
0x19b4   :  { %v6843_v56 = vpop.permute.xlu0 %6842 }
0x19b8   :  { %v6945_v63 = vpop.permute.xlu0 %6944 }
0x19b9   :  { %v6947_v37 = vsel %vm17145_vm1, %v6945_v63, 0  ;;  %vm17160_vm1 = vmmov %vm17146_vm2 }
0x19ba   :  { %v6949_v49 = vsel %vm17143_vm5, %v6947_v37, 0 }
0x19bc   :  { %12018 = vmatmul.mubr.msk.bf16.vlgmr.msra.gmra.mrb[24].mxu0 %vm17133_vm0, %v6633_v29  ;;  %vm17147_vm0 = vmmov %vm17130_vm4  ;;  %v7003_v9 = vpop.permute.xlu0 %7002 }
0x19bd   :  { %12022 = vmatpush3.bf16.msra.mxu0 %v6691_v8  ;;  %12023 = vmatprep.mubr.msk.bf16.mxu0 %vm16944_vm3, %v16966_v12  ;;  %v6959_v32 = vsel %vm17147_vm0, %v6949_v49, 0  ;;  %v7005_v47 = vsel %vm17148_vm12, %v7003_v9, 0  ;;  %vm17151_vm8 = vmmov %vm17147_vm0 }
0x19be   :  { %12027 = vmatprep.subr.bf16.mxu0 %v16966_v12  ;;  %v7007_v28 = vsel %vm17149_vm14, %v7005_v47, 0 }
0x19bf   :  { %v7012_v36 = vsel %vm17151_vm8, %v7007_v28, 0 }
0x19c0   :  { %v7065_v18 = vpop.permute.xlu0 %7064 }
0x19c8   :  { %12024 = vmatmul.mubr.msk.bf16.vlgmr.msra.gmra.mrb[24].mxu0 %vm17136_vm15, %v15347_v35  ;;  %v6892_v35 = vpop.permute.xlu1 %6891  ;;  %vm17150_vm15 = vmmov %vm17146_vm2 }
0x19c9   :  { %12028 = vmatpush3.bf16.msra.mxu0 %v6749_v62  ;;  %12029 = vmatprep.mubr.msk.bf16.mxu0 %vm16944_vm3, %v16966_v12  ;;  %v6894_v1 = vsel %vm17142_vm7, %v6892_v35, 0  ;;  %vm17156_vm7 = vnez %v17001_v0 }
0x19ca   :  { %12033 = vmatprep.subr.bf16.mxu0 %v16966_v12  ;;  %v6896_v57 = vsel %vm17143_vm5, %v6894_v1, 0  ;;  %vm17157_vm5 = vmmov %vm17146_vm2 }
0x19cc   :  { %v6954_v13 = vpop.permute.xlu1 %6953 }
0x19d4   :  { %12030 = vmatmul.mubr.msk.bf16.vlgmr.msra.gmra.mrb[24].mxu0 %vm17138_vm6, %v6744_v43  ;;  %vm17152_vm6 = vmmov %vm17148_vm12  ;;  %vm17163_vm12 = vnez %v17003_v33 }
0x19d5   :  { %12034 = vmatpush3.bf16.msra.mxu0 %v6796_v48  ;;  %12035 = vmatprep.mubr.msk.bf16.mxu0 %vm16944_vm3, %v16966_v12 }
0x19d6   :  { %12039 = vmatprep.subr.bf16.mxu0 %v16966_v12 }
0x19e0   :  { %12036 = vmatmul.mubr.msk.bf16.vlgmr.msra.gmra.mrb[24].mxu0 %vm17140_vm11, %v15355_v2  ;;  %v6901_v2 = vsel %vm17130_vm4, %v6896_v57, 0  ;;  %vm17154_vm11 = vmmov %vm17147_vm0 }
0x19e1   :  { %12040 = vmatpush3.bf16.msra.mxu0 %v6848_v14  ;;  %12041 = vmatprep.mubr.msk.bf16.mxu0 %vm16944_vm3, %v16966_v12  ;;  %vm17159_vm4 = vmmov %vm17155_vm13 }
0x19e2   :  { %12045 = vmatprep.subr.bf16.mxu0 %v16966_v12 }
0x19ec   :  { %12042 = vmatmul.mubr.msk.bf16.vlgmr.msra.gmra.mrb[24].mxu0 %vm17144_vm9, %v6843_v56  ;;  %vm17158_vm9 = vmmov %vm17147_vm0 }
0x19ed   :  { %12046 = vmatpush3.bf16.msra.mxu0 %v6901_v2  ;;  %12047 = vmatprep.mubr.msk.bf16.mxu0 %vm16944_vm3, %v16966_v12 }
0x19ee   :  { %12051 = vmatprep.subr.bf16.mxu0 %v16966_v12 }
0x19f8   :  { %12048 = vmatmul.mubr.msk.bf16.vlgmr.msra.gmra.mrb[24].mxu0 %vm17146_vm2, %v15363_v21  ;;  %v7056_v21 = vpop.permute.xlu1 %7055  ;;  %vm17161_vm2 = vmmov %vm17147_vm0  ;;  %vm17162_vm0 = vcmask 220160  }
0x19f9   :  { %12052 = vmatpush3.bf16.msra.mxu0 %v6959_v32  ;;  %12053 = vmatprep.mubr.msk.bf16.mxu0 %vm16944_vm3, %v16966_v12  ;;  %v7058_v24 = vsel %vm17152_vm6, %v7056_v21, 0  ;;  %vm17166_vm8 = vmmov %vm17162_vm0 }
0x19fa   :  { %12057 = vmatprep.subr.bf16.mxu0 %v16966_v12  ;;  %v7060_v10 = vsel %vm17149_vm14, %v7058_v24, 0  ;;  %vm17164_vm14 = vmmov %vm17160_vm1  ;;  %v7347_v24 = vld [vmem:[%s17171_s12] sm:$0xff] }
0x19fb   :  { %v7070_v46 = vsel %vm17154_vm11, %v7060_v10, 0  ;;  %vm17167_vm6 = vmmov %vm17160_vm1 }
0x19fc   :  { %v7114_v19 = vpop.permute.xlu1 %7113  ;;  %vm17169_vm11 = vmmov %vm17160_vm1 }
0x19fd   :  { %v7116_v45 = vsel %vm17155_vm13, %v7114_v19, 0  ;;  %vm17170_vm13 = vcmask 261120   ;;  %v7351_v19 = vld [vmem:[%s17172_s8] sm:$0xff] }
0x19fe   :  { %v7118_v55 = vsel %vm17156_vm7, %v7116_v45, 0 }
0x19ff   :  { %v7123_v7 = vsel %vm17158_vm9, %v7118_v55, 0  ;;  %v12919_v55 = vld [vmem:[%s13318_s19] sm:$0xff]   ;;  %vm17176_vm9 = vnez %v16941_v53 }
0x1a00   :  { %v7176_v62 = vpop.permute.xlu1 %7175  ;;  %12094 = vmatpush3.bf16.msra.mxu1 %v12919_v55 }
0x1a01   :  { %12095 = vmatprep.subr.bf16.mxu1 %v16966_v12 }
0x1a04   :  { %12054 = vmatmul.mubr.msk.bf16.vlgmr.msra.gmra.mrb[24].mxu0 %vm17150_vm15, %v6954_v13  ;;  %vm17165_vm15 = vmmov %vm17161_vm2 }
0x1a05   :  { %12058 = vmatpush3.bf16.msra.mxu0 %v7012_v36  ;;  %12059 = vmatprep.mubr.msk.bf16.mxu0 %vm16944_vm3, %v16966_v12 }
0x1a06   :  { %12063 = vmatprep.subr.bf16.mxu0 %v16966_v12 }
0x1a10   :  { %12060 = vmatmul.mubr.msk.bf16.vlgmr.msra.gmra.mrb[24].mxu0 %vm17153_vm10, %v15374_v61  ;;  %v7167_v61 = vpop.permute.xlu0 %7166  ;;  %vm17168_vm10 = vmmov %vm17161_vm2 }
0x1a11   :  { %12064 = vmatpush3.bf16.msra.mxu0 %v7070_v46  ;;  %12065 = vmatprep.mubr.msk.bf16.mxu0 %vm16944_vm3, %v16966_v12  ;;  %v7169_v29 = vsel %vm17159_vm4, %v7167_v61, 0  ;;  %v12920_v61 = vld [vmem:[%s13318_s19 + $0x8] sm:$0xff]   ;;  %s17236_s19 = sld [smem:[#allocation24_spill]] }
0x1a12   :  { %12069 = vmatprep.subr.bf16.mxu0 %v16966_v12  ;;  %v7171_v8 = vsel %vm17156_vm7, %v7169_v29, 0  ;;  %vm17173_vm7 = vmmov %vm17170_vm13  ;;  %12096 = vmatpush3.bf16.msra.mxu1 %v12920_v61  ;;  %v15556_v29 = vld [vmem:[%s17174_s14] sm:$0xf] }
0x1a13   :  { %v7181_v59 = vsel %vm17161_vm2, %v7171_v8, 0  ;;  %12101 = vmatprep.subr.bf16.mxu1 %v16966_v12  ;;  %v11319_v8 = vcombine.low %v15556_v29, %v15556_v29  ;;  %vm17177_vm4 = vmmov %vm17173_vm7 }
0x1a14   :  { %v7225_v20 = vpop.permute.xlu0 %7224 }
0x1a15   :  { %v7227_v3 = vsel %vm17162_vm0, %v7225_v20, 0 }
0x1a16   :  { %v7229_v43 = vsel %vm17163_vm12, %v7227_v3, 0 }
0x1a17   :  { %v7234_v0 = vsel %vm17165_vm15, %v7229_v43, 0  ;;  %vm17183_vm15 = vnez %v16939_v50 }
0x1a18   :  { %v7287_v1 = vpop.permute.xlu0 %7286 }
0x1a1c   :  { %12066 = vmatmul.mubr.msk.bf16.vlgmr.msra.gmra.mrb[24].mxu0 %vm17157_vm5, %v7065_v18  ;;  %vm17175_vm5 = vcmask 72704  }
0x1a1d   :  { %12070 = vmatpush3.bf16.msra.mxu0 %v7123_v7  ;;  %12071 = vmatprep.mubr.msk.bf16.mxu0 %vm16944_vm3, %v16966_v12  ;;  %v15549_v7 = vpack.c.bf16 %v14681_v27, %v14681_v27 }
0x1a1e   :  { %12075 = vmatprep.subr.bf16.mxu0 %v16966_v12 }
0x1a28   :  { %12072 = vmatmul.mubr.msk.bf16.vlgmr.msra.gmra.mrb[24].mxu0 %vm17160_vm1, %v15383_v25  ;;  %v7278_v25 = vpop.permute.xlu1 %7277  ;;  %vm17178_vm1 = vmmov %vm17161_vm2 }
0x1a29   :  { %12076 = vmatpush3.bf16.msra.mxu0 %v7181_v59  ;;  %12077 = vmatprep.mubr.msk.bf16.mxu0 %vm16944_vm3, %v16966_v12  ;;  %v7280_v48 = vsel %vm17166_vm8, %v7278_v25, 0  ;;  %vm17179_vm2 = vmmov %vm17167_vm6 }
0x1a2a   :  { %12081 = vmatprep.subr.bf16.mxu0 %v16966_v12  ;;  %v7282_v14 = vsel %vm17163_vm12, %v7280_v48, 0  ;;  %vm17180_vm0 = vmmov %vm17179_vm2 }
0x1a2b   :  { %v7292_v35 = vsel %vm17168_vm10, %v7282_v14, 0  ;;  %vm17181_vm12 = vmmov %vm17175_vm5 }
0x1a2c   :  { %vm17184_vm8 = vmmov %vm17180_vm0 }
0x1a2d   :  { %vm17186_vm10 = vmmov %vm17180_vm0 }
0x1a34   :  { %12078 = vmatmul.mubr.msk.bf16.vlgmr.msra.gmra.mrb[24].mxu0 %vm17164_vm14, %v7176_v62  ;;  %vm17182_vm14 = vmmov %vm17178_vm1 }
0x1a35   :  { %12082 = vmatpush3.bf16.msra.mxu0 %v7234_v0  ;;  %12083 = vmatprep.mubr.msk.bf16.mxu0 %vm16944_vm3, %v16966_v12 }
0x1a36   :  { %12087 = vmatprep.subr.bf16.mxu0 %v16966_v12 }
0x1a40   :  { %12084 = vmatmul.mubr.msk.bf16.vlgmr.msra.gmra.mrb[24].mxu0 %vm17167_vm6, %v15398_v39  ;;  %vm17185_vm6 = vmmov %vm17178_vm1 }
0x1a41   :  { %12088 = vmatpush3.bf16.msra.mxu0 %v7292_v35  ;;  %12089 = vmatprep.mubr.msk.bf16.mxu0 %vm16944_vm3, %v16966_v12 }
0x1a4c   :  { %12090 = vmatmul.mubr.msk.bf16.vlgmr.msra.gmra.mrb[24].mxu0 %vm17169_vm11, %v7287_v1  ;;  %vm17187_vm11 = vmmov %vm17180_vm0 }
0x1a4d   :  { %8854 = vmatprep.mubr.bf16.mxu0 %v16937_v26 }
0x1b1f   :  { %v7328_v57 = vpop.f32.mrb[24].mxu0 }
0x1b20   :  { %v7338_v56 = vmul.f32 %v7328_v57, %v7328_v57  ;;  %v12091_v2 = vpop.f32.mrb[25].mxu0  ;;  %v7335_v33 = vsel %vm17170_vm13, %v7328_v57, 0.0  ;;  %vm17188_vm13 = vmmov %vm17178_vm1 }
0x1b21   :  { %7336 = vadd.xlane.f32.xlu1 %v7335_v33  ;;  %v7331_v63 = vpop.f32.mrb[26].mxu0 }
0x1b22   :  { %v12092_v39 = vpop.f32.mrb[27].mxu0  ;;  %v7339_v37 = vsel %vm17173_vm7, %v7338_v56, 0.0  ;;  %vm17189_vm7 = vcmask 56320  }
0x1b23   :  { %7340 = vadd.xlane.f32.xlu0 %v7339_v37  ;;  %v15583_v37 = vld [vmem:[%s17174_s14 + $0x8] sm:$0xf] }
0x1bae   :  { %v7337_v49 = vpop.xlane.xlu1 %7336 }
0x1baf   :  { %v7342_v32 = vmul.f32 0.03125, %v7337_v49  ;;  %v11326_v49 = vcombine.low %v15583_v37, %v15583_v37 }
0x1bb0   :  { %v7341_v9 = vpop.xlane.xlu0 %7340 }
0x1bb1   :  { %v7344_v47 = vmul.f32 %v7342_v32, %v7342_v32  ;;  %v7343_v13 = vmul.f32 0.03125, %v7341_v9 }
0x1bb3   :  { %v7345_v28 = vsub.f32 %v7343_v13, %v7344_v47  ;;  %v15600_v47 = vld [vmem:[%s17174_s14 + $0x10] sm:$0xf] }
0x1bb4   :  { %v11332_v13 = vcombine.low %v15600_v47, %v15600_v47 }
0x1bb5   :  { %v7346_v36 = vmax.f32 %v7345_v28, 0.0  ;;  %v15608_v28 = vld [vmem:[%s17174_s14 + $0x14] sm:$0xf] }
0x1bb7   :  { %v7348_v21 = vadd.f32 1e-05, %v7346_v36  ;;  %v11335_v36 = vcombine.low %v15608_v28, %v15608_v28 }
0x1bb9   :  { %12992 = vrsqrt.f32 %v7348_v21  ;;  %v15619_v21 = vld [vmem:[%s17174_s14 + $0x18] sm:$0xf] }
0x1bc3   :  { %v12993_v10 = vpop.eup %12992 }
0x1bc4   :  { %v7350_v46 = vmul.f32 %v12993_v10, %v7347_v24  ;;  %v11338_v24 = vcombine.low %v15619_v21, %v15619_v21  ;;  %v15628_v10 = vld [vmem:[%s17174_s14 + $0x1c] sm:$0xf] }
0x1bc6   :  { %7356 = vperm.xlu0 %12840, %v7350_v46   ;;  %v7352_v45 = vmul.f32 %v7350_v46, %v7342_v32  ;;  %v15592_v32 = vld [vmem:[%s17174_s14 + $0xc] sm:$0xf]  ;;  %v11341_v46 = vcombine.low %v15628_v10, %v15628_v10 }
0x1bc7   :  { %v11329_v9 = vcombine.low %v15592_v32, %v15592_v32 }
0x1bc8   :  { %v7353_v18 = vsub.f32 %v7351_v19, %v7352_v45  ;;  %v15643_v19 = vld [vmem:[%s17174_s14 + $0x20] sm:$0xf] }
0x1bc9   :  { %v11344_v45 = vcombine.low %v15643_v19, %v15643_v19 }
0x1bca   :  { %7362 = vperm.xlu1 %12841, %v7353_v18   ;;  %7455 = vrot.lane.b32.xlu0 %v11319_v8, %s13104_s29 }
0x1bce   :  { %7446 = vrot.lane.b32.xlu1 %v15549_v7, %s13099_s9 }
0x1c45   :  { %v7357_v59 = vpop.permute.xlu0 %7356 }
0x1c46   :  { %v7359_v20 = vmul.f32 %v7357_v59, %v7328_v57  ;;  %v7428_v57 = vld [vmem:[%s17174_s14 + $0x4] sm:$0xf] }
0x1c47   :  { %v11323_v39 = vcombine.low %v7428_v57, %v7428_v57 }
0x1c49   :  { %v7363_v3 = vpop.permute.xlu1 %7362  ;;  %v7456_v35 = vpop.permute.xlu0 %7455 }
0x1c4a   :  { %v7365_v27 = vadd.f32 %v7363_v3, %v7359_v20 }
0x1c4c   :  { %v7366_v62 = vmax.f32 %v7365_v27, 0.0 }
0x1c4d   :  { %v7447_v43 = vpop.permute.xlu1 %7446 }
0x1c4e   :  { %v7367_v0 = vpack.c.bf16 %v7366_v62, %v7366_v62  ;;  %v7449_v25 = vsel %vm17175_vm5, 0, %v7447_v43  ;;  %vm17190_vm5 = vnez %v16946_v30 }
0x1c4f   :  { %v7451_v48 = vsel %vm17176_vm9, %v7449_v25, 0 }
0x1c50   :  { %12098 = vmatmul.mubr.msk.bf16.vlgmr.msra.gmra.mrb[36].mxu1 %vm17177_vm4, %v7367_v0  ;;  %v7461_v14 = vsel %vm17178_vm1, %v7451_v48, 0  ;;  %vm17192_vm4 = vmmov %vm17178_vm1 }
0x1c51   :  { %12102 = vmatpush3.bf16.msra.mxu1 %v7461_v14  ;;  %12103 = vmatprep.mubr.msk.bf16.mxu1 %vm16944_vm3, %v16966_v12  ;;  %vm17193_vm1 = vmmov %vm17189_vm7 }
0x1c52   :  { %12107 = vmatprep.subr.bf16.mxu1 %v16966_v12 }
0x1c58   :  { %12104 = vmatmul.mubr.msk.bf16.vlgmr.msra.gmra.mrb[40].mxu1 %vm17179_vm2, %v7456_v35  ;;  %vm17194_vm2 = vmmov %vm17180_vm0 }
0x1c59   :  { %12109 = vmatprep.mubr.msk.bf16.mxu1 %vm16944_vm3, %v16966_v12 }
0x1d23   :  { %v7421_v1 = vpop.f32.mrb[36].mxu1 }
0x1d24   :  { %v15573_v56 = vpack.c.bf16 %v7421_v1, %v7421_v1  ;;  %v12099_v2 = vpop.f32.mrb[37].mxu1 }
0x1d25   :  { %v7424_v33 = vpop.f32.mrb[38].mxu1 }
0x1d26   :  { %7549 = vrot.lane.b32.xlu0 %v15573_v56, %s13100_s13  ;;  %7439 = vrot.lane.b32.xlu1 %v15573_v56, %s13099_s9  ;;  %v12100_v63 = vpop.f32.mrb[39].mxu1  ;;  %s17237_s9 = sld [smem:[#allocation25_spill]] }
0x1d2a   :  { %7611 = vrot.lane.b32.xlu0 %v11323_v39, %s13104_s29  ;;  %7602 = vrot.lane.b32.xlu1 %v15549_v7, %s13100_s13  ;;  %s17238_s13 = sld [smem:[#allocation26_spill]] }
0x1d2e   :  { %7713 = vrot.lane.b32.xlu0 %v15549_v7, %s13101_s17  ;;  %7660 = vrot.lane.b32.xlu1 %v15573_v56, %s13101_s17 }
0x1d32   :  { %7771 = vrot.lane.b32.xlu0 %v15573_v56, %s13092_s18  ;;  %7722 = vrot.lane.b32.xlu1 %v11326_v49, %s13104_s29 }
0x1d36   :  { %7833 = vrot.lane.b32.xlu0 %v11329_v9, %s13104_s29  ;;  %7824 = vrot.lane.b32.xlu1 %v15549_v7, %s13092_s18 }
0x1d3a   :  { %7981 = vrot.lane.b32.xlu0 %v15573_v56, %s13093_s22  ;;  %7932 = vrot.lane.b32.xlu1 %v11332_v13, %s13104_s29 }
0x1d3e   :  { %8043 = vrot.lane.b32.xlu0 %v11335_v36, %s13104_s29  ;;  %8034 = vrot.lane.b32.xlu1 %v15549_v7, %s13093_s22 }
0x1d42   :  { %8145 = vrot.lane.b32.xlu0 %v15549_v7, %s13102_s21  ;;  %8092 = vrot.lane.b32.xlu1 %v15573_v56, %s13102_s21 }
0x1d46   :  { %8203 = vrot.lane.b32.xlu0 %v15573_v56, %s13104_s29  ;;  %8154 = vrot.lane.b32.xlu1 %v11338_v24, %s13104_s29 }
0x1d4a   :  { %8265 = vrot.lane.b32.xlu0 %v11341_v46, %s13104_s29  ;;  %8256 = vrot.lane.b32.xlu1 %v15549_v7, %s13104_s29 }
0x1d4e   :  { %8367 = vrot.lane.b32.xlu0 %v15549_v7, %s13103_s25  ;;  %8314 = vrot.lane.b32.xlu1 %v15573_v56, %s13103_s25 }
0x1d52   :  { %8376 = vrot.lane.b32.xlu1 %v11344_v45, %s13104_s29 }
0x1d98   :  { %v7550_v55 = vpop.permute.xlu0 %7549  ;;  %v7440_v18 = vpop.permute.xlu1 %7439 }
0x1d99   :  { %v7552_v61 = vsel %vm17180_vm0, 0, %v7550_v55  ;;  %v7442_v8 = vsel %vm17181_vm12, 0, %v7440_v18  ;;  %vm17196_vm12 = vcmask 7168  }
0x1d9a   :  { %v7444_v59 = vsel %vm17176_vm9, %v7442_v8, 0  ;;  %v7554_v3 = vsel %vm17183_vm15, %v7552_v61, 0  ;;  %vm17191_vm9 = vmmov %vm17180_vm0 }
0x1d9b   :  { %v7507_v20 = vsel %vm17182_vm14, %v7444_v59, 0  ;;  %v7559_v27 = vsel %vm17185_vm6, %v7554_v3, 0  ;;  %vm17195_vm0 = vmmov %vm17192_vm4  ;;  %vm17197_vm14 = vnez %v16949_v17 }
0x1d9c   :  { %12108 = vmatpush3.bf16.msra.mxu1 %v7507_v20  ;;  %v7603_v53 = vpop.permute.xlu1 %7602  ;;  %v7612_v48 = vpop.permute.xlu0 %7611  ;;  %vm17200_vm6 = vmmov %vm17196_vm12 }
0x1d9d   :  { %12113 = vmatprep.subr.bf16.mxu1 %v16966_v12  ;;  %v7605_v62 = vsel %vm17186_vm10, 0, %v7603_v53  ;;  %vm17201_vm10 = vmmov %vm17195_vm0 }
0x1d9e   :  { %v7607_v43 = vsel %vm17183_vm15, %v7605_v62, 0  ;;  %vm17198_vm15 = vmmov %vm17195_vm0 }
0x1d9f   :  { %12110 = vmatmul.mubr.msk.bf16.vlgmr.msra.gmra.mrb[40].mxu1 %vm17184_vm8, %v15556_v29  ;;  %v7617_v0 = vsel %vm17188_vm13, %v7607_v43, 0  ;;  %vm17199_vm8 = vmmov %vm17194_vm2 }
0x1da0   :  { %12114 = vmatpush3.bf16.msra.mxu1 %v7559_v27  ;;  %12115 = vmatprep.mubr.msk.bf16.mxu1 %vm16944_vm3, %v16966_v12  ;;  %v7661_v29 = vpop.permute.xlu1 %7660  ;;  %v7714_v35 = vpop.permute.xlu0 %7713  ;;  %vm17203_vm13 = vmmov %vm17194_vm2 }
0x1da1   :  { %12119 = vmatprep.subr.bf16.mxu1 %v16966_v12  ;;  %v7663_v25 = vsel %vm17189_vm7, 0, %v7661_v29  ;;  %v7716_v1 = vsel %vm17193_vm1, 0, %v7714_v35  ;;  %vm17204_vm7 = vmmov %vm17195_vm0  ;;  %vm17208_vm1 = vnez %v16955_v4 }
0x1da2   :  { %v7665_v14 = vsel %vm17190_vm5, %v7663_v25, 0  ;;  %v7886_v46 = vsel %vm17204_vm7, %v15573_v56, 0 }
0x1da3   :  { %v7670_v50 = vsel %vm17192_vm4, %v7665_v14, 0  ;;  %vm17207_vm4 = vcmask 1039360  }
0x1da4   :  { %v7772_v33 = vpop.permute.xlu0 %7771  ;;  %v7723_v49 = vpop.permute.xlu1 %7722 }
0x1da5   :  { %v7774_v63 = vsel %vm17196_vm12, 0, %v7772_v33  ;;  %vm17211_vm12 = vmmov %vm17207_vm4 }
0x1da6   :  { %v7776_v39 = vsel %vm17197_vm14, %v7774_v63, 0 }
0x1da7   :  { %v7781_v30 = vsel %vm17198_vm15, %v7776_v39, 0 }
0x1da8   :  { %v7834_v24 = vpop.permute.xlu0 %7833 }
0x1dab   :  { %12116 = vmatmul.mubr.msk.bf16.vlgmr.msra.gmra.mrb[40].mxu1 %vm17187_vm11, %v7428_v57  ;;  %v7718_v57 = vsel %vm17190_vm5, %v7716_v1, 0  ;;  %vm17202_vm11 = vmmov %vm17194_vm2 }
0x1dac   :  { %12120 = vmatpush3.bf16.msra.mxu1 %v7617_v0  ;;  %12121 = vmatprep.mubr.msk.bf16.mxu1 %vm16944_vm3, %v16966_v12  ;;  %v7728_v2 = vsel %vm17195_vm0, %v7718_v57, 0  ;;  %vm17205_vm5 = vmmov %vm17194_vm2 }
0x1dad   :  { %12125 = vmatprep.subr.bf16.mxu1 %v16966_v12 }
0x1db7   :  { %12122 = vmatmul.mubr.msk.bf16.vlgmr.msra.gmra.mrb[40].mxu1 %vm17191_vm9, %v7612_v48  ;;  %vm17206_vm9 = vmmov %vm17195_vm0 }
0x1db8   :  { %12126 = vmatpush3.bf16.msra.mxu1 %v7670_v50  ;;  %12127 = vmatprep.mubr.msk.bf16.mxu1 %vm16944_vm3, %v16966_v12  ;;  %v7938_v17 = vsel %vm17206_vm9, %v15549_v7, 0  ;;  %vm17221_vm9 = vcmask 982016  }
0x1db9   :  { %12131 = vmatprep.subr.bf16.mxu1 %v16966_v12 }
0x1dc3   :  { %12128 = vmatmul.mubr.msk.bf16.vlgmr.msra.gmra.mrb[40].mxu1 %vm17194_vm2, %v15583_v37  ;;  %v7825_v37 = vpop.permute.xlu1 %7824  ;;  %vm17209_vm2 = vmmov %vm17195_vm0 }
0x1dc4   :  { %12132 = vmatpush3.bf16.msra.mxu1 %v7728_v2  ;;  %12133 = vmatprep.mubr.msk.bf16.mxu1 %vm16944_vm3, %v16966_v12  ;;  %v7827_v9 = vsel %vm17200_vm6, 0, %v7825_v37  ;;  %vm17210_vm0 = vmmov %vm17205_vm5  ;;  %vm17215_vm6 = vnez %v16959_v31 }
0x1dc5   :  { %12137 = vmatprep.subr.bf16.mxu1 %v16966_v12  ;;  %v7829_v13 = vsel %vm17197_vm14, %v7827_v9, 0  ;;  %vm17212_vm14 = vmmov %vm17209_vm2 }
0x1dc6   :  { %v7839_v36 = vsel %vm17201_vm10, %v7829_v13, 0  ;;  %vm17213_vm15 = vmmov %vm17210_vm0  ;;  %v12930_v13 = vld [vmem:[%s13323_s4] ss:$16 sps:$4 sm:$0xff]  }
0x1dc7   :  { %v7933_v55 = vpop.permute.xlu1 %7932  ;;  %vm17216_vm10 = vmmov %vm17209_vm2 }
0x1dc8   :  { %vm17219_vm7 = vmmov %vm17209_vm2 }
0x1dcb   :  { %v8035_v7 = vpop.permute.xlu1 %8034 }
0x1dcf   :  { %12134 = vmatmul.mubr.msk.bf16.vlgmr.msra.gmra.mrb[40].mxu1 %vm17199_vm8, %v7723_v49  ;;  %v8093_v59 = vpop.permute.xlu1 %8092  ;;  %vm17214_vm8 = vcmask 990208  }
0x1dd0   :  { %12138 = vmatpush3.bf16.msra.mxu1 %v7781_v30  ;;  %12139 = vmatprep.mubr.msk.bf16.mxu1 %vm16944_vm3, %v16966_v12  ;;  %v8095_v20 = vsel %vm17214_vm8, %v8093_v59, 0 }
0x1dd1   :  { %12143 = vmatprep.subr.bf16.mxu1 %v16966_v12  ;;  %v8097_v27 = vsel %vm17215_vm6, %v8095_v20, 0 }
0x1dd2   :  { %v8102_v4 = vsel %vm17216_vm10, %v8097_v27, 0 }
0x1dd3   :  { %v8155_v48 = vpop.permute.xlu1 %8154 }
0x1ddb   :  { %12140 = vmatmul.mubr.msk.bf16.vlgmr.msra.gmra.mrb[40].mxu1 %vm17202_vm11, %v15592_v32  ;;  %v7982_v32 = vpop.permute.xlu0 %7981  ;;  %vm17217_vm11 = vmmov %vm17210_vm0 }
0x1ddc   :  { %12144 = vmatpush3.bf16.msra.mxu1 %v7839_v36  ;;  %12145 = vmatprep.mubr.msk.bf16.mxu1 %vm16944_vm3, %v16966_v12  ;;  %v7984_v56 = vsel %vm17207_vm4, %v7982_v32, 0  ;;  %vm17222_vm4 = vnez %v16962_v6  ;;  %v12932_v36 = vld [vmem:[%s13323_s4 + $0x4] ss:$16 sps:$4 sm:$0xff]   ;;  %v12936_v32 = vld [vmem:[%s13323_s4 + $0x40] ss:$16 sps:$4 sm:$0xff]  }
0x1ddd   :  { %12149 = vmatprep.subr.bf16.mxu1 %v16966_v12  ;;  %v7986_v45 = vsel %vm17208_vm1, %v7984_v56, 0  ;;  %v12941_v56 = vld [vmem:[%s13323_s4 + $0x64] ss:$16 sps:$4 sm:$0xff]  }
0x1dde   :  { %v7991_v18 = vsel %vm17209_vm2, %v7986_v45, 0  ;;  %v12939_v45 = vld [vmem:[%s13323_s4 + $0x60] ss:$16 sps:$4 sm:$0xff]  }
0x1ddf   :  { %v8044_v3 = vpop.permute.xlu0 %8043 }
0x1de7   :  { %12146 = vmatmul.mubr.msk.bf16.vlgmr.msra.gmra.mrb[40].mxu1 %vm17203_vm13, %v7834_v24  ;;  %vm17218_vm13 = vmmov %vm17214_vm8  ;;  %vm17229_vm8 = vnez %v16964_v15  ;;  %v12935_v24 = vld [vmem:[%s13323_s4 + $0x24] ss:$16 sps:$4 sm:$0xff]  }
0x1de8   :  { %12150 = vmatpush3.bf16.msra.mxu1 %v7886_v46  ;;  %12151 = vmatprep.mubr.msk.bf16.mxu1 %vm16944_vm3, %v16966_v12  ;;  %v12933_v46 = vld [vmem:[%s13323_s4 + $0x20] ss:$16 sps:$4 sm:$0xff]  }
0x1de9   :  { %12155 = vmatprep.subr.bf16.mxu1 %v16966_v12 }
0x1df3   :  { %12152 = vmatmul.mubr.msk.bf16.vlgmr.msra.gmra.mrb[40].mxu1 %vm17205_vm5, %v15600_v47  ;;  %v8037_v47 = vsel %vm17211_vm12, %v8035_v7, 0  ;;  %vm17220_vm5 = vmmov %vm17210_vm0  ;;  %v12947_v7 = vld [vmem:[%s13323_s4 + $0xa4] ss:$16 sps:$4 sm:$0xff]  }
0x1df4   :  { %12156 = vmatpush3.bf16.msra.mxu1 %v7938_v17  ;;  %12157 = vmatprep.mubr.msk.bf16.mxu1 %vm16944_vm3, %v16966_v12  ;;  %v8039_v61 = vsel %vm17208_vm1, %v8037_v47, 0  ;;  %vm17223_vm1 = vmmov %vm17209_vm2  ;;  %v12938_v17 = vld [vmem:[%s13323_s4 + $0x44] ss:$16 sps:$4 sm:$0xff]   ;;  %v12945_v47 = vld [vmem:[%s13323_s4 + $0xa0] ss:$16 sps:$4 sm:$0xff]  }
0x1df5   :  { %12161 = vmatprep.subr.bf16.mxu1 %v16966_v12  ;;  %v8049_v8 = vsel %vm17212_vm14, %v8039_v61, 0  ;;  %vm17224_vm2 = vmmov %vm17210_vm0 }
0x1df6   :  { %vm17226_vm12 = vmmov %vm17223_vm1 }
0x1df7   :  { %vm17227_vm14 = vmmov %vm17224_vm2 }
0x1df8   :  { %vm17231_vm10 = vmmov %vm17224_vm2 }
0x1dff   :  { %12158 = vmatmul.mubr.msk.bf16.vlgmr.msra.gmra.mrb[40].mxu1 %vm17210_vm0, %v7933_v55  ;;  %vm17225_vm0 = vmmov %vm17221_vm9  ;;  %v12944_v55 = vld [vmem:[%s13323_s4 + $0x84] ss:$16 sps:$4 sm:$0xff]  }
0x1e00   :  { %12162 = vmatpush3.bf16.msra.mxu1 %v7991_v18  ;;  %12163 = vmatprep.mubr.msk.bf16.mxu1 %vm16944_vm3, %v16966_v12  ;;  %v12942_v18 = vld [vmem:[%s13323_s4 + $0x80] ss:$16 sps:$4 sm:$0xff]  }
0x1e01   :  { %12167 = vmatprep.subr.bf16.mxu1 %v16966_v12 }
0x1e0b   :  { %12164 = vmatmul.mubr.msk.bf16.vlgmr.msra.gmra.mrb[40].mxu1 %vm17213_vm15, %v15608_v28  ;;  %v8146_v28 = vpop.permute.xlu0 %8145  ;;  %vm17228_vm15 = vcmask 973824  }
0x1e0c   :  { %12168 = vmatpush3.bf16.msra.mxu1 %v8049_v8  ;;  %12169 = vmatprep.mubr.msk.bf16.mxu1 %vm16944_vm3, %v16966_v12  ;;  %v8148_v53 = vsel %vm17218_vm13, %v8146_v28, 0  ;;  %vm17233_vm13 = vmmov %vm17223_vm1 }
0x1e0d   :  { %12173 = vmatprep.subr.bf16.mxu1 %v16966_v12  ;;  %v8150_v62 = vsel %vm17215_vm6, %v8148_v53, 0  ;;  %vm17230_vm6 = vmmov %vm17223_vm1  ;;  %v13113_v53 = vmov 1983009808  }
0x1e0e   :  { %v8160_v43 = vsel %vm17219_vm7, %v8150_v62, 0  ;;  %vm17234_vm7 = vmmov %vm17224_vm2  ;;  %v8799_v62 = vunpack.c.l.s4 %v13113_v53  ;;  %v12969_v53 = vld [vmem:[%s13323_s4 + $0xa8] ss:$16 sps:$4 sm:$0xff]  }
0x1e0f   :  { %v8204_v0 = vpop.permute.xlu0 %8203 }
0x1e10   :  { %v8206_v29 = vsel %vm17221_vm9, %v8204_v0, 0  ;;  %v8800_v0 = vunpack.c.0.s8 %v8799_v62  ;;  %vm17240_vm9 = vnez %v16650_v23  ;;  %v12974_v62 = vld [vmem:[%s13323_s4 + $0xcc] ss:$16 sps:$4 sm:$0xff]  }
0x1e11   :  { %v8208_v25 = vsel %vm17222_vm4, %v8206_v29, 0 }
0x1e12   :  { %v8213_v31 = vsel %vm17223_vm1, %v8208_v25, 0  ;;  %vm17242_vm1 = vnez %v16640_v60  ;;  %v16032_v60 = vld [vmem:[%s17238_s13 + $0xe] sm:$0x3] }
0x1e13   :  { %v8266_v2 = vpop.permute.xlu0 %8265 }
0x1e17   :  { %12170 = vmatmul.mubr.msk.bf16.vlgmr.msra.gmra.mrb[40].mxu1 %vm17217_vm11, %v8044_v3  ;;  %vm17232_vm11 = vmmov %vm17228_vm15 }
0x1e18   :  { %12174 = vmatpush3.bf16.msra.mxu1 %v8102_v4  ;;  %12175 = vmatprep.mubr.msk.bf16.mxu1 %vm16944_vm3, %v16966_v12 }
0x1e19   :  { %12179 = vmatprep.subr.bf16.mxu1 %v16966_v12 }
0x1e23   :  { %12176 = vmatmul.mubr.msk.bf16.vlgmr.msra.gmra.mrb[40].mxu1 %vm17220_vm5, %v15619_v21  ;;  %v8257_v21 = vpop.permute.xlu1 %8256  ;;  %vm17235_vm5 = vmmov %vm17224_vm2 }
0x1e24   :  { %12180 = vmatpush3.bf16.msra.mxu1 %v8160_v43  ;;  %12181 = vmatprep.mubr.msk.bf16.mxu1 %vm16944_vm3, %v16966_v12  ;;  %v8259_v14 = vsel %vm17225_vm0, %v8257_v21, 0  ;;  %v8435_v43 = vld [vmem:[%s17236_s19] sm:$0xff]  ;;  %v15806_v21 = vsub.s32 %v8800_v0, %v13413_v11  ;;  %v12977_v0 = vld [vmem:[%s13323_s4 + $0xec] ss:$16 sps:$4 sm:$0xff]  }
0x1e25   :  { %12185 = vmatprep.subr.bf16.mxu1 %v16966_v12  ;;  %v8261_v50 = vsel %vm17222_vm4, %v8259_v14, 0  ;;  %v12948_v14 = vld [vmem:[%s13323_s4 + $0xc0] ss:$16 sps:$4 sm:$0xff]  }
0x1e26   :  { %v8271_v35 = vsel %vm17226_vm12, %v8261_v50, 0  ;;  %v12950_v50 = vld [vmem:[%s13323_s4 + $0xc4] ss:$16 sps:$4 sm:$0xff]  }
0x1e27   :  { %v8315_v1 = vpop.permute.xlu1 %8314 }
0x1e28   :  { %v8317_v57 = vsel %vm17228_vm15, %v8315_v1, 0  ;;  %v15815_v1 = vpack.c.bf16 %v14421_v22, %v14421_v22  ;;  %v12956_v22 = vld [vmem:[%s13323_s4 + $0xc] ss:$16 sps:$4 sm:$0xff]   ;;  %vm17247_vm15 = vnez %v16662_v58 }
0x1e29   :  { %v8319_v33 = vsel %vm17229_vm8, %v8317_v57, 0 }
0x1e2a   :  { %v8324_v6 = vsel %vm17230_vm6, %v8319_v33, 0  ;;  %v12951_v33 = vld [vmem:[%s13323_s4 + $0xe0] ss:$16 sps:$4 sm:$0xff]  }
0x1e2b   :  { %v8377_v30 = vpop.permute.xlu1 %8376 }
0x1e2f   :  { %12182 = vmatmul.mubr.msk.bf16.vlgmr.msra.gmra.mrb[40].mxu1 %vm17224_vm2, %v8155_v48  ;;  %v8439_v48 = vld [vmem:[%s17237_s9] sm:$0xff]  ;;  %vm17243_vm2 = vmmov %vm17230_vm6 }
0x1e30   :  { %12186 = vmatpush3.bf16.msra.mxu1 %v8213_v31  ;;  %12187 = vmatprep.mubr.msk.bf16.mxu1 %vm16944_vm3, %v16966_v12  ;;  %vm17244_vm0 = vmmov %vm17243_vm2 }
0x1e31   :  { %12191 = vmatprep.subr.bf16.mxu1 %v16966_v12  ;;  %vm17249_vm6 = vmmov %vm17244_vm0 }
0x1e3b   :  { %12188 = vmatmul.mubr.msk.bf16.vlgmr.msra.gmra.mrb[40].mxu1 %vm17227_vm14, %v15628_v10  ;;  %v8368_v10 = vpop.permute.xlu0 %8367 }
0x1e3c   :  { %12192 = vmatpush3.bf16.msra.mxu1 %v8271_v35  ;;  %12193 = vmatprep.mubr.msk.bf16.mxu1 %vm16944_vm3, %v16966_v12  ;;  %v8370_v63 = vsel %vm17232_vm11, %v8368_v10, 0  ;;  %v15811_v35 = vld [vmem:[%s17238_s13] sm:$0x3]  ;;  %v15833_v10 = vpack.c.bf16 %v14411_v40, %v14411_v40  ;;  %vm17251_vm11 = vmmov %vm17244_vm0 }
0x1e3d   :  { %12197 = vmatprep.subr.bf16.mxu1 %v16966_v12  ;;  %v8372_v39 = vsel %vm17229_vm8, %v8370_v63, 0  ;;  %v8804_v11 = vrot.slane %v15811_v35, %v15806_v21  ;;  %v15837_v63 = vpack.c.bf16 %v14431_v16, %v14431_v16  ;;  %vm17248_vm8 = vnez %v16652_v34 }
0x1e3e   :  { %v8382_v49 = vsel %vm17233_vm13, %v8372_v39, 0  ;;  %vm17252_vm13 = vmmov %vm17235_vm5 }
0x1e47   :  { %12194 = vmatmul.mubr.msk.bf16.vlgmr.msra.gmra.mrb[40].mxu1 %vm17231_vm10, %v8266_v2  ;;  %v12953_v2 = vld [vmem:[%s13323_s4 + $0xe4] ss:$16 sps:$4 sm:$0xff]   ;;  %vm17250_vm10 = vmmov %vm17235_vm5 }
0x1e48   :  { %12198 = vmatpush3.bf16.msra.mxu1 %v8324_v6  ;;  %12199 = vmatprep.mubr.msk.bf16.mxu1 %vm16944_vm3, %v16966_v12  ;;  %v15825_v6 = vpack.c.bf16 %v14409_v51, %v14409_v51 }
0x1e49   :  { %12203 = vmatprep.subr.bf16.mxu1 %v16966_v12 }
0x1e53   :  { %12200 = vmatmul.mubr.msk.bf16.vlgmr.msra.gmra.mrb[40].mxu1 %vm17234_vm7, %v15643_v19 }
0x1e54   :  { %12204 = vmatpush3.bf16.msra.mxu1 %v8382_v49  ;;  %12205 = vmatprep.mubr.msk.bf16.mxu1 %vm16944_vm3, %v16966_v12  ;;  %vm17239_vm3 = vcmask 138240  }
0x1e55   :  { %8648 = vmatprep.subr.bf16.mxu1 %v12932_v36  ;;  %vm17241_vm4 = vmmov %vm17239_vm3 }
0x1e56   :  { %vm17245_vm12 = vmmov %vm17239_vm3 }
0x1e57   :  { %vm17246_vm14 = vmmov %vm17239_vm3 }
0x1e58   :  { %vm17253_vm7 = vmmov %vm17239_vm3 }
0x1e5f   :  { %12206 = vmatmul.mubr.msk.bf16.vlgmr.msra.gmra.mrb[40].mxu1 %vm17235_vm5, %v8377_v30  ;;  %vm17254_vm5 = vmmov %vm17239_vm3 }
0x1e60   :  { %8680 = vmatprep.mubr.bf16.mxu1 %v16937_v26  ;;  %8649 = vmatpush1.bf16.msra.mxu1 %v12930_v13  ;;  %v12954_v13 = vld [vmem:[%s13323_s4 + $0x8] ss:$16 sps:$4 sm:$0xff]  }
0x1e61   :  { %8650 = vmatprep.subr.bf16.mxu1 %v12935_v24 }
0x1e64   :  { %8651 = vmatpush1.bf16.msra.mxu1 %v12933_v46  ;;  %v12959_v46 = vld [vmem:[%s13323_s4 + $0x2c] ss:$16 sps:$4 sm:$0xff]  }
0x1e65   :  { %8652 = vmatprep.subr.bf16.mxu1 %v12938_v17 }
0x1e68   :  { %8653 = vmatpush1.bf16.msra.mxu1 %v12936_v32 }
0x1e69   :  { %8654 = vmatprep.subr.bf16.mxu1 %v12941_v56 }
0x1e6c   :  { %8655 = vmatpush1.bf16.msra.mxu1 %v12939_v45  ;;  %v12957_v45 = vld [vmem:[%s13323_s4 + $0x28] ss:$16 sps:$4 sm:$0xff]  }
0x1e6d   :  { %8656 = vmatprep.subr.bf16.mxu1 %v12944_v55 }
0x1e70   :  { %8657 = vmatpush1.bf16.msra.mxu1 %v12942_v18 }
0x1e71   :  { %8658 = vmatprep.subr.bf16.mxu1 %v12947_v7  ;;  %v12962_v7 = vld [vmem:[%s13323_s4 + $0x4c] ss:$16 sps:$4 sm:$0xff]  }
0x1e74   :  { %8659 = vmatpush1.bf16.msra.mxu1 %v12945_v47 }
0x1e75   :  { %8660 = vmatprep.subr.bf16.mxu1 %v12950_v50 }
0x1e78   :  { %8661 = vmatpush1.bf16.msra.mxu1 %v12948_v14 }
0x1e79   :  { %8662 = vmatprep.subr.bf16.mxu1 %v12953_v2 }
0x1e7c   :  { %8663 = vmatpush1.bf16.msra.mxu1 %v12951_v33 }
0x1e7d   :  { %8689 = vmatprep.subr.bf16.mxu1 %v12956_v22 }
0x1f32   :  { %v15786_v15 = vpop.f32.mrb[40].mxu1 }
0x1f33   :  { %v8427_v37 = vmul.f32 %v15786_v15, %v15786_v15  ;;  %8425 = vadd.xlane.f32.xlu0 %v15786_v15  ;;  %v12207_v19 = vpop.f32.mrb[41].mxu1 }
0x1f34   :  { %v8421_v9 = vpop.f32.mrb[42].mxu1 }
0x1f35   :  { %8428 = vadd.xlane.f32.xlu1 %v8427_v37  ;;  %v12208_v12 = vpop.f32.mrb[43].mxu1 }
0x1fc0   :  { %v8426_v61 = vpop.xlane.xlu0 %8425 }
0x1fc1   :  { %v8430_v8 = vmul.f32 0.0078125, %v8426_v61 }
0x1fc2   :  { %v8429_v59 = vpop.xlane.xlu1 %8428 }
0x1fc3   :  { %v8432_v20 = vmul.f32 %v8430_v8, %v8430_v8  ;;  %v8431_v3 = vmul.f32 0.0078125, %v8429_v59  ;;  %v12960_v59 = vld [vmem:[%s13323_s4 + $0x48] ss:$16 sps:$4 sm:$0xff]  }
0x1fc5   :  { %v8433_v27 = vsub.f32 %v8431_v3, %v8432_v20  ;;  %v12965_v20 = vld [vmem:[%s13323_s4 + $0x6c] ss:$16 sps:$4 sm:$0xff]   ;;  %v12963_v3 = vld [vmem:[%s13323_s4 + $0x68] ss:$16 sps:$4 sm:$0xff]  }
0x1fc7   :  { %v8434_v4 = vmax.f32 %v8433_v27, 0.0  ;;  %v12968_v27 = vld [vmem:[%s13323_s4 + $0x8c] ss:$16 sps:$4 sm:$0xff]  }
0x1fc9   :  { %v8436_v28 = vadd.f32 1e-05, %v8434_v4  ;;  %v12966_v4 = vld [vmem:[%s13323_s4 + $0x88] ss:$16 sps:$4 sm:$0xff]  }
0x1fcb   :  { %12994 = vrsqrt.f32 %v8436_v28  ;;  %v12971_v28 = vld [vmem:[%s13323_s4 + $0xac] ss:$16 sps:$4 sm:$0xff]  }
0x1fd5   :  { %v12995_v29 = vpop.eup %12994 }
0x1fd6   :  { %v8438_v25 = vmul.f32 %v12995_v29, %v8435_v43  ;;  %v12972_v43 = vld [vmem:[%s13323_s4 + $0xc8] ss:$16 sps:$4 sm:$0xff]  }
0x1fd7   :  { %v12975_v29 = vld [vmem:[%s13323_s4 + $0xe8] ss:$16 sps:$4 sm:$0xff]   ;;  %s17467_s4 = sld [smem:[#allocation27_spill]] }
0x1fd8   :  { %8444 = vperm.xlu0 %12840, %v8438_v25   ;;  %v8440_v31 = vmul.f32 %v8438_v25, %v8430_v8 }
0x1fda   :  { %v8441_v57 = vsub.f32 %v8439_v48, %v8440_v31 }
0x1fdc   :  { %8776 = vrot.lane.b32.xlu0 %v15815_v1, %s13090_s5  ;;  %8450 = vperm.xlu1 %12841, %v8441_v57  }
0x1fe0   :  { %8805 = vrot.lane.b32.xlu0 %v8804_v11, %s13104_s29  ;;  %8778 = vrot.lane.b32.xlu1 %v15825_v6, %s13090_s5 }
0x1fe4   :  { %8782 = vrot.lane.b32.xlu0 %v15837_v63, %s13090_s5  ;;  %8780 = vrot.lane.b32.xlu1 %v15833_v10, %s13090_s5 }
0x2057   :  { %v8445_v51 = vpop.permute.xlu0 %8444 }
0x2058   :  { %v8447_v39 = vmul.f32 %v8445_v51, %v15786_v15 }
0x205b   :  { %v8777_v49 = vpop.permute.xlu0 %8776  ;;  %v8451_v30 = vpop.permute.xlu1 %8450 }
0x205c   :  { %v8791_v40 = vsel %vm17239_vm3, 0, %v8777_v49  ;;  %v8453_v37 = vadd.f32 %v8451_v30, %v8447_v39  ;;  %vm17255_vm3 = vmmov %vm17244_vm0 }
0x205d   :  { %v8793_v16 = vsel %vm17240_vm9, %v8791_v40, 0  ;;  %v15925_v40 = vld [vmem:[%s17238_s13 + $0x4] sm:$0x3] }
0x205e   :  { %v8454_v19 = vmax.f32 %v8453_v37, 0.0  ;;  %v8811_v17 = vsel %vm17244_vm0, %v8793_v16, 0  ;;  %v9405_v37 = vrot.slane %v15925_v40, %v15806_v21 }
0x205f   :  { %v8806_v9 = vpop.permute.xlu0 %8805  ;;  %v8779_v12 = vpop.permute.xlu1 %8778 }
0x2060   :  { %v8455_v36 = vpack.c.bf16 %v8454_v19, %v8454_v19  ;;  %v8784_v24 = vsel %vm17241_vm4, %v8777_v49, %v8779_v12  ;;  %v15905_v49 = vld [vmem:[%s17238_s13 + $0x2] sm:$0x3]  ;;  %v15949_v19 = vld [vmem:[%s17238_s13 + $0x6] sm:$0x3]  ;;  %vm17256_vm4 = vmmov %vm17244_vm0 }
0x2061   :  { %v8794_v15 = vsel %vm17242_vm1, %v8784_v24, 0  ;;  %v9151_v30 = vrot.slane %v15905_v49, %v15806_v21  ;;  %v9659_v16 = vrot.slane %v15949_v19, %v15806_v21 }
0x2062   :  { %8681 = vmatmul.mubr.bf16.vlgmr.msra.gmra.mrb[44].mxu1 %v8455_v36  ;;  %11378 = vmatprep.subr.msk.bf16.mxu0 %vm17243_vm2, %v8794_v15 }
0x2063   :  { %8690 = vmatpush1.bf16.msra.mxu1 %v12954_v13  ;;  %v8783_v32 = vpop.permute.xlu0 %8782  ;;  %8823 = vmatpush1.bf16.msra.mxu0 %v8811_v17  ;;  %v8781_v56 = vpop.permute.xlu1 %8780  ;;  %v15977_v13 = vld [vmem:[%s17238_s13 + $0xa] sm:$0x3] }
0x2064   :  { %v8785_v55 = vsel %vm17245_vm12, %v8779_v12, %v8781_v56  ;;  %v8786_v18 = vsel %vm17246_vm14, %v8781_v56, %v8783_v32  ;;  %8691 = vmatprep.subr.bf16.mxu1 %v12959_v46  ;;  %8721 = vmatprep.mubr.bf16.mxu1 %v16937_v26  ;;  %vm17260_vm12 = vmmov %vm17244_vm0  ;;  %vm17261_vm14 = vcmask 130048  }
0x2065   :  { %v8795_v47 = vsel %vm17247_vm15, %v8785_v55, 0  ;;  %v8796_v61 = vsel %vm17248_vm8, %v8786_v18, 0  ;;  %v16008_v55 = vld [vmem:[%s17238_s13 + $0xc] sm:$0x3]  ;;  %v10633_v18 = vrot.slane %v16032_v60, %v15806_v21 }
0x2066   :  { %11380 = vmatprep.subr.msk.bf16.mxu0 %vm17249_vm6, %v8796_v61  ;;  %11379 = vmatmul.mubr.msk.bf16.vlgmr.msra.gmra.mrb[28].mxu0 %vm17250_vm10, %v8806_v9  ;;  %v8817_v8 = vsel %vm17251_vm11, %v8795_v47, 0  ;;  %v10379_v23 = vrot.slane %v16008_v55, %v15806_v21  ;;  %vm17263_vm6 = vmmov %vm17261_vm14 }
0x2067   :  { %8692 = vmatpush1.bf16.msra.mxu1 %v12957_v45  ;;  %8864 = vmatpush1.bf16.msra.mxu0 %v8817_v8 }
0x2068   :  { %8693 = vmatprep.subr.bf16.mxu1 %v12962_v7  ;;  %8895 = vmatprep.mubr.bf16.mxu0 %v16937_v26 }
0x206b   :  { %8694 = vmatpush1.bf16.msra.mxu1 %v12960_v59 }
0x206c   :  { %8695 = vmatprep.subr.bf16.mxu1 %v12965_v20 }
0x206e   :  { %11381 = vmatmul.mubr.msk.bf16.vlgmr.msra.gmra.mrb[32].mxu0 %vm17252_vm13, %v8806_v9  ;;  %v15958_v9 = vld [vmem:[%s17238_s13 + $0x8] sm:$0x3]  ;;  %vm17267_vm13 = vmmov %vm17244_vm0 }
0x206f   :  { %8696 = vmatpush1.bf16.msra.mxu1 %v12963_v3  ;;  %8951 = vmatprep.mubr.bf16.mxu0 %v16937_v26  ;;  %v9871_v12 = vrot.slane %v15958_v9, %v15806_v21 }
0x2070   :  { %8697 = vmatprep.subr.bf16.mxu1 %v12968_v27 }
0x2073   :  { %8698 = vmatpush1.bf16.msra.mxu1 %v12966_v4 }
0x2074   :  { %8699 = vmatprep.subr.bf16.mxu1 %v12971_v28 }
0x2077   :  { %8700 = vmatpush1.bf16.msra.mxu1 %v12969_v53 }
0x2078   :  { %8701 = vmatprep.subr.bf16.mxu1 %v12974_v62 }
0x207b   :  { %8702 = vmatpush1.bf16.msra.mxu1 %v12972_v43 }
0x207c   :  { %8703 = vmatprep.subr.bf16.mxu1 %v12977_v0 }
0x207f   :  { %8704 = vmatpush1.bf16.msra.mxu1 %v12975_v29 }
0x2082   :  { %8722 = vmatmul.mubr.bf16.vlgmr.msra.gmra.mrb[48].mxu1 %v8455_v36  ;;  %v10125_v36 = vrot.slane %v15977_v13, %v15806_v21 }
0x2135   :  { %v8682_v25 = vpop.f32.mrb[44].mxu1 }
0x2136   :  { %v15880_v48 = vpack.c.bf16 %v8682_v25, %v8682_v25  ;;  %v8684_v31 = vpop.f32.mrb[45].mxu1 }
0x2137   :  { %v15882_v14 = vpack.c.bf16 %v8684_v31, %v8684_v31  ;;  %v8686_v50 = vpop.f32.mrb[46].mxu1  ;;  %v16079_v31 = vld [vmem:[%s17238_s13 + $0x10] sm:$0x3] }
0x2138   :  { %8751 = vrot.lane.b32.xlu1 %v15880_v48, %s13090_s5  ;;  %v8687_v57 = vpop.f32.mrb[47].mxu1 }
0x2139   :  { %8753 = vrot.lane.b32.xlu0 %v15882_v14, %s13090_s5 }
0x2155   :  { %v8723_v11 = vpop.f32.mrb[48].mxu1 }
0x2156   :  { %v15888_v2 = vpack.c.bf16 %v8723_v11, %v8723_v11  ;;  %v8725_v33 = vpop.f32.mrb[49].mxu1 }
0x2157   :  { %v15890_v22 = vpack.c.bf16 %v8725_v33, %v8725_v33  ;;  %v8727_v51 = vpop.f32.mrb[50].mxu1 }
0x2158   :  { %8755 = vrot.lane.b32.xlu1 %v15888_v2, %s13090_s5  ;;  %v8728_v39 = vpop.f32.mrb[51].mxu1 }
0x2159   :  { %8757 = vrot.lane.b32.xlu0 %v15890_v22, %s13090_s5  ;;  %s13114_s5 = smov [#allocation5]  }
0x215c   :  { %9001 = vrot.lane.b32.xlu1 %v15880_v48, %s13089_s0 }
0x215d   :  { %9003 = vrot.lane.b32.xlu0 %v15882_v14, %s13089_s0 }
0x2160   :  { %9005 = vrot.lane.b32.xlu1 %v15888_v2, %s13089_s0 }
0x2161   :  { %9007 = vrot.lane.b32.xlu0 %v15890_v22, %s13089_s0 }
0x2164   :  { %9123 = vrot.lane.b32.xlu1 %v15815_v1, %s13089_s0 }
0x2165   :  { %9125 = vrot.lane.b32.xlu0 %v15825_v6, %s13089_s0 }
0x2168   :  { %9152 = vrot.lane.b32.xlu1 %v9151_v30, %s13104_s29 }
0x2169   :  { %9127 = vrot.lane.b32.xlu0 %v15833_v10, %s13089_s0 }
0x216c   :  { %9129 = vrot.lane.b32.xlu1 %v15837_v63, %s13089_s0  ;;  %s17469_s0 = sld [smem:[#allocation28_spill]] }
0x216d   :  { %9255 = vrot.lane.b32.xlu0 %v15880_v48, %s13091_s16 }
0x2170   :  { %9257 = vrot.lane.b32.xlu1 %v15882_v14, %s13091_s16 }
0x2171   :  { %9259 = vrot.lane.b32.xlu0 %v15888_v2, %s13091_s16 }
0x2174   :  { %9261 = vrot.lane.b32.xlu1 %v15890_v22, %s13091_s16 }
0x2175   :  { %9377 = vrot.lane.b32.xlu0 %v15815_v1, %s13091_s16 }
0x2178   :  { %9379 = vrot.lane.b32.xlu1 %v15825_v6, %s13091_s16 }
0x2179   :  { %9406 = vrot.lane.b32.xlu0 %v9405_v37, %s13104_s29 }
0x217c   :  { %9381 = vrot.lane.b32.xlu1 %v15833_v10, %s13091_s16 }
0x217d   :  { %9383 = vrot.lane.b32.xlu0 %v15837_v63, %s13091_s16  ;;  %s11067_s16 = sshll.u32 %s13114_s5, 4  ;;  %s11068_s16 = int_to_ptr.vmem [resolvable:$true] %s11067_s16 }
0x217e   :  { %p13025_p9 = scmp.lt.s32.totalorder %s11068_s16, %s11068_s16 }
0x2180   :  { %9509 = vrot.lane.b32.xlu1 %v15880_v48, %s13092_s18 }
0x2181   :  { %9511 = vrot.lane.b32.xlu0 %v15882_v14, %s13092_s18 }
0x2184   :  { %9513 = vrot.lane.b32.xlu1 %v15888_v2, %s13092_s18 }
0x2185   :  { %9515 = vrot.lane.b32.xlu0 %v15890_v22, %s13092_s18 }
0x2188   :  { %9631 = vrot.lane.b32.xlu1 %v15815_v1, %s13092_s18 }
0x2189   :  { %9633 = vrot.lane.b32.xlu0 %v15825_v6, %s13092_s18 }
0x218c   :  { %9660 = vrot.lane.b32.xlu1 %v9659_v16, %s13104_s29 }
0x218d   :  { %9635 = vrot.lane.b32.xlu0 %v15833_v10, %s13092_s18 }
0x2190   :  { %9637 = vrot.lane.b32.xlu1 %v15837_v63, %s13092_s18  ;;  %s13020_s18 = scalar_lea.vmem %s11068_s16, 256 }
0x2191   :  { %9872 = vrot.lane.b32.xlu0 %v9871_v12, %s13104_s29  ;;  %p13021_p8 = scmp.ne.s32.totalorder %s11068_s16, %s13020_s18  ;;  %p13026_p10 = scmp.lt.s32.totalorder %s13020_s18, %s13020_s18 }
0x2193   :  { %p13027_p11 = por %p13026_p10, %p13025_p9 }
0x2194   :  { %9975 = vrot.lane.b32.xlu1 %v15880_v48, %s13093_s22 }
0x2195   :  { %9977 = vrot.lane.b32.xlu0 %v15882_v14, %s13093_s22  ;;  %p13028_p12 = pnand %p13027_p11, %p13021_p8 }
0x2198   :  { %9979 = vrot.lane.b32.xlu1 %v15888_v2, %s13093_s22 }
0x2199   :  { %9981 = vrot.lane.b32.xlu0 %v15890_v22, %s13093_s22 }
0x219c   :  { %10097 = vrot.lane.b32.xlu1 %v15815_v1, %s13093_s22 }
0x219d   :  { %10099 = vrot.lane.b32.xlu0 %v15825_v6, %s13093_s22 }
0x21a0   :  { %10101 = vrot.lane.b32.xlu1 %v15833_v10, %s13093_s22 }
0x21a1   :  { %10126 = vrot.lane.b32.xlu0 %v10125_v36, %s13104_s29 }
0x21a4   :  { %10103 = vrot.lane.b32.xlu1 %v15837_v63, %s13093_s22 }
0x21a5   :  { %10229 = vrot.lane.b32.xlu0 %v15880_v48, %s13094_s23 }
0x21a8   :  { %10231 = vrot.lane.b32.xlu1 %v15882_v14, %s13094_s23 }
0x21a9   :  { %10233 = vrot.lane.b32.xlu0 %v15888_v2, %s13094_s23 }
0x21aa   :  { %v8752_v24 = vpop.permute.xlu1 %8751 }
0x21ab   :  { %v8766_v46 = vsel %vm17253_vm7, 0, %v8752_v24  ;;  %v8754_v15 = vpop.permute.xlu0 %8753  ;;  %vm17268_vm7 = vmmov %vm17263_vm6 }
0x21ac   :  { %v8768_v17 = vsel %vm17240_vm9, %v8766_v46, 0  ;;  %v8759_v32 = vsel %vm17254_vm5, %v8752_v24, %v8754_v15  ;;  %10235 = vrot.lane.b32.xlu1 %v15890_v22, %s13094_s23  ;;  %vm17257_vm9 = vmmov %vm17250_vm10 }
0x21ad   :  { %v8769_v56 = vsel %vm17242_vm1, %v8759_v32, 0  ;;  %10351 = vrot.lane.b32.xlu0 %v15815_v1, %s13094_s23  ;;  %v8908_v45 = vsel %vm17255_vm3, %v8768_v17, 0  ;;  %vm17258_vm1 = vmmov %vm17254_vm5  ;;  %vm17270_vm3 = vnez %v16630_v41 }
0x21ae   :  { %11382 = vmatprep.subr.msk.bf16.mxu0 %vm17256_vm4, %v8769_v56  ;;  %vm17259_vm2 = vmmov %vm17258_vm1 }
0x21af   :  { %8920 = vmatpush1.bf16.msra.mxu0 %v8908_v45  ;;  %vm17265_vm10 = vmmov %vm17244_vm0 }
0x21b0   :  { %10353 = vrot.lane.b32.xlu1 %v15825_v6, %s13094_s23  ;;  %vm17266_vm11 = vmmov %vm17257_vm9 }
0x21b1   :  { %10355 = vrot.lane.b32.xlu0 %v15833_v10, %s13094_s23  ;;  %vm17269_vm5 = vmmov %vm17263_vm6 }
0x21b2   :  { %11383 = vmatmul.mubr.msk.bf16.vlgmr.msra.gmra.mrb[28].mxu0 %vm17257_vm9, %v15811_v35  ;;  %vm17271_vm4 = vmmov %vm17244_vm0  ;;  %vm17272_vm9 = vnez %v16638_v54 }
0x21b3   :  { %8992 = vmatprep.mubr.bf16.mxu0 %v16937_v26 }
0x21b4   :  { %10380 = vrot.lane.b32.xlu1 %v10379_v23, %s13104_s29 }
0x21b5   :  { %10357 = vrot.lane.b32.xlu0 %v15837_v63, %s13094_s23 }
0x21b8   :  { %10483 = vrot.lane.b32.xlu1 %v15880_v48, %s13095_s26 }
0x21b9   :  { %10485 = vrot.lane.b32.xlu0 %v15882_v14, %s13095_s26 }
0x21bc   :  { %10487 = vrot.lane.b32.xlu1 %v15888_v2, %s13095_s26 }
0x21bd   :  { %10489 = vrot.lane.b32.xlu0 %v15890_v22, %s13095_s26 }
0x21c0   :  { %10605 = vrot.lane.b32.xlu1 %v15815_v1, %s13095_s26 }
0x21c1   :  { %10607 = vrot.lane.b32.xlu0 %v15825_v6, %s13095_s26 }
0x21c4   :  { %10609 = vrot.lane.b32.xlu1 %v15833_v10, %s13095_s26 }
0x21c5   :  { %10634 = vrot.lane.b32.xlu0 %v10633_v18, %s13104_s29 }
0x21c8   :  { %10611 = vrot.lane.b32.xlu1 %v15837_v63, %s13095_s26 }
0x21c9   :  { %10737 = vrot.lane.b32.xlu0 %v15880_v48, %s13096_s28 }
0x21ca   :  { %v8756_v7 = vpop.permute.xlu1 %8755 }
0x21cb   :  { %v8760_v47 = vsel %vm17258_vm1, %v8754_v15, %v8756_v7  ;;  %v8758_v61 = vpop.permute.xlu0 %8757  ;;  %vm17273_vm1 = vmmov %vm17269_vm5 }
0x21cc   :  { %v8770_v8 = vsel %vm17247_vm15, %v8760_v47, 0  ;;  %v8761_v59 = vsel %vm17259_vm2, %v8756_v7, %v8758_v61  ;;  %10739 = vrot.lane.b32.xlu1 %v15882_v14, %s13096_s28  ;;  %vm17262_vm15 = vnez %v16628_v38  ;;  %vm17274_vm2 = vmmov %vm17266_vm11 }
0x21cd   :  { %v8771_v20 = vsel %vm17248_vm8, %v8761_v59, 0  ;;  %10741 = vrot.lane.b32.xlu0 %v15888_v2, %s13096_s28  ;;  %v8914_v3 = vsel %vm17244_vm0, %v8770_v8, 0  ;;  %vm17264_vm8 = vnez %v16632_v42 }
0x21ce   :  { %v9002_v27 = vpop.permute.xlu1 %9001  ;;  %11384 = vmatprep.subr.msk.bf16.mxu0 %vm17260_vm12, %v8771_v20  ;;  %vm17275_vm12 = vmmov %vm17273_vm1 }
0x21cf   :  { %v9016_v4 = vsel %vm17261_vm14, 0, %v9002_v27  ;;  %8961 = vmatpush1.bf16.msra.mxu0 %v8914_v3  ;;  %v9004_v58 = vpop.permute.xlu0 %9003  ;;  %vm17276_vm14 = vmmov %vm17244_vm0  ;;  %v17295_v3 = vld [vmem:[#allocation36_spill] sm:$0xff] }
0x21d0   :  { %v9018_v28 = vsel %vm17262_vm15, %v9016_v4, 0  ;;  %v9009_v53 = vsel %vm17263_vm6, %v9002_v27, %v9004_v58  ;;  %10743 = vrot.lane.b32.xlu1 %v15890_v22, %s13096_s28  ;;  %vm17277_vm6 = vmmov %vm17273_vm1 }
0x21d1   :  { %v9019_v34 = vsel %vm17264_vm8, %v9009_v53, 0  ;;  %10859 = vrot.lane.b32.xlu0 %v15815_v1, %s13096_s28  ;;  %v9026_v62 = vsel %vm17265_vm10, %v9018_v28, 0  ;;  %vm17279_vm10 = vmmov %vm17244_vm0 }
0x21d2   :  { %v9006_v43 = vpop.permute.xlu1 %9005  ;;  %11385 = vmatmul.mubr.msk.bf16.vlgmr.msra.gmra.mrb[32].mxu0 %vm17266_vm11, %v15811_v35  ;;  %11386 = vmatprep.subr.msk.bf16.mxu0 %vm17267_vm13, %v9019_v34  ;;  %v10887_v35 = vrot.slane %v16079_v31, %v15806_v21  ;;  %vm17280_vm11 = vmmov %vm17273_vm1 }
0x21d3   :  { %9038 = vmatpush1.bf16.msra.mxu0 %v9026_v62  ;;  %v9008_v0 = vpop.permute.xlu0 %9007  ;;  %9069 = vmatprep.mubr.bf16.mxu0 %v16937_v26  ;;  %v9010_v29 = vsel %vm17268_vm7, %v9004_v58, %v9006_v43  ;;  %vm17281_vm13 = vmmov %vm17244_vm0 }
0x21d4   :  { %v9011_v25 = vsel %vm17269_vm5, %v9006_v43, %v9008_v0  ;;  %10861 = vrot.lane.b32.xlu1 %v15825_v6, %s13096_s28  ;;  %v9020_v11 = vsel %vm17272_vm9, %v9010_v29, 0  ;;  %vm17283_vm7 = vmmov %vm17274_vm2 }
0x21d5   :  { %v9021_v50 = vsel %vm17270_vm3, %v9011_v25, 0  ;;  %10863 = vrot.lane.b32.xlu0 %v15833_v10, %s13096_s28  ;;  %v9032_v21 = vsel %vm17244_vm0, %v9020_v11, 0  ;;  %vm17284_vm5 = vmmov %vm17244_vm0 }
0x21d6   :  { %v9124_v57 = vpop.permute.xlu1 %9123  ;;  %11388 = vmatprep.subr.msk.bf16.mxu0 %vm17271_vm4, %v9021_v50 }
0x21d7   :  { %v9126_v33 = vpop.permute.xlu0 %9125  ;;  %v9138_v37 = vsel %vm17275_vm12, 0, %v9124_v57 }
0x21d8   :  { %v9131_v51 = vsel %vm17273_vm1, %v9124_v57, %v9126_v33  ;;  %10888 = vrot.lane.b32.xlu1 %v10887_v35, %s13104_s29  ;;  %v9140_v42 = vsel %vm17262_vm15, %v9138_v37, 0  ;;  %vm17282_vm15 = vcmask 121856   ;;  %vm17287_vm1 = vmmov %vm17244_vm0 }
0x21d9   :  { %v9141_v39 = vsel %vm17264_vm8, %v9131_v51, 0  ;;  %10865 = vrot.lane.b32.xlu0 %v15837_v63, %s13096_s28  ;;  %vm17278_vm8 = vmmov %vm17274_vm2  ;;  %v9158_v24 = vsel %vm17279_vm10, %v9140_v42, 0  ;;  %vm17296_vm10 = vnez %v17295_v3 }
0x21da   :  { %v9153_v30 = vpop.permute.xlu1 %9152  ;;  %11387 = vmatmul.mubr.msk.bf16.vlgmr.msra.gmra.mrb[28].mxu0 %vm17274_vm2, %v15905_v49  ;;  %vm17286_vm4 = vmmov %vm17282_vm15 }
0x21db   :  { %9079 = vmatpush1.bf16.msra.mxu0 %v9032_v21  ;;  %9110 = vmatprep.mubr.bf16.mxu0 %v16937_v26  ;;  %v9128_v12 = vpop.permute.xlu0 %9127  ;;  %vm17289_vm2 = vmmov %vm17286_vm4  ;;  %v17314_v21 = vld [vmem:[#allocation33_spill] sm:$0xff] }
0x21dc   :  { %11390 = vmatprep.subr.msk.bf16.mxu0 %vm17276_vm14, %v9141_v39  ;;  %v9132_v15 = vsel %vm17280_vm11, %v9126_v33, %v9128_v12  ;;  %vm17290_vm0 = vmmov %vm17283_vm7  ;;  %vm17292_vm14 = vnez %v16699_v52  ;;  %v17310_v52 = vld [vmem:[#allocation32_spill] sm:$0xff] }
0x21dd   :  { %v9142_v32 = vsel %vm17272_vm9, %v9132_v15, 0  ;;  %vm17288_vm9 = vnez %v16688_v44  ;;  %vm17291_vm12 = vmmov %vm17287_vm1 }
0x21de   :  { %v9130_v16 = vpop.permute.xlu1 %9129  ;;  %vm17297_vm11 = vmmov %vm17289_vm2 }
0x21df   :  { %v9133_v36 = vsel %vm17277_vm6, %v9128_v12, %v9130_v16  ;;  %v9256_v38 = vpop.permute.xlu0 %9255  ;;  %vm17293_vm6 = vmmov %vm17289_vm2 }
0x21e0   :  { %v9143_v46 = vsel %vm17270_vm3, %v9133_v36, 0  ;;  %vm17285_vm3 = vnez %v16675_v5  ;;  %v9270_v23 = vsel %vm17286_vm4, 0, %v9256_v38  ;;  %vm17302_vm4 = vmmov %vm17289_vm2  ;;  %v17319_v36 = vld [vmem:[#allocation37_spill] sm:$0xff] }
0x21e1   :  { %v9272_v54 = vsel %vm17288_vm9, %v9270_v23, 0 }
0x21e2   :  { %11389 = vmatmul.mubr.msk.bf16.vlgmr.msra.gmra.mrb[32].mxu0 %vm17278_vm8, %v15905_v49  ;;  %v9258_v17 = vpop.permute.xlu1 %9257  ;;  %v9164_v49 = vsel %vm17284_vm5, %v9142_v32, 0  ;;  %v9280_v61 = vsel %vm17291_vm12, %v9272_v54, 0  ;;  %vm17294_vm8 = vmmov %vm17287_vm1 }
0x21e3   :  { %9170 = vmatpush1.bf16.msra.mxu0 %v9158_v24  ;;  %9201 = vmatprep.mubr.bf16.mxu0 %v16937_v26  ;;  %v9263_v56 = vsel %vm17282_vm15, %v9256_v38, %v9258_v17  ;;  %v9260_v45 = vpop.permute.xlu0 %9259  ;;  %vm17299_vm15 = vmmov %vm17287_vm1  ;;  %v17323_v38 = vld [vmem:[#allocation38_spill] sm:$0xff] }
0x21e4   :  { %11392 = vmatprep.subr.msk.bf16.mxu0 %vm17281_vm13, %v9143_v46  ;;  %v9273_v41 = vsel %vm17285_vm3, %v9263_v56, 0  ;;  %v9264_v59 = vsel %vm17293_vm6, %v9258_v17, %v9260_v45  ;;  %vm17298_vm13 = vmmov %vm17290_vm0 }
0x21e5   :  { %v9274_v27 = vsel %vm17296_vm10, %v9264_v59, 0  ;;  %vm17301_vm5 = vmmov %vm17287_vm1 }
0x21e6   :  { %v9262_v18 = vpop.permute.xlu1 %9261  ;;  %v9286_v28 = vsel %vm17299_vm15, %v9274_v27, 0 }
0x21e7   :  { %v9265_v7 = vsel %vm17289_vm2, %v9260_v45, %v9262_v18  ;;  %v9378_v47 = vpop.permute.xlu0 %9377 }
0x21e8   :  { %v9275_v8 = vsel %vm17292_vm14, %v9265_v7, 0 }
0x21ea   :  { %11391 = vmatmul.mubr.msk.bf16.vlgmr.msra.gmra.mrb[28].mxu0 %vm17283_vm7, %v9153_v30  ;;  %v9380_v20 = vpop.permute.xlu1 %9379  ;;  %vm17300_vm7 = vmmov %vm17289_vm2 }
0x21eb   :  { %9211 = vmatpush1.bf16.msra.mxu0 %v9164_v49  ;;  %9242 = vmatprep.mubr.bf16.mxu0 %v16937_v26  ;;  %v9407_v4 = vpop.permute.xlu0 %9406  ;;  %v9385_v58 = vsel %vm17297_vm11, %v9378_v47, %v9380_v20  ;;  %v9392_v34 = vsel %vm17300_vm7, 0, %v9378_v47  ;;  %vm17304_vm2 = vmmov %vm17301_vm5 }
0x21ec   :  { %11394 = vmatprep.subr.msk.bf16.mxu0 %vm17287_vm1, %v9273_v41  ;;  %v9395_v53 = vsel %vm17285_vm3, %v9385_v58, 0  ;;  %v9394_v0 = vsel %vm17288_vm9, %v9392_v34, 0  ;;  %vm17303_vm1 = vmmov %vm17290_vm0  ;;  %vm17307_vm9 = vcmask 7168   ;;  %v17349_v58 = vld [vmem:[#allocation34_spill] sm:$0xff] }
0x21ed   :  { %v9412_v5 = vsel %vm17304_vm2, %v9394_v0, 0  ;;  %vm17305_vm3 = vmmov %vm17302_vm4 }
0x21ee   :  { %v9382_v62 = vpop.permute.xlu1 %9381  ;;  %vm17308_vm12 = vmmov %vm17303_vm1 }
0x21ef   :  { %v9384_v43 = vpop.permute.xlu0 %9383  ;;  %v9386_v50 = vsel %vm17305_vm3, %v9380_v20, %v9382_v62  ;;  %vm17317_vm15 = vmmov %vm17303_vm1 }
0x21f0   :  { %v9387_v29 = vsel %vm17302_vm4, %v9382_v62, %v9384_v43  ;;  %v9396_v57 = vsel %vm17296_vm10, %v9386_v50, 0  ;;  %vm17315_vm10 = vnez %v17314_v21  ;;  %v17358_v43 = vld [vmem:[#allocation43_spill] sm:$0xff]  ;;  %v17362_v50 = vld [vmem:[#allocation45_spill] sm:$0xff] }
0x21f1   :  { %v9397_v25 = vsel %vm17292_vm14, %v9387_v29, 0  ;;  %vm17311_vm14 = vnez %v17310_v52 }
0x21f2   :  { %11393 = vmatmul.mubr.msk.bf16.vlgmr.msra.gmra.mrb[32].mxu0 %vm17290_vm0, %v9153_v30  ;;  %vm17306_vm0 = vmmov %vm17304_vm2  ;;  %v9510_v35 = vpop.permute.xlu1 %9509  ;;  %vm17324_vm2 = vnez %v17323_v38 }
0x21f3   :  { %9292 = vmatpush1.bf16.msra.mxu0 %v9280_v61  ;;  %9323 = vmatprep.mubr.bf16.mxu0 %v16937_v26  ;;  %v9512_v44 = vpop.permute.xlu0 %9511  ;;  %vm17309_vm6 = vmmov %vm17306_vm0 }
0x21f4   :  { %11396 = vmatprep.subr.msk.bf16.mxu0 %vm17294_vm8, %v9275_v8  ;;  %v9517_v11 = vsel %vm17307_vm9, %v9510_v35, %v9512_v44  ;;  %vm17312_vm8 = vmmov %vm17307_vm9 }
0x21f5   :  { %v9527_v33 = vsel %vm17311_vm14, %v9517_v11, 0  ;;  %v9524_v39 = vsel %vm17312_vm8, 0, %v9510_v35  ;;  %vm17313_vm11 = vmmov %vm17306_vm0 }
0x21f6   :  { %v9514_v51 = vpop.permute.xlu1 %9513  ;;  %v9526_v37 = vsel %vm17315_vm10, %v9524_v39, 0  ;;  %vm17318_vm7 = vmmov %vm17306_vm0 }
0x21f7   :  { %v9516_v30 = vpop.permute.xlu0 %9515  ;;  %v9534_v12 = vsel %vm17318_vm7, %v9526_v37, 0  ;;  %vm17321_vm4 = vmmov %vm17312_vm8 }
0x21f8   :  { %v9518_v46 = vsel %vm17321_vm4, %v9512_v44, %v9514_v51  ;;  %vm17325_vm3 = vmmov %vm17321_vm4 }
0x21f9   :  { %v9528_v17 = vsel %vm17324_vm2, %v9518_v46, 0  ;;  %v17377_v46 = vld [vmem:[#allocation39_spill] sm:$0xff] }
0x21fa   :  { %11395 = vmatmul.mubr.msk.bf16.vlgmr.msra.gmra.mrb[28].mxu0 %vm17298_vm13, %v15925_v40  ;;  %vm17316_vm13 = vmmov %vm17312_vm8  ;;  %v9632_v42 = vpop.permute.xlu1 %9631 }
0x21fb   :  { %9333 = vmatpush1.bf16.msra.mxu0 %v9286_v28  ;;  %9364 = vmatprep.mubr.bf16.mxu0 %v16937_v26  ;;  %v9519_v16 = vsel %vm17316_vm13, %v9514_v51, %v9516_v30  ;;  %v9634_v15 = vpop.permute.xlu0 %9633  ;;  %vm17330_vm8 = vmmov %vm17325_vm3  ;;  %v17353_v28 = vld [vmem:[#allocation35_spill] sm:$0xff] }
0x21fc   :  { %11398 = vmatprep.subr.msk.bf16.mxu0 %vm17301_vm5, %v9395_v53  ;;  %vm17320_vm5 = vnez %v17319_v36  ;;  %v9639_v56 = vsel %vm17325_vm3, %v9632_v42, %v9634_v15 }
0x21fd   :  { %v9529_v24 = vsel %vm17320_vm5, %v9519_v16, 0  ;;  %v9649_v41 = vsel %vm17311_vm14, %v9639_v56, 0  ;;  %vm17333_vm14 = vmmov %vm17325_vm3 }
0x21fe   :  { %v9661_v32 = vpop.permute.xlu1 %9660 }
0x21ff   :  { %v9636_v54 = vpop.permute.xlu0 %9635 }
0x2200   :  { %v9640_v8 = vsel %vm17333_vm14, %v9634_v15, %v9636_v54 }
0x2201   :  { %v9650_v59 = vsel %vm17324_vm2, %v9640_v8, 0 }
0x2202   :  { %11397 = vmatmul.mubr.msk.bf16.vlgmr.msra.gmra.mrb[32].mxu0 %vm17303_vm1, %v15925_v40  ;;  %v9418_v40 = vsel %vm17309_vm6, %v9396_v57, 0  ;;  %vm17322_vm1 = vmmov %vm17306_vm0  ;;  %v9638_v23 = vpop.permute.xlu1 %9637 }
0x2203   :  { %9424 = vmatpush1.bf16.msra.mxu0 %v9412_v5  ;;  %9455 = vmatprep.mubr.bf16.mxu0 %v16937_v26  ;;  %vm17327_vm9 = vmmov %vm17322_vm1  ;;  %v9641_v7 = vsel %vm17330_vm8, %v9636_v54, %v9638_v23  ;;  %v17386_v23 = vld [vmem:[#allocation47_spill] sm:$0xff] }
0x2204   :  { %11400 = vmatprep.subr.msk.bf16.mxu0 %vm17306_vm0, %v9397_v25  ;;  %vm17326_vm0 = vmmov %vm17308_vm12  ;;  %v9540_v49 = vsel %vm17327_vm9, %v9528_v17, 0  ;;  %v9651_v61 = vsel %vm17320_vm5, %v9641_v7, 0 }
0x2205   :  { %vm17329_vm6 = vmmov %vm17322_vm1 }
0x2206   :  { %vm17332_vm13 = vmmov %vm17322_vm1 }
0x2207   :  { %vm17336_vm7 = vmmov %vm17322_vm1 }
0x2208   :  { %v9672_v20 = vsel %vm17336_vm7, %v9650_v59, 0  ;;  %vm17337_vm4 = vmmov %vm17322_vm1 }
0x2209   :  { %vm17338_vm5 = vmmov %vm17326_vm0 }
0x220a   :  { %11399 = vmatmul.mubr.msk.bf16.vlgmr.msra.gmra.mrb[28].mxu0 %vm17308_vm12, %v9407_v4  ;;  %vm17328_vm12 = vmmov %vm17325_vm3 }
0x220b   :  { %9465 = vmatpush1.bf16.msra.mxu0 %v9418_v40  ;;  %9496 = vmatprep.mubr.bf16.mxu0 %v16937_v26  ;;  %v9646_v45 = vsel %vm17328_vm12, 0, %v9632_v42  ;;  %vm17339_vm2 = vmmov %vm17322_vm1 }
0x220c   :  { %11402 = vmatprep.subr.msk.bf16.mxu0 %vm17313_vm11, %v9527_v33  ;;  %v9648_v18 = vsel %vm17315_vm10, %v9646_v45, 0  ;;  %vm17331_vm11 = vmmov %vm17326_vm0 }
0x220d   :  { %v9666_v47 = vsel %vm17332_vm13, %v9648_v18, 0  ;;  %vm17335_vm10 = vmmov %vm17326_vm0 }
0x220e   :  { %vm17340_vm3 = vmmov %vm17326_vm0 }
0x220f   :  { %vm17343_vm12 = vmmov %vm17340_vm3 }
0x2210   :  { %vm17347_vm13 = vmmov %vm17340_vm3 }
0x2212   :  { %11401 = vmatmul.mubr.msk.bf16.vlgmr.msra.gmra.mrb[32].mxu0 %vm17317_vm15, %v9407_v4  ;;  %vm17334_vm15 = vmmov %vm17322_vm1 }
0x2213   :  { %9546 = vmatpush1.bf16.msra.mxu0 %v9534_v12  ;;  %9577 = vmatprep.mubr.bf16.mxu0 %v16937_v26 }
0x2214   :  { %11404 = vmatprep.subr.msk.bf16.mxu0 %vm17322_vm1, %v9529_v24 }
0x221a   :  { %11403 = vmatmul.mubr.msk.bf16.vlgmr.msra.gmra.mrb[28].mxu0 %vm17326_vm0, %v15949_v19  ;;  %vm17341_vm0 = vmmov %vm17322_vm1 }
0x221b   :  { %9587 = vmatpush1.bf16.msra.mxu0 %v9540_v49  ;;  %9618 = vmatprep.mubr.bf16.mxu0 %v16937_v26  ;;  %v9773_v3 = vsel %vm17341_vm0, %v15888_v2, 0  ;;  %vm17342_vm9 = vmmov %vm17341_vm0 }
0x221c   :  { %11406 = vmatprep.subr.msk.bf16.mxu0 %vm17329_vm6, %v9649_v41  ;;  %vm17344_vm6 = vmmov %vm17341_vm0 }
0x221d   :  { %vm17345_vm8 = vmmov %vm17341_vm0 }
0x221e   :  { %vm17348_vm14 = vmmov %vm17341_vm0 }
0x221f   :  { %vm17352_vm7 = vmmov %vm17341_vm0 }
0x2222   :  { %11405 = vmatmul.mubr.msk.bf16.vlgmr.msra.gmra.mrb[32].mxu0 %vm17331_vm11, %v15949_v19  ;;  %v9767_v19 = vsel %vm17322_vm1, %v15880_v48, 0  ;;  %v9873_v48 = vpop.permute.xlu0 %9872  ;;  %vm17346_vm11 = vcmask 1039360   ;;  %vm17356_vm1 = vmmov %vm17340_vm3 }
0x2223   :  { %9678 = vmatpush1.bf16.msra.mxu0 %v9666_v47  ;;  %9709 = vmatprep.mubr.bf16.mxu0 %v16937_v26 }
0x2224   :  { %11408 = vmatprep.subr.msk.bf16.mxu0 %vm17334_vm15, %v9651_v61  ;;  %vm17350_vm15 = vnez %v17349_v58  ;;  %v17390_v61 = vld [vmem:[#allocation48_spill] sm:$0xff] }
0x2226   :  { %v9978_v27 = vpop.permute.xlu0 %9977 }
0x222a   :  { %11407 = vmatmul.mubr.msk.bf16.vlgmr.msra.gmra.mrb[28].mxu0 %vm17335_vm10, %v9661_v32  ;;  %vm17351_vm10 = vmmov %vm17346_vm11 }
0x222b   :  { %9719 = vmatpush1.bf16.msra.mxu0 %v9672_v20  ;;  %9750 = vmatprep.mubr.bf16.mxu0 %v16937_v26 }
0x222c   :  { %11410 = vmatprep.subr.msk.bf16.mxu0 %vm17337_vm4, %v15882_v14  ;;  %v9976_v14 = vpop.permute.xlu1 %9975  ;;  %vm17354_vm4 = vnez %v17353_v28 }
0x2230   :  { %v9980_v2 = vpop.permute.xlu1 %9979 }
0x2231   :  { %v9984_v4 = vsel %vm17346_vm11, %v9978_v27, %v9980_v2 }
0x2232   :  { %11409 = vmatmul.mubr.msk.bf16.vlgmr.msra.gmra.mrb[32].mxu0 %vm17338_vm5, %v9661_v32  ;;  %vm17355_vm5 = vmmov %vm17351_vm10  ;;  %v17381_v32 = vld [vmem:[#allocation40_spill] sm:$0xff] }
0x2233   :  { %9779 = vmatpush1.bf16.msra.mxu0 %v9767_v19  ;;  %9810 = vmatprep.mubr.bf16.mxu0 %v16937_v26 }
0x2234   :  { %11412 = vmatprep.subr.msk.bf16.mxu0 %vm17339_vm2, %v15890_v22  ;;  %v9878_v22 = vsel %vm17344_vm6, %v15815_v1, 0  ;;  %v9983_v1 = vsel %vm17351_vm10, %v9976_v14, %v9978_v27  ;;  %v10098_v34 = vpop.permute.xlu1 %10097  ;;  %vm17357_vm2 = vmmov %vm17341_vm0 }
0x2235   :  { %v9992_v53 = vsel %vm17354_vm4, %v9983_v1, 0  ;;  %vm17360_vm0 = vmmov %vm17355_vm5 }
0x2236   :  { %vm17364_vm6 = vmmov %vm17360_vm0 }
0x2237   :  { %vm17366_vm11 = vmmov %vm17357_vm2 }
0x2238   :  { %v10102_v25 = vpop.permute.xlu1 %10101  ;;  %vm17369_vm10 = vmmov %vm17360_vm0 }
0x223a   :  { %11411 = vmatmul.mubr.msk.bf16.vlgmr.msra.gmra.mrb[28].mxu0 %vm17340_vm3, %v15958_v9  ;;  %vm17359_vm3 = vnez %v17358_v43  ;;  %v17408_v43 = vld [vmem:[#allocation42_spill] sm:$0xff] }
0x223b   :  { %9820 = vmatpush1.bf16.msra.mxu0 %v9773_v3  ;;  %9851 = vmatprep.mubr.bf16.mxu0 %v16937_v26 }
0x223c   :  { %11414 = vmatprep.subr.msk.bf16.mxu0 %vm17342_vm9, %v15825_v6  ;;  %v9884_v6 = vsel %vm17348_vm14, %v15833_v10, 0  ;;  %v10000_v10 = vsel %vm17357_vm2, %v9992_v53, 0  ;;  %vm17361_vm9 = vmmov %vm17357_vm2  ;;  %v10104_v33 = vpop.permute.xlu1 %10103  ;;  %v17404_v53 = vld [vmem:[#allocation41_spill] sm:$0xff] }
0x223d   :  { %vm17368_vm14 = vmmov %vm17357_vm2  ;;  %v10112_v30 = vsel %vm17369_vm10, %v10104_v33, 0 }
0x223e   :  { %v10117_v37 = vsel %vm17359_vm3, %v10112_v30, 0 }
0x2240   :  { %v10232_v42 = vpop.permute.xlu1 %10231 }
0x2242   :  { %11413 = vmatmul.mubr.msk.bf16.vlgmr.msra.gmra.mrb[32].mxu0 %vm17343_vm12, %v15958_v9  ;;  %v9993_v9 = vsel %vm17350_vm15, %v9984_v4, 0  ;;  %vm17363_vm12 = vnez %v17362_v50  ;;  %v17413_v50 = vld [vmem:[#allocation49_spill] sm:$0xff] }
0x2243   :  { %9890 = vmatpush1.bf16.msra.mxu0 %v9878_v22  ;;  %9921 = vmatprep.mubr.bf16.mxu0 %v16937_v26 }
0x2244   :  { %11416 = vmatprep.subr.msk.bf16.mxu0 %vm17345_vm8, %v15837_v63  ;;  %v9982_v63 = vpop.permute.xlu0 %9981  ;;  %vm17365_vm8 = vmmov %vm17356_vm1  ;;  %v10236_v17 = vpop.permute.xlu1 %10235 }
0x2245   :  { %v9990_v62 = vsel %vm17355_vm5, %v9982_v63, 0  ;;  %v9985_v5 = vsel %vm17360_vm0, %v9980_v2, %v9982_v63  ;;  %vm17371_vm5 = vmmov %vm17357_vm2 }
0x2246   :  { %v9995_v0 = vsel %vm17359_vm3, %v9990_v62, 0  ;;  %v9994_v35 = vsel %vm17363_vm12, %v9985_v5, 0  ;;  %vm17378_vm3 = vnez %v17377_v46 }
0x2247   :  { %v10006_v11 = vsel %vm17366_vm11, %v9994_v35, 0 }
0x2248   :  { %v10100_v29 = vpop.permute.xlu0 %10099  ;;  %v10354_v54 = vpop.permute.xlu1 %10353 }
0x2249   :  { %v10106_v44 = vsel %vm17364_vm6, %v10100_v29, %v10102_v25 }
0x224a   :  { %11415 = vmatmul.mubr.msk.bf16.vlgmr.msra.gmra.mrb[28].mxu0 %vm17347_vm13, %v9873_v48  ;;  %v10115_v40 = vsel %vm17350_vm15, %v10106_v44, 0  ;;  %vm17367_vm13 = vmmov %vm17360_vm0 }
0x224b   :  { %9931 = vmatpush1.bf16.msra.mxu0 %v9884_v6  ;;  %9962 = vmatprep.mubr.bf16.mxu0 %v16937_v26  ;;  %v10105_v52 = vsel %vm17367_vm13, %v10098_v34, %v10100_v29  ;;  %vm17372_vm15 = vmmov %vm17360_vm0 }
0x224c   :  { %11418 = vmatprep.subr.msk.bf16.mxu0 %vm17352_vm7, %v9993_v9  ;;  %v10127_v57 = vpop.permute.xlu0 %10126  ;;  %v10114_v51 = vsel %vm17354_vm4, %v10105_v52, 0  ;;  %vm17370_vm7 = vmmov %vm17356_vm1  ;;  %v10107_v16 = vsel %vm17372_vm15, %v10102_v25, %v10104_v33  ;;  %vm17374_vm4 = vcmask 924672   ;;  %v10381_v20 = vpop.permute.xlu1 %10380 }
0x224d   :  { %v10132_v21 = vsel %vm17371_vm5, %v10114_v51, 0  ;;  %v10116_v36 = vsel %vm17363_vm12, %v10107_v16, 0  ;;  %vm17383_vm12 = vmmov %vm17374_vm4  ;;  %vm17391_vm5 = vnez %v17390_v61 }
0x224e   :  { %v10244_v41 = vsel %vm17383_vm12, %v10236_v17, 0  ;;  %vm17388_vm10 = vmmov %vm17374_vm4 }
0x224f   :  { %vm17392_vm15 = vmmov %vm17374_vm4 }
0x2250   :  { %v10230_v39 = vpop.permute.xlu0 %10229  ;;  %v10484_v2 = vpop.permute.xlu1 %10483 }
0x2252   :  { %11417 = vmatmul.mubr.msk.bf16.vlgmr.msra.gmra.mrb[32].mxu0 %vm17356_vm1, %v9873_v48  ;;  %vm17373_vm1 = vmmov %vm17357_vm2 }
0x2253   :  { %10012 = vmatpush1.bf16.msra.mxu0 %v10000_v10  ;;  %10043 = vmatprep.mubr.bf16.mxu0 %v16937_v26  ;;  %vm17375_vm2 = vmmov %vm17370_vm7 }
0x2254   :  { %11420 = vmatprep.subr.msk.bf16.mxu0 %vm17361_vm9, %v9995_v0  ;;  %v10234_v12 = vpop.permute.xlu0 %10233  ;;  %vm17376_vm0 = vmmov %vm17373_vm1  ;;  %v10488_v9 = vpop.permute.xlu1 %10487 }
0x2255   :  { %v10238_v24 = vsel %vm17374_vm4, %v10232_v42, %v10234_v12  ;;  %vm17379_vm9 = vmmov %vm17374_vm4  ;;  %v10239_v7 = vsel %vm17388_vm10, %v10234_v12, %v10236_v17 }
0x2256   :  { %v10247_v15 = vsel %vm17378_vm3, %v10238_v24, 0  ;;  %v10237_v38 = vsel %vm17379_vm9, %v10230_v39, %v10232_v42  ;;  %vm17380_vm6 = vmmov %vm17376_vm0  ;;  %v10248_v8 = vsel %vm17391_vm5, %v10239_v7, 0 }
0x2257   :  { %vm17384_vm11 = vmmov %vm17375_vm2 }
0x2258   :  { %v10352_v49 = vpop.permute.xlu0 %10351  ;;  %vm17385_vm13 = vmmov %vm17376_vm0  ;;  %v10606_v29 = vpop.permute.xlu1 %10605 }
0x2259   :  { %vm17394_vm4 = vmmov %vm17376_vm0 }
0x225a   :  { %11419 = vmatmul.mubr.msk.bf16.vlgmr.msra.gmra.mrb[28].mxu0 %vm17365_vm8, %v15977_v13  ;;  %vm17382_vm8 = vnez %v17381_v32  ;;  %v10260_v19 = vsel %vm17394_vm4, %v10248_v8, 0  ;;  %vm17398_vm12 = vmmov %vm17376_vm0  ;;  %v17432_v32 = vld [vmem:[#allocation44_spill] sm:$0xff] }
0x225b   :  { %10053 = vmatpush1.bf16.msra.mxu0 %v10006_v11  ;;  %10084 = vmatprep.mubr.bf16.mxu0 %v16937_v26  ;;  %v10246_v56 = vsel %vm17382_vm8, %v10237_v38, 0  ;;  %vm17403_vm10 = vmmov %vm17376_vm0 }
0x225c   :  { %11422 = vmatprep.subr.msk.bf16.mxu0 %vm17368_vm14, %v10115_v40  ;;  %v10254_v45 = vsel %vm17385_vm13, %v10246_v56, 0  ;;  %vm17387_vm14 = vnez %v17386_v23  ;;  %v10356_v47 = vpop.permute.xlu0 %10355  ;;  %v10610_v11 = vpop.permute.xlu1 %10609  ;;  %v17417_v40 = vld [vmem:[#allocation50_spill] sm:$0xff] }
0x225d   :  { %v10249_v18 = vsel %vm17387_vm14, %v10244_v41, 0  ;;  %v10360_v59 = vsel %vm17392_vm15, %v10354_v54, %v10356_v47  ;;  %vm17407_vm15 = vmmov %vm17376_vm0 }
0x225e   :  { %v10369_v3 = vsel %vm17378_vm3, %v10360_v59, 0 }
0x2260   :  { %v10358_v48 = vpop.permute.xlu0 %10357 }
0x2262   :  { %11421 = vmatmul.mubr.msk.bf16.vlgmr.msra.gmra.mrb[32].mxu0 %vm17370_vm7, %v15977_v13  ;;  %v10138_v13 = vsel %vm17376_vm0, %v10116_v36, 0  ;;  %vm17389_vm7 = vmmov %vm17376_vm0 }
0x2263   :  { %10144 = vmatpush1.bf16.msra.mxu0 %v10132_v21  ;;  %10175 = vmatprep.mubr.bf16.mxu0 %v16937_v26 }
0x2264   :  { %11424 = vmatprep.subr.msk.bf16.mxu0 %vm17373_vm1, %v10117_v37  ;;  %vm17393_vm1 = vmmov %vm17375_vm2  ;;  %v10486_v63 = vpop.permute.xlu0 %10485  ;;  %v10612_v37 = vpop.permute.xlu1 %10611 }
0x2265   :  { %vm17402_vm13 = vmmov %vm17393_vm1 }
0x2268   :  { %v10490_v10 = vpop.permute.xlu0 %10489  ;;  %v10740_v46 = vpop.permute.xlu1 %10739 }
0x226a   :  { %11423 = vmatmul.mubr.msk.bf16.vlgmr.msra.gmra.mrb[28].mxu0 %vm17375_vm2, %v10127_v57  ;;  %vm17395_vm2 = vmmov %vm17379_vm9 }
0x226b   :  { %10185 = vmatpush1.bf16.msra.mxu0 %v10138_v13  ;;  %10216 = vmatprep.mubr.bf16.mxu0 %v16937_v26  ;;  %v10359_v14 = vsel %vm17395_vm2, %v10352_v49, %v10354_v54  ;;  %vm17396_vm9 = vmmov %vm17395_vm2 }
0x226c   :  { %11426 = vmatprep.subr.msk.bf16.mxu0 %vm17380_vm6, %v10247_v15  ;;  %v10368_v22 = vsel %vm17382_vm8, %v10359_v14, 0  ;;  %v10366_v27 = vsel %vm17396_vm9, %v10358_v48, 0  ;;  %vm17397_vm6 = vmmov %vm17393_vm1  ;;  %vm17401_vm8 = vcmask 916480   ;;  %v10608_v44 = vpop.permute.xlu0 %10607  ;;  %v10744_v41 = vpop.permute.xlu1 %10743 }
0x226d   :  { %v10386_v4 = vsel %vm17398_vm12, %v10368_v22, 0  ;;  %v10371_v6 = vsel %vm17387_vm14, %v10366_v27, 0  ;;  %vm17399_vm3 = vmmov %vm17395_vm2  ;;  %v10492_v28 = vsel %vm17401_vm8, %v10486_v63, %v10488_v9  ;;  %vm17405_vm14 = vnez %v17404_v53 }
0x226e   :  { %v10361_v58 = vsel %vm17399_vm3, %v10356_v47, %v10358_v48  ;;  %v10501_v34 = vsel %vm17405_vm14, %v10492_v28, 0  ;;  %vm17411_vm4 = vmmov %vm17397_vm6  ;;  %vm17418_vm12 = vnez %v17417_v40  ;;  %v17441_v47 = vld [vmem:[#allocation51_spill] sm:$0xff] }
0x226f   :  { %v10370_v1 = vsel %vm17391_vm5, %v10361_v58, 0  ;;  %vm17409_vm5 = vnez %v17408_v43  ;;  %vm17412_vm2 = vmmov %vm17376_vm0 }
0x2270   :  { %v10635_v51 = vpop.permute.xlu0 %10634  ;;  %v10862_v59 = vpop.permute.xlu1 %10861 }
0x2272   :  { %11425 = vmatmul.mubr.msk.bf16.vlgmr.msra.gmra.mrb[32].mxu0 %vm17384_vm11, %v10127_v57  ;;  %vm17400_vm11 = vmmov %vm17376_vm0 }
0x2273   :  { %10266 = vmatpush1.bf16.msra.mxu0 %v10254_v45  ;;  %10297 = vmatprep.mubr.bf16.mxu0 %v16937_v26  ;;  %v17436_v45 = vld [vmem:[#allocation46_spill] sm:$0xff] }
0x2274   :  { %11428 = vmatprep.subr.msk.bf16.mxu0 %vm17389_vm7, %v10249_v18  ;;  %vm17406_vm7 = vmmov %vm17401_vm8  ;;  %v10738_v42 = vpop.permute.xlu0 %10737  ;;  %v10889_v28 = vpop.permute.xlu1 %10888 }
0x2275   :  { %v10491_v62 = vsel %vm17406_vm7, %v10484_v2, %v10486_v63  ;;  %vm17421_vm8 = vmmov %vm17412_vm2 }
0x2276   :  { %v10500_v0 = vsel %vm17409_vm5, %v10491_v62, 0 }
0x2277   :  { %v10508_v25 = vsel %vm17412_vm2, %v10500_v0, 0 }
0x2278   :  { %v10742_v15 = vpop.permute.xlu0 %10741 }
0x227a   :  { %11427 = vmatmul.mubr.msk.bf16.vlgmr.msra.gmra.mrb[28].mxu0 %vm17393_vm1, %v16008_v55  ;;  %vm17410_vm1 = vmmov %vm17406_vm7 }
0x227b   :  { %10307 = vmatpush1.bf16.msra.mxu0 %v10260_v19  ;;  %10338 = vmatprep.mubr.bf16.mxu0 %v16937_v26  ;;  %v10498_v5 = vsel %vm17410_vm1, %v10490_v10, 0  ;;  %vm17415_vm9 = vmmov %vm17410_vm1  ;;  %v17445_v19 = vld [vmem:[#allocation52_spill] sm:$0xff] }
0x227c   :  { %11430 = vmatprep.subr.msk.bf16.mxu0 %vm17376_vm0, %v10369_v3  ;;  %vm17414_vm0 = vnez %v17413_v50  ;;  %v10493_v57 = vsel %vm17415_vm9, %v10488_v9, %v10490_v10  ;;  %vm17419_vm3 = vmmov %vm17410_vm1  ;;  %v10860_v18 = vpop.permute.xlu0 %10859 }
0x227d   :  { %v10503_v35 = vsel %vm17414_vm0, %v10498_v5, 0  ;;  %v10502_v52 = vsel %vm17418_vm12, %v10493_v57, 0  ;;  %v10614_v33 = vsel %vm17419_vm3, %v10608_v44, %v10610_v11  ;;  %vm17424_vm7 = vmmov %vm17410_vm1 }
0x227e   :  { %v10514_v39 = vsel %vm17421_vm8, %v10502_v52, 0  ;;  %v10623_v30 = vsel %vm17405_vm14, %v10614_v33, 0  ;;  %v10620_v12 = vsel %vm17424_vm7, %v10612_v37, 0  ;;  %vm17427_vm14 = vmmov %vm17419_vm3 }
0x227f   :  { %v10625_v24 = vsel %vm17414_vm0, %v10620_v12, 0  ;;  %v10615_v13 = vsel %vm17427_vm14, %v10610_v11, %v10612_v37  ;;  %vm17433_vm0 = vnez %v17432_v32 }
0x2280   :  { %v10624_v38 = vsel %vm17418_vm12, %v10615_v13, 0 }
0x2282   :  { %11429 = vmatmul.mubr.msk.bf16.vlgmr.msra.gmra.mrb[32].mxu0 %vm17397_vm6, %v16008_v55  ;;  %v10392_v55 = vsel %vm17403_vm10, %v10370_v1, 0  ;;  %vm17416_vm6 = vmmov %vm17412_vm2 }
0x2283   :  { %10398 = vmatpush1.bf16.msra.mxu0 %v10386_v4  ;;  %10429 = vmatprep.mubr.bf16.mxu0 %v16937_v26  ;;  %vm17423_vm10 = vmmov %vm17412_vm2 }
0x2284   :  { %11432 = vmatprep.subr.msk.bf16.mxu0 %vm17400_vm11, %v10371_v6  ;;  %vm17420_vm11 = vmmov %vm17411_vm4 }
0x228a   :  { %11431 = vmatmul.mubr.msk.bf16.vlgmr.msra.gmra.mrb[28].mxu0 %vm17402_vm13, %v10381_v20  ;;  %vm17422_vm13 = vmmov %vm17410_vm1 }
0x228b   :  { %10439 = vmatpush1.bf16.msra.mxu0 %v10392_v55  ;;  %10470 = vmatprep.mubr.bf16.mxu0 %v16937_v26  ;;  %v10613_v21 = vsel %vm17422_vm13, %v10606_v29, %v10608_v44  ;;  %vm17426_vm1 = vmmov %vm17412_vm2 }
0x228c   :  { %11434 = vmatprep.subr.msk.bf16.mxu0 %vm17407_vm15, %v10501_v34  ;;  %v10622_v16 = vsel %vm17409_vm5, %v10613_v21, 0  ;;  %vm17425_vm15 = vmmov %vm17411_vm4  ;;  %vm17429_vm5 = vcmask 908288  }
0x228d   :  { %v10640_v36 = vsel %vm17426_vm1, %v10622_v16, 0  ;;  %v10746_v17 = vsel %vm17429_vm5, %v10740_v46, %v10742_v15  ;;  %vm17430_vm2 = vmmov %vm17420_vm11 }
0x228e   :  { %vm17431_vm9 = vmmov %vm17426_vm1  ;;  %v10755_v56 = vsel %vm17433_vm0, %v10746_v17, 0 }
0x228f   :  { %vm17435_vm3 = vmmov %vm17426_vm1 }
0x2290   :  { %vm17438_vm12 = vmmov %vm17429_vm5 }
0x2291   :  { %v10752_v54 = vsel %vm17438_vm12, %v10744_v41, 0  ;;  %vm17439_vm8 = vmmov %vm17430_vm2 }
0x2292   :  { %11433 = vmatmul.mubr.msk.bf16.vlgmr.msra.gmra.mrb[32].mxu0 %vm17411_vm4, %v10381_v20  ;;  %vm17428_vm4 = vmmov %vm17426_vm1  ;;  %v10864_v20 = vpop.permute.xlu0 %10863 }
0x2293   :  { %10520 = vmatpush1.bf16.msra.mxu0 %v10508_v25  ;;  %10551 = vmatprep.mubr.bf16.mxu0 %v16937_v26  ;;  %vm17440_vm13 = vmmov %vm17426_vm1 }
0x2294   :  { %11436 = vmatprep.subr.msk.bf16.mxu0 %vm17416_vm6, %v10503_v35  ;;  %vm17434_vm6 = vmmov %vm17429_vm5 }
0x2295   :  { %v10745_v49 = vsel %vm17434_vm6, %v10738_v42, %v10740_v46  ;;  %vm17443_vm7 = vmmov %vm17429_vm5 }
0x2296   :  { %v10747_v8 = vsel %vm17443_vm7, %v10742_v15, %v10744_v41  ;;  %vm17447_vm14 = vmmov %vm17429_vm5  ;;  %v10866_v27 = vpop.permute.xlu0 %10865 }
0x2297   :  { %v10868_v14 = vsel %vm17447_vm14, %v10862_v59, %v10864_v20  ;;  %vm17449_vm5 = vmmov %vm17435_vm3 }
0x2298   :  { %v10877_v22 = vsel %vm17433_vm0, %v10868_v14, 0  ;;  %vm17454_vm12 = vmmov %vm17449_vm5 }
0x229a   :  { %11435 = vmatmul.mubr.msk.bf16.vlgmr.msra.gmra.mrb[28].mxu0 %vm17420_vm11, %v16032_v60  ;;  %vm17437_vm11 = vnez %v17436_v45 }
0x229b   :  { %10561 = vmatpush1.bf16.msra.mxu0 %v10514_v39  ;;  %10592 = vmatprep.mubr.bf16.mxu0 %v16937_v26  ;;  %v10754_v23 = vsel %vm17437_vm11, %v10745_v49, 0  ;;  %v11022_v49 = vld [vmem:[%s17469_s0] sm:$0xf] }
0x229c   :  { %11438 = vmatprep.subr.msk.bf16.mxu0 %vm17423_vm10, %v10623_v30  ;;  %v10762_v7 = vsel %vm17440_vm13, %v10754_v23, 0  ;;  %vm17442_vm10 = vnez %v17441_v47  ;;  %vm17458_vm13 = vmmov %vm17449_vm5 }
0x229d   :  { %v10757_v61 = vsel %vm17442_vm10, %v10752_v54, 0 }
0x22a2   :  { %11437 = vmatmul.mubr.msk.bf16.vlgmr.msra.gmra.mrb[32].mxu0 %vm17425_vm15, %v16032_v60  ;;  %v10646_v60 = vsel %vm17431_vm9, %v10624_v38, 0  ;;  %vm17444_vm15 = vmmov %vm17426_vm1  ;;  %vm17446_vm1 = vnez %v17445_v19 }
0x22a3   :  { %10652 = vmatpush1.bf16.msra.mxu0 %v10640_v36  ;;  %10683 = vmatprep.mubr.bf16.mxu0 %v16937_v26  ;;  %v10756_v3 = vsel %vm17446_vm1, %v10747_v8, 0  ;;  %vm17451_vm9 = vmmov %vm17435_vm3 }
0x22a4   :  { %11440 = vmatprep.subr.msk.bf16.mxu0 %vm17428_vm4, %v10625_v24  ;;  %vm17448_vm4 = vmmov %vm17430_vm2  ;;  %v10768_v48 = vsel %vm17449_vm5, %v10756_v3, 0 }
0x22aa   :  { %11439 = vmatmul.mubr.msk.bf16.vlgmr.msra.gmra.mrb[28].mxu0 %vm17430_vm2, %v10635_v51  ;;  %vm17450_vm2 = vmmov %vm17434_vm6 }
0x22ab   :  { %10693 = vmatpush1.bf16.msra.mxu0 %v10646_v60  ;;  %10724 = vmatprep.mubr.bf16.mxu0 %v16937_v26  ;;  %v10867_v2 = vsel %vm17450_vm2, %v10860_v18, %v10862_v59  ;;  %vm17452_vm6 = vmmov %vm17450_vm2  ;;  %v11018_v60 = vld [vmem:[%s17467_s4] sm:$0xf] }
0x22ac   :  { %11442 = vmatprep.subr.msk.bf16.mxu0 %vm17435_vm3, %v10755_v56  ;;  %v10876_v4 = vsel %vm17437_vm11, %v10867_v2, 0  ;;  %v10874_v6 = vsel %vm17452_vm6, %v10866_v27, 0  ;;  %vm17453_vm3 = vmmov %vm17448_vm4  ;;  %v17470_v2 = vld [vmem:[#allocation53_spill] sm:$0xff] }
0x22ad   :  { %v10894_v58 = vsel %vm17454_vm12, %v10876_v4, 0  ;;  %v10879_v9 = vsel %vm17442_vm10, %v10874_v6, 0  ;;  %vm17455_vm0 = vmmov %vm17450_vm2  ;;  %v17471_v4 = vld [vmem:[#allocation55_spill] sm:$0xff] }
0x22ae   :  { %v10869_v1 = vsel %vm17455_vm0, %v10864_v20, %v10866_v27  ;;  %vm17457_vm11 = vmmov %vm17453_vm3 }
0x22af   :  { %v10878_v63 = vsel %vm17446_vm1, %v10869_v1, 0  ;;  %vm17459_vm7 = vmmov %vm17453_vm3  ;;  %v17473_v1 = vld [vmem:[#allocation56_spill] sm:$0xff] }
0x22b0   :  { %vm17460_vm10 = vmmov %vm17449_vm5 }
0x22b1   :  { %vm17462_vm1 = vmmov %vm17449_vm5 }
0x22b2   :  { %11441 = vmatmul.mubr.msk.bf16.vlgmr.msra.gmra.mrb[32].mxu0 %vm17439_vm8, %v10635_v51  ;;  %vm17456_vm8 = vmmov %vm17449_vm5 }
0x22b3   :  { %10774 = vmatpush1.bf16.msra.mxu0 %v10762_v7  ;;  %10805 = vmatprep.mubr.bf16.mxu0 %v16937_v26  ;;  %vm17463_vm14 = vmmov %vm17462_vm1 }
0x22b4   :  { %11444 = vmatprep.subr.msk.bf16.mxu0 %vm17444_vm15, %v10757_v61  ;;  %vm17461_vm15 = vmmov %vm17449_vm5 }
0x22b5   :  { %vm17465_vm5 = vmmov %vm17462_vm1 }
0x22b6   :  { %vm17466_vm2 = vmmov %vm17462_vm1 }
0x22ba   :  { %11443 = vmatmul.mubr.msk.bf16.vlgmr.msra.gmra.mrb[28].mxu0 %vm17448_vm4, %v16079_v31  ;;  %vm17464_vm4 = vmmov %vm17462_vm1 }
0x22bb   :  { %10815 = vmatpush1.bf16.msra.mxu0 %v10768_v48  ;;  %10846 = vmatprep.mubr.bf16.mxu0 %v16937_v26 }
0x22bc   :  { %11446 = vmatprep.subr.msk.bf16.mxu0 %vm17451_vm9, %v10877_v22  ;;  %vm17468_vm9 = vmmov %vm17462_vm1 }
0x22c2   :  { %11445 = vmatmul.mubr.msk.bf16.vlgmr.msra.gmra.mrb[32].mxu0 %vm17453_vm3, %v16079_v31  ;;  %v10900_v31 = vsel %vm17458_vm13, %v10878_v63, 0 }
0x22c3   :  { %10906 = vmatpush1.bf16.msra.mxu0 %v10894_v58  ;;  %10937 = vmatprep.mubr.bf16.mxu0 %v16937_v26  ;;  %v17472_v58 = vld [vmem:[#allocation54_spill] sm:$0xff] }
0x22c4   :  { %11448 = vmatprep.subr.msk.bf16.mxu0 %vm17456_vm8, %v10879_v9 }
0x22ca   :  { %11447 = vmatmul.mubr.msk.bf16.vlgmr.msra.gmra.mrb[28].mxu0 %vm17457_vm11, %v10889_v28 }
0x22cb   :  { %10947 = vmatpush1.bf16.msra.mxu0 %v10900_v31  ;;  %10978 = vmatprep.mubr.bf16.mxu0 %v16937_v26 }
0x22d2   :  { %11449 = vmatmul.mubr.msk.bf16.vlgmr.msra.gmra.mrb[32].mxu0 %vm17459_vm7, %v10889_v28 }
0x239d   :  { %v10939_v55 = vpop.f32.mrb[28].mxu0 }
0x239e   :  { %v10991_v53 = vsel %vm17460_vm10, %v10939_v55, 0.0  ;;  %v11000_v34 = vmul.f32 %v10939_v55, %v10939_v55  ;;  %v10941_v62 = vpop.f32.mrb[29].mxu0 }
0x239f   :  { %v10992_v10 = vsel %vm17461_vm15, %v10941_v62, 0.0  ;;  %v11001_v43 = vmul.f32 %v10941_v62, %v10941_v62  ;;  %v10943_v0 = vpop.f32.mrb[30].mxu0 }
0x23a0   :  { %v11004_v29 = vsel %vm17462_vm1, %v11000_v34, 0.0  ;;  %v10993_v5 = vadd.f32 %v10992_v10, %v10991_v53  ;;  %v10944_v25 = vpop.f32.mrb[31].mxu0 }
0x23a1   :  { %v11005_v50 = vsel %vm17463_vm14, %v11001_v43, 0.0 }
0x23a2   :  { %v11006_v35 = vadd.f32 %v11005_v50, %v11004_v29 }
0x23a5   :  { %v10980_v44 = vpop.f32.mrb[32].mxu0 }
0x23a6   :  { %v10994_v26 = vsel %vm17464_vm4, %v10980_v44, 0.0  ;;  %v11002_v57 = vmul.f32 %v10980_v44, %v10980_v44  ;;  %v10982_v11 = vpop.f32.mrb[33].mxu0 }
0x23a7   :  { %v10995_v40 = vadd.f32 %v10994_v26, %v10993_v5  ;;  %v10996_v52 = vsel %vm17465_vm5, %v10982_v11, 0.0  ;;  %v11003_v33 = vmul.f32 %v10982_v11, %v10982_v11  ;;  %v10984_v51 = vpop.f32.mrb[34].mxu0 }
0x23a8   :  { %v11007_v39 = vsel %vm17466_vm2, %v11002_v57, 0.0  ;;  %v10985_v30 = vpop.f32.mrb[35].mxu0 }
0x23a9   :  { %v10997_v21 = vadd.f32 %v10996_v52, %v10995_v40  ;;  %v11008_v37 = vadd.f32 %v11007_v39, %v11006_v35  ;;  %v11009_v16 = vsel %vm17468_vm9, %v11003_v33, 0.0 }
0x23ab   :  { %10998 = vadd.xlane.f32.xlu1 %v10997_v21  ;;  %v11010_v42 = vadd.f32 %v11009_v16, %v11008_v37 }
0x23ad   :  { %11011 = vadd.xlane.f32.xlu0 %v11010_v42 }
0x2438   :  { %v10999_v12 = vpop.xlane.xlu1 %10998 }
0x2439   :  { %v11013_v36 = vmul.f32 0.001953125, %v10999_v12 }
0x243a   :  { %v11012_v24 = vpop.xlane.xlu0 %11011 }
0x243b   :  { %v11015_v13 = vmul.f32 %v11013_v36, %v11013_v36  ;;  %v11014_v46 = vmul.f32 0.001953125, %v11012_v24 }
0x243d   :  { %v11016_v15 = vsub.f32 %v11014_v46, %v11015_v13 }
0x243f   :  { %v11017_v38 = vmax.f32 %v11016_v15, 0.0 }
0x2441   :  { %v11019_v17 = vadd.f32 1e-05, %v11017_v38 }
0x2443   :  { %12996 = vrsqrt.f32 %v11019_v17 }
0x244d   :  { %v12997_v32 = vpop.eup %12996 }
0x244e   :  { %v11021_v56 = vmul.f32 %v12997_v32, %v11018_v60 }
0x2450   :  { %11027 = vperm.xlu0 %12840, %v11021_v56   ;;  %v11023_v41 = vmul.f32 %v11021_v56, %v11013_v36 }
0x2452   :  { %v11024_v45 = vsub.f32 %v11022_v49, %v11023_v41 }
0x2454   :  { %11036 = vperm.xlu1 %12841, %v11024_v45  }
0x24cf   :  { %v11028_v23 = vpop.permute.xlu0 %11027 }
0x24d0   :  { %v11030_v18 = vmul.f32 %v11028_v23, %v10939_v55  ;;  %v11031_v54 = vmul.f32 %v11028_v23, %v10941_v62  ;;  %v11032_v7 = vmul.f32 %v11028_v23, %v10980_v44  ;;  %v11033_v47 = vmul.f32 %v11028_v23, %v10982_v11 }
0x24d3   :  { %v11037_v61 = vpop.permute.xlu1 %11036 }
0x24d4   :  { %v11039_v8 = vadd.f32 %v11037_v61, %v11030_v18  ;;  %v11040_v59 = vadd.f32 %v11037_v61, %v11031_v54  ;;  %v11041_v20 = vadd.f32 %v11037_v61, %v11032_v7  ;;  %v11042_v19 = vadd.f32 %v11037_v61, %v11033_v47 }
0x24d6   :  { %v11043_v3 = vmax.f32 %v11039_v8, 0.0  ;;  %v11044_v14 = vmax.f32 %v11040_v59, 0.0  ;;  %v11045_v48 = vmax.f32 %v11041_v20, 0.0  ;;  %v11046_v22 = vmax.f32 %v11042_v19, 0.0 }
0x24d8   :  { %v11047_v27 = vadd.f32 %v11043_v3, %v17470_v2  ;;  %v11048_v6 = vadd.f32 %v11044_v14, %v17471_v4  ;;  %v11049_v9 = vadd.f32 %v11045_v48, %v17472_v58  ;;  %v11050_v63 = vadd.f32 %v11046_v22, %v17473_v1 }
0x24da   :  { %v11055_v28 = vcombine.low %v11047_v27, %v11048_v6  ;;  %v11056_v31 = vcombine.low %v11049_v9, %v11050_v63 }
0x24dc   :  { %11059 = vst [vmem:[#allocation5] sm:$0xff] %v11055_v28  ;;  %11060 = vst [vmem:[#allocation5 + $0x8] sm:$0xff] %v11056_v31 }
0x24dd   :  { %13031 = shalt.err (!%p13028_p12)
}
0x24de   :  { %s13032_s22 = scalar_lea.hbm %s13328_s24, 256 }
0x24df   :  { %p13033_p13 = scmp.ne.s32.totalorder %s13328_s24, %s13032_s22  ;;  %p13036_p0 = scmp.lt.u32.totalorder %s13032_s22, %s13328_s24 }
0x24e1   :  { %p13038_p1 = pnand %p13036_p0, %p13033_p13 }
0x24e3   :  { %13041 = shalt.err (!%p13038_p1)
}
0x24e4   :  { %11070 = dma.vmem_to_hbm [thread:$0]  %s11068_s16, 256, %s13328_s24, [#allocation4]  }
0x24e5   :  { %13044 = dma.done.wait [#allocation4], 256  }
0x24e6   :  { %13045 = vsyncadd [#allocation4], 4294967040 }
0x24e7   :  { %11074 = vsyncpa [#allocation3], 1 }
0x24e8   :  { %11075 = vsyncpa [#allocation4], 1 }

</bundles_post_ra>
